<compile_context>
chip_gen: v7x
topology: tpu7x:2x2x1
jax: 0.10.0
libtpu: 0.0.40
codegen_flags: <defaults>
</compile_context>

<pallas_src>
import functools
import math

import jax
import jax.numpy as jnp
from jax import lax
from jax.experimental import pallas as pl
from jax.experimental.pallas import tpu as pltpu

BN_EPS = 1e-4          # nn.BatchNorm2d(out_channels, eps=0.0001)
LANES = 128            # TPU vreg lane width


def _round_up(x, m):
    return (x + m - 1) // m * m


def _activation(x, name):
    if name == "ReLU":
        return jnp.maximum(x, 0.0)
    if name == "LeakyReLU":
        return jnp.where(x >= 0, x, 0.01 * x)
    if name == "Sigmoid":
        return jax.nn.sigmoid(x)
    if name == "Tanh":
        return jnp.tanh(x)
    # TODO(synk): arbitrary `getattr(nn, acti_func)` modules are not translated.
    raise NotImplementedError(f"activation {name!r} not supported")


# ---------------------------------------------------------------------------
# Fused ConvBlock body: conv (one MXU matmul) + BN batch stats + scale/shift
# + activation + 2x2 max-pool.  Shared by both block kernels below.
# ---------------------------------------------------------------------------
def _conv_bn_act_pool(x_ref, w_ref, g_ref, b_ref, conv_ref, *,
                      n_img, hc, wc, ho, wo, acti):
    # x_ref   : (n_img*hc*wc, K*K*Cin) bf16  im2col'd input (batch folded into M)
    # w_ref   : (K*K*Cin, Cp)          bf16  folded conv weight (channels padded)
    # g_ref   : (1, Cp) f32 gamma (padded lanes are 0)
    # b_ref   : (1, Cp) f32 beta  (padded lanes are 0)
    # conv_ref: (n_img*hc*wc, Cp) f32 VMEM scratch (written once, read once)
    cp = w_ref.shape[1]
    p = hc * wc

    # Convolution: ONE matmul, bf16 operands, f32 accumulation on the MXU.
    conv = jnp.dot(x_ref[...], w_ref[...], preferred_element_type=jnp.float32)
    conv_ref[...] = conv

    # BatchNorm2d training-mode batch statistics (biased variance), computed in
    # f32 from exactly the values the normalization is applied to.
    mean = jnp.mean(conv, axis=0, keepdims=True)                  # (1, cp)
    msq = jnp.mean(conv * conv, axis=0, keepdims=True)
    var = jnp.maximum(msq - mean * mean, 0.0)
    scale = g_ref[...] * lax.rsqrt(var + BN_EPS)                  # (1, cp)
    shift = b_ref[...] - mean * scale
    # Padded channel lanes have gamma=beta=0 and zero conv output -> scale=0,
    # shift=0, so they contribute nothing downstream.

    pooled = []
    for n in range(n_img):
        z = conv_ref[pl.ds(n * p, p), :]                          # (p, cp) f32
        z = _activation(z * scale + shift, acti)
        z = z.reshape(hc, wc, cp)[:2 * ho, :2 * wo, :]            # MaxPool floor
        z = jnp.max(z.reshape(2 * ho, wo, 2, cp), axis=2)         # column pairs
        z = jnp.max(z.reshape(ho, 2, wo, cp), axis=1)             # row pairs
        pooled.append(z)                                          # (ho, wo, cp) f32
    return pooled


def _conv_block_kernel(x_ref, w_ref, g_ref, b_ref, o_ref, conv_ref, *,
                       hc, wc, acti):
    # o_ref: (n_img, ho, wo, cout) bf16 — channel-unpadded pooled output.
    n_img, ho, wo, cout = o_ref.shape
    pooled = _conv_bn_act_pool(x_ref, w_ref, g_ref, b_ref, conv_ref,
                               n_img=n_img, hc=hc, wc=wc, ho=ho, wo=wo, acti=acti)
    for n in range(n_img):
        o_ref[n] = pooled[n][:, :, :cout].astype(o_ref.dtype)


def _conv_block_linear_kernel(x_ref, w_ref, g_ref, b_ref, lw_ref, lb_ref, o_ref,
                              conv_ref, *, hc, wc, ho, wo, acti):
    # Last block: additionally fuses Flatten + Linear so the final feature map
    # never round-trips HBM.
    # lw_ref: (ho*wo*cp, rp) bf16 (rows for padded channels are zero)
    # lb_ref: (1, rp) f32
    # o_ref : (n_img, rp) f32
    n_img = o_ref.shape[0]
    cp = w_ref.shape[1]
    pooled = _conv_bn_act_pool(x_ref, w_ref, g_ref, b_ref, conv_ref,
                               n_img=n_img, hc=hc, wc=wc, ho=ho, wo=wo, acti=acti)
    feats = []
    for n in range(n_img):
        p2 = pooled[n].reshape(ho * wo, cp)                       # (S, cp)
        # Lay the S spatial rows side-by-side along lanes -> (1, S*cp); pieces
        # are 128-lane aligned so this is a cheap, layout-safe concatenation.
        feats.append(jnp.concatenate([p2[s:s + 1, :] for s in range(ho * wo)],
                                     axis=1))
    feat = jnp.concatenate(feats, axis=0).astype(jnp.bfloat16)    # (n_img, S*cp)
    o_ref[...] = (jnp.dot(feat, lw_ref[...], preferred_element_type=jnp.float32)
                  + lb_ref[...])


# ---------------------------------------------------------------------------
# Wrappers
# ---------------------------------------------------------------------------
def _im2col_nhwc(x, k, padding):
    # (N, H, W, C) -> (N*Hc*Wc, K*K*C); tap order (kh, kw, cin) matches the
    # folded weight below.  Tiny slices/concat; fuses with the pad in XLA.
    n, h, w, c = x.shape
    hp, wp = h + 2 * padding, w + 2 * padding
    hc, wc = hp - k + 1, wp - k + 1
    xp = jnp.pad(x, ((0, 0), (padding, padding), (padding, padding), (0, 0)))
    taps = [xp[:, kh:kh + hc, kw:kw + wc, :] for kh in range(k) for kw in range(k)]
    xcol = jnp.concatenate(taps, axis=-1)                         # (n, hc, wc, k*k*c)
    return xcol.reshape(n * hc * wc, k * k * c), hc, wc


def _conv_block(x_nhwc, w_oihw, gamma, beta, *, padding, acti_func,
                lin_w=None, lin_b=None):
    n, h, w, cin = x_nhwc.shape
    cout, wcin, k, k2 = w_oihw.shape
    assert wcin == cin and k == k2
    cp = _round_up(cout, LANES)

    xcol, hc, wc = _im2col_nhwc(x_nhwc.astype(jnp.bfloat16), k, padding)
    ho, wo = hc // 2, wc // 2                                     # MaxPool2d(2,2)
    assert ho >= 1 and wo >= 1

    wf = jnp.transpose(w_oihw, (2, 3, 1, 0)).reshape(k * k * cin, cout)
    wf = jnp.pad(wf, ((0, 0), (0, cp - cout))).astype(jnp.bfloat16)
    g = jnp.pad(gamma.astype(jnp.float32), (0, cp - cout)).reshape(1, cp)
    b = jnp.pad(beta.astype(jnp.float32), (0, cp - cout)).reshape(1, cp)

    scratch = [pltpu.VMEM((n * hc * wc, cp), jnp.float32)]

    if lin_w is None:
        return pl.pallas_call(
            functools.partial(_conv_block_kernel, hc=hc, wc=wc, acti=acti_func),
            out_shape=jax.ShapeDtypeStruct((n, ho, wo, cout), jnp.bfloat16),
            scratch_shapes=scratch,
        )(xcol, wf, g, b)

    # Last block: fuse Flatten (PyTorch NCHW order) + Linear.
    r = lin_w.shape[0]
    rp = _round_up(r, LANES)
    assert lin_w.shape[1] == cout * ho * wo
    wl = lin_w.reshape(r, cout, ho, wo)
    wl = jnp.transpose(wl, (2, 3, 1, 0))                          # (ho, wo, cout, r)
    wl = jnp.pad(wl, ((0, 0), (0, 0), (0, cp - cout), (0, rp - r)))
    wl = wl.reshape(ho * wo * cp, rp).astype(jnp.bfloat16)
    lb = jnp.pad(lin_b.astype(jnp.float32), (0, rp - r)).reshape(1, rp)

    out = pl.pallas_call(
        functools.partial(_conv_block_linear_kernel, hc=hc, wc=wc, ho=ho, wo=wo,
                          acti=acti_func),
        out_shape=jax.ShapeDtypeStruct((n, rp), jnp.float32),
        scratch_shapes=scratch,
    )(xcol, wf, g, b, wl, lb)
    return out[:, :r]


def bt_net_forward(x_nchw, params):
    """BTNet forward: [ConvBlock]*num_cnn -> Flatten -> Linear.

    NCHW f32 in, (N, rep_dim) f32 out.  Exactly one pallas_call per ConvBlock;
    the final block's kernel also performs Flatten + Linear.
    """
    h = jnp.transpose(x_nchw, (0, 2, 3, 1))                       # NHWC internally
    blocks = params["blocks"]
    for i, blk in enumerate(blocks):
        if i + 1 == len(blocks):
            h = _conv_block(h, blk["w"], blk["gamma"], blk["beta"],
                            padding=blk["padding"], acti_func=blk["acti_func"],
                            lin_w=params["lin_w"], lin_b=params["lin_b"])
        else:
            h = _conv_block(h, blk["w"], blk["gamma"], blk["beta"],
                            padding=blk["padding"], acti_func=blk["acti_func"])
    return h


# ---------------------------------------------------------------------------
# Pure-JAX reference (validation)
# ---------------------------------------------------------------------------
def _conv_block_reference(x, w, gamma, beta, *, padding, acti_func):
    y = lax.conv_general_dilated(
        x, w, window_strides=(1, 1),
        padding=[(padding, padding), (padding, padding)],
        dimension_numbers=("NCHW", "OIHW", "NCHW"))
    mean = y.mean(axis=(0, 2, 3), keepdims=True)
    var = jnp.square(y - mean).mean(axis=(0, 2, 3), keepdims=True)
    y = (y - mean) * lax.rsqrt(var + BN_EPS) * gamma.reshape(1, -1, 1, 1) \
        + beta.reshape(1, -1, 1, 1)
    y = _activation(y, acti_func)
    n, c, hh, ww = y.shape
    y = y[:, :, :2 * (hh // 2), :2 * (ww // 2)]
    return y.reshape(n, c, hh // 2, 2, ww // 2, 2).max(axis=(3, 5))


def bt_net_reference(x, params):
    h = x
    for blk in params["blocks"]:
        h = _conv_block_reference(h, blk["w"], blk["gamma"], blk["beta"],
                                  padding=blk["padding"], acti_func=blk["acti_func"])
    flat = h.reshape(h.shape[0], -1)
    return flat @ params["lin_w"].T + params["lin_b"]


if __name__ == "__main__":
    # BTNet(in_channels=4, num_cnn=2, channels=[8,16], kernel_sizes=[3,3],
    #       paddings=[1,1], rep_dim=32, linear=256, acti_funcs=["ReLU","ReLU"])
    N, Cin, H, W = 2, 4, 16, 16
    channels = [8, 16]
    kernel_sizes = [3, 3]
    paddings = [1, 1]
    acti_funcs = ["ReLU", "ReLU"]
    rep_dim = 32
    lin_in = channels[-1] * (H // 4) * (W // 4)   # 16 * 4 * 4 = 256

    key = jax.random.PRNGKey(0)
    keys = jax.random.split(key, 4 + 3 * len(channels))
    x = jax.random.normal(keys[0], (N, Cin, H, W), dtype=jnp.float32)

    blocks = []
    cin = Cin
    for i, (co, k, p, a) in enumerate(zip(channels, kernel_sizes, paddings, acti_funcs)):
        fan = cin * k * k
        wk = jax.random.normal(keys[1 + 3 * i], (co, cin, k, k), jnp.float32) / math.sqrt(fan)
        # BatchNorm affine params (perturbed from the default gamma=1, beta=0 to
        # exercise the scale/shift path — any values are valid parameters).
        gk = 1.0 + 0.1 * jax.random.normal(keys[2 + 3 * i], (co,), jnp.float32)
        bk = 0.1 * jax.random.normal(keys[3 + 3 * i], (co,), jnp.float32)
        blocks.append(dict(w=wk, gamma=gk, beta=bk, padding=p, acti_func=a))
        cin = co
    lin_w = jax.random.normal(keys[-2], (rep_dim, lin_in), jnp.float32) / math.sqrt(lin_in)
    lin_b = 0.01 * jax.random.normal(keys[-1], (rep_dim,), jnp.float32)
    params = dict(blocks=blocks, lin_w=lin_w, lin_b=lin_b)

    fwd = jax.jit(lambda xx: bt_net_forward(xx, params))
    out = jax.block_until_ready(fwd(x))

    ref = bt_net_reference(x, params)
    assert out.shape == (N, rep_dim), out.shape
    max_err = float(jnp.max(jnp.abs(out - ref)))
    # bf16 matmul operands / bf16 inter-block activations vs f32 reference
    assert jnp.allclose(out, ref, atol=3e-2, rtol=3e-2), max_err
    print("KERNEL_OK")
</pallas_src>

<mosaic_0001>
module attributes {stable_mosaic.version = 11 : i64} {
  func.func @_conv_block_kernel(%arg0: memref<512x36xbf16, #tpu.memory_space<vmem>>, %arg1: memref<36x128xbf16, #tpu.memory_space<vmem>>, %arg2: memref<1x128xf32, #tpu.memory_space<vmem>>, %arg3: memref<1x128xf32, #tpu.memory_space<vmem>>, %arg4: memref<2x8x8x8xbf16, #tpu.memory_space<vmem>>, %arg5: memref<512x128xf32, #tpu.memory_space<vmem>>) attributes {dimension_semantics = [], scalar_prefetch = 0 : i64, scratch_operands = 1 : i64, tpu.core_type = #tpu.core_type<tc>} {
    %c0 = arith.constant 0 : index
    %c0_0 = arith.constant 0 : index
    %0 = vector.load %arg0[%c0, %c0_0] : memref<512x36xbf16, #tpu.memory_space<vmem>>, vector<512x36xbf16>
    %c0_1 = arith.constant 0 : index
    %c0_2 = arith.constant 0 : index
    %1 = vector.load %arg1[%c0_1, %c0_2] : memref<36x128xbf16, #tpu.memory_space<vmem>>, vector<36x128xbf16>
    %cst = arith.constant dense<0.000000e+00> : vector<512x128xf32>
    %2 = tpu.matmul %0, %1, %cst {dimension_numbers = #tpu.dot_dimension_numbers<[1], [0], [0], [1], [0, 0, 1, 1], [], []>} : vector<512x36xbf16>, vector<36x128xbf16>, vector<512x128xf32> -> vector<512x128xf32>
    %c0_3 = arith.constant 0 : index
    %c0_4 = arith.constant 0 : index
    %3 = vector.load %arg5[%c0_3, %c0_4] : memref<512x128xf32, #tpu.memory_space<vmem>>, vector<512x128xf32>
    tpu.vector_store %arg5[%c0_3, %c0_4], %2 {strides = array<i32>} : memref<512x128xf32, #tpu.memory_space<vmem>>, vector<512x128xf32>,
    %cst_5 = arith.constant dense<0.000000e+00> : vector<128xf32>
    %4 = vector.multi_reduction <add>, %2, %cst_5 [0] : vector<512x128xf32> to vector<128xf32>
    %5 = vector.shape_cast %4 : vector<128xf32> to vector<1x128xf32>
    %cst_6 = arith.constant 5.120000e+02 : f32
    %6 = vector.broadcast %cst_6 : f32 to vector<1x128xf32>
    %7 = arith.divf %5, %6 : vector<1x128xf32>
    %8 = arith.mulf %2, %2 : vector<512x128xf32>
    %cst_7 = arith.constant dense<0.000000e+00> : vector<128xf32>
    %9 = vector.multi_reduction <add>, %8, %cst_7 [0] : vector<512x128xf32> to vector<128xf32>
    %10 = vector.shape_cast %9 : vector<128xf32> to vector<1x128xf32>
    %cst_8 = arith.constant 5.120000e+02 : f32
    %11 = vector.broadcast %cst_8 : f32 to vector<1x128xf32>
    %12 = arith.divf %10, %11 : vector<1x128xf32>
    %13 = arith.mulf %7, %7 : vector<1x128xf32>
    %14 = arith.subf %12, %13 : vector<1x128xf32>
    %cst_9 = arith.constant 0.000000e+00 : f32
    %15 = vector.broadcast %cst_9 : f32 to vector<1x128xf32>
    %16 = arith.maximumf %14, %15 : vector<1x128xf32>
    %c0_10 = arith.constant 0 : index
    %c0_11 = arith.constant 0 : index
    %17 = vector.load %arg2[%c0_10, %c0_11] : memref<1x128xf32, #tpu.memory_space<vmem>>, vector<1x128xf32>
    %cst_12 = arith.constant 9.99999974E-5 : f32
    %18 = vector.broadcast %cst_12 : f32 to vector<1x128xf32>
    %19 = arith.addf %16, %18 : vector<1x128xf32>
    %20 = math.rsqrt %19 : vector<1x128xf32>
    %21 = arith.mulf %17, %20 : vector<1x128xf32>
    %c0_13 = arith.constant 0 : index
    %c0_14 = arith.constant 0 : index
    %22 = vector.load %arg3[%c0_13, %c0_14] : memref<1x128xf32, #tpu.memory_space<vmem>>, vector<1x128xf32>
    %23 = arith.mulf %7, %21 : vector<1x128xf32>
    %24 = arith.subf %22, %23 : vector<1x128xf32>
    %c0_15 = arith.constant 0 : index
    %c0_16 = arith.constant 0 : index
    %25 = vector.load %arg5[%c0_15, %c0_16] : memref<512x128xf32, #tpu.memory_space<vmem>>, vector<256x128xf32>
    %26 = vector.broadcast %21 : vector<1x128xf32> to vector<256x128xf32>
    %27 = arith.mulf %25, %26 : vector<256x128xf32>
    %28 = vector.broadcast %24 : vector<1x128xf32> to vector<256x128xf32>
    %29 = arith.addf %27, %28 : vector<256x128xf32>
    %cst_17 = arith.constant 0.000000e+00 : f32
    %30 = vector.broadcast %cst_17 : f32 to vector<256x128xf32>
    %31 = arith.maximumf %29, %30 : vector<256x128xf32>
    %32 = vector.shape_cast %31 : vector<256x128xf32> to vector<16x16x128xf32>
    %33 = vector.shape_cast %32 : vector<16x16x128xf32> to vector<16x8x2x128xf32>
    %cst_18 = arith.constant dense<0xFF800000> : vector<16x8x128xf32>
    %34 = vector.multi_reduction <maximumf>, %33, %cst_18 [2] : vector<16x8x2x128xf32> to vector<16x8x128xf32>
    %35 = vector.shape_cast %34 : vector<16x8x128xf32> to vector<8x2x8x128xf32>
    %cst_19 = arith.constant dense<0xFF800000> : vector<8x8x128xf32>
    %36 = vector.multi_reduction <maximumf>, %35, %cst_19 [1] : vector<8x2x8x128xf32> to vector<8x8x128xf32>
    %c256 = arith.constant 256 : index
    %c0_20 = arith.constant 0 : index
    %37 = vector.load %arg5[%c256, %c0_20] : memref<512x128xf32, #tpu.memory_space<vmem>>, vector<256x128xf32>
    %38 = vector.broadcast %21 : vector<1x128xf32> to vector<256x128xf32>
    %39 = arith.mulf %37, %38 : vector<256x128xf32>
    %40 = vector.broadcast %24 : vector<1x128xf32> to vector<256x128xf32>
    %41 = arith.addf %39, %40 : vector<256x128xf32>
    %cst_21 = arith.constant 0.000000e+00 : f32
    %42 = vector.broadcast %cst_21 : f32 to vector<256x128xf32>
    %43 = arith.maximumf %41, %42 : vector<256x128xf32>
    %44 = vector.shape_cast %43 : vector<256x128xf32> to vector<16x16x128xf32>
    %45 = vector.shape_cast %44 : vector<16x16x128xf32> to vector<16x8x2x128xf32>
    %cst_22 = arith.constant dense<0xFF800000> : vector<16x8x128xf32>
    %46 = vector.multi_reduction <maximumf>, %45, %cst_22 [2] : vector<16x8x2x128xf32> to vector<16x8x128xf32>
    %47 = vector.shape_cast %46 : vector<16x8x128xf32> to vector<8x2x8x128xf32>
    %cst_23 = arith.constant dense<0xFF800000> : vector<8x8x128xf32>
    %48 = vector.multi_reduction <maximumf>, %47, %cst_23 [1] : vector<8x2x8x128xf32> to vector<8x8x128xf32>
    %49 = vector.extract_strided_slice %36 {offsets = [0, 0, 0], sizes = [8, 8, 8], strides = [1, 1, 1]} : vector<8x8x128xf32> to vector<8x8x8xf32>
    %50 = arith.truncf %49 : vector<8x8x8xf32> to vector<8x8x8xbf16>
    %c0_24 = arith.constant 0 : index
    %c0_25 = arith.constant 0 : index
    %c0_26 = arith.constant 0 : index
    %c0_27 = arith.constant 0 : index
    %51 = vector.load %arg4[%c0_24, %c0_25, %c0_26, %c0_27] : memref<2x8x8x8xbf16, #tpu.memory_space<vmem>>, vector<1x8x8x8xbf16>
    %52 = vector.shape_cast %51 : vector<1x8x8x8xbf16> to vector<8x8x8xbf16>
    %53 = vector.shape_cast %50 : vector<8x8x8xbf16> to vector<1x8x8x8xbf16>
    tpu.vector_store %arg4[%c0_24, %c0_25, %c0_26, %c0_27], %53 {strides = array<i32>} : memref<2x8x8x8xbf16, #tpu.memory_space<vmem>>, vector<1x8x8x8xbf16>,
    %54 = vector.extract_strided_slice %48 {offsets = [0, 0, 0], sizes = [8, 8, 8], strides = [1, 1, 1]} : vector<8x8x128xf32> to vector<8x8x8xf32>
    %55 = arith.truncf %54 : vector<8x8x8xf32> to vector<8x8x8xbf16>
    %c1 = arith.constant 1 : index
    %c0_28 = arith.constant 0 : index
    %c0_29 = arith.constant 0 : index
    %c0_30 = arith.constant 0 : index
    %56 = vector.load %arg4[%c1, %c0_28, %c0_29, %c0_30] : memref<2x8x8x8xbf16, #tpu.memory_space<vmem>>, vector<1x8x8x8xbf16>
    %57 = vector.shape_cast %56 : vector<1x8x8x8xbf16> to vector<8x8x8xbf16>
    %58 = vector.shape_cast %55 : vector<8x8x8xbf16> to vector<1x8x8x8xbf16>
    tpu.vector_store %arg4[%c1, %c0_28, %c0_29, %c0_30], %58 {strides = array<i32>} : memref<2x8x8x8xbf16, #tpu.memory_space<vmem>>, vector<1x8x8x8xbf16>,
    return
  }
}

module attributes {stable_mosaic.version = 11 : i64} {
  func.func @_conv_block_linear_kernel(%arg0: memref<128x72xbf16, #tpu.memory_space<vmem>>, %arg1: memref<72x128xbf16, #tpu.memory_space<vmem>>, %arg2: memref<1x128xf32, #tpu.memory_space<vmem>>, %arg3: memref<1x128xf32, #tpu.memory_space<vmem>>, %arg4: memref<2048x128xbf16, #tpu.memory_space<vmem>>, %arg5: memref<1x128xf32, #tpu.memory_space<vmem>>, %arg6: memref<2x128xf32, #tpu.memory_space<vmem>>, %arg7: memref<128x128xf32, #tpu.memory_space<vmem>>) attributes {dimension_semantics = [], scalar_prefetch = 0 : i64, scratch_operands = 1 : i64, tpu.core_type = #tpu.core_type<tc>} {
    %c0 = arith.constant 0 : index
    %c0_0 = arith.constant 0 : index
    %0 = vector.load %arg0[%c0, %c0_0] : memref<128x72xbf16, #tpu.memory_space<vmem>>, vector<128x72xbf16>
    %c0_1 = arith.constant 0 : index
    %c0_2 = arith.constant 0 : index
    %1 = vector.load %arg1[%c0_1, %c0_2] : memref<72x128xbf16, #tpu.memory_space<vmem>>, vector<72x128xbf16>
    %cst = arith.constant dense<0.000000e+00> : vector<128x128xf32>
    %2 = tpu.matmul %0, %1, %cst {dimension_numbers = #tpu.dot_dimension_numbers<[1], [0], [0], [1], [0, 0, 1, 1], [], []>} : vector<128x72xbf16>, vector<72x128xbf16>, vector<128x128xf32> -> vector<128x128xf32>
    %c0_3 = arith.constant 0 : index
    %c0_4 = arith.constant 0 : index
    %3 = vector.load %arg7[%c0_3, %c0_4] : memref<128x128xf32, #tpu.memory_space<vmem>>, vector<128x128xf32>
    tpu.vector_store %arg7[%c0_3, %c0_4], %2 {strides = array<i32>} : memref<128x128xf32, #tpu.memory_space<vmem>>, vector<128x128xf32>,
    %cst_5 = arith.constant dense<0.000000e+00> : vector<128xf32>
    %4 = vector.multi_reduction <add>, %2, %cst_5 [0] : vector<128x128xf32> to vector<128xf32>
    %5 = vector.shape_cast %4 : vector<128xf32> to vector<1x128xf32>
    %cst_6 = arith.constant 1.280000e+02 : f32
    %6 = vector.broadcast %cst_6 : f32 to vector<1x128xf32>
    %7 = arith.divf %5, %6 : vector<1x128xf32>
    %8 = arith.mulf %2, %2 : vector<128x128xf32>
    %cst_7 = arith.constant dense<0.000000e+00> : vector<128xf32>
    %9 = vector.multi_reduction <add>, %8, %cst_7 [0] : vector<128x128xf32> to vector<128xf32>
    %10 = vector.shape_cast %9 : vector<128xf32> to vector<1x128xf32>
    %cst_8 = arith.constant 1.280000e+02 : f32
    %11 = vector.broadcast %cst_8 : f32 to vector<1x128xf32>
    %12 = arith.divf %10, %11 : vector<1x128xf32>
    %13 = arith.mulf %7, %7 : vector<1x128xf32>
    %14 = arith.subf %12, %13 : vector<1x128xf32>
    %cst_9 = arith.constant 0.000000e+00 : f32
    %15 = vector.broadcast %cst_9 : f32 to vector<1x128xf32>
    %16 = arith.maximumf %14, %15 : vector<1x128xf32>
    %c0_10 = arith.constant 0 : index
    %c0_11 = arith.constant 0 : index
    %17 = vector.load %arg2[%c0_10, %c0_11] : memref<1x128xf32, #tpu.memory_space<vmem>>, vector<1x128xf32>
    %cst_12 = arith.constant 9.99999974E-5 : f32
    %18 = vector.broadcast %cst_12 : f32 to vector<1x128xf32>
    %19 = arith.addf %16, %18 : vector<1x128xf32>
    %20 = math.rsqrt %19 : vector<1x128xf32>
    %21 = arith.mulf %17, %20 : vector<1x128xf32>
    %c0_13 = arith.constant 0 : index
    %c0_14 = arith.constant 0 : index
    %22 = vector.load %arg3[%c0_13, %c0_14] : memref<1x128xf32, #tpu.memory_space<vmem>>, vector<1x128xf32>
    %23 = arith.mulf %7, %21 : vector<1x128xf32>
    %24 = arith.subf %22, %23 : vector<1x128xf32>
    %c0_15 = arith.constant 0 : index
    %c0_16 = arith.constant 0 : index
    %25 = vector.load %arg7[%c0_15, %c0_16] : memref<128x128xf32, #tpu.memory_space<vmem>>, vector<64x128xf32>
    %26 = vector.broadcast %21 : vector<1x128xf32> to vector<64x128xf32>
    %27 = arith.mulf %25, %26 : vector<64x128xf32>
    %28 = vector.broadcast %24 : vector<1x128xf32> to vector<64x128xf32>
    %29 = arith.addf %27, %28 : vector<64x128xf32>
    %cst_17 = arith.constant 0.000000e+00 : f32
    %30 = vector.broadcast %cst_17 : f32 to vector<64x128xf32>
    %31 = arith.maximumf %29, %30 : vector<64x128xf32>
    %32 = vector.shape_cast %31 : vector<64x128xf32> to vector<8x8x128xf32>
    %33 = vector.shape_cast %32 : vector<8x8x128xf32> to vector<8x4x2x128xf32>
    %cst_18 = arith.constant dense<0xFF800000> : vector<8x4x128xf32>
    %34 = vector.multi_reduction <maximumf>, %33, %cst_18 [2] : vector<8x4x2x128xf32> to vector<8x4x128xf32>
    %35 = vector.shape_cast %34 : vector<8x4x128xf32> to vector<4x2x4x128xf32>
    %cst_19 = arith.constant dense<0xFF800000> : vector<4x4x128xf32>
    %36 = vector.multi_reduction <maximumf>, %35, %cst_19 [1] : vector<4x2x4x128xf32> to vector<4x4x128xf32>
    %c64 = arith.constant 64 : index
    %c0_20 = arith.constant 0 : index
    %37 = vector.load %arg7[%c64, %c0_20] : memref<128x128xf32, #tpu.memory_space<vmem>>, vector<64x128xf32>
    %38 = vector.broadcast %21 : vector<1x128xf32> to vector<64x128xf32>
    %39 = arith.mulf %37, %38 : vector<64x128xf32>
    %40 = vector.broadcast %24 : vector<1x128xf32> to vector<64x128xf32>
    %41 = arith.addf %39, %40 : vector<64x128xf32>
    %cst_21 = arith.constant 0.000000e+00 : f32
    %42 = vector.broadcast %cst_21 : f32 to vector<64x128xf32>
    %43 = arith.maximumf %41, %42 : vector<64x128xf32>
    %44 = vector.shape_cast %43 : vector<64x128xf32> to vector<8x8x128xf32>
    %45 = vector.shape_cast %44 : vector<8x8x128xf32> to vector<8x4x2x128xf32>
    %cst_22 = arith.constant dense<0xFF800000> : vector<8x4x128xf32>
    %46 = vector.multi_reduction <maximumf>, %45, %cst_22 [2] : vector<8x4x2x128xf32> to vector<8x4x128xf32>
    %47 = vector.shape_cast %46 : vector<8x4x128xf32> to vector<4x2x4x128xf32>
    %cst_23 = arith.constant dense<0xFF800000> : vector<4x4x128xf32>
    %48 = vector.multi_reduction <maximumf>, %47, %cst_23 [1] : vector<4x2x4x128xf32> to vector<4x4x128xf32>
    %49 = vector.shape_cast %36 : vector<4x4x128xf32> to vector<16x128xf32>
    %50 = vector.extract_strided_slice %49 {offsets = [0, 0], sizes = [1, 128], strides = [1, 1]} : vector<16x128xf32> to vector<1x128xf32>
    %51 = vector.extract_strided_slice %49 {offsets = [1, 0], sizes = [1, 128], strides = [1, 1]} : vector<16x128xf32> to vector<1x128xf32>
    %52 = vector.extract_strided_slice %49 {offsets = [2, 0], sizes = [1, 128], strides = [1, 1]} : vector<16x128xf32> to vector<1x128xf32>
    %53 = vector.extract_strided_slice %49 {offsets = [3, 0], sizes = [1, 128], strides = [1, 1]} : vector<16x128xf32> to vector<1x128xf32>
    %54 = vector.extract_strided_slice %49 {offsets = [4, 0], sizes = [1, 128], strides = [1, 1]} : vector<16x128xf32> to vector<1x128xf32>
    %55 = vector.extract_strided_slice %49 {offsets = [5, 0], sizes = [1, 128], strides = [1, 1]} : vector<16x128xf32> to vector<1x128xf32>
    %56 = vector.extract_strided_slice %49 {offsets = [6, 0], sizes = [1, 128], strides = [1, 1]} : vector<16x128xf32> to vector<1x128xf32>
    %57 = vector.extract_strided_slice %49 {offsets = [7, 0], sizes = [1, 128], strides = [1, 1]} : vector<16x128xf32> to vector<1x128xf32>
    %58 = vector.extract_strided_slice %49 {offsets = [8, 0], sizes = [1, 128], strides = [1, 1]} : vector<16x128xf32> to vector<1x128xf32>
    %59 = vector.extract_strided_slice %49 {offsets = [9, 0], sizes = [1, 128], strides = [1, 1]} : vector<16x128xf32> to vector<1x128xf32>
    %60 = vector.extract_strided_slice %49 {offsets = [10, 0], sizes = [1, 128], strides = [1, 1]} : vector<16x128xf32> to vector<1x128xf32>
    %61 = vector.extract_strided_slice %49 {offsets = [11, 0], sizes = [1, 128], strides = [1, 1]} : vector<16x128xf32> to vector<1x128xf32>
    %62 = vector.extract_strided_slice %49 {offsets = [12, 0], sizes = [1, 128], strides = [1, 1]} : vector<16x128xf32> to vector<1x128xf32>
    %63 = vector.extract_strided_slice %49 {offsets = [13, 0], sizes = [1, 128], strides = [1, 1]} : vector<16x128xf32> to vector<1x128xf32>
    %64 = vector.extract_strided_slice %49 {offsets = [14, 0], sizes = [1, 128], strides = [1, 1]} : vector<16x128xf32> to vector<1x128xf32>
    %65 = vector.extract_strided_slice %49 {offsets = [15, 0], sizes = [1, 128], strides = [1, 1]} : vector<16x128xf32> to vector<1x128xf32>
    %66 = tpu.concatenate %50, %51, %52, %53, %54, %55, %56, %57, %58, %59, %60, %61, %62, %63, %64, %65 in 1 : vector<1x128xf32>, vector<1x128xf32>, vector<1x128xf32>, vector<1x128xf32>, vector<1x128xf32>, vector<1x128xf32>, vector<1x128xf32>, vector<1x128xf32>, vector<1x128xf32>, vector<1x128xf32>, vector<1x128xf32>, vector<1x128xf32>, vector<1x128xf32>, vector<1x128xf32>, vector<1x128xf32>, vector<1x128xf32> -> vector<1x2048xf32>
    %67 = vector.shape_cast %48 : vector<4x4x128xf32> to vector<16x128xf32>
    %68 = vector.extract_strided_slice %67 {offsets = [0, 0], sizes = [1, 128], strides = [1, 1]} : vector<16x128xf32> to vector<1x128xf32>
    %69 = vector.extract_strided_slice %67 {offsets = [1, 0], sizes = [1, 128], strides = [1, 1]} : vector<16x128xf32> to vector<1x128xf32>
    %70 = vector.extract_strided_slice %67 {offsets = [2, 0], sizes = [1, 128], strides = [1, 1]} : vector<16x128xf32> to vector<1x128xf32>
    %71 = vector.extract_strided_slice %67 {offsets = [3, 0], sizes = [1, 128], strides = [1, 1]} : vector<16x128xf32> to vector<1x128xf32>
    %72 = vector.extract_strided_slice %67 {offsets = [4, 0], sizes = [1, 128], strides = [1, 1]} : vector<16x128xf32> to vector<1x128xf32>
    %73 = vector.extract_strided_slice %67 {offsets = [5, 0], sizes = [1, 128], strides = [1, 1]} : vector<16x128xf32> to vector<1x128xf32>
    %74 = vector.extract_strided_slice %67 {offsets = [6, 0], sizes = [1, 128], strides = [1, 1]} : vector<16x128xf32> to vector<1x128xf32>
    %75 = vector.extract_strided_slice %67 {offsets = [7, 0], sizes = [1, 128], strides = [1, 1]} : vector<16x128xf32> to vector<1x128xf32>
    %76 = vector.extract_strided_slice %67 {offsets = [8, 0], sizes = [1, 128], strides = [1, 1]} : vector<16x128xf32> to vector<1x128xf32>
    %77 = vector.extract_strided_slice %67 {offsets = [9, 0], sizes = [1, 128], strides = [1, 1]} : vector<16x128xf32> to vector<1x128xf32>
    %78 = vector.extract_strided_slice %67 {offsets = [10, 0], sizes = [1, 128], strides = [1, 1]} : vector<16x128xf32> to vector<1x128xf32>
    %79 = vector.extract_strided_slice %67 {offsets = [11, 0], sizes = [1, 128], strides = [1, 1]} : vector<16x128xf32> to vector<1x128xf32>
    %80 = vector.extract_strided_slice %67 {offsets = [12, 0], sizes = [1, 128], strides = [1, 1]} : vector<16x128xf32> to vector<1x128xf32>
    %81 = vector.extract_strided_slice %67 {offsets = [13, 0], sizes = [1, 128], strides = [1, 1]} : vector<16x128xf32> to vector<1x128xf32>
    %82 = vector.extract_strided_slice %67 {offsets = [14, 0], sizes = [1, 128], strides = [1, 1]} : vector<16x128xf32> to vector<1x128xf32>
    %83 = vector.extract_strided_slice %67 {offsets = [15, 0], sizes = [1, 128], strides = [1, 1]} : vector<16x128xf32> to vector<1x128xf32>
    %84 = tpu.concatenate %68, %69, %70, %71, %72, %73, %74, %75, %76, %77, %78, %79, %80, %81, %82, %83 in 1 : vector<1x128xf32>, vector<1x128xf32>, vector<1x128xf32>, vector<1x128xf32>, vector<1x128xf32>, vector<1x128xf32>, vector<1x128xf32>, vector<1x128xf32>, vector<1x128xf32>, vector<1x128xf32>, vector<1x128xf32>, vector<1x128xf32>, vector<1x128xf32>, vector<1x128xf32>, vector<1x128xf32>, vector<1x128xf32> -> vector<1x2048xf32>
    %85 = tpu.concatenate %66, %84 in 0 : vector<1x2048xf32>, vector<1x2048xf32> -> vector<2x2048xf32>
    %86 = arith.truncf %85 : vector<2x2048xf32> to vector<2x2048xbf16>
    %c0_24 = arith.constant 0 : index
    %c0_25 = arith.constant 0 : index
    %87 = vector.load %arg4[%c0_24, %c0_25] : memref<2048x128xbf16, #tpu.memory_space<vmem>>, vector<2048x128xbf16>
    %cst_26 = arith.constant dense<0.000000e+00> : vector<2x128xf32>
    %88 = tpu.matmul %86, %87, %cst_26 {dimension_numbers = #tpu.dot_dimension_numbers<[1], [0], [0], [1], [0, 0, 1, 1], [], []>} : vector<2x2048xbf16>, vector<2048x128xbf16>, vector<2x128xf32> -> vector<2x128xf32>
    %c0_27 = arith.constant 0 : index
    %c0_28 = arith.constant 0 : index
    %89 = vector.load %arg5[%c0_27, %c0_28] : memref<1x128xf32, #tpu.memory_space<vmem>>, vector<1x128xf32>
    %90 = vector.broadcast %89 : vector<1x128xf32> to vector<2x128xf32>
    %91 = arith.addf %88, %90 : vector<2x128xf32>
    %c0_29 = arith.constant 0 : index
    %c0_30 = arith.constant 0 : index
    %92 = vector.load %arg6[%c0_29, %c0_30] : memref<2x128xf32, #tpu.memory_space<vmem>>, vector<2x128xf32>
    tpu.vector_store %arg6[%c0_29, %c0_30], %91 {strides = array<i32>} : memref<2x128xf32, #tpu.memory_space<vmem>>, vector<2x128xf32>,
    return
  }
}

</mosaic_0001>

<bundles_post_ra>
// kernel: _lambda_.3
= control target key start
LH: loop header
LB: loop body
LE: loop exit
PB: predicated region body
PF: predicated region fallthrough
CT: control target
= control target key end

     0   :  { %vm117_vm0 = vcmask 588800   ;;  %vm142_vm1 = vcmask 1043456   ;;  %s4252_s0 = inlined_call_operand.vmem [shape: bf16[128,72], index: 0, kind: input, shape index: {}]   ;;  %s4253_s1 = inlined_call_operand.vmem [shape: bf16[72,128], index: 1, kind: input, shape index: {}]   ;;  %s4254_s2 = inlined_call_operand.vmem [shape: f32[1,128], index: 2, kind: input, shape index: {}]   ;;  %s4255_s3 = inlined_call_operand.vmem [shape: f32[1,128], index: 3, kind: input, shape index: {}]   ;;  %s4256_s4 = inlined_call_operand.vmem [shape: bf16[2048,128], index: 4, kind: input, shape index: {}]   ;;  %s4257_s5 = inlined_call_operand.vmem [shape: f32[1,128], index: 5, kind: input, shape index: {}]   ;;  %s4258_s6 = inlined_call_operand.hbm [shape: f32[2,128], index: 6, kind: output, shape index: {}]  }
   0x1   :  { %v3054_v0 = vld [vmem:[%s4253_s1] sm:$0xff]   ;;  %v3055_v1 = vld [vmem:[%s4253_s1 + $0x8] sm:$0xff]   ;;  %v3056_v2 = vld [vmem:[%s4253_s1 + $0x10] sm:$0xff]  }
   0x2   :  { %3025 = vmatprep.subr.bf16.mxu0 %v3054_v0  ;;  %v3059_v3 = vld [vmem:[%s4252_s0] sm:$0xff]   ;;  %v3057_v4 = vld [vmem:[%s4253_s1 + $0x18] sm:$0xff]   ;;  %v3060_v7 = vld [vmem:[%s4252_s0 + $0x8] sm:$0xff]  }
   0x3   :  { %3026 = vmatpush3.bf16.msra.mxu0 %v3054_v0  ;;  %3035 = vmatprep.mubr.msk.bf16.mxu0 %vm117_vm0, %v3059_v3  ;;  %v3058_v5 = vld [vmem:[%s4253_s1 + $0x20] ss:$0 sps:$4 sm:$0xff]   ;;  %v3061_v8 = vld [vmem:[%s4252_s0 + $0x10] sm:$0xff]   ;;  %v3062_v9 = vld [vmem:[%s4252_s0 + $0x18] sm:$0xff]  }
   0x4   :  { %3027 = vmatprep.subr.bf16.mxu0 %v3055_v1  ;;  %v144_v6 = vsel %vm142_vm1, %v3058_v5, 0  ;;  %v3063_v10 = vld [vmem:[%s4252_s0 + $0x20] sm:$0xff]   ;;  %v3064_v11 = vld [vmem:[%s4252_s0 + $0x28] sm:$0xff]   ;;  %v3065_v12 = vld [vmem:[%s4252_s0 + $0x30] sm:$0xff]  }
   0x5   :  { %v3066_v13 = vld [vmem:[%s4252_s0 + $0x38] sm:$0xff]  }
   0x7   :  { %3028 = vmatpush3.bf16.msra.mxu0 %v3055_v1 }
   0x8   :  { %3029 = vmatprep.subr.bf16.mxu0 %v3056_v2 }
   0xb   :  { %3030 = vmatpush3.bf16.msra.mxu0 %v3056_v2 }
   0xc   :  { %3031 = vmatprep.subr.bf16.mxu0 %v3057_v4 }
   0xf   :  { %3032 = vmatpush3.bf16.msra.mxu0 %v3057_v4 }
  0x10   :  { %3051 = vmatprep.subr.msk.bf16.mxu0 %vm142_vm1, %v3058_v5 }
  0x13   :  { %3034 = vmatpush3.bf16.msra.mxu0 %v144_v6 }
  0x16   :  { %3036 = vmatmul.mubr.msk.bf16.vlgmr.msra.gmra.mrb[0].mxu0 %vm117_vm0, %v3060_v7 }
  0x17   :  { %3039 = vmatprep.mubr.msk.bf16.mxu0 %vm117_vm0, %v3061_v8 }
  0x1e   :  { %3040 = vmatmul.mubr.msk.bf16.gmra.mrb[4].mxu0 %vm117_vm0, %v3062_v9 }
  0x1f   :  { %3043 = vmatprep.mubr.msk.bf16.mxu0 %vm117_vm0, %v3063_v10 }
  0x26   :  { %3044 = vmatmul.mubr.msk.bf16.gmra.mrb[8].mxu0 %vm117_vm0, %v3064_v11 }
  0x27   :  { %3047 = vmatprep.mubr.msk.bf16.mxu0 %vm117_vm0, %v3065_v12 }
  0x2e   :  { %3048 = vmatmul.mubr.msk.bf16.gmra.mrb[12].mxu0 %vm117_vm0, %v3066_v13 }
  0x2f   :  { %11 = vsyncpa [#allocation4], 0  ;;  %v3067_v14 = vld [vmem:[%s4256_s4 + $0x40] sm:$0xff]   ;;  %v3071_v18 = vld [vmem:[%s4256_s4 + $0x48] sm:$0xff]   ;;  %vm550_vm2 = vcmask 1041408   ;;  %vm1287_vm3 = vcmask 1040384  }
  0x30   :  { %v3068_v15 = vld [vmem:[%s4256_s4] sm:$0xff]   ;;  %2849 = vmatprep.subr.bf16.mxu1 %v3067_v14  ;;  %v3072_v19 = vld [vmem:[%s4256_s4 + $0x8] sm:$0xff]   ;;  %v3075_v22 = vld [vmem:[%s4256_s4 + $0x50] sm:$0xff]  }
  0x31   :  { %v3069_v16 = vld [vmem:[%s4256_s4 + $0xc0] sm:$0xff]   ;;  %2850 = vmatpush3.bf16.msra.mxu1 %v3068_v15  ;;  %v3073_v20 = vld [vmem:[%s4256_s4 + $0xc8] sm:$0xff]   ;;  %v3076_v23 = vld [vmem:[%s4256_s4 + $0x10] sm:$0xff]  }
  0x32   :  { %v3070_v17 = vld [vmem:[%s4256_s4 + $0x80] sm:$0xff]   ;;  %2871 = vmatprep.subr.bf16.mxu0 %v3069_v16  ;;  %2851 = vmatprep.subr.bf16.mxu1 %v3071_v18  ;;  %v3074_v21 = vld [vmem:[%s4256_s4 + $0x88] sm:$0xff]   ;;  %v3077_v24 = vld [vmem:[%s4256_s4 + $0xd0] sm:$0xff]  }
  0x33   :  { %2872 = vmatpush3.bf16.msra.mxu0 %v3070_v17  ;;  %v3078_v25 = vld [vmem:[%s4256_s4 + $0x90] sm:$0xff]   ;;  %v3079_v26 = vld [vmem:[%s4256_s4 + $0x58] sm:$0xff]   ;;  %v3083_v30 = vld [vmem:[%s4256_s4 + $0x60] sm:$0xff]  }
  0x34   :  { %2873 = vmatprep.subr.bf16.mxu0 %v3073_v20  ;;  %v3080_v27 = vld [vmem:[%s4256_s4 + $0x18] sm:$0xff]   ;;  %v3084_v31 = vld [vmem:[%s4256_s4 + $0x20] sm:$0xff]   ;;  %v3087_v34 = vld [vmem:[%s4256_s4 + $0x68] sm:$0xff]  }
  0x35   :  { %2852 = vmatpush3.bf16.msra.mxu1 %v3072_v19  ;;  %v3081_v28 = vld [vmem:[%s4256_s4 + $0xd8] sm:$0xff]   ;;  %v3085_v32 = vld [vmem:[%s4256_s4 + $0xe0] sm:$0xff]   ;;  %v3088_v35 = vld [vmem:[%s4256_s4 + $0x28] sm:$0xff]  }
  0x36   :  { %2853 = vmatprep.subr.bf16.mxu1 %v3075_v22  ;;  %v3082_v29 = vld [vmem:[%s4256_s4 + $0x98] sm:$0xff]   ;;  %v3086_v33 = vld [vmem:[%s4256_s4 + $0xa0] sm:$0xff]   ;;  %v3089_v36 = vld [vmem:[%s4256_s4 + $0xe8] sm:$0xff]  }
  0x37   :  { %2874 = vmatpush3.bf16.msra.mxu0 %v3074_v21  ;;  %v3090_v37 = vld [vmem:[%s4256_s4 + $0xa8] sm:$0xff]   ;;  %v3091_v38 = vld [vmem:[%s4256_s4 + $0x70] sm:$0xff]   ;;  %v3095_v41 = vld [vmem:[%s4256_s4 + $0x78] sm:$0xff]  }
  0x38   :  { %2875 = vmatprep.subr.bf16.mxu0 %v3077_v24  ;;  %v3093_v39 = vld [vmem:[%s4256_s4 + $0xf0] sm:$0xff]   ;;  %v3097_v43 = vld [vmem:[%s4256_s4 + $0xf8] sm:$0xff]   ;;  %v3099_v46 = vld [vmem:[%s4256_s4 + $0x140] sm:$0xff]  }
  0x39   :  { %2854 = vmatpush3.bf16.msra.mxu1 %v3076_v23  ;;  %v3092_v40 = vld [vmem:[%s4256_s4 + $0x30] sm:$0xff]   ;;  %v3096_v44 = vld [vmem:[%s4256_s4 + $0x38] sm:$0xff]   ;;  %v3101_v6 = vld [vmem:[%s4256_s4 + $0x1c0] sm:$0xff]  }
  0x3a   :  { %2855 = vmatprep.subr.bf16.mxu1 %v3079_v26  ;;  %v3094_v42 = vld [vmem:[%s4256_s4 + $0xb0] sm:$0xff]   ;;  %v3098_v45 = vld [vmem:[%s4256_s4 + $0xb8] sm:$0xff]  }
  0x3b   :  { %2876 = vmatpush3.bf16.msra.mxu0 %v3078_v25 }
  0x3c   :  { %2877 = vmatprep.subr.bf16.mxu0 %v3081_v28 }
  0x3d   :  { %2856 = vmatpush3.bf16.msra.mxu1 %v3080_v27 }
  0x3e   :  { %2857 = vmatprep.subr.bf16.mxu1 %v3083_v30 }
  0x3f   :  { %2878 = vmatpush3.bf16.msra.mxu0 %v3082_v29 }
  0x40   :  { %2879 = vmatprep.subr.bf16.mxu0 %v3085_v32 }
  0x41   :  { %2858 = vmatpush3.bf16.msra.mxu1 %v3084_v31 }
  0x42   :  { %2859 = vmatprep.subr.bf16.mxu1 %v3087_v34 }
  0x43   :  { %2880 = vmatpush3.bf16.msra.mxu0 %v3086_v33 }
  0x44   :  { %2881 = vmatprep.subr.bf16.mxu0 %v3089_v36 }
  0x45   :  { %2860 = vmatpush3.bf16.msra.mxu1 %v3088_v35 }
  0x46   :  { %2861 = vmatprep.subr.bf16.mxu1 %v3091_v38 }
  0x47   :  { %2882 = vmatpush3.bf16.msra.mxu0 %v3090_v37 }
  0x48   :  { %2883 = vmatprep.subr.bf16.mxu0 %v3093_v39 }
  0x49   :  { %2862 = vmatpush3.bf16.msra.mxu1 %v3092_v40 }
  0x4a   :  { %2863 = vmatprep.subr.bf16.mxu1 %v3095_v41 }
  0x4b   :  { %2884 = vmatpush3.bf16.msra.mxu0 %v3094_v42 }
  0x4c   :  { %2885 = vmatprep.subr.bf16.mxu0 %v3097_v43 }
  0x4d   :  { %2864 = vmatpush3.bf16.msra.mxu1 %v3096_v44 }
  0x4e   :  { %2893 = vmatprep.subr.bf16.mxu1 %v3099_v46 }
  0x4f   :  { %2886 = vmatpush3.bf16.msra.mxu0 %v3098_v45 }
  0x50   :  { %2915 = vmatprep.subr.bf16.mxu0 %v3101_v6 }
  0xe9   :  { %v3404_v47 = vpop.f32.mrb[0].mxu0 }
  0xea   :  { %v3406_v48 = vpop.f32.mrb[1].mxu0  ;;  %v284_v54 = vmul.f32 %v3404_v47, %v3404_v47 }
  0xeb   :  { %v3408_v49 = vpop.f32.mrb[2].mxu0  ;;  %v282_v51 = vmul.f32 %v3406_v48, %v3406_v48 }
  0xec   :  { %v3410_v50 = vpop.f32.mrb[3].mxu0  ;;  %v285_v57 = vmul.f32 %v3408_v49, %v3408_v49 }
  0xed   :  { %v259_v52 = vadd.f32 %v3410_v50, %v3406_v48  ;;  %v283_v53 = vmul.f32 %v3410_v50, %v3410_v50 }
  0xef   :  { %v260_v55 = vadd.f32 %v3404_v47, %v259_v52  ;;  %v298_v56 = vadd.f32 %v283_v53, %v282_v51 }
  0xf1   :  { %v299_v58 = vadd.f32 %v298_v56, %v284_v54  ;;  %v3423_v59 = vpop.f32.mrb[4].mxu0  ;;  %v261_v60 = vadd.f32 %v3408_v49, %v260_v55 }
  0xf2   :  { %v3426_v61 = vpop.f32.mrb[5].mxu0  ;;  %v288_v7 = vmul.f32 %v3423_v59, %v3423_v59 }
  0xf3   :  { %v262_v62 = vadd.f32 %v261_v60, %v3426_v61  ;;  %v286_v63 = vmul.f32 %v3426_v61, %v3426_v61  ;;  %v300_v0 = vadd.f32 %v299_v58, %v285_v57  ;;  %v3431_v1 = vpop.f32.mrb[6].mxu0 }
  0xf4   :  { %v3433_v2 = vpop.f32.mrb[7].mxu0  ;;  %v289_v10 = vmul.f32 %v3431_v1, %v3431_v1 }
  0xf5   :  { %v301_v3 = vadd.f32 %v300_v0, %v286_v63  ;;  %v263_v4 = vadd.f32 %v262_v62, %v3433_v2  ;;  %v287_v5 = vmul.f32 %v3433_v2, %v3433_v2 }
  0xf7   :  { %v264_v8 = vadd.f32 %v3423_v59, %v263_v4  ;;  %v302_v9 = vadd.f32 %v301_v3, %v287_v5 }
  0xf9   :  { %v303_v11 = vadd.f32 %v302_v9, %v288_v7  ;;  %v3446_v12 = vpop.f32.mrb[8].mxu0  ;;  %v265_v13 = vadd.f32 %v3431_v1, %v264_v8  ;;  %v339_v8 = vlaneseq }
  0xfa   :  { %v3449_v14 = vpop.f32.mrb[9].mxu0  ;;  %v292_v23 = vmul.f32 %v3446_v12, %v3446_v12 }
  0xfb   :  { %v266_v15 = vadd.f32 %v265_v13, %v3449_v14  ;;  %v290_v16 = vmul.f32 %v3449_v14, %v3449_v14  ;;  %v304_v17 = vadd.f32 %v303_v11, %v289_v10  ;;  %v3454_v18 = vpop.f32.mrb[10].mxu0  ;;  %v340_v9 = vshrl.u32 %v339_v8, 7  ;;  %v323_v13 = vld [vmem:[%s4254_s2] sm:$0x1] }
  0xfc   :  { %v3456_v19 = vpop.f32.mrb[11].mxu0  ;;  %v293_v26 = vmul.f32 %v3454_v18, %v3454_v18  ;;  %v3221_v10 = vmov 1983009808  }
  0xfd   :  { %v305_v20 = vadd.f32 %v304_v17, %v290_v16  ;;  %v267_v21 = vadd.f32 %v266_v15, %v3456_v19  ;;  %v291_v22 = vmul.f32 %v3456_v19, %v3456_v19  ;;  %v384_v11 = vunpack.c.l.s4 %v3221_v10 }
  0xfe   :  { %v341_v15 = vsub.s32 0, %v340_v9 }
  0xff   :  { %v268_v24 = vadd.f32 %v3446_v12, %v267_v21  ;;  %v306_v25 = vadd.f32 %v305_v20, %v291_v22  ;;  %v385_v17 = vunpack.c.0.s8 %v384_v11  ;;  %v327_v21 = vld [vmem:[%s4255_s3] sm:$0x1] }
 0x101   :  { %v307_v27 = vadd.f32 %v306_v25, %v292_v23  ;;  %v3466_v28 = vpop.f32.mrb[12].mxu0  ;;  %v269_v29 = vadd.f32 %v3454_v18, %v268_v24  ;;  %v3485_v24 = vsub.s32 %v385_v17, %v340_v9 }
 0x102   :  { %v228_v30 = vpop.f32.mrb[13].mxu0  ;;  %v296_v39 = vmul.f32 %v3466_v28, %v3466_v28 }
 0x103   :  { %v270_v31 = vadd.f32 %v269_v29, %v228_v30  ;;  %v294_v32 = vmul.f32 %v228_v30, %v228_v30  ;;  %v308_v33 = vadd.f32 %v307_v27, %v293_v26  ;;  %v3469_v34 = vpop.f32.mrb[14].mxu0 }
 0x104   :  { %v231_v35 = vpop.f32.mrb[15].mxu0  ;;  %v297_v42 = vmul.f32 %v3469_v34, %v3469_v34 }
 0x105   :  { %v309_v36 = vadd.f32 %v308_v33, %v294_v32  ;;  %v271_v37 = vadd.f32 %v270_v31, %v231_v35  ;;  %v295_v38 = vmul.f32 %v231_v35, %v231_v35 }
 0x107   :  { %v272_v40 = vadd.f32 %v3466_v28, %v271_v37  ;;  %v310_v41 = vadd.f32 %v309_v36, %v295_v38 }
 0x109   :  { %v273_v43 = vadd.f32 %v3469_v34, %v272_v40  ;;  %v311_v44 = vadd.f32 %v310_v41, %v296_v39 }
 0x10b   :  { %v274_v45 = vrot.slane %v273_v43, 4  ;;  %v312_v46 = vadd.f32 %v311_v44, %v297_v42 }
 0x10d   :  { %v275_v51 = vadd.f32 %v274_v45, %v273_v43  ;;  %v313_v52 = vrot.slane %v312_v46, 4 }
 0x10f   :  { %v276_v53 = vrot.slane %v275_v51, 2  ;;  %v314_v54 = vadd.f32 %v313_v52, %v312_v46 }
 0x111   :  { %v277_v55 = vadd.f32 %v276_v53, %v275_v51  ;;  %v315_v56 = vrot.slane %v314_v54, 2 }
 0x113   :  { %v278_v57 = vrot.slane %v277_v55, 1  ;;  %v316_v58 = vadd.f32 %v315_v56, %v314_v54 }
 0x115   :  { %v279_v60 = vadd.f32 %v278_v57, %v277_v55  ;;  %v317_v62 = vrot.slane %v316_v58, 1 }
 0x117   :  { %v281_v63 = vmul.f32 0.0078125, %v279_v60  ;;  %v318_v0 = vadd.f32 %v317_v62, %v316_v58 }
 0x119   :  { %v319_v3 = vmul.f32 0.0078125, %v318_v0  ;;  %v320_v4 = vmul.f32 %v281_v63, %v281_v63 }
 0x11b   :  { %v321_v5 = vsub.f32 %v319_v3, %v320_v4 }
 0x11d   :  { %v322_v6 = vmax.f32 %v321_v5, 0.0 }
 0x11f   :  { %v324_v7 = vadd.f32 0.0001, %v322_v6 }
 0x121   :  { %3195 = vrsqrt.f32 %v324_v7 }
 0x12b   :  { %v3196_v16 = vpop.eup %3195 }
 0x12c   :  { %v326_v20 = vmul.f32 %v3196_v16, %v323_v13 }
 0x12e   :  { %v328_v22 = vmul.f32 %v326_v20, %v281_v63  ;;  %v3483_v23 = vrot.slane %v326_v20, %v341_v15 }
 0x130   :  { %v329_v25 = vsub.f32 %v327_v21, %v328_v22  ;;  %v804_v26 = vmul.f32 %v3483_v23, %v231_v35  ;;  %v344_v27 = vmul.f32 %v3483_v23, %v3406_v48  ;;  %v345_v29 = vmul.f32 %v3483_v23, %v3410_v50 }
 0x131   :  { %v799_v31 = vmul.f32 %v3483_v23, %v3449_v14  ;;  %v800_v32 = vmul.f32 %v3483_v23, %v3456_v19  ;;  %v346_v33 = vmul.f32 %v3404_v47, %v3483_v23  ;;  %v347_v36 = vmul.f32 %v3408_v49, %v3483_v23 }
 0x132   :  { %v3500_v37 = vrot.slane %v329_v25, %v341_v15  ;;  %v801_v48 = vmul.f32 %v3446_v12, %v3483_v23  ;;  %v802_v50 = vmul.f32 %v3454_v18, %v3483_v23  ;;  %v3508_v14 = vmul.f32 %v3483_v23, %v3426_v61 }
 0x133   :  { %v3512_v19 = vmul.f32 %v3483_v23, %v3433_v2  ;;  %v3515_v47 = vmul.f32 %v3483_v23, %v228_v30  ;;  %v3519_v49 = vmul.f32 %v3423_v59, %v3483_v23  ;;  %v3523_v12 = vmul.f32 %v3431_v1, %v3483_v23 }
 0x134   :  { %v812_v18 = vadd.f32 %v804_v26, %v3500_v37  ;;  %v358_v61 = vadd.f32 %v3500_v37, %v344_v27  ;;  %v359_v35 = vadd.f32 %v3500_v37, %v345_v29  ;;  %v807_v2 = vadd.f32 %v799_v31, %v3500_v37 }
 0x135   :  { %v808_v38 = vadd.f32 %v800_v32, %v3500_v37  ;;  %v360_v30 = vadd.f32 %v3500_v37, %v346_v33  ;;  %v361_v39 = vadd.f32 %v3500_v37, %v347_v36  ;;  %v3533_v59 = vadd.f32 %v801_v48, %v3500_v37 }
 0x136   :  { %v820_v40 = vmax.f32 %v812_v18, 0.0  ;;  %v3535_v1 = vmax.f32 %v358_v61, 0.0  ;;  %v3537_v41 = vmax.f32 %v359_v35, 0.0  ;;  %v3539_v42 = vmax.f32 %v807_v2, 0.0 }
 0x137   :  { %v3541_v43 = vmax.f32 %v808_v38, 0.0  ;;  %v3543_v44 = vmax.f32 %v360_v30, 0.0  ;;  %v3545_v45 = vmax.f32 %v361_v39, 0.0  ;;  %v3548_v46 = vadd.f32 %v802_v50, %v3500_v37 }
 0x138   :  { %v916_v51 = vcombine.high %v820_v40, %v820_v40  ;;  %v923_v52 = vrot.slane %v820_v40, %v3485_v24  ;;  %v382_v53 = vcombine.high %v3535_v1, %v3535_v1  ;;  %v389_v54 = vrot.slane %v3535_v1, %v3485_v24 }
 0x139   :  { %v399_v55 = vcombine.high %v3537_v41, %v3537_v41  ;;  %v406_v56 = vrot.slane %v3537_v41, %v3485_v24  ;;  %v831_v57 = vcombine.high %v3539_v42, %v3539_v42  ;;  %v838_v58 = vrot.slane %v3539_v42, %v3485_v24 }
 0x13a   :  { %v930_v60 = vrot.slane %v916_v51, %v3485_v24  ;;  %v931_v62 = vcombine.high %v923_v52, %v923_v52  ;;  %v1139_v63 = vsel %vm550_vm2, %v923_v52, -inf  ;;  %v397_v0 = vcombine.high %v389_v54, %v389_v54 }
 0x13b   :  { %v1140_v3 = vrot.slane %v1139_v63, 4  ;;  %v414_v4 = vcombine.high %v406_v56, %v406_v56  ;;  %v846_v5 = vcombine.high %v838_v58, %v838_v58  ;;  %v848_v6 = vcombine.high %v3541_v43, %v3541_v43 }
 0x13c   :  { %v932_v7 = vcombine.high %v930_v60, %v930_v60  ;;  %v1146_v8 = vsel %vm550_vm2, %v931_v62, -inf  ;;  %v1153_v9 = vsel %vm550_vm2, %v930_v60, -inf  ;;  %v558_v10 = vsel %vm550_vm2, %v397_v0, -inf }
 0x13d   :  { %v1141_v11 = vmax.f32 %v1139_v63, %v1140_v3  ;;  %v1147_v13 = vrot.slane %v1146_v8, 4  ;;  %v1154_v15 = vrot.slane %v1153_v9, 4  ;;  %v559_v16 = vrot.slane %v558_v10, 4 }
 0x13e   :  { %v1160_v17 = vsel %vm550_vm2, %v932_v7, -inf  ;;  %v586_v20 = vsel %vm550_vm2, %v414_v4, -inf  ;;  %v855_v21 = vrot.slane %v3541_v43, %v3485_v24  ;;  %v1006_v22 = vsel %vm550_vm2, %v846_v5, -inf }
 0x13f   :  { %v1142_v25 = vrot.slane %v1141_v11, 2  ;;  %v3575_v26 = vmax.f32 %v1146_v8, %v1147_v13  ;;  %v1155_v27 = vmax.f32 %v1153_v9, %v1154_v15  ;;  %v1161_v29 = vrot.slane %v1160_v17, 4 }
 0x140   :  { %v560_v31 = vmax.f32 %v558_v10, %v559_v16  ;;  %v587_v32 = vrot.slane %v586_v20, 4  ;;  %v863_v33 = vcombine.high %v855_v21, %v855_v21  ;;  %v1007_v36 = vrot.slane %v1006_v22, 4 }
 0x141   :  { %v3577_v48 = vmax.f32 %v1141_v11, %v1142_v25  ;;  %v1149_v50 = vrot.slane %v3575_v26, 2  ;;  %v1156_v18 = vrot.slane %v1155_v27, 2  ;;  %v3580_v61 = vmax.f32 %v1160_v17, %v1161_v29 }
 0x142   :  { %v561_v35 = vrot.slane %v560_v31, 2  ;;  %v588_v2 = vmax.f32 %v586_v20, %v587_v32  ;;  %v1008_v38 = vmax.f32 %v1006_v22, %v1007_v36  ;;  %v1034_v30 = vsel %vm550_vm2, %v863_v33, -inf }
 0x143   :  { %v1144_v39 = vrot.slane %v3577_v48, 1  ;;  %v3584_v40 = vmax.f32 %v1155_v27, %v1156_v18  ;;  %v1035_v51 = vrot.slane %v1034_v30, 4  ;;  %v551_v52 = vsel %vm550_vm2, %v389_v54, -inf }
 0x144   :  { %v562_v60 = vmax.f32 %v560_v31, %v561_v35  ;;  %v589_v62 = vrot.slane %v588_v2, 2  ;;  %v1009_v63 = vrot.slane %v1008_v38, 2  ;;  %v552_v0 = vrot.slane %v551_v52, 4 }
 0x145   :  { %v1036_v3 = vmax.f32 %v1034_v30, %v1035_v51  ;;  %v579_v4 = vsel %vm550_vm2, %v406_v56, -inf  ;;  %v999_v5 = vsel %vm550_vm2, %v838_v58, -inf  ;;  %v1027_v7 = vsel %vm550_vm2, %v855_v21, -inf }
 0x146   :  { %v563_v8 = vrot.slane %v562_v60, 1  ;;  %v590_v9 = vmax.f32 %v588_v2, %v589_v62  ;;  %v1010_v10 = vmax.f32 %v1008_v38, %v1009_v63  ;;  %v553_v11 = vmax.f32 %v551_v52, %v552_v0 }
 0x147   :  { %v1037_v13 = vrot.slane %v1036_v3, 2  ;;  %v580_v15 = vrot.slane %v579_v4, 4  ;;  %v1000_v16 = vrot.slane %v999_v5, 4  ;;  %v1028_v17 = vrot.slane %v1027_v7, 4 }
 0x148   :  { %v564_v54 = vmax.f32 %v562_v60, %v563_v8  ;;  %v591_v20 = vrot.slane %v590_v9, 1  ;;  %v1011_v22 = vrot.slane %v1010_v10, 1  ;;  %v554_v25 = vrot.slane %v553_v11, 2 }
 0x149   :  { %v1038_v27 = vmax.f32 %v1036_v3, %v1037_v13  ;;  %v581_v29 = vmax.f32 %v579_v4, %v580_v15  ;;  %v1001_v31 = vmax.f32 %v999_v5, %v1000_v16  ;;  %v1029_v56 = vmax.f32 %v1027_v7, %v1028_v17 }
 0x14a   :  { %v592_v32 = vmax.f32 %v590_v9, %v591_v20  ;;  %v1012_v58 = vmax.f32 %v1010_v10, %v1011_v22  ;;  %v555_v21 = vmax.f32 %v553_v11, %v554_v25  ;;  %v396_v33 = vrot.slane %v382_v53, %v3485_v24 }
 0x14b   :  { %v1039_v36 = vrot.slane %v1038_v27, 1  ;;  %v582_v18 = vrot.slane %v581_v29, 2  ;;  %v1002_v35 = vrot.slane %v1001_v31, 2  ;;  %v1030_v2 = vrot.slane %v1029_v56, 2 }
 0x14c   :  { %v776_v38 = vmax.f32 %v564_v54, %v592_v32  ;;  %v556_v30 = vrot.slane %v555_v21, 1  ;;  %v398_v51 = vcombine.high %v396_v33, %v396_v33  ;;  %v413_v52 = vrot.slane %v399_v55, %v3485_v24 }
 0x14d   :  { %v1040_v60 = vmax.f32 %v1038_v27, %v1039_v36  ;;  %v583_v62 = vmax.f32 %v581_v29, %v582_v18  ;;  %v1003_v63 = vmax.f32 %v1001_v31, %v1002_v35  ;;  %v1031_v0 = vmax.f32 %v1029_v56, %v1030_v2 }
 0x14e   :  { %v557_v3 = vmax.f32 %v555_v21, %v556_v30  ;;  %v415_v4 = vcombine.high %v413_v52, %v413_v52  ;;  %v3599_v1 = vsel %vm550_vm2, %v396_v33, -inf  ;;  %v572_v53 = vsel %vm550_vm2, %v398_v51, -inf  ;;  %v3100_v30 = vld [vmem:[%s4256_s4 + $0x100] sm:$0xff]  }
 0x14f   :  { %v1224_v5 = vmax.f32 %v1012_v58, %v1040_v60  ;;  %v584_v7 = vrot.slane %v583_v62, 1  ;;  %v1004_v8 = vrot.slane %v1003_v63, 1  ;;  %v1032_v9 = vrot.slane %v1031_v0, 1 }
 0x150   :  { %v566_v10 = vrot.slane %v3599_v1, 4  ;;  %v573_v11 = vrot.slane %v572_v53, 4  ;;  %v3604_v41 = vsel %vm550_vm2, %v413_v52, -inf  ;;  %v600_v55 = vsel %vm550_vm2, %v415_v4, -inf  ;;  %v3103_v4 = vld [vmem:[%s4256_s4 + $0x148] sm:$0xff]  }
 0x151   :  { %v1256_v13 = vrot.slane %v1224_v5, 7  ;;  %v585_v15 = vmax.f32 %v583_v62, %v584_v7  ;;  %v1005_v16 = vmax.f32 %v1003_v63, %v1004_v8  ;;  %v1033_v17 = vmax.f32 %v1031_v0, %v1032_v9 }
 0x152   :  { %v574_v54 = vmax.f32 %v572_v53, %v573_v11  ;;  %v594_v20 = vrot.slane %v3604_v41, 4  ;;  %v601_v22 = vrot.slane %v600_v55, 4  ;;  %v845_v25 = vrot.slane %v831_v57, %v3485_v24 }
 0x153   :  { %v1289_v27 = vsel %vm1287_vm3, %v776_v38, %v1256_v13  ;;  %v775_v29 = vmax.f32 %v557_v3, %v585_v15  ;;  %v1223_v31 = vmax.f32 %v1005_v16, %v1033_v17  ;;  %v862_v56 = vrot.slane %v848_v6, %v3485_v24 }
 0x154   :  { %v1305_v32 = vpack.c.bf16 %v1289_v27, %v1289_v27  ;;  %v575_v58 = vrot.slane %v574_v54, 2  ;;  %v602_v21 = vmax.f32 %v600_v55, %v601_v22  ;;  %v847_v33 = vcombine.high %v845_v25, %v845_v25 }
 0x155   :  { %v1255_v36 = vrot.slane %v1223_v31, 7  ;;  %v864_v18 = vcombine.high %v862_v56, %v862_v56  ;;  %v3618_v35 = vsel %vm550_vm2, %v845_v25, -inf  ;;  %v3621_v42 = vsel %vm550_vm2, %v862_v56, -inf }
 0x156   :  { %2383 = vmatprep.mubr.bf16.mxu1 %v1305_v32  ;;  %v576_v57 = vmax.f32 %v574_v54, %v575_v58  ;;  %v603_v2 = vrot.slane %v602_v21, 2  ;;  %v1014_v38 = vrot.slane %v3618_v35, 4  ;;  %v1020_v43 = vsel %vm550_vm2, %v847_v33, -inf  ;;  %v3104_v54 = vld [vmem:[%s4256_s4 + $0x108] sm:$0xff]  }
 0x157   :  { %v1288_v6 = vsel %vm1287_vm3, %v775_v29, %v1255_v36  ;;  %v1021_v51 = vrot.slane %v1020_v43, 4  ;;  %v1042_v52 = vrot.slane %v3621_v42, 4  ;;  %v1048_v60 = vsel %vm550_vm2, %v864_v18, -inf  ;;  %v3107_v29 = vld [vmem:[%s4256_s4 + $0x150] sm:$0xff]  }
 0x158   :  { %v1304_v62 = vpack.c.bf16 %v1288_v6, %v1288_v6  ;;  %v577_v63 = vrot.slane %v576_v57, 1  ;;  %v604_v0 = vmax.f32 %v602_v21, %v603_v2  ;;  %v1049_v3 = vrot.slane %v1048_v60, 4 }
 0x159   :  { %v1022_v53 = vmax.f32 %v1020_v43, %v1021_v51  ;;  %v3636_v5 = vrot.slane %v3543_v44, %v3485_v24  ;;  %v3640_v7 = vrot.slane %v3545_v45, %v3485_v24  ;;  %v3643_v8 = vmax.f32 %v3533_v59, 0.0  ;;  %v3108_v43 = vld [vmem:[%s4256_s4 + $0x110] sm:$0xff]  }
 0x15a   :  { %2384 = vmatmul.mubr.bf16.vlgmr.msra.gmra.mrb[0].mxu1 %v1304_v62  ;;  %v3645_v9 = vmax.f32 %v576_v57, %v577_v63  ;;  %v605_v11 = vrot.slane %v604_v0, 1  ;;  %v1050_v55 = vmax.f32 %v1048_v60, %v1049_v3  ;;  %v3648_v13 = vmax.f32 %v3548_v46, 0.0  ;;  %v3111_v62 = vld [vmem:[%s4256_s4 + $0x158] sm:$0xff]  }
 0x15b   :  { %2894 = vmatpush3.bf16.msra.mxu1 %v3100_v30  ;;  %v1023_v15 = vrot.slane %v1022_v53, 2  ;;  %v431_v16 = vcombine.high %v3636_v5, %v3636_v5  ;;  %v448_v17 = vcombine.high %v3640_v7, %v3640_v7  ;;  %v3656_v59 = vrot.slane %v3643_v8, %v3485_v24 }
 0x15c   :  { %v606_v22 = vmax.f32 %v604_v0, %v605_v11  ;;  %v1051_v25 = vrot.slane %v1050_v55, 2  ;;  %v3663_v46 = vrot.slane %v3648_v13, %v3485_v24  ;;  %v567_v27 = vmax.f32 %v3599_v1, %v566_v10  ;;  %2895 = vmatprep.subr.bf16.mxu1 %v3103_v4 }
 0x15d   :  { %v1024_v31 = vmax.f32 %v1022_v53, %v1023_v15  ;;  %v614_v56 = vsel %vm550_vm2, %v431_v16, -inf  ;;  %v642_v32 = vsel %vm550_vm2, %v448_v17, -inf  ;;  %v880_v58 = vcombine.high %v3656_v59, %v3656_v59 }
 0x15e   :  { %v778_v21 = vmax.f32 %v3645_v9, %v606_v22  ;;  %v1052_v33 = vmax.f32 %v1050_v55, %v1051_v25  ;;  %v615_v36 = vrot.slane %v614_v56, 4  ;;  %v643_v18 = vrot.slane %v642_v32, 4  ;;  %v3112_v22 = vld [vmem:[%s4256_s4 + $0x118] sm:$0xff]  }
 0x15f   :  { %v1025_v57 = vrot.slane %v1024_v31, 1  ;;  %v897_v1 = vcombine.high %v3663_v46, %v3663_v46  ;;  %v1062_v10 = vsel %vm550_vm2, %v880_v58, -inf  ;;  %v568_v2 = vrot.slane %v567_v27, 2  ;;  %2896 = vmatpush3.bf16.msra.mxu1 %v3104_v54 }
 0x160   :  { %v1053_v6 = vrot.slane %v1052_v33, 1  ;;  %v616_v30 = vmax.f32 %v614_v56, %v615_v36  ;;  %v644_v51 = vmax.f32 %v642_v32, %v643_v18  ;;  %v1063_v60 = vrot.slane %v1062_v10, 4  ;;  %2897 = vmatprep.subr.bf16.mxu1 %v3107_v29 }
 0x161   :  { %v1026_v63 = vmax.f32 %v1024_v31, %v1025_v57  ;;  %v1090_v0 = vsel %vm550_vm2, %v897_v1, -inf  ;;  %v569_v3 = vmax.f32 %v567_v27, %v568_v2  ;;  %v595_v4 = vmax.f32 %v3604_v41, %v594_v20  ;;  %v3115_v20 = vld [vmem:[%s4256_s4 + $0x160] sm:$0xff]  }
 0x162   :  { %v1054_v53 = vmax.f32 %v1052_v33, %v1053_v6  ;;  %v617_v9 = vrot.slane %v616_v30, 2  ;;  %v645_v11 = vrot.slane %v644_v51, 2  ;;  %v1064_v55 = vmax.f32 %v1062_v10, %v1063_v60  ;;  %v3116_v2 = vld [vmem:[%s4256_s4 + $0x120] sm:$0xff]   ;;  %v3119_v60 = vld [vmem:[%s4256_s4 + $0x168] sm:$0xff]  }
 0x163   :  { %v1091_v15 = vrot.slane %v1090_v0, 4  ;;  %v570_v16 = vrot.slane %v569_v3, 1  ;;  %v596_v17 = vrot.slane %v595_v4, 2  ;;  %v1015_v54 = vmax.f32 %v3618_v35, %v1014_v38  ;;  %2898 = vmatpush3.bf16.msra.mxu1 %v3108_v43 }
 0x164   :  { %v1226_v25 = vmax.f32 %v1026_v63, %v1054_v53  ;;  %v618_v27 = vmax.f32 %v616_v30, %v617_v9  ;;  %v646_v29 = vmax.f32 %v644_v51, %v645_v11  ;;  %v1065_v41 = vrot.slane %v1064_v55, 2  ;;  %2899 = vmatprep.subr.bf16.mxu1 %v3111_v62 }
 0x165   :  { %v1092_v31 = vmax.f32 %v1090_v0, %v1091_v15  ;;  %v3696_v56 = vmax.f32 %v569_v3, %v570_v16  ;;  %v597_v32 = vmax.f32 %v595_v4, %v596_v17  ;;  %v1016_v58 = vrot.slane %v1015_v54, 2  ;;  %v3120_v15 = vld [vmem:[%s4256_s4 + $0x128] sm:$0xff]  }
 0x166   :  { %v1258_v35 = vrot.slane %v1226_v25, 7  ;;  %v619_v38 = vrot.slane %v618_v27, 1  ;;  %v647_v33 = vrot.slane %v646_v29, 1  ;;  %v1066_v36 = vmax.f32 %v1064_v55, %v1065_v41 }
 0x167   :  { %v1093_v18 = vrot.slane %v1092_v31, 2  ;;  %v598_v57 = vrot.slane %v597_v32, 1  ;;  %v1017_v1 = vmax.f32 %v1015_v54, %v1016_v58  ;;  %v1043_v10 = vmax.f32 %v3621_v42, %v1042_v52  ;;  %2900 = vmatpush3.bf16.msra.mxu1 %v3112_v22 }
 0x168   :  { %v1291_v43 = vsel %vm1287_vm3, %v778_v21, %v1258_v35  ;;  %v620_v6 = vmax.f32 %v618_v27, %v619_v38  ;;  %v648_v30 = vmax.f32 %v646_v29, %v647_v33  ;;  %v1067_v51 = vrot.slane %v1066_v36, 1  ;;  %2901 = vmatprep.subr.bf16.mxu1 %v3115_v20 }
 0x169   :  { %v1307_v62 = vpack.c.bf16 %v1291_v43, %v1291_v43  ;;  %v1094_v63 = vmax.f32 %v1092_v31, %v1093_v18  ;;  %v3708_v0 = vmax.f32 %v597_v32, %v598_v57  ;;  %v1018_v42 = vrot.slane %v1017_v1, 1 }
 0x16a   :  { %v780_v52 = vmax.f32 %v620_v6, %v648_v30  ;;  %v1068_v3 = vmax.f32 %v1066_v36, %v1067_v51  ;;  %v1044_v4 = vrot.slane %v1043_v10, 2  ;;  %v416_v53 = vcombine.high %v3543_v44, %v3543_v44  ;;  %v3127_v36 = vld [vmem:[%s4256_s4 + $0x178] sm:$0xff]  }
 0x16b   :  { %2423 = vmatprep.mubr.bf16.mxu0 %v1307_v62  ;;  %v1095_v21 = vrot.slane %v1094_v63, 1  ;;  %v777_v9 = vmax.f32 %v3696_v56, %v3708_v0  ;;  %v1019_v11 = vmax.f32 %v1017_v1, %v1018_v42  ;;  %v433_v55 = vcombine.high %v3545_v45, %v3545_v45  ;;  %2902 = vmatpush3.bf16.msra.mxu1 %v3116_v2  ;;  %v3123_v45 = vld [vmem:[%s4256_s4 + $0x170] sm:$0xff]   ;;  %v3128_v0 = vld [vmem:[%s4256_s4 + $0x138] sm:$0xff]  }
 0x16c   :  { %v1045_v16 = vmax.f32 %v1043_v10, %v1044_v4  ;;  %v3720_v17 = vrot.slane %v416_v53, %v3485_v24  ;;  %v865_v44 = vcombine.high %v3643_v8, %v3643_v8  ;;  %v882_v54 = vcombine.high %v3648_v13, %v3648_v13  ;;  %2903 = vmatprep.subr.bf16.mxu1 %v3119_v60 }
 0x16d   :  { %v1096_v22 = vmax.f32 %v1094_v63, %v1095_v21  ;;  %v3730_v25 = vrot.slane %v433_v55, %v3485_v24  ;;  %v607_v27 = vsel %vm550_vm2, %v3636_v5, -inf  ;;  %v635_v29 = vsel %vm550_vm2, %v3640_v7, -inf  ;;  %v3124_v5 = vld [vmem:[%s4256_s4 + $0x130] sm:$0xff]   ;;  %v3131_v21 = vld [vmem:[%s4256_s4 + $0x240] sm:$0xff]  }
 0x16e   :  { %v1046_v41 = vrot.slane %v1045_v16, 1  ;;  %v432_v8 = vcombine.high %v3720_v17, %v3720_v17  ;;  %v3739_v13 = vrot.slane %v865_v44, %v3485_v24  ;;  %v3742_v20 = vrot.slane %v882_v54, %v3485_v24  ;;  %v3102_v44 = vld [vmem:[%s4256_s4 + $0x180] sm:$0xff]  }
 0x16f   :  { %v1228_v31 = vmax.f32 %v1068_v3, %v1096_v22  ;;  %v449_v56 = vcombine.high %v3730_v25, %v3730_v25  ;;  %2904 = vmatpush3.bf16.msra.mxu1 %v3120_v15  ;;  %v608_v7 = vrot.slane %v607_v27, 4  ;;  %v636_v32 = vrot.slane %v635_v29, 4 }
 0x170   :  { %v1047_v58 = vmax.f32 %v1045_v16, %v1046_v41  ;;  %v628_v35 = vsel %vm550_vm2, %v432_v8, -inf  ;;  %v881_v38 = vcombine.high %v3739_v13, %v3739_v13  ;;  %v898_v33 = vcombine.high %v3742_v20, %v3742_v20  ;;  %2905 = vmatprep.subr.bf16.mxu1 %v3123_v45 }
 0x171   :  { %v1260_v18 = vrot.slane %v1228_v31, 7  ;;  %v629_v57 = vrot.slane %v628_v35, 4  ;;  %v656_v1 = vsel %vm550_vm2, %v449_v56, -inf  ;;  %v609_v10 = vmax.f32 %v607_v27, %v608_v7 }
 0x172   :  { %v1225_v2 = vmax.f32 %v1019_v11, %v1047_v58  ;;  %v657_v43 = vrot.slane %v656_v1, 4  ;;  %v1076_v6 = vsel %vm550_vm2, %v881_v38, -inf  ;;  %v1104_v30 = vsel %vm550_vm2, %v898_v33, -inf  ;;  %v3106_v33 = vld [vmem:[%s4256_s4 + $0x188] sm:$0xff]  }
 0x173   :  { %v1293_v51 = vsel %vm1287_vm3, %v780_v52, %v1260_v18  ;;  %v630_v60 = vmax.f32 %v628_v35, %v629_v57  ;;  %v1077_v62 = vrot.slane %v1076_v6, 4  ;;  %v1105_v63 = vrot.slane %v1104_v30, 4  ;;  %2906 = vmatpush3.bf16.msra.mxu1 %v3124_v5 }
 0x174   :  { %v1309_v42 = vpack.c.bf16 %v1293_v51, %v1293_v51  ;;  %v1257_v3 = vrot.slane %v1225_v2, 7  ;;  %v658_v4 = vmax.f32 %v656_v1, %v657_v43  ;;  %2907 = vmatprep.subr.bf16.mxu1 %v3127_v36  ;;  %v610_v53 = vrot.slane %v609_v10, 2  ;;  %v3109_v43 = vld [vmem:[%s4256_s4 + $0x1d0] sm:$0xff]  }
 0x175   :  { %v631_v11 = vrot.slane %v630_v60, 2  ;;  %v1078_v55 = vmax.f32 %v1076_v6, %v1077_v62  ;;  %v1106_v52 = vmax.f32 %v1104_v30, %v1105_v63  ;;  %v637_v15 = vmax.f32 %v635_v29, %v636_v32  ;;  %v3105_v29 = vld [vmem:[%s4256_s4 + $0x1c8] sm:$0xff]  }
 0x176   :  { %2463 = vmatprep.mubr.bf16.mxu1 %v1309_v42  ;;  %v1290_v16 = vsel %vm1287_vm3, %v777_v9, %v1257_v3  ;;  %v659_v54 = vrot.slane %v658_v4, 2  ;;  %v611_v45 = vmax.f32 %v609_v10, %v610_v53  ;;  %v1055_v22 = vsel %vm550_vm2, %v3656_v59, -inf }
 0x177   :  { %v1306_v27 = vpack.c.bf16 %v1290_v16, %v1290_v16  ;;  %v632_v41 = vmax.f32 %v630_v60, %v631_v11  ;;  %v1079_v8 = vrot.slane %v1078_v55, 2  ;;  %v1107_v31 = vrot.slane %v1106_v52, 2  ;;  %2908 = vmatpush3.bf16.msra.mxu1 %v3128_v0 }
 0x178   :  { %v660_v56 = vmax.f32 %v658_v4, %v659_v54  ;;  %v612_v9 = vrot.slane %v611_v45, 1  ;;  %v638_v5 = vrot.slane %v637_v15, 2  ;;  %v1056_v7 = vrot.slane %v1055_v22, 4  ;;  %2937 = vmatprep.subr.bf16.mxu1 %v3131_v21  ;;  %v3110_v4 = vld [vmem:[%s4256_s4 + $0x190] sm:$0xff]  }
 0x179   :  { %2424 = vmatmul.mubr.bf16.vlgmr.msra.gmra.mrb[16].mxu0 %v1306_v27  ;;  %v633_v32 = vrot.slane %v632_v41, 1  ;;  %v1080_v58 = vmax.f32 %v1078_v55, %v1079_v8  ;;  %v1108_v35 = vmax.f32 %v1106_v52, %v1107_v31  ;;  %v1083_v59 = vsel %vm550_vm2, %v3663_v46, -inf }
 0x17a   :  { %2916 = vmatpush3.bf16.msra.mxu0 %v3102_v44  ;;  %v661_v38 = vrot.slane %v660_v56, 1  ;;  %v3781_v36 = vmax.f32 %v611_v45, %v612_v9  ;;  %v639_v18 = vmax.f32 %v637_v15, %v638_v5  ;;  %v1057_v57 = vmax.f32 %v1055_v22, %v1056_v7  ;;  %v3117_v9 = vld [vmem:[%s4256_s4 + $0x1e0] sm:$0xff]  }
 0x17b   :  { %v634_v1 = vmax.f32 %v632_v41, %v633_v32  ;;  %v1081_v10 = vrot.slane %v1080_v58, 1  ;;  %v1109_v2 = vrot.slane %v1108_v35, 1  ;;  %2917 = vmatprep.subr.bf16.mxu0 %v3105_v29  ;;  %v1084_v6 = vrot.slane %v1083_v59, 4 }
 0x17c   :  { %v662_v46 = vmax.f32 %v660_v56, %v661_v38  ;;  %v640_v30 = vrot.slane %v639_v18, 1  ;;  %v1058_v51 = vrot.slane %v1057_v57, 2  ;;  %v362_v60 = vadd.f32 %v3500_v37, %v3508_v14  ;;  %v3113_v14 = vld [vmem:[%s4256_s4 + $0x1d8] sm:$0xff]  }
 0x17d   :  { %v1082_v62 = vmax.f32 %v1080_v58, %v1081_v10  ;;  %v1110_v63 = vmax.f32 %v1108_v35, %v1109_v2  ;;  %v1085_v0 = vmax.f32 %v1083_v59, %v1084_v6  ;;  %v363_v42 = vadd.f32 %v3500_v37, %v3512_v19  ;;  %v3121_v6 = vld [vmem:[%s4256_s4 + $0x1e8] sm:$0xff]  }
 0x17e   :  { %v782_v3 = vmax.f32 %v634_v1, %v662_v46  ;;  %2918 = vmatpush3.bf16.msra.mxu0 %v3106_v33  ;;  %v3793_v53 = vmax.f32 %v639_v18, %v640_v30  ;;  %v1059_v21 = vmax.f32 %v1057_v57, %v1058_v51  ;;  %v3795_v11 = vmax.f32 %v362_v60, 0.0  ;;  %v3118_v57 = vld [vmem:[%s4256_s4 + $0x1a0] sm:$0xff]  }
 0x17f   :  { %v1230_v55 = vmax.f32 %v1082_v62, %v1110_v63  ;;  %2919 = vmatprep.subr.bf16.mxu0 %v3109_v43  ;;  %v1086_v52 = vrot.slane %v1085_v0, 2  ;;  %v3800_v15 = vmax.f32 %v363_v42, 0.0  ;;  %v811_v19 = vadd.f32 %v3515_v47, %v3500_v37  ;;  %v3114_v47 = vld [vmem:[%s4256_s4 + $0x198] sm:$0xff]  }
 0x180   :  { %v779_v16 = vmax.f32 %v3781_v36, %v3793_v53  ;;  %v1060_v44 = vrot.slane %v1059_v21, 1  ;;  %v3808_v54 = vrot.slane %v3795_v11, %v3485_v24  ;;  %v1150_v45 = vmax.f32 %v3575_v26, %v1149_v50  ;;  %v3122_v53 = vld [vmem:[%s4256_s4 + $0x1a8] sm:$0xff]  }
 0x181   :  { %v1262_v22 = vrot.slane %v1230_v55, 7  ;;  %v1087_v27 = vmax.f32 %v1085_v0, %v1086_v52  ;;  %v3815_v41 = vrot.slane %v3800_v15, %v3485_v24  ;;  %v3817_v8 = vmax.f32 %v811_v19, 0.0  ;;  %v3125_v19 = vld [vmem:[%s4256_s4 + $0x1f0] sm:$0xff]  }
 0x182   :  { %2920 = vmatpush3.bf16.msra.mxu0 %v3110_v4  ;;  %v1061_v31 = vmax.f32 %v1059_v21, %v1060_v44  ;;  %v465_v29 = vcombine.high %v3808_v54, %v3808_v54  ;;  %v1151_v56 = vrot.slane %v1150_v45, 1  ;;  %v621_v26 = vsel %vm550_vm2, %v3720_v17, -inf }
 0x183   :  { %v1295_v50 = vsel %vm1287_vm3, %v782_v3, %v1262_v22  ;;  %2921 = vmatprep.subr.bf16.mxu0 %v3113_v14  ;;  %v1088_v5 = vrot.slane %v1087_v27, 1  ;;  %v482_v7 = vcombine.high %v3815_v41, %v3815_v41  ;;  %v3834_v32 = vrot.slane %v3817_v8, %v3485_v24 }
 0x184   :  { %v1311_v58 = vpack.c.bf16 %v1295_v50, %v1295_v50  ;;  %v670_v35 = vsel %vm550_vm2, %v465_v29, -inf  ;;  %v3837_v59 = vmax.f32 %v1150_v45, %v1151_v56  ;;  %v622_v17 = vrot.slane %v621_v26, 4 }
 0x185   :  { %v1089_v38 = vmax.f32 %v1087_v27, %v1088_v5  ;;  %v671_v33 = vrot.slane %v670_v35, 4  ;;  %v698_v36 = vsel %vm550_vm2, %v482_v7, -inf  ;;  %v914_v18 = vcombine.high %v3834_v32, %v3834_v32 }
 0x186   :  { %2503 = vmatprep.mubr.bf16.mxu0 %v1311_v58  ;;  %2922 = vmatpush3.bf16.msra.mxu0 %v3114_v47  ;;  %v699_v1 = vrot.slane %v698_v36, 4  ;;  %v623_v10 = vmax.f32 %v621_v26, %v622_v17  ;;  %v649_v2 = vsel %vm550_vm2, %v3730_v25, -inf  ;;  %v1069_v43 = vsel %vm550_vm2, %v3739_v13, -inf  ;;  %v3135_v26 = vld [vmem:[%s4256_s4 + $0x248] sm:$0xff]  }
 0x187   :  { %2923 = vmatprep.subr.bf16.mxu0 %v3117_v9  ;;  %v1227_v46 = vmax.f32 %v1061_v31, %v1089_v38  ;;  %v672_v30 = vmax.f32 %v670_v35, %v671_v33  ;;  %v1118_v51 = vsel %vm550_vm2, %v914_v18, -inf  ;;  %v650_v60 = vrot.slane %v649_v2, 4  ;;  %v3129_v33 = vld [vmem:[%s4256_s4 + $0x1f8] sm:$0xff]  }
 0x188   :  { %v700_v62 = vmax.f32 %v698_v36, %v699_v1  ;;  %v1119_v63 = vrot.slane %v1118_v51, 4  ;;  %v624_v0 = vrot.slane %v623_v10, 2  ;;  %v1070_v42 = vrot.slane %v1069_v43, 4 }
 0x189   :  { %v1259_v3 = vrot.slane %v1227_v46, 7  ;;  %v673_v4 = vrot.slane %v672_v30, 2  ;;  %v651_v25 = vmax.f32 %v649_v2, %v650_v60  ;;  %v1097_v13 = vsel %vm550_vm2, %v3742_v20, -inf  ;;  %v3132_v20 = vld [vmem:[%s4256_s4 + $0x200] sm:$0xff]   ;;  %v3139_v46 = vld [vmem:[%s4256_s4 + $0x250] sm:$0xff]  }
 0x18a   :  { %2924 = vmatpush3.bf16.msra.mxu0 %v3118_v57  ;;  %v701_v21 = vrot.slane %v700_v62, 2  ;;  %v1120_v55 = vmax.f32 %v1118_v51, %v1119_v63  ;;  %v625_v14 = vmax.f32 %v623_v10, %v624_v0  ;;  %v1071_v52 = vmax.f32 %v1069_v43, %v1070_v42  ;;  %v3136_v10 = vld [vmem:[%s4256_s4 + $0x208] sm:$0xff]   ;;  %v3130_v63 = vld [vmem:[%s4256_s4 + $0x1b8] sm:$0xff]  }
 0x18b   :  { %2925 = vmatprep.subr.bf16.mxu0 %v3121_v6  ;;  %v1292_v44 = vsel %vm1287_vm3, %v779_v16, %v1259_v3  ;;  %v674_v45 = vmax.f32 %v672_v30, %v673_v4  ;;  %v652_v22 = vrot.slane %v651_v25, 2  ;;  %v1098_v27 = vrot.slane %v1097_v13, 4  ;;  %v3126_v16 = vld [vmem:[%s4256_s4 + $0x1b0] sm:$0xff]  }
 0x18c   :  { %v1308_v47 = vpack.c.bf16 %v1292_v44, %v1292_v44  ;;  %v702_v31 = vmax.f32 %v700_v62, %v701_v21  ;;  %v1121_v29 = vrot.slane %v1120_v55, 2  ;;  %v626_v56 = vrot.slane %v625_v14, 1  ;;  %v3140_v21 = vld [vmem:[%s4256_s4 + $0x210] sm:$0xff]   ;;  %v3143_v44 = vld [vmem:[%s4256_s4 + $0x258] sm:$0xff]  }
 0x18d   :  { %v675_v50 = vrot.slane %v674_v45, 1  ;;  %v653_v9 = vmax.f32 %v651_v25, %v652_v22  ;;  %v1072_v5 = vrot.slane %v1071_v52, 2  ;;  %v1099_v7 = vmax.f32 %v1097_v13, %v1098_v27 }
 0x18e   :  { %2926 = vmatpush3.bf16.msra.mxu0 %v3122_v53  ;;  %2464 = vmatmul.mubr.bf16.vlgmr.msra.gmra.mrb[4].mxu1 %v1308_v47  ;;  %v703_v58 = vrot.slane %v702_v31, 1  ;;  %v1122_v35 = vmax.f32 %v1120_v55, %v1121_v29  ;;  %v3871_v17 = vmax.f32 %v625_v14, %v626_v56  ;;  %v450_v38 = vcombine.high %v3795_v11, %v3795_v11 }
 0x18f   :  { %2927 = vmatprep.subr.bf16.mxu0 %v3125_v19  ;;  %2938 = vmatpush3.bf16.msra.mxu1 %v3132_v20  ;;  %v676_v36 = vmax.f32 %v674_v45, %v675_v50  ;;  %v654_v18 = vrot.slane %v653_v9, 1  ;;  %v1073_v57 = vmax.f32 %v1071_v52, %v1072_v5  ;;  %v1100_v1 = vrot.slane %v1099_v7, 2  ;;  %v3144_v5 = vld [vmem:[%s4256_s4 + $0x218] sm:$0xff]  }
 0x190   :  { %v704_v2 = vmax.f32 %v702_v31, %v703_v58  ;;  %v1123_v43 = vrot.slane %v1122_v35, 1  ;;  %v3882_v6 = vrot.slane %v450_v38, %v3485_v24  ;;  %v467_v11 = vcombine.high %v3800_v15, %v3800_v15  ;;  %2939 = vmatprep.subr.bf16.mxu1 %v3135_v26 }
 0x191   :  { %v655_v30 = vmax.f32 %v653_v9, %v654_v18  ;;  %v1074_v51 = vrot.slane %v1073_v57, 1  ;;  %v1101_v60 = vmax.f32 %v1099_v7, %v1100_v1  ;;  %v899_v62 = vcombine.high %v3817_v8, %v3817_v8  ;;  %v3133_v8 = vld [vmem:[%s4256_s4 + $0x2c0] sm:$0xff]  }
 0x192   :  { %2928 = vmatpush3.bf16.msra.mxu0 %v3126_v16  ;;  %v784_v0 = vmax.f32 %v676_v36, %v704_v2  ;;  %v1124_v42 = vmax.f32 %v1122_v35, %v1123_v43  ;;  %v466_v15 = vcombine.high %v3882_v6, %v3882_v6  ;;  %v3897_v3 = vrot.slane %v467_v11, %v3485_v24  ;;  %v3134_v2 = vld [vmem:[%s4256_s4 + $0x280] sm:$0xff]  }
 0x193   :  { %2929 = vmatprep.subr.bf16.mxu0 %v3129_v33  ;;  %v781_v4 = vmax.f32 %v3871_v17, %v655_v30  ;;  %v1075_v25 = vmax.f32 %v1073_v57, %v1074_v51  ;;  %v1102_v13 = vrot.slane %v1101_v60, 1  ;;  %v3904_v53 = vrot.slane %v899_v62, %v3485_v24  ;;  %2940 = vmatpush3.bf16.msra.mxu1 %v3136_v10  ;;  %v3151_v62 = vld [vmem:[%s4256_s4 + $0x268] sm:$0xff]  }
 0x194   :  { %v1232_v55 = vmax.f32 %v1124_v42, %v3837_v59  ;;  %v483_v14 = vcombine.high %v3897_v3, %v3897_v3  ;;  %v684_v52 = vsel %vm550_vm2, %v466_v15, -inf  ;;  %v1163_v19 = vrot.slane %v3580_v61, 2  ;;  %2941 = vmatprep.subr.bf16.mxu1 %v3139_v46  ;;  %v3148_v46 = vld [vmem:[%s4256_s4 + $0x220] sm:$0xff]  }
 0x195   :  { %v1103_v20 = vmax.f32 %v1101_v60, %v1102_v13  ;;  %v685_v45 = vrot.slane %v684_v52, 4  ;;  %v915_v22 = vcombine.high %v3904_v53, %v3904_v53  ;;  %v663_v59 = vsel %vm550_vm2, %v3808_v54, -inf }
 0x196   :  { %2930 = vmatpush3.bf16.msra.mxu0 %v3130_v63  ;;  %v1264_v27 = vrot.slane %v1232_v55, 7  ;;  %v712_v47 = vsel %vm550_vm2, %v483_v14, -inf  ;;  %v1164_v31 = vmax.f32 %v3580_v61, %v1163_v19  ;;  %v664_v29 = vrot.slane %v663_v59, 4  ;;  %v3147_v61 = vld [vmem:[%s4256_s4 + $0x260] sm:$0xff]   ;;  %v3152_v19 = vld [vmem:[%s4256_s4 + $0x228] sm:$0xff]  }
 0x197   :  { %v1229_v56 = vmax.f32 %v1075_v25, %v1103_v20  ;;  %2959 = vmatprep.subr.bf16.mxu0 %v3133_v8  ;;  %v686_v26 = vmax.f32 %v684_v52, %v685_v45  ;;  %v713_v50 = vrot.slane %v712_v47, 4  ;;  %v1132_v9 = vsel %vm550_vm2, %v915_v22, -inf  ;;  %2942 = vmatpush3.bf16.msra.mxu1 %v3140_v21 }
 0x198   :  { %v1297_v54 = vsel %vm1287_vm3, %v784_v0, %v1264_v27  ;;  %v1133_v7 = vrot.slane %v1132_v9, 4  ;;  %v1165_v16 = vrot.slane %v1164_v31, 1  ;;  %2943 = vmatprep.subr.bf16.mxu1 %v3143_v44  ;;  %v665_v58 = vmax.f32 %v663_v59, %v664_v29 }
 0x199   :  { %v1313_v35 = vpack.c.bf16 %v1297_v54, %v1297_v54  ;;  %v1261_v17 = vrot.slane %v1229_v56, 7  ;;  %v687_v38 = vrot.slane %v686_v26, 2  ;;  %v714_v33 = vmax.f32 %v712_v47, %v713_v50 }
 0x19a   :  { %v1134_v36 = vmax.f32 %v1132_v9, %v1133_v7  ;;  %v3931_v18 = vmax.f32 %v1164_v31, %v1165_v16  ;;  %v666_v57 = vrot.slane %v665_v58, 2  ;;  %v691_v1 = vsel %vm550_vm2, %v3815_v41, -inf  ;;  %v3137_v41 = vld [vmem:[%s4256_s4 + $0x2c8] sm:$0xff]  }
 0x19b   :  { %2543 = vmatprep.mubr.bf16.mxu1 %v1313_v35  ;;  %v1294_v10 = vsel %vm1287_vm3, %v781_v4, %v1261_v17  ;;  %v688_v43 = vmax.f32 %v686_v26, %v687_v38  ;;  %v715_v11 = vrot.slane %v714_v33, 2  ;;  %2944 = vmatpush3.bf16.msra.mxu1 %v3144_v5  ;;  %v692_v30 = vrot.slane %v691_v1, 4 }
 0x19c   :  { %v1310_v51 = vpack.c.bf16 %v1294_v10, %v1294_v10  ;;  %v1135_v60 = vrot.slane %v1134_v36, 2  ;;  %2945 = vmatprep.subr.bf16.mxu1 %v3147_v61  ;;  %v667_v63 = vmax.f32 %v665_v58, %v666_v57  ;;  %v1111_v0 = vsel %vm550_vm2, %v3834_v32, -inf  ;;  %v3138_v32 = vld [vmem:[%s4256_s4 + $0x288] sm:$0xff]  }
 0x19d   :  { %v689_v42 = vrot.slane %v688_v43, 1  ;;  %v716_v15 = vmax.f32 %v714_v33, %v715_v11  ;;  %v693_v4 = vmax.f32 %v691_v1, %v692_v30  ;;  %v1112_v25 = vrot.slane %v1111_v0, 4 }
 0x19e   :  { %2504 = vmatmul.mubr.bf16.vlgmr.msra.gmra.mrb[20].mxu0 %v1310_v51  ;;  %v1136_v13 = vmax.f32 %v1134_v36, %v1135_v60  ;;  %v668_v8 = vrot.slane %v667_v63, 1  ;;  %v3953_v21 = vmax.f32 %v3577_v48, %v1144_v39  ;;  %v364_v55 = vadd.f32 %v3500_v37, %v3519_v49  ;;  %v3141_v49 = vld [vmem:[%s4256_s4 + $0x2d0] sm:$0xff]   ;;  %v3149_v51 = vld [vmem:[%s4256_s4 + $0x2e0] sm:$0xff]   ;;  %v3160_v60 = vld [vmem:[%s4256_s4 + $0x238] sm:$0xff]  }
 0x19f   :  { %2960 = vmatpush3.bf16.msra.mxu0 %v3134_v2  ;;  %v690_v14 = vmax.f32 %v688_v43, %v689_v42  ;;  %v717_v52 = vrot.slane %v716_v15, 1  ;;  %2946 = vmatpush3.bf16.msra.mxu1 %v3148_v46  ;;  %v694_v44 = vrot.slane %v693_v4, 2  ;;  %v1113_v20 = vmax.f32 %v1111_v0, %v1112_v25  ;;  %v3155_v48 = vld [vmem:[%s4256_s4 + $0x270] sm:$0xff]   ;;  %v3146_v43 = vld [vmem:[%s4256_s4 + $0x298] sm:$0xff]  }
 0x1a0   :  { %v1137_v45 = vrot.slane %v1136_v13, 1  ;;  %2961 = vmatprep.subr.bf16.mxu0 %v3137_v41  ;;  %2947 = vmatprep.subr.bf16.mxu1 %v3151_v62  ;;  %v3969_v39 = vmax.f32 %v667_v63, %v668_v8  ;;  %v365_v22 = vadd.f32 %v3500_v37, %v3523_v12  ;;  %v3973_v59 = vmax.f32 %v364_v55, 0.0  ;;  %v3142_v12 = vld [vmem:[%s4256_s4 + $0x290] sm:$0xff]  }
 0x1a1   :  { %v718_v27 = vmax.f32 %v716_v15, %v717_v52  ;;  %v695_v47 = vmax.f32 %v693_v4, %v694_v44  ;;  %v1114_v31 = vrot.slane %v1113_v20, 2  ;;  %v805_v29 = vmul.f32 %v3466_v28, %v3483_v23  ;;  %v3156_v28 = vld [vmem:[%s4256_s4 + $0x230] sm:$0xff]   ;;  %v3163_v15 = vld [vmem:[%s4256_s4 + $0x340] sm:$0xff]  }
 0x1a2   :  { %v1138_v56 = vmax.f32 %v1136_v13, %v1137_v45  ;;  %v3977_v26 = vmax.f32 %v365_v22, 0.0  ;;  %v3981_v50 = vrot.slane %v3973_v59, %v3485_v24  ;;  %v806_v9 = vmul.f32 %v3469_v34, %v3483_v23  ;;  %v3145_v34 = vld [vmem:[%s4256_s4 + $0x2d8] sm:$0xff]   ;;  %v3164_v22 = vld [vmem:[%s4256_s4 + $0x300] sm:$0xff]  }
 0x1a3   :  { %v786_v5 = vmax.f32 %v690_v14, %v718_v27  ;;  %2962 = vmatpush3.bf16.msra.mxu0 %v3138_v32  ;;  %2948 = vmatpush3.bf16.msra.mxu1 %v3152_v19  ;;  %v696_v54 = vrot.slane %v695_v47, 1  ;;  %v1115_v7 = vmax.f32 %v1113_v20, %v1114_v31  ;;  %v813_v16 = vadd.f32 %v805_v29, %v3500_v37  ;;  %v3159_v23 = vld [vmem:[%s4256_s4 + $0x278] sm:$0xff]   ;;  %v3153_v20 = vld [vmem:[%s4256_s4 + $0x2e8] sm:$0xff]  }
 0x1a4   :  { %v1234_v61 = vmax.f32 %v1138_v56, %v3931_v18  ;;  %2963 = vmatprep.subr.bf16.mxu0 %v3141_v49  ;;  %2949 = vmatprep.subr.bf16.mxu1 %v3155_v48  ;;  %v499_v58 = vcombine.high %v3981_v50, %v3981_v50  ;;  %v4003_v35 = vrot.slane %v3977_v26, %v3485_v24  ;;  %v677_v17 = vsel %vm550_vm2, %v3882_v6, -inf }
 0x1a5   :  { %v697_v38 = vmax.f32 %v695_v47, %v696_v54  ;;  %v1116_v33 = vrot.slane %v1115_v7, 1  ;;  %v814_v36 = vadd.f32 %v806_v9, %v3500_v37  ;;  %v4008_v18 = vmax.f32 %v813_v16, 0.0 }
 0x1a6   :  { %v1266_v57 = vrot.slane %v1234_v61, 7  ;;  %v516_v1 = vcombine.high %v4003_v35, %v4003_v35  ;;  %v726_v10 = vsel %vm550_vm2, %v499_v58, -inf  ;;  %v678_v2 = vrot.slane %v677_v17, 4  ;;  %v3157_v61 = vld [vmem:[%s4256_s4 + $0x2f0] sm:$0xff]  }
 0x1a7   :  { %2964 = vmatpush3.bf16.msra.mxu0 %v3142_v12  ;;  %2950 = vmatpush3.bf16.msra.mxu1 %v3156_v28  ;;  %v783_v6 = vmax.f32 %v3969_v39, %v697_v38  ;;  %v1117_v11 = vmax.f32 %v1115_v7, %v1116_v33  ;;  %v727_v46 = vrot.slane %v726_v10, 4  ;;  %v4017_v37 = vmax.f32 %v814_v36, 0.0  ;;  %v3167_v12 = vld [vmem:[%s4256_s4 + $0x348] sm:$0xff]  }
 0x1a8   :  { %v1299_v30 = vsel %vm1287_vm3, %v786_v5, %v1266_v57  ;;  %2965 = vmatprep.subr.bf16.mxu0 %v3145_v34  ;;  %2951 = vmatprep.subr.bf16.mxu1 %v3159_v23  ;;  %v754_v41 = vsel %vm550_vm2, %v516_v1, -inf  ;;  %v4029_v62 = vrot.slane %v4008_v18, %v3485_v24  ;;  %v679_v63 = vmax.f32 %v677_v17, %v678_v2  ;;  %v3168_v1 = vld [vmem:[%s4256_s4 + $0x308] sm:$0xff]  }
 0x1a9   :  { %v1315_v0 = vpack.c.bf16 %v1299_v30, %v1299_v30  ;;  %v1231_v42 = vmax.f32 %v1117_v11, %v3953_v21  ;;  %v728_v4 = vmax.f32 %v726_v10, %v727_v46  ;;  %v755_v25 = vrot.slane %v754_v41, 4  ;;  %v3150_v21 = vld [vmem:[%s4256_s4 + $0x2a0] sm:$0xff]   ;;  %v3171_v11 = vld [vmem:[%s4256_s4 + $0x350] sm:$0xff]  }
 0x1aa   :  { %v948_v13 = vcombine.high %v4029_v62, %v4029_v62  ;;  %v4039_v8 = vrot.slane %v4017_v37, %v3485_v24  ;;  %v680_v55 = vrot.slane %v679_v63, 2  ;;  %v705_v14 = vsel %vm550_vm2, %v3897_v3, -inf  ;;  %v3158_v46 = vld [vmem:[%s4256_s4 + $0x2b0] sm:$0xff]  }
 0x1ab   :  { %2583 = vmatprep.mubr.bf16.mxu0 %v1315_v0  ;;  %2966 = vmatpush3.bf16.msra.mxu0 %v3146_v43  ;;  %v1263_v52 = vrot.slane %v1231_v42, 7  ;;  %v729_v32 = vrot.slane %v728_v4, 2  ;;  %v756_v19 = vmax.f32 %v754_v41, %v755_v25  ;;  %v706_v44 = vrot.slane %v705_v14, 4 }
 0x1ac   :  { %2967 = vmatprep.subr.bf16.mxu0 %v3149_v51  ;;  %2952 = vmatpush3.bf16.msra.mxu1 %v3160_v60  ;;  %v965_v45 = vcombine.high %v4039_v8, %v4039_v8  ;;  %v1174_v3 = vsel %vm550_vm2, %v948_v13, -inf  ;;  %v681_v49 = vmax.f32 %v679_v63, %v680_v55  ;;  %v1125_v48 = vsel %vm550_vm2, %v3904_v53, -inf  ;;  %v3154_v53 = vld [vmem:[%s4256_s4 + $0x2a8] sm:$0xff]   ;;  %v3172_v13 = vld [vmem:[%s4256_s4 + $0x310] sm:$0xff]  }
 0x1ad   :  { %v1296_v39 = vsel %vm1287_vm3, %v783_v6, %v1263_v52  ;;  %2981 = vmatprep.subr.bf16.mxu1 %v3163_v15  ;;  %v730_v27 = vmax.f32 %v728_v4, %v729_v32  ;;  %v757_v47 = vrot.slane %v756_v19, 2  ;;  %v1175_v31 = vrot.slane %v1174_v3, 4  ;;  %v3175_v52 = vld [vmem:[%s4256_s4 + $0x358] sm:$0xff]  }
 0x1ae   :  { %v1312_v29 = vpack.c.bf16 %v1296_v39, %v1296_v39  ;;  %v1202_v56 = vsel %vm550_vm2, %v965_v45, -inf  ;;  %v682_v9 = vrot.slane %v681_v49, 1  ;;  %v707_v5 = vmax.f32 %v705_v14, %v706_v44  ;;  %v3162_v32 = vld [vmem:[%s4256_s4 + $0x2b8] sm:$0xff]  }
 0x1af   :  { %2968 = vmatpush3.bf16.msra.mxu0 %v3150_v21  ;;  %v731_v28 = vrot.slane %v730_v27, 1  ;;  %v758_v54 = vmax.f32 %v756_v19, %v757_v47  ;;  %v1176_v7 = vmax.f32 %v1174_v3, %v1175_v31  ;;  %v1203_v16 = vrot.slane %v1202_v56, 4 }
 0x1b0   :  { %2969 = vmatprep.subr.bf16.mxu0 %v3153_v20  ;;  %2544 = vmatmul.mubr.bf16.vlgmr.msra.gmra.mrb[8].mxu1 %v1312_v29  ;;  %v4068_v34 = vmax.f32 %v681_v49, %v682_v9  ;;  %v708_v23 = vrot.slane %v707_v5, 2  ;;  %v1126_v58 = vrot.slane %v1125_v48, 4  ;;  %v1158_v17 = vrot.slane %v3584_v40, 1 }
 0x1b1   :  { %2982 = vmatpush3.bf16.msra.mxu1 %v3164_v22  ;;  %v4071_v38 = vmax.f32 %v730_v27, %v731_v28  ;;  %v759_v33 = vrot.slane %v758_v54, 1  ;;  %v1177_v36 = vrot.slane %v1176_v7, 2  ;;  %v1204_v57 = vmax.f32 %v1202_v56, %v1203_v16 }
 0x1b2   :  { %v709_v10 = vmax.f32 %v707_v5, %v708_v23  ;;  %v1127_v2 = vmax.f32 %v1125_v48, %v1126_v58  ;;  %v4077_v43 = vmax.f32 %v3584_v40, %v1158_v17  ;;  %v484_v6 = vcombine.high %v3973_v59, %v3973_v59  ;;  %2983 = vmatprep.subr.bf16.mxu1 %v3167_v12  ;;  %v3161_v59 = vld [vmem:[%s4256_s4 + $0x2f8] sm:$0xff]   ;;  %v3165_v48 = vld [vmem:[%s4256_s4 + $0x3c0] sm:$0xff]  }
 0x1b3   :  { %2970 = vmatpush3.bf16.msra.mxu0 %v3154_v53  ;;  %v4087_v30 = vmax.f32 %v758_v54, %v759_v33  ;;  %v1178_v51 = vmax.f32 %v1176_v7, %v1177_v36  ;;  %v1205_v60 = vrot.slane %v1204_v57, 2  ;;  %v501_v40 = vcombine.high %v3977_v26, %v3977_v26  ;;  %v3179_v12 = vld [vmem:[%s4256_s4 + $0x360] sm:$0xff]  }
 0x1b4   :  { %2971 = vmatprep.subr.bf16.mxu0 %v3157_v61  ;;  %v710_v41 = vrot.slane %v709_v10, 1  ;;  %v1128_v63 = vrot.slane %v1127_v2, 2  ;;  %v4095_v0 = vrot.slane %v484_v6, %v3485_v24  ;;  %v933_v42 = vcombine.high %v4008_v18, %v4008_v18  ;;  %v3180_v33 = vld [vmem:[%s4256_s4 + $0x320] sm:$0xff]  }
 0x1b5   :  { %v788_v15 = vmax.f32 %v4071_v38, %v4087_v30  ;;  %v1179_v4 = vrot.slane %v1178_v51, 1  ;;  %v1206_v25 = vmax.f32 %v1204_v57, %v1205_v60  ;;  %v4102_v26 = vrot.slane %v501_v40, %v3485_v24  ;;  %2984 = vmatpush3.bf16.msra.mxu1 %v3168_v1 }
 0x1b6   :  { %v711_v55 = vmax.f32 %v709_v10, %v710_v41  ;;  %v1129_v14 = vmax.f32 %v1127_v2, %v1128_v63  ;;  %v500_v21 = vcombine.high %v4095_v0, %v4095_v0  ;;  %v4110_v18 = vrot.slane %v933_v42, %v3485_v24  ;;  %2985 = vmatprep.subr.bf16.mxu1 %v3171_v11  ;;  %v3183_v10 = vld [vmem:[%s4256_s4 + $0x368] sm:$0xff]  }
 0x1b7   :  { %2972 = vmatpush3.bf16.msra.mxu0 %v3158_v46  ;;  %v1180_v19 = vmax.f32 %v1178_v51, %v1179_v4  ;;  %v1207_v44 = vrot.slane %v1206_v25, 1  ;;  %v517_v20 = vcombine.high %v4102_v26, %v4102_v26  ;;  %v950_v45 = vcombine.high %v4017_v37, %v4017_v37  ;;  %v3176_v37 = vld [vmem:[%s4256_s4 + $0x318] sm:$0xff]   ;;  %v3166_v51 = vld [vmem:[%s4256_s4 + $0x380] sm:$0xff]   ;;  %v3169_v42 = vld [vmem:[%s4256_s4 + $0x3c8] sm:$0xff]  }
 0x1b8   :  { %2973 = vmatprep.subr.bf16.mxu0 %v3161_v59  ;;  %v785_v3 = vmax.f32 %v4068_v34, %v711_v55  ;;  %v1130_v49 = vrot.slane %v1129_v14, 1  ;;  %v740_v39 = vsel %vm550_vm2, %v500_v21, -inf  ;;  %v949_v22 = vcombine.high %v4110_v18, %v4110_v18  ;;  %v3187_v55 = vld [vmem:[%s4256_s4 + $0x370] sm:$0xff]  }
 0x1b9   :  { %v1208_v27 = vmax.f32 %v1206_v25, %v1207_v44  ;;  %v741_v47 = vrot.slane %v740_v39, 4  ;;  %v768_v31 = vsel %vm550_vm2, %v517_v20, -inf  ;;  %v4131_v29 = vrot.slane %v950_v45, %v3485_v24  ;;  %2986 = vmatpush3.bf16.msra.mxu1 %v3172_v13 }
 0x1ba   :  { %v1131_v56 = vmax.f32 %v1129_v14, %v1130_v49  ;;  %v769_v9 = vrot.slane %v768_v31, 4  ;;  %v1188_v5 = vsel %vm550_vm2, %v949_v22, -inf  ;;  %2987 = vmatprep.subr.bf16.mxu1 %v3175_v52  ;;  %v719_v53 = vsel %vm550_vm2, %v3981_v50, -inf  ;;  %v3188_v22 = vld [vmem:[%s4256_s4 + $0x330] sm:$0xff]  }
 0x1bb   :  { %2974 = vmatpush3.bf16.msra.mxu0 %v3162_v32  ;;  %v1236_v24 = vmax.f32 %v1180_v19, %v1208_v27  ;;  %v742_v28 = vmax.f32 %v740_v39, %v741_v47  ;;  %v966_v54 = vcombine.high %v4131_v29, %v4131_v29  ;;  %v1189_v7 = vrot.slane %v1188_v5, 4 }
 0x1bc   :  { %v1233_v16 = vmax.f32 %v1131_v56, %v4077_v43  ;;  %3003 = vmatprep.subr.bf16.mxu0 %v3165_v48  ;;  %v770_v61 = vmax.f32 %v768_v31, %v769_v9  ;;  %v720_v34 = vrot.slane %v719_v53, 4  ;;  %v747_v23 = vsel %vm550_vm2, %v4003_v35, -inf }
 0x1bd   :  { %v1268_v58 = vrot.slane %v1236_v24, 7  ;;  %v743_v17 = vrot.slane %v742_v28, 2  ;;  %v1190_v38 = vmax.f32 %v1188_v5, %v1189_v7  ;;  %v1216_v50 = vsel %vm550_vm2, %v966_v54, -inf  ;;  %2988 = vmatpush3.bf16.msra.mxu1 %v3176_v37  ;;  %v3174_v7 = vld [vmem:[%s4256_s4 + $0x390] sm:$0xff]  }
 0x1be   :  { %v1265_v36 = vrot.slane %v1233_v16, 7  ;;  %v771_v57 = vrot.slane %v770_v61, 2  ;;  %v1217_v1 = vrot.slane %v1216_v50, 4  ;;  %2989 = vmatprep.subr.bf16.mxu1 %v3179_v12  ;;  %v721_v2 = vmax.f32 %v719_v53, %v720_v34 }
 0x1bf   :  { %v1301_v35 = vsel %vm1287_vm3, %v788_v15, %v1268_v58  ;;  %v744_v43 = vmax.f32 %v742_v28, %v743_v17  ;;  %v1191_v6 = vrot.slane %v1190_v38, 2  ;;  %v748_v11 = vrot.slane %v747_v23, 4  ;;  %v3184_v15 = vld [vmem:[%s4256_s4 + $0x328] sm:$0xff]  }
 0x1c0   :  { %v1317_v46 = vpack.c.bf16 %v1301_v35, %v1301_v35  ;;  %v1298_v30 = vsel %vm1287_vm3, %v785_v3, %v1265_v36  ;;  %v772_v60 = vmax.f32 %v770_v61, %v771_v57  ;;  %v1218_v40 = vmax.f32 %v1216_v50, %v1217_v1  ;;  %v3170_v3 = vld [vmem:[%s4256_s4 + $0x388] sm:$0xff]  }
 0x1c1   :  { %v1314_v59 = vpack.c.bf16 %v1298_v30, %v1298_v30  ;;  %v745_v41 = vrot.slane %v744_v43, 1  ;;  %v1192_v63 = vmax.f32 %v1190_v38, %v1191_v6  ;;  %2990 = vmatpush3.bf16.msra.mxu1 %v3180_v33  ;;  %v722_v4 = vrot.slane %v721_v2, 2  ;;  %v3181_v30 = vld [vmem:[%s4256_s4 + $0x3e0] sm:$0xff]  }
 0x1c2   :  { %2623 = vmatprep.mubr.bf16.mxu1 %v1317_v46  ;;  %v773_v25 = vrot.slane %v772_v60, 1  ;;  %v1219_v13 = vrot.slane %v1218_v40, 2  ;;  %2991 = vmatprep.subr.bf16.mxu1 %v3183_v10  ;;  %v749_v14 = vmax.f32 %v747_v23, %v748_v11  ;;  %v1167_v21 = vsel %vm550_vm2, %v4029_v62, -inf  ;;  %v3173_v62 = vld [vmem:[%s4256_s4 + $0x3d0] sm:$0xff]   ;;  %v3192_v23 = vld [vmem:[%s4256_s4 + $0x338] sm:$0xff]  }
 0x1c3   :  { %2584 = vmatmul.mubr.bf16.vlgmr.msra.gmra.mrb[24].mxu0 %v1314_v59  ;;  %v4170_v52 = vmax.f32 %v744_v43, %v745_v41  ;;  %v1193_v32 = vrot.slane %v1192_v63, 1  ;;  %v723_v19 = vmax.f32 %v721_v2, %v722_v4  ;;  %v1168_v44 = vrot.slane %v1167_v21, 4  ;;  %v3178_v43 = vld [vmem:[%s4256_s4 + $0x398] sm:$0xff]  }
 0x1c4   :  { %3004 = vmatpush3.bf16.msra.mxu0 %v3166_v51  ;;  %v774_v20 = vmax.f32 %v772_v60, %v773_v25  ;;  %v1220_v45 = vmax.f32 %v1218_v40, %v1219_v13  ;;  %v750_v49 = vrot.slane %v749_v14, 2  ;;  %v1195_v48 = vsel %vm550_vm2, %v4039_v8, -inf  ;;  %v3191_v8 = vld [vmem:[%s4256_s4 + $0x378] sm:$0xff]   ;;  %v3182_v13 = vld [vmem:[%s4256_s4 + $0x3a0] sm:$0xff]  }
 0x1c5   :  { %v1194_v39 = vmax.f32 %v1192_v63, %v1193_v32  ;;  %3005 = vmatprep.subr.bf16.mxu0 %v3169_v42  ;;  %2992 = vmatpush3.bf16.msra.mxu1 %v3184_v15  ;;  %v724_v27 = vrot.slane %v723_v19, 1  ;;  %v1169_v47 = vmax.f32 %v1167_v21, %v1168_v44  ;;  %v1196_v31 = vrot.slane %v1195_v48, 4  ;;  %v3185_v21 = vld [vmem:[%s4256_s4 + $0x3e8] sm:$0xff]  }
 0x1c6   :  { %v790_v37 = vmax.f32 %v4170_v52, %v774_v20  ;;  %v1221_v56 = vrot.slane %v1220_v45, 1  ;;  %2993 = vmatprep.subr.bf16.mxu1 %v3187_v55  ;;  %v751_v9 = vmax.f32 %v749_v14, %v750_v49  ;;  %v733_v5 = vsel %vm550_vm2, %v4095_v0, -inf  ;;  %v3177_v0 = vld [vmem:[%s4256_s4 + $0x3d8] sm:$0xff]   ;;  %v3186_v49 = vld [vmem:[%s4256_s4 + $0x3a8] sm:$0xff]  }
 0x1c7   :  { %v4189_v12 = vmax.f32 %v723_v19, %v724_v27  ;;  %v1170_v53 = vrot.slane %v1169_v47, 2  ;;  %v1197_v24 = vmax.f32 %v1195_v48, %v1196_v31  ;;  %v734_v28 = vrot.slane %v733_v5, 4 }
 0x1c8   :  { %v1222_v54 = vmax.f32 %v1220_v45, %v1221_v56  ;;  %3006 = vmatpush3.bf16.msra.mxu0 %v3170_v3  ;;  %v752_v16 = vrot.slane %v751_v9, 1  ;;  %v761_v61 = vsel %vm550_vm2, %v4102_v26, -inf  ;;  %v1181_v34 = vsel %vm550_vm2, %v4110_v18, -inf }
 0x1c9   :  { %3007 = vmatprep.subr.bf16.mxu0 %v3173_v62  ;;  %2994 = vmatpush3.bf16.msra.mxu1 %v3188_v22  ;;  %v1171_v58 = vmax.f32 %v1169_v47, %v1170_v53  ;;  %v1198_v17 = vrot.slane %v1197_v24, 2  ;;  %v735_v38 = vmax.f32 %v733_v5, %v734_v28  ;;  %v762_v50 = vrot.slane %v761_v61, 4  ;;  %v3189_v62 = vld [vmem:[%s4256_s4 + $0x3f0] sm:$0xff]   ;;  %v3194_v5 = vld [vmem:[%s4256_s4 + $0x3b8] sm:$0xff]  }
 0x1ca   :  { %v1238_v33 = vmax.f32 %v1194_v39, %v1222_v54  ;;  %2995 = vmatprep.subr.bf16.mxu1 %v3191_v8  ;;  %v753_v26 = vmax.f32 %v751_v9, %v752_v16  ;;  %v1182_v36 = vrot.slane %v1181_v34, 4  ;;  %v1209_v18 = vsel %vm550_vm2, %v4131_v29, -inf  ;;  %v3193_v8 = vld [vmem:[%s4256_s4 + $0x3f8] sm:$0xff]  }
 0x1cb   :  { %v1172_v57 = vrot.slane %v1171_v58, 1  ;;  %v1199_v1 = vmax.f32 %v1197_v24, %v1198_v17  ;;  %v736_v10 = vrot.slane %v735_v38, 2  ;;  %v763_v2 = vmax.f32 %v761_v61, %v762_v50  ;;  %v2707_v61 = vld [vmem:[%s4257_s5] ss:$0 sm:$0xff] }
 0x1cc   :  { %v1270_v35 = vrot.slane %v1238_v33, 7  ;;  %3008 = vmatpush3.bf16.msra.mxu0 %v3174_v7  ;;  %v787_v6 = vmax.f32 %v4189_v12, %v753_v26  ;;  %v1183_v11 = vmax.f32 %v1181_v34, %v1182_v36  ;;  %v1210_v46 = vrot.slane %v1209_v18, 4 }
 0x1cd   :  { %3009 = vmatprep.subr.bf16.mxu0 %v3177_v0  ;;  %2996 = vmatpush3.bf16.msra.mxu1 %v3192_v23  ;;  %v1173_v29 = vmax.f32 %v1171_v58, %v1172_v57  ;;  %v1200_v51 = vrot.slane %v1199_v1, 1  ;;  %v737_v60 = vmax.f32 %v735_v38, %v736_v10  ;;  %v764_v40 = vrot.slane %v763_v2, 2 }
 0x1ce   :  { %v1303_v59 = vsel %vm1287_vm3, %v790_v37, %v1270_v35  ;;  %v1184_v41 = vrot.slane %v1183_v11, 2  ;;  %v1211_v63 = vmax.f32 %v1209_v18, %v1210_v46  ;;  %v3190_v37 = vld [vmem:[%s4256_s4 + $0x3b0] sm:$0xff]   ;;  %s3222_s4 = smov [#allocation3]  }
 0x1cf   :  { %v1319_v42 = vpack.c.bf16 %v1303_v59, %v1303_v59  ;;  %v1201_v15 = vmax.f32 %v1199_v1, %v1200_v51  ;;  %v738_v4 = vrot.slane %v737_v60, 1  ;;  %v765_v25 = vmax.f32 %v763_v2, %v764_v40  ;;  %s2678_s5 = sshll.u32 %s3222_s4, 4  ;;  %s2679_s5 = int_to_ptr.vmem [resolvable:$true] %s2678_s5 }
 0x1d0   :  { %3010 = vmatpush3.bf16.msra.mxu0 %v3178_v43  ;;  %v1185_v55 = vmax.f32 %v1183_v11, %v1184_v41  ;;  %v1212_v14 = vrot.slane %v1211_v63, 2  ;;  %s3197_s11 = scalar_lea.vmem %s2679_s5, 32  ;;  %p3202_p1 = scmp.lt.s32.totalorder %s2679_s5, %s2679_s5 }
 0x1d1   :  { %2663 = vmatprep.mubr.bf16.mxu0 %v1319_v42  ;;  %3011 = vmatprep.subr.bf16.mxu0 %v3181_v30  ;;  %v1235_v52 = vmax.f32 %v1173_v29, %v1201_v15  ;;  %v739_v32 = vmax.f32 %v737_v60, %v738_v4  ;;  %v766_v19 = vrot.slane %v765_v25, 1  ;;  %p3198_p0 = scmp.ne.s32.totalorder %s2679_s5, %s3197_s11  ;;  %p3203_p2 = scmp.lt.s32.totalorder %s3197_s11, %s3197_s11 }
 0x1d2   :  { %v1186_v44 = vrot.slane %v1185_v55, 1  ;;  %v1213_v20 = vmax.f32 %v1211_v63, %v1212_v14 }
 0x1d3   :  { %v1267_v45 = vrot.slane %v1235_v52, 7  ;;  %v767_v3 = vmax.f32 %v765_v25, %v766_v19  ;;  %p3204_p3 = por %p3203_p2, %p3202_p1 }
 0x1d4   :  { %3012 = vmatpush3.bf16.msra.mxu0 %v3182_v13  ;;  %v1187_v48 = vmax.f32 %v1185_v55, %v1186_v44  ;;  %v1214_v39 = vrot.slane %v1213_v20, 1 }
 0x1d5   :  { %3013 = vmatprep.subr.bf16.mxu0 %v3185_v21  ;;  %v1300_v22 = vsel %vm1287_vm3, %v787_v6, %v1267_v45  ;;  %v789_v27 = vmax.f32 %v739_v32, %v767_v3  ;;  %p3205_p4 = pnand %p3204_p3, %p3198_p0 }
 0x1d6   :  { %v1316_v47 = vpack.c.bf16 %v1300_v22, %v1300_v22  ;;  %v1215_v31 = vmax.f32 %v1213_v20, %v1214_v39 }
 0x1d8   :  { %3014 = vmatpush3.bf16.msra.mxu0 %v3186_v49  ;;  %2624 = vmatmul.mubr.bf16.vlgmr.msra.gmra.mrb[12].mxu1 %v1316_v47  ;;  %v1237_v56 = vmax.f32 %v1187_v48, %v1215_v31 }
 0x1d9   :  { %3015 = vmatprep.subr.bf16.mxu0 %v3189_v62 }
 0x1da   :  { %v1269_v9 = vrot.slane %v1237_v56, 7 }
 0x1dc   :  { %3016 = vmatpush3.bf16.msra.mxu0 %v3190_v37  ;;  %v1302_v12 = vsel %vm1287_vm3, %v789_v27, %v1269_v9 }
 0x1dd   :  { %3017 = vmatprep.subr.bf16.mxu0 %v3193_v8  ;;  %v1318_v53 = vpack.c.bf16 %v1302_v12, %v1302_v12 }
 0x1e0   :  { %3018 = vmatpush3.bf16.msra.mxu0 %v3194_v5 }
 0x1e3   :  { %2664 = vmatmul.mubr.bf16.vlgmr.msra.gmra.mrb[28].mxu0 %v1318_v53 }
 0x22d   :  { %v2865_v24 = vpop.f32.mrb[0].mxu1 }
 0x22e   :  { %v2866_v28 = vpop.f32.mrb[1].mxu1 }
 0x22f   :  { %v2867_v54 = vadd.f32 %v2866_v28, %v2865_v24  ;;  %v2868_v7 = vpop.f32.mrb[2].mxu1 }
 0x230   :  { %v2869_v16 = vpop.f32.mrb[3].mxu1 }
 0x231   :  { %v2386_v34 = vadd.f32 %v2867_v54, %v2707_v61 }
 0x24c   :  { %v2887_v0 = vpop.f32.mrb[16].mxu0 }
 0x24d   :  { %v2888_v23 = vpop.f32.mrb[17].mxu0 }
 0x24e   :  { %v2889_v58 = vadd.f32 %v2888_v23, %v2887_v0  ;;  %v2890_v17 = vpop.f32.mrb[18].mxu0 }
 0x24f   :  { %v2891_v38 = vpop.f32.mrb[19].mxu0 }
 0x250   :  { %v2426_v50 = vadd.f32 %v2889_v58, %v2386_v34 }
 0x261   :  { %v2909_v33 = vpop.f32.mrb[4].mxu1 }
 0x262   :  { %v2910_v26 = vpop.f32.mrb[5].mxu1 }
 0x263   :  { %v2911_v36 = vadd.f32 %v2910_v26, %v2909_v33  ;;  %v2912_v18 = vpop.f32.mrb[6].mxu1 }
 0x264   :  { %v2913_v57 = vpop.f32.mrb[7].mxu1 }
 0x265   :  { %v2466_v1 = vadd.f32 %v2911_v36, %v2426_v50 }
 0x271   :  { %v2931_v10 = vpop.f32.mrb[20].mxu0 }
 0x272   :  { %v2932_v2 = vpop.f32.mrb[21].mxu0 }
 0x273   :  { %v2933_v35 = vadd.f32 %v2932_v2, %v2931_v10  ;;  %v2934_v43 = vpop.f32.mrb[22].mxu0 }
 0x274   :  { %v2935_v6 = vpop.f32.mrb[23].mxu0 }
 0x275   :  { %v2506_v11 = vadd.f32 %v2933_v35, %v2466_v1 }
 0x283   :  { %v2953_v46 = vpop.f32.mrb[8].mxu1 }
 0x284   :  { %v2954_v30 = vpop.f32.mrb[9].mxu1 }
 0x285   :  { %v2955_v29 = vadd.f32 %v2954_v30, %v2953_v46  ;;  %v2956_v51 = vpop.f32.mrb[10].mxu1 }
 0x286   :  { %v2957_v60 = vpop.f32.mrb[11].mxu1 }
 0x287   :  { %v2546_v40 = vadd.f32 %v2955_v29, %v2506_v11 }
 0x296   :  { %v2975_v59 = vpop.f32.mrb[24].mxu0 }
 0x297   :  { %v2976_v41 = vpop.f32.mrb[25].mxu0 }
 0x298   :  { %v2977_v63 = vadd.f32 %v2976_v41, %v2975_v59  ;;  %v2978_v42 = vpop.f32.mrb[26].mxu0 }
 0x299   :  { %v2979_v15 = vpop.f32.mrb[27].mxu0 }
 0x29a   :  { %v2586_v4 = vadd.f32 %v2977_v63, %v2546_v40 }
 0x2ab   :  { %v2997_v25 = vpop.f32.mrb[12].mxu1 }
 0x2ac   :  { %v2998_v13 = vpop.f32.mrb[13].mxu1 }
 0x2ad   :  { %v2999_v55 = vadd.f32 %v2998_v13, %v2997_v25  ;;  %v3000_v14 = vpop.f32.mrb[14].mxu1 }
 0x2ae   :  { %v3001_v21 = vpop.f32.mrb[15].mxu1 }
 0x2af   :  { %v2626_v52 = vadd.f32 %v2999_v55, %v2586_v4 }
 0x2b6   :  { %v3019_v32 = vpop.f32.mrb[28].mxu0 }
 0x2b7   :  { %v3020_v19 = vpop.f32.mrb[29].mxu0 }
 0x2b8   :  { %v3021_v44 = vadd.f32 %v3020_v19, %v3019_v32  ;;  %v3022_v20 = vpop.f32.mrb[30].mxu0 }
 0x2b9   :  { %v3023_v45 = vpop.f32.mrb[31].mxu0 }
 0x2ba   :  { %v2666_v3 = vadd.f32 %v3021_v44, %v2626_v52 }
 0x2bc   :  { %2671 = vst [vmem:[#allocation3] sm:$0x3] %v2666_v3 }
 0x2bd   :  { %3208 = shalt.err (!%p3205_p4)
}
 0x2be   :  { %s3209_s13 = scalar_lea.hbm %s4258_s6, 32 }
 0x2bf   :  { %p3210_p5 = scmp.ne.s32.totalorder %s4258_s6, %s3209_s13  ;;  %p3213_p6 = scmp.lt.u32.totalorder %s3209_s13, %s4258_s6 }
 0x2c1   :  { %p3215_p7 = pnand %p3213_p6, %p3210_p5 }
 0x2c3   :  { %3218 = shalt.err (!%p3215_p7)
}
 0x2c4   :  { %2681 = dma.vmem_to_hbm [thread:$0]  %s2679_s5, 32, %s4258_s6, [#allocation4]  }
 0x2c5   :  { %3219 = dma.done.wait [#allocation4], 32  }
 0x2c6   :  { %3220 = vsyncadd [#allocation4], 4294967264 }
 0x2c7   :  { %2685 = vsyncpa [#allocation4], 1 }

// kernel: _lambda_.2
= control target key start
LH: loop header
LB: loop body
LE: loop exit
PB: predicated region body
PF: predicated region fallthrough
CT: control target
= control target key end

     0   :  { %vm262_vm0 = vcmask 293888   ;;  %vm359_vm1 = vcmask 1041408   ;;  %vm4847_vm2 = vcmask 1041409   ;;  %vm4849_vm3 = vcmask 1042434   ;;  %s10196_s1 = inlined_call_operand.vmem [shape: bf16[36,128], index: 1, kind: input, shape index: {}]   ;;  %s10197_s0 = inlined_call_operand.vmem [shape: bf16[512,36], index: 0, kind: input, shape index: {}]   ;;  %s10198_s2 = inlined_call_operand.vmem [shape: f32[1,128], index: 2, kind: input, shape index: {}]   ;;  %s10199_s3 = inlined_call_operand.vmem [shape: f32[1,128], index: 3, kind: input, shape index: {}]   ;;  %s10200_s4 = inlined_call_operand.vmem [shape: bf16[2,8,8,8], index: 4, kind: output, shape index: {}]  }
   0x1   :  { %v5785_v0 = vld [vmem:[%s10196_s1] sm:$0xff]   ;;  %v5786_v1 = vld [vmem:[%s10196_s1 + $0x8] sm:$0xff]   ;;  %v5787_v2 = vld [vmem:[%s10196_s1 + $0x10] ss:$0 sps:$4 sm:$0x33]   ;;  %vm4851_vm4 = vcmask 1043459  }
   0x2   :  { %5706 = vmatprep.subr.bf16.mxu0 %v5785_v0  ;;  %v5788_v3 = vld [vmem:[%s10197_s0] sm:$0xff]   ;;  %5776 = vmatprep.subr.bf16.mxu1 %v5785_v0  ;;  %v361_v4 = vsel %vm359_vm1, %v5787_v2, 0  ;;  %v5789_v5 = vld [vmem:[%s10197_s0 + $0x8] sm:$0xff]   ;;  %v5790_v6 = vld [vmem:[%s10197_s0 + $0x10] sm:$0xff]   ;;  %vm4853_vm5 = vcmask 1044484   ;;  %vm4855_vm6 = vcmask 1045509  }
   0x3   :  { %5707 = vmatpush3.bf16.msra.mxu0 %v5785_v0  ;;  %5779 = vmatpush3.bf16.msra.mxu1 %v5785_v0  ;;  %v5791_v7 = vld [vmem:[%s10197_s0 + $0x18] sm:$0xff]   ;;  %v5792_v8 = vld [vmem:[%s10197_s0 + $0x20] sm:$0xff]   ;;  %v5805_v10 = vld [vmem:[%s10197_s0 + $0x88] sm:$0xff]   ;;  %vm4857_vm7 = vcmask 1046534   ;;  %vm4859_vm8 = vcmask 1047559   ;;  %vm4926_vm9 = vcmask 60416  }
   0x4   :  { %5708 = vmatprep.subr.bf16.mxu0 %v5786_v1  ;;  %5712 = vmatprep.mubr.msk.bf16.mxu0 %vm262_vm0, %v5788_v3  ;;  %v5804_v9 = vld [vmem:[%s10197_s0 + $0x80] sm:$0xff]   ;;  %v5806_v11 = vld [vmem:[%s10197_s0 + $0x90] sm:$0xff]   ;;  %v5793_v12 = vld [vmem:[%s10197_s0 + $0x28] sm:$0xff]  }
   0x5   :  { %5777 = vmatprep.subr.bf16.mxu1 %v5786_v1  ;;  %5744 = vmatprep.mubr.msk.bf16.mxu1 %vm262_vm0, %v5804_v9  ;;  %v5794_v13 = vld [vmem:[%s10197_s0 + $0x30] sm:$0xff]   ;;  %v5807_v14 = vld [vmem:[%s10197_s0 + $0x98] sm:$0xff]   ;;  %v5808_v15 = vld [vmem:[%s10197_s0 + $0xa0] sm:$0xff]  }
   0x6   :  { %v5795_v16 = vld [vmem:[%s10197_s0 + $0x38] sm:$0xff]   ;;  %v5809_v17 = vld [vmem:[%s10197_s0 + $0xa8] sm:$0xff]   ;;  %v5796_v18 = vld [vmem:[%s10197_s0 + $0x40] sm:$0xff]  }
   0x7   :  { %5709 = vmatpush3.bf16.msra.mxu0 %v5786_v1  ;;  %5780 = vmatpush3.bf16.msra.mxu1 %v5786_v1  ;;  %v5810_v19 = vld [vmem:[%s10197_s0 + $0xb0] sm:$0xff]   ;;  %v5797_v20 = vld [vmem:[%s10197_s0 + $0x48] sm:$0xff]   ;;  %v5811_v21 = vld [vmem:[%s10197_s0 + $0xb8] sm:$0xff]  }
   0x8   :  { %5782 = vmatprep.subr.msk.bf16.mxu0 %vm359_vm1, %v5787_v2  ;;  %5783 = vmatprep.subr.msk.bf16.mxu1 %vm359_vm1, %v5787_v2  ;;  %v5798_v22 = vld [vmem:[%s10197_s0 + $0x50] sm:$0xff]   ;;  %v5812_v23 = vld [vmem:[%s10197_s0 + $0xc0] sm:$0xff]   ;;  %v5799_v24 = vld [vmem:[%s10197_s0 + $0x58] sm:$0xff]  }
   0x9   :  { %v5813_v25 = vld [vmem:[%s10197_s0 + $0xc8] sm:$0xff]   ;;  %v5800_v26 = vld [vmem:[%s10197_s0 + $0x60] sm:$0xff]   ;;  %v5814_v27 = vld [vmem:[%s10197_s0 + $0xd0] sm:$0xff]  }
   0xa   :  { %v5801_v28 = vld [vmem:[%s10197_s0 + $0x68] sm:$0xff]   ;;  %v5815_v29 = vld [vmem:[%s10197_s0 + $0xd8] sm:$0xff]   ;;  %v5802_v30 = vld [vmem:[%s10197_s0 + $0x70] sm:$0xff]  }
   0xb   :  { %5711 = vmatpush3.bf16.msra.mxu0 %v361_v4  ;;  %5781 = vmatpush3.bf16.msra.mxu1 %v361_v4  ;;  %v5816_v31 = vld [vmem:[%s10197_s0 + $0xe0] sm:$0xff]   ;;  %v5803_v32 = vld [vmem:[%s10197_s0 + $0x78] sm:$0xff]   ;;  %v5817_v33 = vld [vmem:[%s10197_s0 + $0xe8] sm:$0xff]  }
   0xc   :  { %v5818_v34 = vld [vmem:[%s10197_s0 + $0xf0] sm:$0xff]   ;;  %v5819_v35 = vld [vmem:[%s10197_s0 + $0xf8] sm:$0xff]  }
   0xe   :  { %5713 = vmatmul.mubr.msk.bf16.vlgmr.msra.gmra.mrb[0].mxu0 %vm262_vm0, %v5789_v5  ;;  %5745 = vmatmul.mubr.msk.bf16.vlgmr.msra.gmra.mrb[0].mxu1 %vm262_vm0, %v5805_v10 }
   0xf   :  { %5716 = vmatprep.mubr.msk.bf16.mxu0 %vm262_vm0, %v5790_v6  ;;  %5748 = vmatprep.mubr.msk.bf16.mxu1 %vm262_vm0, %v5806_v11 }
  0x16   :  { %5717 = vmatmul.mubr.msk.bf16.gmra.mrb[4].mxu0 %vm262_vm0, %v5791_v7  ;;  %5749 = vmatmul.mubr.msk.bf16.gmra.mrb[4].mxu1 %vm262_vm0, %v5807_v14 }
  0x17   :  { %5720 = vmatprep.mubr.msk.bf16.mxu0 %vm262_vm0, %v5792_v8  ;;  %5752 = vmatprep.mubr.msk.bf16.mxu1 %vm262_vm0, %v5808_v15 }
  0x1e   :  { %5721 = vmatmul.mubr.msk.bf16.gmra.mrb[8].mxu0 %vm262_vm0, %v5793_v12  ;;  %5753 = vmatmul.mubr.msk.bf16.gmra.mrb[8].mxu1 %vm262_vm0, %v5809_v17 }
  0x1f   :  { %5724 = vmatprep.mubr.msk.bf16.mxu0 %vm262_vm0, %v5794_v13  ;;  %5756 = vmatprep.mubr.msk.bf16.mxu1 %vm262_vm0, %v5810_v19 }
  0x26   :  { %5725 = vmatmul.mubr.msk.bf16.gmra.mrb[12].mxu0 %vm262_vm0, %v5795_v16  ;;  %5757 = vmatmul.mubr.msk.bf16.gmra.mrb[12].mxu1 %vm262_vm0, %v5811_v21 }
  0x27   :  { %5728 = vmatprep.mubr.msk.bf16.mxu0 %vm262_vm0, %v5796_v18  ;;  %5760 = vmatprep.mubr.msk.bf16.mxu1 %vm262_vm0, %v5812_v23 }
  0x2e   :  { %5729 = vmatmul.mubr.msk.bf16.gmra.mrb[16].mxu0 %vm262_vm0, %v5797_v20  ;;  %5761 = vmatmul.mubr.msk.bf16.gmra.mrb[16].mxu1 %vm262_vm0, %v5813_v25 }
  0x2f   :  { %5732 = vmatprep.mubr.msk.bf16.mxu0 %vm262_vm0, %v5798_v22  ;;  %5764 = vmatprep.mubr.msk.bf16.mxu1 %vm262_vm0, %v5814_v27 }
  0x36   :  { %5733 = vmatmul.mubr.msk.bf16.gmra.mrb[20].mxu0 %vm262_vm0, %v5799_v24  ;;  %5765 = vmatmul.mubr.msk.bf16.gmra.mrb[20].mxu1 %vm262_vm0, %v5815_v29 }
  0x37   :  { %5736 = vmatprep.mubr.msk.bf16.mxu0 %vm262_vm0, %v5800_v26  ;;  %5768 = vmatprep.mubr.msk.bf16.mxu1 %vm262_vm0, %v5816_v31 }
  0x3e   :  { %5737 = vmatmul.mubr.msk.bf16.gmra.mrb[24].mxu0 %vm262_vm0, %v5801_v28  ;;  %5769 = vmatmul.mubr.msk.bf16.gmra.mrb[24].mxu1 %vm262_vm0, %v5817_v33 }
  0x3f   :  { %5740 = vmatprep.mubr.msk.bf16.mxu0 %vm262_vm0, %v5802_v30  ;;  %5772 = vmatprep.mubr.msk.bf16.mxu1 %vm262_vm0, %v5818_v34 }
  0x46   :  { %5741 = vmatmul.mubr.msk.bf16.gmra.mrb[28].mxu0 %vm262_vm0, %v5803_v32  ;;  %5773 = vmatmul.mubr.msk.bf16.gmra.mrb[28].mxu1 %vm262_vm0, %v5819_v35 }
  0xe1   :  { %v5988_v36 = vpop.f32.mrb[0].mxu0  ;;  %v6010_v50 = vpop.f32.mrb[0].mxu1 }
  0xe2   :  { %v5990_v37 = vpop.f32.mrb[1].mxu0  ;;  %v789_v43 = vmul.f32 %v5988_v36, %v5988_v36  ;;  %10488 = vst [vmem:[#allocation3_spill] sm:$0xff] %v6010_v50  ;;  %v6014_v52 = vpop.f32.mrb[1].mxu1 }
  0xe3   :  { %v5992_v38 = vpop.f32.mrb[2].mxu0  ;;  %v787_v40 = vmul.f32 %v5990_v37, %v5990_v37  ;;  %10489 = vst [vmem:[#allocation4_spill] sm:$0xff] %v6014_v52  ;;  %v6021_v57 = vpop.f32.mrb[2].mxu1 }
  0xe4   :  { %v5994_v39 = vpop.f32.mrb[3].mxu0  ;;  %v790_v46 = vmul.f32 %v5992_v38, %v5992_v38  ;;  %10490 = vst [vmem:[#allocation5_spill] sm:$0xff] %v6021_v57  ;;  %v6025_v59 = vpop.f32.mrb[3].mxu1 }
  0xe5   :  { %v716_v41 = vadd.f32 %v5994_v39, %v5990_v37  ;;  %v788_v42 = vmul.f32 %v5994_v39, %v5994_v39  ;;  %10491 = vst [vmem:[#allocation6_spill] sm:$0xff] %v6025_v59 }
  0xe7   :  { %v717_v44 = vadd.f32 %v5988_v36, %v716_v41  ;;  %v851_v45 = vadd.f32 %v788_v42, %v787_v40 }
  0xe9   :  { %v852_v47 = vadd.f32 %v851_v45, %v789_v43  ;;  %v6007_v48 = vpop.f32.mrb[4].mxu0  ;;  %v718_v49 = vadd.f32 %v5992_v38, %v717_v44  ;;  %v6038_v6 = vpop.f32.mrb[4].mxu1 }
  0xea   :  { %v6012_v51 = vpop.f32.mrb[5].mxu0  ;;  %v793_v63 = vmul.f32 %v6007_v48, %v6007_v48  ;;  %10492 = vst [vmem:[#allocation7_spill] sm:$0xff] %v6038_v6  ;;  %v6042_v8 = vpop.f32.mrb[5].mxu1 }
  0xeb   :  { %v719_v53 = vadd.f32 %v718_v49, %v6012_v51  ;;  %v791_v54 = vmul.f32 %v6012_v51, %v6012_v51  ;;  %v853_v55 = vadd.f32 %v852_v47, %v790_v46  ;;  %v6019_v56 = vpop.f32.mrb[6].mxu0  ;;  %10493 = vst [vmem:[#allocation8_spill] sm:$0xff] %v6042_v8  ;;  %v6049_v13 = vpop.f32.mrb[6].mxu1 }
  0xec   :  { %v6023_v58 = vpop.f32.mrb[7].mxu0  ;;  %v794_v2 = vmul.f32 %v6019_v56, %v6019_v56  ;;  %10494 = vst [vmem:[#allocation9_spill] sm:$0xff] %v6049_v13  ;;  %v6053_v15 = vpop.f32.mrb[7].mxu1 }
  0xed   :  { %v854_v60 = vadd.f32 %v853_v55, %v791_v54  ;;  %v720_v61 = vadd.f32 %v719_v53, %v6023_v58  ;;  %v792_v62 = vmul.f32 %v6023_v58, %v6023_v58  ;;  %10495 = vst [vmem:[#allocation10_spill] sm:$0xff] %v6053_v15 }
  0xef   :  { %v721_v0 = vadd.f32 %v6007_v48, %v720_v61  ;;  %v855_v1 = vadd.f32 %v854_v60, %v792_v62 }
  0xf1   :  { %v856_v3 = vadd.f32 %v855_v1, %v793_v63  ;;  %v6035_v4 = vpop.f32.mrb[8].mxu0  ;;  %v722_v5 = vadd.f32 %v6019_v56, %v721_v0  ;;  %v6066_v26 = vpop.f32.mrb[8].mxu1 }
  0xf2   :  { %v6040_v7 = vpop.f32.mrb[9].mxu0  ;;  %v797_v19 = vmul.f32 %v6035_v4, %v6035_v4  ;;  %10496 = vst [vmem:[#allocation11_spill] sm:$0xff] %v6066_v26  ;;  %v6070_v28 = vpop.f32.mrb[9].mxu1 }
  0xf3   :  { %v723_v9 = vadd.f32 %v722_v5, %v6040_v7  ;;  %v795_v10 = vmul.f32 %v6040_v7, %v6040_v7  ;;  %v857_v11 = vadd.f32 %v856_v3, %v794_v2  ;;  %v6047_v12 = vpop.f32.mrb[10].mxu0  ;;  %10497 = vst [vmem:[#allocation12_spill] sm:$0xff] %v6070_v28  ;;  %v6077_v33 = vpop.f32.mrb[10].mxu1 }
  0xf4   :  { %v6051_v14 = vpop.f32.mrb[11].mxu0  ;;  %v798_v22 = vmul.f32 %v6047_v12, %v6047_v12  ;;  %10498 = vst [vmem:[#allocation13_spill] sm:$0xff] %v6077_v33  ;;  %v6081_v35 = vpop.f32.mrb[11].mxu1 }
  0xf5   :  { %v858_v16 = vadd.f32 %v857_v11, %v795_v10  ;;  %v724_v17 = vadd.f32 %v723_v9, %v6051_v14  ;;  %v796_v18 = vmul.f32 %v6051_v14, %v6051_v14  ;;  %10499 = vst [vmem:[#allocation14_spill] sm:$0xff] %v6081_v35 }
  0xf7   :  { %v725_v20 = vadd.f32 %v6035_v4, %v724_v17  ;;  %v859_v21 = vadd.f32 %v858_v16, %v796_v18 }
  0xf9   :  { %v860_v23 = vadd.f32 %v859_v21, %v797_v19  ;;  %v6063_v24 = vpop.f32.mrb[12].mxu0  ;;  %v726_v25 = vadd.f32 %v6047_v12, %v725_v20  ;;  %v6094_v54 = vpop.f32.mrb[12].mxu1 }
  0xfa   :  { %v6068_v27 = vpop.f32.mrb[13].mxu0  ;;  %v801_v43 = vmul.f32 %v6063_v24, %v6063_v24  ;;  %10500 = vst [vmem:[#allocation15_spill] sm:$0xff] %v6094_v54  ;;  %v6098_v60 = vpop.f32.mrb[13].mxu1 }
  0xfb   :  { %v727_v29 = vadd.f32 %v726_v25, %v6068_v27  ;;  %v799_v30 = vmul.f32 %v6068_v27, %v6068_v27  ;;  %v861_v31 = vadd.f32 %v860_v23, %v798_v22  ;;  %v6075_v32 = vpop.f32.mrb[14].mxu0  ;;  %10501 = vst [vmem:[#allocation16_spill] sm:$0xff] %v6098_v60  ;;  %v6105_v1 = vpop.f32.mrb[14].mxu1 }
  0xfc   :  { %v6079_v34 = vpop.f32.mrb[15].mxu0  ;;  %v802_v46 = vmul.f32 %v6075_v32, %v6075_v32  ;;  %10503 = vst [vmem:[#allocation18_spill] sm:$0xff] %v6105_v1  ;;  %v6109_v3 = vpop.f32.mrb[15].mxu1 }
  0xfd   :  { %v862_v40 = vadd.f32 %v861_v31, %v799_v30  ;;  %v728_v41 = vadd.f32 %v727_v29, %v6079_v34  ;;  %v800_v42 = vmul.f32 %v6079_v34, %v6079_v34  ;;  %10504 = vst [vmem:[#allocation19_spill] sm:$0xff] %v6109_v3 }
  0xff   :  { %v729_v44 = vadd.f32 %v6063_v24, %v728_v41  ;;  %v863_v45 = vadd.f32 %v862_v40, %v800_v42 }
 0x101   :  { %v864_v47 = vadd.f32 %v863_v45, %v801_v43  ;;  %v6091_v49 = vpop.f32.mrb[16].mxu0  ;;  %v730_v53 = vadd.f32 %v6075_v32, %v729_v44  ;;  %v6122_v22 = vpop.f32.mrb[16].mxu1 }
 0x102   :  { %v6096_v55 = vpop.f32.mrb[17].mxu0  ;;  %v805_v11 = vmul.f32 %v6091_v49, %v6091_v49  ;;  %10506 = vst [vmem:[#allocation21_spill] sm:$0xff] %v6122_v22  ;;  %v6126_v25 = vpop.f32.mrb[17].mxu1 }
 0x103   :  { %v731_v61 = vadd.f32 %v730_v53, %v6096_v55  ;;  %v803_v62 = vmul.f32 %v6096_v55, %v6096_v55  ;;  %v865_v63 = vadd.f32 %v864_v47, %v802_v46  ;;  %v6103_v0 = vpop.f32.mrb[18].mxu0  ;;  %10508 = vst [vmem:[#allocation23_spill] sm:$0xff] %v6126_v25  ;;  %v6133_v41 = vpop.f32.mrb[18].mxu1 }
 0x104   :  { %10502 = vst [vmem:[#allocation17_spill] sm:$0xff] %v6103_v0  ;;  %v6107_v2 = vpop.f32.mrb[19].mxu0  ;;  %v806_v18 = vmul.f32 %v6103_v0, %v6103_v0  ;;  %10510 = vst [vmem:[#allocation25_spill] sm:$0xff] %v6133_v41  ;;  %v6137_v43 = vpop.f32.mrb[19].mxu1 }
 0x105   :  { %v866_v5 = vadd.f32 %v865_v63, %v803_v62  ;;  %v732_v9 = vadd.f32 %v731_v61, %v6107_v2  ;;  %v804_v10 = vmul.f32 %v6107_v2, %v6107_v2  ;;  %10512 = vst [vmem:[#allocation27_spill] sm:$0xff] %v6137_v43 }
 0x107   :  { %v733_v16 = vadd.f32 %v6091_v49, %v732_v9  ;;  %v867_v17 = vadd.f32 %v866_v5, %v804_v10 }
 0x109   :  { %v868_v19 = vadd.f32 %v867_v17, %v805_v11  ;;  %v6119_v20 = vpop.f32.mrb[20].mxu0  ;;  %v734_v21 = vadd.f32 %v6103_v0, %v733_v16  ;;  %v6150_v10 = vpop.f32.mrb[20].mxu1 }
 0x10a   :  { %10505 = vst [vmem:[#allocation20_spill] sm:$0xff] %v6119_v20  ;;  %v6124_v23 = vpop.f32.mrb[21].mxu0  ;;  %v809_v47 = vmul.f32 %v6119_v20, %v6119_v20  ;;  %10514 = vst [vmem:[#allocation29_spill] sm:$0xff] %v6150_v10  ;;  %v6154_v16 = vpop.f32.mrb[21].mxu1 }
 0x10b   :  { %10507 = vst [vmem:[#allocation22_spill] sm:$0xff] %v6124_v23  ;;  %v735_v29 = vadd.f32 %v734_v21, %v6124_v23  ;;  %v807_v30 = vmul.f32 %v6124_v23, %v6124_v23  ;;  %v869_v31 = vadd.f32 %v868_v19, %v806_v18  ;;  %v6131_v40 = vpop.f32.mrb[22].mxu0  ;;  %10516 = vst [vmem:[#allocation31_spill] sm:$0xff] %v6154_v16 }
 0x10c   :  { %10509 = vst [vmem:[#allocation24_spill] sm:$0xff] %v6131_v40  ;;  %v6135_v42 = vpop.f32.mrb[23].mxu0  ;;  %v810_v62 = vmul.f32 %v6131_v40, %v6131_v40 }
 0x10d   :  { %10511 = vst [vmem:[#allocation26_spill] sm:$0xff] %v6135_v42  ;;  %v870_v44 = vadd.f32 %v869_v31, %v807_v30  ;;  %v736_v45 = vadd.f32 %v735_v29, %v6135_v42  ;;  %v808_v46 = vmul.f32 %v6135_v42, %v6135_v42  ;;  %v6161_v29 = vpop.f32.mrb[22].mxu1 }
 0x10e   :  { %10518 = vst [vmem:[#allocation33_spill] sm:$0xff] %v6161_v29  ;;  %v6165_v31 = vpop.f32.mrb[23].mxu1 }
 0x10f   :  { %v737_v53 = vadd.f32 %v6119_v20, %v736_v45  ;;  %v871_v61 = vadd.f32 %v870_v44, %v808_v46  ;;  %10520 = vst [vmem:[#allocation35_spill] sm:$0xff] %v6165_v31 }
 0x111   :  { %v872_v63 = vadd.f32 %v871_v61, %v809_v47  ;;  %v6147_v5 = vpop.f32.mrb[24].mxu0  ;;  %v738_v9 = vadd.f32 %v6131_v40, %v737_v53 }
 0x112   :  { %10513 = vst [vmem:[#allocation28_spill] sm:$0xff] %v6147_v5  ;;  %v6152_v11 = vpop.f32.mrb[25].mxu0  ;;  %v813_v47 = vmul.f32 %v6147_v5, %v6147_v5 }
 0x113   :  { %10515 = vst [vmem:[#allocation30_spill] sm:$0xff] %v6152_v11  ;;  %v739_v17 = vadd.f32 %v738_v9, %v6152_v11  ;;  %v811_v18 = vmul.f32 %v6152_v11, %v6152_v11  ;;  %v873_v19 = vadd.f32 %v872_v63, %v810_v62  ;;  %v6159_v21 = vpop.f32.mrb[26].mxu0 }
 0x114   :  { %10517 = vst [vmem:[#allocation32_spill] sm:$0xff] %v6159_v21  ;;  %v6163_v30 = vpop.f32.mrb[27].mxu0  ;;  %v814_v62 = vmul.f32 %v6159_v21, %v6159_v21 }
 0x115   :  { %10519 = vst [vmem:[#allocation34_spill] sm:$0xff] %v6163_v30  ;;  %v874_v44 = vadd.f32 %v873_v19, %v811_v18  ;;  %v740_v45 = vadd.f32 %v739_v17, %v6163_v30  ;;  %v812_v46 = vmul.f32 %v6163_v30, %v6163_v30  ;;  %v6178_v18 = vpop.f32.mrb[24].mxu1 }
 0x116   :  { %10522 = vst [vmem:[#allocation37_spill] sm:$0xff] %v6178_v18  ;;  %v6182_v19 = vpop.f32.mrb[25].mxu1 }
 0x117   :  { %v741_v53 = vadd.f32 %v6147_v5, %v740_v45  ;;  %v875_v61 = vadd.f32 %v874_v44, %v812_v46  ;;  %10524 = vst [vmem:[#allocation39_spill] sm:$0xff] %v6182_v19  ;;  %v6189_v5 = vpop.f32.mrb[26].mxu1 }
 0x118   :  { %10526 = vst [vmem:[#allocation41_spill] sm:$0xff] %v6189_v5 }
 0x119   :  { %v876_v63 = vadd.f32 %v875_v61, %v813_v47  ;;  %v6175_v9 = vpop.f32.mrb[28].mxu0  ;;  %v742_v11 = vadd.f32 %v6159_v21, %v741_v53  ;;  %v6193_v61 = vpop.f32.mrb[27].mxu1 }
 0x11a   :  { %10521 = vst [vmem:[#allocation36_spill] sm:$0xff] %v6175_v9  ;;  %v6180_v17 = vpop.f32.mrb[29].mxu0  ;;  %10528 = vst [vmem:[#allocation43_spill] sm:$0xff] %v6193_v61 }
 0x11b   :  { %10523 = vst [vmem:[#allocation38_spill] sm:$0xff] %v6180_v17  ;;  %v743_v30 = vadd.f32 %v742_v11, %v6180_v17  ;;  %v815_v45 = vmul.f32 %v6180_v17, %v6180_v17  ;;  %v877_v44 = vadd.f32 %v876_v63, %v814_v62  ;;  %v6187_v46 = vpop.f32.mrb[30].mxu0  ;;  %v817_v11 = vmul.f32 %v6175_v9, %v6175_v9 }
 0x11c   :  { %10525 = vst [vmem:[#allocation40_spill] sm:$0xff] %v6187_v46  ;;  %v6191_v47 = vpop.f32.mrb[31].mxu0  ;;  %v818_v63 = vmul.f32 %v6187_v46, %v6187_v46 }
 0x11d   :  { %10527 = vst [vmem:[#allocation42_spill] sm:$0xff] %v6191_v47  ;;  %v878_v53 = vadd.f32 %v877_v44, %v815_v45  ;;  %v744_v21 = vadd.f32 %v743_v30, %v6191_v47  ;;  %v816_v40 = vmul.f32 %v6191_v47, %v6191_v47  ;;  %v819_v45 = vmul.f32 %v6014_v52, %v6014_v52  ;;  %v6206_v44 = vpop.f32.mrb[28].mxu1 }
 0x11e   :  { %10529 = vst [vmem:[#allocation44_spill] sm:$0xff] %v6206_v44  ;;  %v6208_v30 = vpop.f32.mrb[29].mxu1 }
 0x11f   :  { %v745_v17 = vadd.f32 %v6175_v9, %v744_v21  ;;  %v879_v62 = vadd.f32 %v878_v53, %v816_v40  ;;  %10530 = vst [vmem:[#allocation45_spill] sm:$0xff] %v6208_v30  ;;  %v6211_v0 = vpop.f32.mrb[30].mxu1  ;;  %v824_v9 = vmul.f32 %v6053_v15, %v6053_v15 }
 0x120   :  { %10531 = vst [vmem:[#allocation46_spill] sm:$0xff] %v6211_v0  ;;  %v6213_v21 = vpop.f32.mrb[31].mxu1 }
 0x121   :  { %v880_v20 = vadd.f32 %v879_v62, %v817_v11  ;;  %v746_v42 = vadd.f32 %v6187_v46, %v745_v17  ;;  %10532 = vst [vmem:[#allocation47_spill] sm:$0xff] %v6213_v21  ;;  %v820_v17 = vmul.f32 %v6025_v59, %v6025_v59  ;;  %v821_v11 = vmul.f32 %v6010_v50, %v6010_v50 }
 0x123   :  { %v747_v47 = vadd.f32 %v746_v42, %v6014_v52  ;;  %v881_v23 = vadd.f32 %v880_v20, %v818_v63  ;;  %v822_v42 = vmul.f32 %v6021_v57, %v6021_v57 }
 0x125   :  { %v882_v40 = vadd.f32 %v881_v23, %v819_v45  ;;  %v748_v53 = vadd.f32 %v747_v47, %v6025_v59  ;;  %v823_v23 = vmul.f32 %v6042_v8, %v6042_v8 }
 0x127   :  { %v749_v62 = vadd.f32 %v6010_v50, %v748_v53  ;;  %v883_v46 = vadd.f32 %v882_v40, %v820_v17  ;;  %v825_v40 = vmul.f32 %v6038_v6, %v6038_v6  ;;  %v826_v17 = vmul.f32 %v6049_v13, %v6049_v13 }
 0x129   :  { %v884_v20 = vadd.f32 %v883_v46, %v821_v11  ;;  %v750_v63 = vadd.f32 %v6021_v57, %v749_v62 }
 0x12b   :  { %v751_v47 = vadd.f32 %v750_v63, %v6042_v8  ;;  %v885_v45 = vadd.f32 %v884_v20, %v822_v42  ;;  %v827_v42 = vmul.f32 %v6070_v28, %v6070_v28 }
 0x12d   :  { %v886_v52 = vadd.f32 %v885_v45, %v823_v23  ;;  %v752_v59 = vadd.f32 %v751_v47, %v6053_v15  ;;  %v828_v45 = vmul.f32 %v6081_v35, %v6081_v35 }
 0x12f   :  { %v753_v53 = vadd.f32 %v6038_v6, %v752_v59  ;;  %v887_v46 = vadd.f32 %v886_v52, %v824_v9  ;;  %v829_v52 = vmul.f32 %v6066_v26, %v6066_v26 }
 0x131   :  { %v888_v11 = vadd.f32 %v887_v46, %v825_v40  ;;  %v754_v62 = vadd.f32 %v6049_v13, %v753_v53  ;;  %v830_v40 = vmul.f32 %v6077_v33, %v6077_v33 }
 0x133   :  { %v755_v20 = vadd.f32 %v754_v62, %v6070_v28  ;;  %v889_v63 = vadd.f32 %v888_v11, %v826_v17  ;;  %v831_v17 = vmul.f32 %v6098_v60, %v6098_v60 }
 0x135   :  { %v890_v23 = vadd.f32 %v889_v63, %v827_v42  ;;  %v756_v47 = vadd.f32 %v755_v20, %v6081_v35  ;;  %v832_v63 = vmul.f32 %v6109_v3, %v6109_v3 }
 0x137   :  { %v757_v59 = vadd.f32 %v6066_v26, %v756_v47  ;;  %v891_v9 = vadd.f32 %v890_v23, %v828_v45  ;;  %v833_v23 = vmul.f32 %v6094_v54, %v6094_v54 }
 0x139   :  { %v892_v53 = vadd.f32 %v891_v9, %v829_v52  ;;  %v758_v46 = vadd.f32 %v6077_v33, %v757_v59  ;;  %v834_v52 = vmul.f32 %v6105_v1, %v6105_v1 }
 0x13b   :  { %v759_v11 = vadd.f32 %v758_v46, %v6098_v60  ;;  %v893_v62 = vadd.f32 %v892_v53, %v830_v40  ;;  %v835_v40 = vmul.f32 %v6126_v25, %v6126_v25 }
 0x13d   :  { %v894_v42 = vadd.f32 %v893_v62, %v831_v17  ;;  %v760_v20 = vadd.f32 %v759_v11, %v6109_v3  ;;  %v836_v62 = vmul.f32 %v6137_v43, %v6137_v43 }
 0x13f   :  { %v761_v47 = vadd.f32 %v6094_v54, %v760_v20  ;;  %v895_v45 = vadd.f32 %v894_v42, %v832_v63  ;;  %v837_v42 = vmul.f32 %v6122_v22, %v6122_v22 }
 0x141   :  { %v896_v59 = vadd.f32 %v895_v45, %v833_v23  ;;  %v762_v9 = vadd.f32 %v6105_v1, %v761_v47  ;;  %v838_v23 = vmul.f32 %v6133_v41, %v6133_v41 }
 0x143   :  { %v763_v53 = vadd.f32 %v762_v9, %v6126_v25  ;;  %v897_v46 = vadd.f32 %v896_v59, %v834_v52  ;;  %v839_v52 = vmul.f32 %v6154_v16, %v6154_v16 }
 0x145   :  { %v898_v17 = vadd.f32 %v897_v46, %v835_v40  ;;  %v764_v11 = vadd.f32 %v763_v53, %v6137_v43  ;;  %v840_v46 = vmul.f32 %v6165_v31, %v6165_v31 }
 0x147   :  { %v765_v20 = vadd.f32 %v6122_v22, %v764_v11  ;;  %v899_v63 = vadd.f32 %v898_v17, %v836_v62  ;;  %v841_v17 = vmul.f32 %v6150_v10, %v6150_v10 }
 0x149   :  { %v900_v47 = vadd.f32 %v899_v63, %v837_v42  ;;  %v766_v45 = vadd.f32 %v6133_v41, %v765_v20  ;;  %v842_v42 = vmul.f32 %v6161_v29, %v6161_v29 }
 0x14b   :  { %v767_v59 = vadd.f32 %v766_v45, %v6154_v16  ;;  %v901_v9 = vadd.f32 %v900_v47, %v838_v23  ;;  %v843_v23 = vmul.f32 %v6182_v19, %v6182_v19 }
 0x14d   :  { %v902_v40 = vadd.f32 %v901_v9, %v839_v52  ;;  %v768_v53 = vadd.f32 %v767_v59, %v6165_v31  ;;  %v844_v9 = vmul.f32 %v6193_v61, %v6193_v61 }
 0x14f   :  { %v769_v11 = vadd.f32 %v6150_v10, %v768_v53  ;;  %v903_v62 = vadd.f32 %v902_v40, %v840_v46  ;;  %v845_v40 = vmul.f32 %v6178_v18, %v6178_v18 }
 0x151   :  { %v904_v20 = vadd.f32 %v903_v62, %v841_v17  ;;  %v770_v63 = vadd.f32 %v6161_v29, %v769_v11  ;;  %v846_v17 = vmul.f32 %v6189_v5, %v6189_v5 }
 0x153   :  { %v771_v47 = vadd.f32 %v770_v63, %v6182_v19  ;;  %v905_v45 = vadd.f32 %v904_v20, %v842_v42  ;;  %v847_v42 = vmul.f32 %v6208_v30, %v6208_v30 }
 0x155   :  { %v906_v52 = vadd.f32 %v905_v45, %v843_v23  ;;  %v772_v59 = vadd.f32 %v771_v47, %v6193_v61  ;;  %v848_v45 = vmul.f32 %v6213_v21, %v6213_v21 }
 0x157   :  { %v773_v53 = vadd.f32 %v6178_v18, %v772_v59  ;;  %v907_v46 = vadd.f32 %v906_v52, %v844_v9  ;;  %v849_v52 = vmul.f32 %v6206_v44, %v6206_v44 }
 0x159   :  { %v908_v11 = vadd.f32 %v907_v46, %v845_v40  ;;  %v774_v62 = vadd.f32 %v6189_v5, %v773_v53  ;;  %v850_v40 = vmul.f32 %v6211_v0, %v6211_v0 }
 0x15b   :  { %v775_v20 = vadd.f32 %v774_v62, %v6208_v30  ;;  %v909_v63 = vadd.f32 %v908_v11, %v846_v17 }
 0x15d   :  { %v910_v23 = vadd.f32 %v909_v63, %v847_v42  ;;  %v776_v47 = vadd.f32 %v775_v20, %v6213_v21 }
 0x15f   :  { %v777_v59 = vadd.f32 %v6206_v44, %v776_v47  ;;  %v911_v9 = vadd.f32 %v910_v23, %v848_v45 }
 0x161   :  { %v778_v53 = vadd.f32 %v6211_v0, %v777_v59  ;;  %v912_v46 = vadd.f32 %v911_v9, %v849_v52  ;;  %v964_v52 = vlaneseq }
 0x163   :  { %v779_v62 = vrot.slane %v778_v53, 4  ;;  %v913_v17 = vadd.f32 %v912_v46, %v850_v40  ;;  %v965_v9 = vshrl.u32 %v964_v52, 7  ;;  %v924_v40 = vld [vmem:[%s10198_s2] sm:$0x1] }
 0x165   :  { %v780_v11 = vadd.f32 %v779_v62, %v778_v53  ;;  %v914_v42 = vrot.slane %v913_v17, 4  ;;  %v966_v53 = vsub.s32 0, %v965_v9  ;;  %v5822_v62 = vmov 1983009808  }
 0x167   :  { %v781_v20 = vrot.slane %v780_v11, 2  ;;  %v915_v63 = vadd.f32 %v914_v42, %v913_v17 }
 0x169   :  { %v782_v30 = vadd.f32 %v781_v20, %v780_v11  ;;  %v916_v21 = vrot.slane %v915_v63, 2 }
 0x16b   :  { %v783_v5 = vrot.slane %v782_v30, 1  ;;  %v917_v18 = vadd.f32 %v916_v21, %v915_v63  ;;  %v1105_v21 = vunpack.c.l.s4 %v5822_v62  ;;  %v10541_v62 = vld [vmem:[#allocation28_spill] sm:$0xff] }
 0x16d   :  { %v784_v61 = vadd.f32 %v783_v5, %v782_v30  ;;  %v918_v19 = vrot.slane %v917_v18, 1 }
 0x16f   :  { %v786_v47 = vmul.f32 0.001953125, %v784_v61  ;;  %v919_v23 = vadd.f32 %v918_v19, %v917_v18  ;;  %v928_v18 = vld [vmem:[%s10199_s3] sm:$0x1] }
 0x171   :  { %v920_v45 = vmul.f32 0.001953125, %v919_v23  ;;  %v921_v44 = vmul.f32 %v786_v47, %v786_v47  ;;  %v10535_v23 = vld [vmem:[#allocation22_spill] sm:$0xff] }
 0x173   :  { %v922_v29 = vsub.f32 %v920_v45, %v921_v44  ;;  %v10536_v45 = vld [vmem:[#allocation26_spill] sm:$0xff] }
 0x175   :  { %v923_v10 = vmax.f32 %v922_v29, 0.0 }
 0x177   :  { %v925_v59 = vadd.f32 0.0001, %v923_v10  ;;  %v1106_v10 = vunpack.c.0.s8 %v1105_v21 }
 0x179   :  { %5820 = vrsqrt.f32 %v925_v59 }
 0x183   :  { %v5821_v46 = vpop.eup %5820 }
 0x184   :  { %v927_v5 = vmul.f32 %v5821_v46, %v924_v40  ;;  %v10539_v40 = vld [vmem:[#allocation30_spill] sm:$0xff] }
 0x185   :  { %v10540_v46 = vld [vmem:[#allocation34_spill] sm:$0xff] }
 0x186   :  { %v929_v19 = vmul.f32 %v927_v5, %v786_v47  ;;  %v6314_v61 = vrot.slane %v927_v5, %v966_v53  ;;  %v10542_v5 = vld [vmem:[#allocation32_spill] sm:$0xff] }
 0x188   :  { %10533 = vst [vmem:[#allocation48_spill] sm:$0xff] %v6314_v61  ;;  %v930_v29 = vsub.f32 %v928_v18, %v929_v19  ;;  %v969_v44 = vmul.f32 %v6314_v61, %v5990_v37  ;;  %v970_v30 = vmul.f32 %v6314_v61, %v5994_v39  ;;  %v971_v17 = vmul.f32 %v5988_v36, %v6314_v61  ;;  %v10543_v19 = vld [vmem:[#allocation38_spill] sm:$0xff] }
 0x189   :  { %v972_v11 = vmul.f32 %v5992_v38, %v6314_v61  ;;  %v973_v42 = vmul.f32 %v6314_v61, %v6012_v51  ;;  %v974_v20 = vmul.f32 %v6314_v61, %v6023_v58  ;;  %v975_v63 = vmul.f32 %v6007_v48, %v6314_v61 }
 0x18a   :  { %v976_v37 = vmul.f32 %v6019_v56, %v6314_v61  ;;  %v977_v39 = vmul.f32 %v6314_v61, %v6040_v7  ;;  %v978_v36 = vmul.f32 %v6314_v61, %v6051_v14  ;;  %v979_v38 = vmul.f32 %v6035_v4, %v6314_v61 }
 0x18b   :  { %v980_v51 = vmul.f32 %v6047_v12, %v6314_v61  ;;  %v981_v58 = vmul.f32 %v6314_v61, %v6068_v27  ;;  %v982_v48 = vmul.f32 %v6314_v61, %v6079_v34  ;;  %v983_v56 = vmul.f32 %v6063_v24, %v6314_v61  ;;  %v10534_v27 = vld [vmem:[#allocation17_spill] sm:$0xff] }
 0x18c   :  { %v984_v7 = vmul.f32 %v6075_v32, %v6314_v61  ;;  %v985_v14 = vmul.f32 %v6314_v61, %v6096_v55  ;;  %v986_v4 = vmul.f32 %v6314_v61, %v6107_v2  ;;  %v987_v12 = vmul.f32 %v6091_v49, %v6314_v61  ;;  %v10537_v32 = vld [vmem:[#allocation20_spill] sm:$0xff] }
 0x18d   :  { %v988_v47 = vmul.f32 %v10534_v27, %v6314_v61  ;;  %v989_v34 = vmul.f32 %v6314_v61, %v10535_v23  ;;  %v990_v24 = vmul.f32 %v6314_v61, %v10536_v45  ;;  %v991_v59 = vmul.f32 %v10537_v32, %v6314_v61  ;;  %v10538_v55 = vld [vmem:[#allocation24_spill] sm:$0xff]  ;;  %v10544_v23 = vld [vmem:[#allocation42_spill] sm:$0xff] }
 0x18e   :  { %v992_v52 = vmul.f32 %v10538_v55, %v6314_v61  ;;  %v993_v2 = vmul.f32 %v6314_v61, %v10539_v40  ;;  %v994_v49 = vmul.f32 %v6314_v61, %v10540_v46  ;;  %v995_v21 = vmul.f32 %v10541_v62, %v6314_v61  ;;  %v10545_v32 = vld [vmem:[#allocation36_spill] sm:$0xff] }
 0x18f   :  { %v996_v18 = vmul.f32 %v10542_v5, %v6314_v61  ;;  %v997_v27 = vmul.f32 %v6314_v61, %v10543_v19  ;;  %v998_v45 = vmul.f32 %v6314_v61, %v10544_v23  ;;  %v999_v55 = vmul.f32 %v10545_v32, %v6314_v61  ;;  %v10546_v40 = vld [vmem:[#allocation40_spill] sm:$0xff] }
 0x190   :  { %v1000_v0 = vmul.f32 %v10546_v40, %v6314_v61  ;;  %v6380_v31 = vrot.slane %v930_v29, %v966_v53  ;;  %v6382_v46 = vsub.s32 %v1106_v10, %v965_v9 }
 0x192   :  { %10547 = vst [vmem:[#allocation17_spill] sm:$0xff] %v6380_v31  ;;  %10548 = vst [vmem:[#allocation22_spill] sm:$0xff] %v6382_v46  ;;  %v1007_v62 = vadd.f32 %v6380_v31, %v969_v44  ;;  %v1008_v5 = vadd.f32 %v6380_v31, %v970_v30  ;;  %v1009_v16 = vadd.f32 %v6380_v31, %v971_v17 }
 0x193   :  { %v1010_v19 = vadd.f32 %v6380_v31, %v972_v11  ;;  %v1011_v23 = vadd.f32 %v6380_v31, %v973_v42  ;;  %v1012_v41 = vadd.f32 %v6380_v31, %v974_v20  ;;  %v1013_v32 = vadd.f32 %v6380_v31, %v975_v63 }
 0x194   :  { %v1014_v40 = vadd.f32 %v6380_v31, %v976_v37  ;;  %v1015_v53 = vadd.f32 %v6380_v31, %v977_v39  ;;  %v1016_v9 = vadd.f32 %v6380_v31, %v978_v36  ;;  %v1017_v10 = vadd.f32 %v6380_v31, %v979_v38 }
 0x195   :  { %v1018_v29 = vadd.f32 %v6380_v31, %v980_v51  ;;  %v1019_v44 = vadd.f32 %v6380_v31, %v981_v58  ;;  %v1020_v30 = vadd.f32 %v6380_v31, %v982_v48  ;;  %v1021_v17 = vadd.f32 %v6380_v31, %v983_v56 }
 0x196   :  { %v1022_v11 = vadd.f32 %v6380_v31, %v984_v7  ;;  %v1023_v42 = vadd.f32 %v6380_v31, %v985_v14  ;;  %v1024_v20 = vadd.f32 %v6380_v31, %v986_v4  ;;  %v1025_v63 = vadd.f32 %v6380_v31, %v987_v12 }
 0x197   :  { %v1026_v37 = vadd.f32 %v6380_v31, %v988_v47  ;;  %v1027_v39 = vadd.f32 %v6380_v31, %v989_v34  ;;  %v1028_v36 = vadd.f32 %v6380_v31, %v990_v24  ;;  %v1029_v38 = vadd.f32 %v6380_v31, %v991_v59 }
 0x198   :  { %v1030_v51 = vadd.f32 %v6380_v31, %v992_v52  ;;  %v1031_v58 = vadd.f32 %v6380_v31, %v993_v2  ;;  %v1032_v48 = vadd.f32 %v6380_v31, %v994_v49  ;;  %v1033_v56 = vadd.f32 %v6380_v31, %v995_v21 }
 0x199   :  { %v1034_v7 = vadd.f32 %v6380_v31, %v996_v18  ;;  %v1035_v14 = vadd.f32 %v6380_v31, %v997_v27  ;;  %v1036_v4 = vadd.f32 %v6380_v31, %v998_v45  ;;  %v1037_v12 = vadd.f32 %v6380_v31, %v999_v55 }
 0x19a   :  { %v1038_v47 = vadd.f32 %v6380_v31, %v1000_v0  ;;  %v1039_v34 = vmax.f32 %v1007_v62, 0.0  ;;  %v1040_v24 = vmax.f32 %v1008_v5, 0.0  ;;  %v1041_v59 = vmax.f32 %v1009_v16, 0.0 }
 0x19b   :  { %v1042_v52 = vmax.f32 %v1010_v19, 0.0  ;;  %v1043_v22 = vmax.f32 %v1011_v23, 0.0  ;;  %v1044_v2 = vmax.f32 %v1012_v41, 0.0  ;;  %v1045_v43 = vmax.f32 %v1013_v32, 0.0 }
 0x19c   :  { %v6416_v49 = vmax.f32 %v1014_v40, 0.0  ;;  %v6418_v21 = vmax.f32 %v1015_v53, 0.0  ;;  %v6420_v18 = vmax.f32 %v1016_v9, 0.0  ;;  %v6422_v27 = vmax.f32 %v1017_v10, 0.0 }
 0x19d   :  { %v6424_v45 = vmax.f32 %v1018_v29, 0.0  ;;  %v6426_v55 = vmax.f32 %v1019_v44, 0.0  ;;  %v6428_v0 = vmax.f32 %v1020_v30, 0.0  ;;  %v6430_v62 = vmax.f32 %v1021_v17, 0.0 }
 0x19e   :  { %v6432_v16 = vmax.f32 %v1022_v11, 0.0  ;;  %v6434_v41 = vmax.f32 %v1023_v42, 0.0  ;;  %v6436_v5 = vmax.f32 %v1024_v20, 0.0  ;;  %v6438_v19 = vmax.f32 %v1025_v63, 0.0 }
 0x19f   :  { %v6440_v23 = vmax.f32 %v1026_v37, 0.0  ;;  %v6442_v32 = vmax.f32 %v1027_v39, 0.0  ;;  %v6444_v40 = vmax.f32 %v1028_v36, 0.0  ;;  %v6446_v53 = vmax.f32 %v1029_v38, 0.0 }
 0x1a0   :  { %v6448_v9 = vmax.f32 %v1030_v51, 0.0  ;;  %v6450_v10 = vmax.f32 %v1031_v58, 0.0  ;;  %v6452_v29 = vmax.f32 %v1032_v48, 0.0  ;;  %v6454_v44 = vmax.f32 %v1033_v56, 0.0 }
 0x1a1   :  { %v6456_v30 = vmax.f32 %v1034_v7, 0.0  ;;  %v6458_v17 = vmax.f32 %v1035_v14, 0.0  ;;  %v6460_v11 = vmax.f32 %v1036_v4, 0.0  ;;  %v6462_v42 = vmax.f32 %v1037_v12, 0.0 }
 0x1a2   :  { %v6464_v20 = vmax.f32 %v1038_v47, 0.0  ;;  %v1103_v63 = vcombine.high %v1039_v34, %v1039_v34  ;;  %v6467_v37 = vrot.slane %v1039_v34, %v6382_v46  ;;  %v1120_v39 = vcombine.high %v1040_v24, %v1040_v24 }
 0x1a3   :  { %v6470_v36 = vrot.slane %v1040_v24, %v6382_v46  ;;  %v1137_v38 = vcombine.high %v1041_v59, %v1041_v59  ;;  %v6473_v51 = vrot.slane %v1041_v59, %v6382_v46  ;;  %v1154_v58 = vcombine.high %v1042_v52, %v1042_v52 }
 0x1a4   :  { %v6476_v48 = vrot.slane %v1042_v52, %v6382_v46  ;;  %v6479_v56 = vrot.slane %v1103_v63, %v6382_v46  ;;  %v6484_v14 = vrot.slane %v1120_v39, %v6382_v46  ;;  %v1171_v63 = vcombine.high %v1043_v22, %v1043_v22 }
 0x1a5   :  { %v6489_v12 = vrot.slane %v1137_v38, %v6382_v46  ;;  %v6494_v34 = vrot.slane %v1154_v58, %v6382_v46  ;;  %v6503_v39 = vrot.slane %v1043_v22, %v6382_v46  ;;  %v1188_v47 = vcombine.high %v1044_v2, %v1044_v2 }
 0x1a6   :  { %v6510_v4 = vrot.slane %v1044_v2, %v6382_v46  ;;  %v6513_v24 = vrot.slane %v1171_v63, %v6382_v46  ;;  %v1205_v59 = vcombine.high %v1045_v43, %v1045_v43  ;;  %v6518_v22 = vrot.slane %v1045_v43, %v6382_v46 }
 0x1a7   :  { %v6521_v7 = vrot.slane %v1188_v47, %v6382_v46  ;;  %v1222_v2 = vcombine.high %v6416_v49, %v6416_v49  ;;  %v6529_v63 = vrot.slane %v6416_v49, %v6382_v46  ;;  %v1239_v47 = vcombine.high %v6418_v21, %v6418_v21 }
 0x1a8   :  { %v6534_v38 = vrot.slane %v1205_v59, %v6382_v46  ;;  %v6549_v52 = vrot.slane %v6418_v21, %v6382_v46  ;;  %v1256_v25 = vcombine.high %v6420_v18, %v6420_v18  ;;  %v1273_v58 = vcombine.high %v6422_v27, %v6422_v27 }
 0x1a9   :  { %v6543_v31 = vrot.slane %v1222_v2, %v6382_v46  ;;  %v6554_v43 = vrot.slane %v1239_v47, %v6382_v46  ;;  %v6560_v2 = vrot.slane %v6420_v18, %v6382_v46  ;;  %v6570_v47 = vrot.slane %v6422_v27, %v6382_v46 }
 0x1aa   :  { %v6575_v1 = vrot.slane %v1256_v25, %v6382_v46  ;;  %v1290_v49 = vcombine.high %v6424_v45, %v6424_v45  ;;  %v6582_v21 = vrot.slane %v1273_v58, %v6382_v46  ;;  %v6588_v27 = vrot.slane %v6424_v45, %v6382_v46 }
 0x1ab   :  { %v1307_v25 = vcombine.high %v6426_v55, %v6426_v55  ;;  %v6599_v58 = vrot.slane %v6426_v55, %v6382_v46  ;;  %v1324_v54 = vcombine.high %v6428_v0, %v6428_v0  ;;  %v1341_v45 = vcombine.high %v6430_v62, %v6430_v62 }
 0x1ac   :  { %v6595_v18 = vrot.slane %v1290_v49, %v6382_v46  ;;  %v6612_v49 = vrot.slane %v6428_v0, %v6382_v46  ;;  %v6629_v0 = vrot.slane %v6430_v62, %v6382_v46  ;;  %v1358_v55 = vcombine.high %v6432_v16, %v6432_v16 }
 0x1ad   :  { %v6608_v60 = vrot.slane %v1307_v25, %v6382_v46  ;;  %v6619_v33 = vrot.slane %v1324_v54, %v6382_v46  ;;  %v6636_v59 = vrot.slane %v1341_v45, %v6382_v46  ;;  %v6640_v26 = vrot.slane %v6432_v16, %v6382_v46 }
 0x1ae   :  { %v1375_v3 = vcombine.high %v6434_v41, %v6434_v41  ;;  %v6647_v25 = vrot.slane %v1358_v55, %v6382_v46  ;;  %v6651_v35 = vrot.slane %v6434_v41, %v6382_v46  ;;  %v1392_v45 = vcombine.high %v6436_v5, %v6436_v5 }
 0x1af   :  { %v6664_v55 = vrot.slane %v6436_v5, %v6382_v46  ;;  %v1409_v16 = vcombine.high %v6438_v19, %v6438_v19  ;;  %v6681_v5 = vrot.slane %v6438_v19, %v6382_v46  ;;  %v1426_v41 = vcombine.high %v6440_v23, %v6440_v23 }
 0x1b0   :  { %v6660_v28 = vrot.slane %v1375_v3, %v6382_v46  ;;  %v6671_v13 = vrot.slane %v1392_v45, %v6382_v46  ;;  %v6692_v6 = vrot.slane %v6440_v23, %v6382_v46  ;;  %v1443_v54 = vcombine.high %v6442_v32, %v6442_v32 }
 0x1b1   :  { %v6688_v62 = vrot.slane %v1409_v16, %v6382_v46  ;;  %v6699_v3 = vrot.slane %v1426_v41, %v6382_v46  ;;  %v6703_v15 = vrot.slane %v6442_v32, %v6382_v46  ;;  %v1460_v16 = vcombine.high %v6444_v40, %v6444_v40 }
 0x1b2   :  { %10550 = vst [vmem:[#allocation20_spill] sm:$0xff] %v6692_v6  ;;  %v6712_v8 = vrot.slane %v1443_v54, %v6382_v46  ;;  %v6716_v41 = vrot.slane %v6444_v40, %v6382_v46  ;;  %v1477_v23 = vcombine.high %v6446_v53, %v6446_v53  ;;  %v6733_v40 = vrot.slane %v6446_v53, %v6382_v46 }
 0x1b3   :  { %10549 = vst [vmem:[#allocation26_spill] sm:$0xff] %v6688_v62  ;;  %10551 = vst [vmem:[#allocation24_spill] sm:$0xff] %v6699_v3  ;;  %v6723_v57 = vrot.slane %v1460_v16, %v6382_v46  ;;  %v1494_v32 = vcombine.high %v6448_v9, %v6448_v9  ;;  %v6744_v50 = vrot.slane %v6448_v9, %v6382_v46 }
 0x1b4   :  { %10552 = vst [vmem:[#allocation30_spill] sm:$0xff] %v6703_v15  ;;  %10553 = vst [vmem:[#allocation34_spill] sm:$0xff] %v6712_v8  ;;  %v6740_v19 = vrot.slane %v1477_v23, %v6382_v46  ;;  %v1511_v45 = vcombine.high %v6450_v10, %v6450_v10  ;;  %v6755_v61 = vrot.slane %v6450_v10, %v6382_v46 }
 0x1b5   :  { %10554 = vst [vmem:[#allocation28_spill] sm:$0xff] %v6716_v41  ;;  %10555 = vst [vmem:[#allocation32_spill] sm:$0xff] %v6723_v57  ;;  %v6751_v54 = vrot.slane %v1494_v32, %v6382_v46  ;;  %v1528_v23 = vcombine.high %v6452_v29, %v6452_v29  ;;  %v6768_v32 = vrot.slane %v6452_v29, %v6382_v46 }
 0x1b6   :  { %10556 = vst [vmem:[#allocation38_spill] sm:$0xff] %v6733_v40  ;;  %10557 = vst [vmem:[#allocation42_spill] sm:$0xff] %v6740_v19  ;;  %v6764_v57 = vrot.slane %v1511_v45, %v6382_v46  ;;  %v1545_v9 = vcombine.high %v6454_v44, %v6454_v44  ;;  %v6785_v29 = vrot.slane %v6454_v44, %v6382_v46 }
 0x1b7   :  { %10558 = vst [vmem:[#allocation36_spill] sm:$0xff] %v6744_v50  ;;  %10559 = vst [vmem:[#allocation40_spill] sm:$0xff] %v6751_v54  ;;  %v6775_v40 = vrot.slane %v1528_v23, %v6382_v46  ;;  %v1562_v10 = vcombine.high %v6456_v30, %v6456_v30  ;;  %v1579_v16 = vcombine.high %v6458_v17, %v6458_v17  ;;  %v1775_v23 = vsel %vm359_vm1, %v6467_v37, -inf }
 0x1b8   :  { %10560 = vst [vmem:[#allocation49_spill] sm:$0xff] %v6755_v61  ;;  %10561 = vst [vmem:[#allocation50_spill] sm:$0xff] %v6764_v57  ;;  %v6792_v53 = vrot.slane %v1545_v9, %v6382_v46  ;;  %v6796_v61 = vrot.slane %v6456_v30, %v6382_v46  ;;  %v1596_v9 = vcombine.high %v6460_v11, %v6460_v11 }
 0x1b9   :  { %10562 = vst [vmem:[#allocation51_spill] sm:$0xff] %v6768_v32  ;;  %10563 = vst [vmem:[#allocation52_spill] sm:$0xff] %v6775_v40  ;;  %v6803_v45 = vrot.slane %v1562_v10, %v6382_v46  ;;  %v6807_v32 = vrot.slane %v6458_v17, %v6382_v46  ;;  %v6816_v40 = vrot.slane %v1579_v16, %v6382_v46 }
 0x1ba   :  { %10564 = vst [vmem:[#allocation53_spill] sm:$0xff] %v6785_v29  ;;  %10565 = vst [vmem:[#allocation54_spill] sm:$0xff] %v6792_v53  ;;  %v6820_v10 = vrot.slane %v6460_v11, %v6382_v46  ;;  %v6827_v29 = vrot.slane %v1596_v9, %v6382_v46  ;;  %v1613_v30 = vcombine.high %v6462_v42, %v6462_v42 }
 0x1bb   :  { %10566 = vst [vmem:[#allocation55_spill] sm:$0xff] %v6796_v61  ;;  %10567 = vst [vmem:[#allocation56_spill] sm:$0xff] %v6803_v45  ;;  %v6837_v11 = vrot.slane %v6462_v42, %v6382_v46  ;;  %v1630_v17 = vcombine.high %v6464_v20, %v6464_v20  ;;  %v10576_v9 = vcombine.high %v6467_v37, %v6467_v37  ;;  %v1789_v45 = vsel %vm359_vm1, %v6479_v56, -inf }
 0x1bc   :  { %10568 = vst [vmem:[#allocation57_spill] sm:$0xff] %v6807_v32  ;;  %10569 = vst [vmem:[#allocation58_spill] sm:$0xff] %v6816_v40  ;;  %v6844_v44 = vrot.slane %v1613_v30, %v6382_v46  ;;  %v6848_v32 = vrot.slane %v6464_v20, %v6382_v46  ;;  %v10577_v37 = vcombine.high %v6479_v56, %v6479_v56  ;;  %v1817_v56 = vsel %vm359_vm1, %v6484_v14, -inf }
 0x1bd   :  { %10570 = vst [vmem:[#allocation59_spill] sm:$0xff] %v6820_v10  ;;  %10571 = vst [vmem:[#allocation60_spill] sm:$0xff] %v6827_v29  ;;  %v6855_v16 = vrot.slane %v1630_v17, %v6382_v46  ;;  %v1776_v10 = vrot.slane %v1775_v23, 4  ;;  %v1782_v30 = vsel %vm359_vm1, %v10576_v9, -inf  ;;  %v1790_v46 = vrot.slane %v1789_v45, 4 }
 0x1be   :  { %10572 = vst [vmem:[#allocation61_spill] sm:$0xff] %v6837_v11  ;;  %10573 = vst [vmem:[#allocation62_spill] sm:$0xff] %v6844_v44  ;;  %v1783_v40 = vrot.slane %v1782_v30, 4  ;;  %v1796_v9 = vsel %vm359_vm1, %v10577_v37, -inf  ;;  %v1803_v29 = vsel %vm359_vm1, %v6470_v36, -inf  ;;  %v10578_v20 = vcombine.high %v6470_v36, %v6470_v36 }
 0x1bf   :  { %10574 = vst [vmem:[#allocation63_spill] sm:$0xff] %v6848_v32  ;;  %10575 = vst [vmem:[#allocation64_spill] sm:$0xff] %v6855_v16  ;;  %v1777_v42 = vmax.f32 %v1775_v23, %v1776_v10  ;;  %v1797_v61 = vrot.slane %v1796_v9, 4  ;;  %v1791_v53 = vmax.f32 %v1789_v45, %v1790_v46  ;;  %v1804_v17 = vrot.slane %v1803_v29, 4 }
 0x1c0   :  { %v1784_v11 = vmax.f32 %v1782_v30, %v1783_v40  ;;  %v1810_v32 = vsel %vm359_vm1, %v10578_v20, -inf  ;;  %v10579_v40 = vcombine.high %v6484_v14, %v6484_v14  ;;  %v1818_v19 = vrot.slane %v1817_v56, 4 }
 0x1c1   :  { %v1778_v44 = vrot.slane %v1777_v42, 2  ;;  %v1811_v23 = vrot.slane %v1810_v32, 4  ;;  %v1798_v16 = vmax.f32 %v1796_v9, %v1797_v61  ;;  %v1792_v57 = vrot.slane %v1791_v53, 2 }
 0x1c2   :  { %v1785_v10 = vrot.slane %v1784_v11, 2  ;;  %v1824_v30 = vsel %vm359_vm1, %v10579_v40, -inf  ;;  %v1805_v54 = vmax.f32 %v1803_v29, %v1804_v17  ;;  %v1819_v3 = vmax.f32 %v1817_v56, %v1818_v19 }
 0x1c3   :  { %v1779_v37 = vmax.f32 %v1777_v42, %v1778_v44  ;;  %v1812_v36 = vmax.f32 %v1810_v32, %v1811_v23  ;;  %v1799_v20 = vrot.slane %v1798_v16, 2  ;;  %v1825_v46 = vrot.slane %v1824_v30, 4 }
 0x1c4   :  { %v1786_v50 = vmax.f32 %v1784_v11, %v1785_v10  ;;  %v1793_v41 = vmax.f32 %v1791_v53, %v1792_v57  ;;  %v1806_v8 = vrot.slane %v1805_v54, 2  ;;  %v1820_v29 = vrot.slane %v1819_v3, 2 }
 0x1c5   :  { %v1780_v45 = vrot.slane %v1779_v37, 1  ;;  %v1813_v61 = vrot.slane %v1812_v36, 2  ;;  %v1800_v15 = vmax.f32 %v1798_v16, %v1799_v20  ;;  %v1826_v6 = vmax.f32 %v1824_v30, %v1825_v46 }
 0x1c6   :  { %v1787_v9 = vrot.slane %v1786_v50, 1  ;;  %v1794_v14 = vrot.slane %v1793_v41, 1  ;;  %v1807_v40 = vmax.f32 %v1805_v54, %v1806_v8  ;;  %v1831_v53 = vsel %vm359_vm1, %v6473_v51, -inf }
 0x1c7   :  { %v6885_v62 = vmax.f32 %v1779_v37, %v1780_v45  ;;  %v1814_v44 = vmax.f32 %v1812_v36, %v1813_v61  ;;  %v1801_v32 = vrot.slane %v1800_v15, 1  ;;  %v1827_v11 = vrot.slane %v1826_v6, 2 }
 0x1c8   :  { %v6887_v42 = vmax.f32 %v1786_v50, %v1787_v9  ;;  %v6889_v17 = vmax.f32 %v1793_v41, %v1794_v14  ;;  %v1808_v23 = vrot.slane %v1807_v40, 1  ;;  %v1821_v19 = vmax.f32 %v1819_v3, %v1820_v29 }
 0x1c9   :  { %v1815_v57 = vrot.slane %v1814_v44, 1  ;;  %v6893_v16 = vmax.f32 %v1800_v15, %v1801_v32  ;;  %v1828_v10 = vmax.f32 %v1826_v6, %v1827_v11  ;;  %v1832_v56 = vrot.slane %v1831_v53, 4 }
 0x1ca   :  { %v6895_v30 = vmax.f32 %v1807_v40, %v1808_v23  ;;  %v10583_v50 = vcombine.high %v6473_v51, %v6473_v51  ;;  %v1845_v54 = vsel %vm359_vm1, %v6489_v12, -inf  ;;  %v1822_v37 = vrot.slane %v1821_v19, 1 }
 0x1cb   :  { %10580 = vst [vmem:[#allocation65_spill] sm:$0xff] %v6893_v16  ;;  %v6897_v8 = vmax.f32 %v1814_v44, %v1815_v57  ;;  %v1829_v36 = vrot.slane %v1828_v10, 1  ;;  %v1833_v20 = vmax.f32 %v1831_v53, %v1832_v56  ;;  %v1846_v46 = vrot.slane %v1845_v54, 4 }
 0x1cc   :  { %10581 = vst [vmem:[#allocation66_spill] sm:$0xff] %v6895_v30  ;;  %v1838_v41 = vsel %vm359_vm1, %v10583_v50, -inf  ;;  %v10584_v6 = vcombine.high %v6489_v12, %v6489_v12  ;;  %v1859_v45 = vsel %vm359_vm1, %v6476_v48, -inf  ;;  %v10585_v51 = vcombine.high %v6476_v48, %v6476_v48 }
 0x1cd   :  { %10582 = vst [vmem:[#allocation67_spill] sm:$0xff] %v6897_v8  ;;  %v1839_v15 = vrot.slane %v1838_v41, 4  ;;  %v6915_v9 = vmax.f32 %v1821_v19, %v1822_v37  ;;  %v6917_v14 = vmax.f32 %v1828_v10, %v1829_v36  ;;  %v1834_v40 = vrot.slane %v1833_v20, 2 }
 0x1ce   :  { %v1852_v3 = vsel %vm359_vm1, %v10584_v6, -inf  ;;  %v1866_v61 = vsel %vm359_vm1, %v10585_v51, -inf  ;;  %v1847_v32 = vmax.f32 %v1845_v54, %v1846_v46  ;;  %v1860_v11 = vrot.slane %v1859_v45, 4 }
 0x1cf   :  { %10586 = vst [vmem:[#allocation68_spill] sm:$0xff] %v6915_v9  ;;  %10587 = vst [vmem:[#allocation69_spill] sm:$0xff] %v6917_v14  ;;  %v1840_v44 = vmax.f32 %v1838_v41, %v1839_v15  ;;  %v1853_v29 = vrot.slane %v1852_v3, 4  ;;  %v1867_v12 = vrot.slane %v1866_v61, 4  ;;  %v1835_v23 = vmax.f32 %v1833_v20, %v1834_v40 }
 0x1d0   :  { %v1873_v53 = vsel %vm359_vm1, %v6494_v34, -inf  ;;  %v10588_v48 = vcombine.high %v6494_v34, %v6494_v34  ;;  %v1848_v19 = vrot.slane %v1847_v32, 2  ;;  %v1861_v10 = vmax.f32 %v1859_v45, %v1860_v11 }
 0x1d1   :  { %v1841_v57 = vrot.slane %v1840_v44, 2  ;;  %v1854_v50 = vmax.f32 %v1852_v3, %v1853_v29  ;;  %v1868_v37 = vmax.f32 %v1866_v61, %v1867_v12  ;;  %v1836_v36 = vrot.slane %v1835_v23, 1 }
 0x1d2   :  { %v1880_v56 = vsel %vm359_vm1, %v10588_v48, -inf  ;;  %v1874_v54 = vrot.slane %v1873_v53, 4  ;;  %v1849_v46 = vmax.f32 %v1847_v32, %v1848_v19  ;;  %v1862_v20 = vrot.slane %v1861_v10, 2 }
 0x1d3   :  { %v1842_v41 = vmax.f32 %v1840_v44, %v1841_v57  ;;  %v1881_v15 = vrot.slane %v1880_v56, 4  ;;  %v1855_v6 = vrot.slane %v1854_v50, 2  ;;  %v1869_v51 = vrot.slane %v1868_v37, 2 }
 0x1d4   :  { %v6925_v40 = vmax.f32 %v1835_v23, %v1836_v36  ;;  %v1875_v9 = vmax.f32 %v1873_v53, %v1874_v54  ;;  %v1850_v34 = vrot.slane %v1849_v46, 1  ;;  %v1863_v48 = vmax.f32 %v1861_v10, %v1862_v20 }
 0x1d5   :  { %v1843_v14 = vrot.slane %v1842_v41, 1  ;;  %v1882_v8 = vmax.f32 %v1880_v56, %v1881_v15  ;;  %v1856_v30 = vmax.f32 %v1854_v50, %v1855_v6  ;;  %v1870_v16 = vmax.f32 %v1868_v37, %v1869_v51 }
 0x1d6   :  { %v1876_v45 = vrot.slane %v1875_v9, 2  ;;  %v1887_v44 = vsel %vm359_vm1, %v6503_v39, -inf  ;;  %v6931_v32 = vmax.f32 %v1849_v46, %v1850_v34  ;;  %v1864_v11 = vrot.slane %v1863_v48, 1 }
 0x1d7   :  { %v6927_v3 = vmax.f32 %v1842_v41, %v1843_v14  ;;  %v1883_v61 = vrot.slane %v1882_v8, 2  ;;  %v1857_v29 = vrot.slane %v1856_v30, 1  ;;  %v1871_v12 = vrot.slane %v1870_v16, 1 }
 0x1d8   :  { %v1877_v23 = vmax.f32 %v1875_v9, %v1876_v45  ;;  %v1888_v53 = vrot.slane %v1887_v44, 4  ;;  %v10589_v56 = vcombine.high %v6503_v39, %v6503_v39  ;;  %v6939_v50 = vmax.f32 %v1863_v48, %v1864_v11 }
 0x1d9   :  { %v1884_v57 = vmax.f32 %v1882_v8, %v1883_v61  ;;  %v6937_v14 = vmax.f32 %v1856_v30, %v1857_v29  ;;  %v6941_v10 = vmax.f32 %v1870_v16, %v1871_v12  ;;  %v1901_v9 = vsel %vm359_vm1, %v6513_v24, -inf }
 0x1da   :  { %v1894_v19 = vsel %vm359_vm1, %v10589_v56, -inf  ;;  %v1878_v36 = vrot.slane %v1877_v23, 1  ;;  %v1889_v54 = vmax.f32 %v1887_v44, %v1888_v53  ;;  %v1902_v15 = vrot.slane %v1901_v9, 4 }
 0x1db   :  { %v1895_v37 = vrot.slane %v1894_v19, 4  ;;  %v1885_v41 = vrot.slane %v1884_v57, 1  ;;  %v10590_v39 = vcombine.high %v6513_v24, %v6513_v24  ;;  %v1915_v30 = vsel %vm359_vm1, %v6510_v4, -inf }
 0x1dc   :  { %v6951_v6 = vmax.f32 %v1877_v23, %v1878_v36  ;;  %v1890_v20 = vrot.slane %v1889_v54, 2  ;;  %v1903_v48 = vmax.f32 %v1901_v9, %v1902_v15  ;;  %v1916_v45 = vrot.slane %v1915_v30, 4 }
 0x1dd   :  { %v1896_v8 = vmax.f32 %v1894_v19, %v1895_v37  ;;  %v1908_v46 = vsel %vm359_vm1, %v10590_v39, -inf  ;;  %v6953_v16 = vmax.f32 %v1884_v57, %v1885_v41  ;;  %v10592_v61 = vcombine.high %v6510_v4, %v6510_v4 }
 0x1de   :  { %v1909_v51 = vrot.slane %v1908_v46, 4  ;;  %v1891_v24 = vmax.f32 %v1889_v54, %v1890_v20  ;;  %v1929_v12 = vsel %vm359_vm1, %v6521_v7, -inf  ;;  %v1904_v53 = vrot.slane %v1903_v48, 2 }
 0x1df   :  { %10591 = vst [vmem:[#allocation70_spill] sm:$0xff] %v6953_v16  ;;  %v1897_v34 = vrot.slane %v1896_v8, 2  ;;  %v1922_v44 = vsel %vm359_vm1, %v10592_v61, -inf  ;;  %v1917_v57 = vmax.f32 %v1915_v30, %v1916_v45  ;;  %v1930_v56 = vrot.slane %v1929_v12, 4 }
 0x1e0   :  { %v1910_v29 = vmax.f32 %v1908_v46, %v1909_v51  ;;  %v1923_v11 = vrot.slane %v1922_v44, 4  ;;  %v1892_v19 = vrot.slane %v1891_v24, 1  ;;  %v10593_v41 = vcombine.high %v6521_v7, %v6521_v7 }
 0x1e1   :  { %v1898_v23 = vmax.f32 %v1896_v8, %v1897_v34  ;;  %v1905_v15 = vmax.f32 %v1903_v48, %v1904_v53  ;;  %v1918_v54 = vrot.slane %v1917_v57, 2  ;;  %v1931_v39 = vmax.f32 %v1929_v12, %v1930_v56 }
 0x1e2   :  { %v1911_v37 = vrot.slane %v1910_v29, 2  ;;  %v1924_v36 = vmax.f32 %v1922_v44, %v1923_v11  ;;  %v1936_v4 = vsel %vm359_vm1, %v10593_v41, -inf  ;;  %v6965_v46 = vmax.f32 %v1891_v24, %v1892_v19 }
 0x1e3   :  { %v1899_v9 = vrot.slane %v1898_v23, 1  ;;  %v1937_v8 = vrot.slane %v1936_v4, 4  ;;  %v1906_v30 = vrot.slane %v1905_v15, 1  ;;  %v1919_v45 = vmax.f32 %v1917_v57, %v1918_v54 }
 0x1e4   :  { %v1912_v20 = vmax.f32 %v1910_v29, %v1911_v37  ;;  %v1925_v51 = vrot.slane %v1924_v36, 2  ;;  %v1932_v61 = vrot.slane %v1931_v39, 2  ;;  %v1943_v7 = vsel %vm359_vm1, %v6518_v22, -inf }
 0x1e5   :  { %v6967_v34 = vmax.f32 %v1898_v23, %v1899_v9  ;;  %v1938_v16 = vmax.f32 %v1936_v4, %v1937_v8  ;;  %v6971_v41 = vmax.f32 %v1905_v15, %v1906_v30  ;;  %v1920_v48 = vrot.slane %v1919_v45, 1 }
 0x1e6   :  { %v1913_v44 = vrot.slane %v1912_v20, 1  ;;  %v1926_v11 = vmax.f32 %v1924_v36, %v1925_v51  ;;  %v1933_v12 = vmax.f32 %v1931_v39, %v1932_v61  ;;  %v1944_v24 = vrot.slane %v1943_v7, 4 }
 0x1e7   :  { %v1939_v56 = vrot.slane %v1938_v16, 2  ;;  %v10594_v23 = vcombine.high %v6518_v22, %v6518_v22  ;;  %v6979_v19 = vmax.f32 %v1919_v45, %v1920_v48  ;;  %v1957_v54 = vsel %vm359_vm1, %v6534_v38, -inf }
 0x1e8   :  { %v6973_v53 = vmax.f32 %v1912_v20, %v1913_v44  ;;  %v1927_v29 = vrot.slane %v1926_v11, 1  ;;  %v1934_v37 = vrot.slane %v1933_v12, 1  ;;  %v1945_v36 = vmax.f32 %v1943_v7, %v1944_v24 }
 0x1e9   :  { %v1950_v57 = vsel %vm359_vm1, %v10594_v23, -inf  ;;  %10595 = vst [vmem:[#allocation71_spill] sm:$0xff] %v6979_v19  ;;  %v1940_v15 = vmax.f32 %v1938_v16, %v1939_v56  ;;  %v10597_v39 = vcombine.high %v6534_v38, %v6534_v38  ;;  %v1958_v30 = vrot.slane %v1957_v54, 4 }
 0x1ea   :  { %v1951_v4 = vrot.slane %v1950_v57, 4  ;;  %v6981_v9 = vmax.f32 %v1926_v11, %v1927_v29  ;;  %v6989_v51 = vmax.f32 %v1933_v12, %v1934_v37  ;;  %v1946_v22 = vrot.slane %v1945_v36, 2 }
 0x1eb   :  { %v1964_v20 = vsel %vm359_vm1, %v10597_v39, -inf  ;;  %v1941_v45 = vrot.slane %v1940_v15, 1  ;;  %v1971_v44 = vsel %vm359_vm1, %v6529_v63, -inf  ;;  %v10599_v16 = vcombine.high %v6529_v63, %v6529_v63 }
 0x1ec   :  { %10596 = vst [vmem:[#allocation72_spill] sm:$0xff] %v6981_v9  ;;  %10598 = vst [vmem:[#allocation73_spill] sm:$0xff] %v6989_v51  ;;  %v1952_v8 = vmax.f32 %v1950_v57, %v1951_v4  ;;  %v1965_v61 = vrot.slane %v1964_v20, 4  ;;  %v1947_v7 = vmax.f32 %v1945_v36, %v1946_v22  ;;  %v1959_v38 = vmax.f32 %v1957_v54, %v1958_v30 }
 0x1ed   :  { %v1978_v11 = vsel %vm359_vm1, %v10599_v16, -inf  ;;  %v1972_v24 = vrot.slane %v1971_v44, 4  ;;  %v6997_v29 = vmax.f32 %v1940_v15, %v1941_v45  ;;  %v1985_v23 = vsel %vm359_vm1, %v6543_v31, -inf }
 0x1ee   :  { %v1953_v48 = vrot.slane %v1952_v8, 2  ;;  %v1966_v12 = vmax.f32 %v1964_v20, %v1965_v61  ;;  %v1979_v56 = vrot.slane %v1978_v11, 4  ;;  %v1948_v57 = vrot.slane %v1947_v7, 1 }
 0x1ef   :  { %10600 = vst [vmem:[#allocation74_spill] sm:$0xff] %v6997_v29  ;;  %v1960_v4 = vrot.slane %v1959_v38, 2  ;;  %v1973_v39 = vmax.f32 %v1971_v44, %v1972_v24  ;;  %v1986_v63 = vrot.slane %v1985_v23, 4  ;;  %v10601_v36 = vcombine.high %v6543_v31, %v6543_v31 }
 0x1f0   :  { %v1954_v37 = vmax.f32 %v1952_v8, %v1953_v48  ;;  %v1967_v51 = vrot.slane %v1966_v12, 2  ;;  %v1980_v9 = vmax.f32 %v1978_v11, %v1979_v56  ;;  %v7005_v22 = vmax.f32 %v1947_v7, %v1948_v57 }
 0x1f1   :  { %v1992_v54 = vsel %vm359_vm1, %v10601_v36, -inf  ;;  %v1961_v20 = vmax.f32 %v1959_v38, %v1960_v4  ;;  %v1974_v30 = vrot.slane %v1973_v39, 2  ;;  %v1987_v16 = vmax.f32 %v1985_v23, %v1986_v63 }
 0x1f2   :  { %v1955_v15 = vrot.slane %v1954_v37, 1  ;;  %v1968_v45 = vmax.f32 %v1966_v12, %v1967_v51  ;;  %v1981_v61 = vrot.slane %v1980_v9, 2  ;;  %v1993_v29 = vrot.slane %v1992_v54, 4 }
 0x1f3   :  { %v1962_v44 = vrot.slane %v1961_v20, 1  ;;  %v1975_v48 = vmax.f32 %v1973_v39, %v1974_v30  ;;  %v1999_v11 = vsel %vm359_vm1, %v6549_v52, -inf  ;;  %v1988_v56 = vrot.slane %v1987_v16, 2 }
 0x1f4   :  { %v7007_v8 = vmax.f32 %v1954_v37, %v1955_v15  ;;  %v1969_v24 = vrot.slane %v1968_v45, 1  ;;  %v1982_v31 = vmax.f32 %v1980_v9, %v1981_v61  ;;  %v1994_v36 = vmax.f32 %v1992_v54, %v1993_v29 }
 0x1f5   :  { %v7011_v7 = vmax.f32 %v1961_v20, %v1962_v44  ;;  %v1976_v57 = vrot.slane %v1975_v48, 1  ;;  %v2000_v38 = vrot.slane %v1999_v11, 4  ;;  %v10602_v51 = vcombine.high %v6549_v52, %v6549_v52 }
 0x1f6   :  { %v7017_v23 = vmax.f32 %v1968_v45, %v1969_v24  ;;  %v1983_v37 = vrot.slane %v1982_v31, 1  ;;  %v1989_v4 = vmax.f32 %v1987_v16, %v1988_v56  ;;  %v1995_v39 = vrot.slane %v1994_v36, 2 }
 0x1f7   :  { %v2006_v12 = vsel %vm359_vm1, %v10602_v51, -inf  ;;  %v7019_v63 = vmax.f32 %v1975_v48, %v1976_v57  ;;  %v2001_v15 = vmax.f32 %v1999_v11, %v2000_v38  ;;  %v2013_v29 = vsel %vm359_vm1, %v6554_v43, -inf }
 0x1f8   :  { %v2007_v9 = vrot.slane %v2006_v12, 4  ;;  %v7023_v54 = vmax.f32 %v1982_v31, %v1983_v37  ;;  %v1990_v20 = vrot.slane %v1989_v4, 1  ;;  %v1996_v30 = vmax.f32 %v1994_v36, %v1995_v39 }
 0x1f9   :  { %v2014_v61 = vrot.slane %v2013_v29, 4  ;;  %v2002_v52 = vrot.slane %v2001_v15, 2  ;;  %v10604_v45 = vcombine.high %v6554_v43, %v6554_v43  ;;  %v2027_v48 = vsel %vm359_vm1, %v6560_v2, -inf }
 0x1fa   :  { %10603 = vst [vmem:[#allocation75_spill] sm:$0xff] %v7023_v54  ;;  %v2008_v44 = vmax.f32 %v2006_v12, %v2007_v9  ;;  %v7031_v11 = vmax.f32 %v1989_v4, %v1990_v20  ;;  %v1997_v24 = vrot.slane %v1996_v30, 1  ;;  %v2028_v51 = vrot.slane %v2027_v48, 4 }
 0x1fb   :  { %v2020_v16 = vsel %vm359_vm1, %v10604_v45, -inf  ;;  %v2015_v56 = vmax.f32 %v2013_v29, %v2014_v61  ;;  %v2003_v31 = vmax.f32 %v2001_v15, %v2002_v52  ;;  %v10606_v36 = vcombine.high %v6560_v2, %v6560_v2 }
 0x1fc   :  { %10605 = vst [vmem:[#allocation76_spill] sm:$0xff] %v7031_v11  ;;  %v2021_v57 = vrot.slane %v2020_v16, 4  ;;  %v2009_v38 = vrot.slane %v2008_v44, 2  ;;  %v7037_v37 = vmax.f32 %v1996_v30, %v1997_v24  ;;  %v2029_v4 = vmax.f32 %v2027_v48, %v2028_v51 }
 0x1fd   :  { %v2034_v12 = vsel %vm359_vm1, %v10606_v36, -inf  ;;  %v2016_v43 = vrot.slane %v2015_v56, 2  ;;  %v2004_v45 = vrot.slane %v2003_v31, 1  ;;  %v2041_v29 = vsel %vm359_vm1, %v6575_v1, -inf }
 0x1fe   :  { %v2022_v39 = vmax.f32 %v2020_v16, %v2021_v57  ;;  %v2035_v9 = vrot.slane %v2034_v12, 4  ;;  %v2010_v54 = vmax.f32 %v2008_v44, %v2009_v38  ;;  %v2042_v52 = vrot.slane %v2041_v29, 4 }
 0x1ff   :  { %v2017_v20 = vmax.f32 %v2015_v56, %v2016_v43  ;;  %v7041_v11 = vmax.f32 %v2003_v31, %v2004_v45  ;;  %v2030_v19 = vrot.slane %v2029_v4, 2  ;;  %v10608_v30 = vcombine.high %v6575_v1, %v6575_v1 }
 0x200   :  { %v2023_v15 = vrot.slane %v2022_v39, 2  ;;  %v2036_v61 = vmax.f32 %v2034_v12, %v2035_v9  ;;  %v2011_v2 = vrot.slane %v2010_v54, 1  ;;  %v2043_v48 = vmax.f32 %v2041_v29, %v2042_v52 }
 0x201   :  { %10607 = vst [vmem:[#allocation77_spill] sm:$0xff] %v7041_v11  ;;  %v2048_v16 = vsel %vm359_vm1, %v10608_v30, -inf  ;;  %v2018_v24 = vrot.slane %v2017_v20, 1  ;;  %v2031_v51 = vmax.f32 %v2029_v4, %v2030_v19  ;;  %v2055_v36 = vsel %vm359_vm1, %v6570_v47, -inf }
 0x202   :  { %v2024_v57 = vmax.f32 %v2022_v39, %v2023_v15  ;;  %v2037_v44 = vrot.slane %v2036_v61, 2  ;;  %v7047_v38 = vmax.f32 %v2010_v54, %v2011_v2  ;;  %v2049_v56 = vrot.slane %v2048_v16, 4 }
 0x203   :  { %v7051_v31 = vmax.f32 %v2017_v20, %v2018_v24  ;;  %v2044_v9 = vrot.slane %v2043_v48, 2  ;;  %v2032_v45 = vrot.slane %v2031_v51, 1  ;;  %v2056_v11 = vrot.slane %v2055_v36, 4 }
 0x204   :  { %v2025_v12 = vrot.slane %v2024_v57, 1  ;;  %v2038_v43 = vmax.f32 %v2036_v61, %v2037_v44  ;;  %v2050_v1 = vmax.f32 %v2048_v16, %v2049_v56  ;;  %v10609_v39 = vcombine.high %v6570_v47, %v6570_v47 }
 0x205   :  { %v2045_v4 = vmax.f32 %v2043_v48, %v2044_v9  ;;  %v7059_v52 = vmax.f32 %v2031_v51, %v2032_v45  ;;  %v2057_v2 = vmax.f32 %v2055_v36, %v2056_v11  ;;  %v2069_v61 = vsel %vm359_vm1, %v6582_v21, -inf }
 0x206   :  { %v2062_v29 = vsel %vm359_vm1, %v10609_v39, -inf  ;;  %v7057_v54 = vmax.f32 %v2024_v57, %v2025_v12  ;;  %v2039_v19 = vrot.slane %v2038_v43, 1  ;;  %v2051_v20 = vrot.slane %v2050_v1, 2 }
 0x207   :  { %v2063_v15 = vrot.slane %v2062_v29, 4  ;;  %10610 = vst [vmem:[#allocation78_spill] sm:$0xff] %v7059_v52  ;;  %v2046_v16 = vrot.slane %v2045_v4, 1  ;;  %v2070_v44 = vrot.slane %v2069_v61, 4  ;;  %v2058_v56 = vrot.slane %v2057_v2, 2 }
 0x208   :  { %v7063_v30 = vmax.f32 %v2038_v43, %v2039_v19  ;;  %v2052_v47 = vmax.f32 %v2050_v1, %v2051_v20  ;;  %v10612_v57 = vcombine.high %v6582_v21, %v6582_v21  ;;  %v2083_v51 = vsel %vm359_vm1, %v6588_v27, -inf }
 0x209   :  { %v2064_v24 = vmax.f32 %v2062_v29, %v2063_v15  ;;  %v7071_v12 = vmax.f32 %v2045_v4, %v2046_v16  ;;  %v2071_v36 = vmax.f32 %v2069_v61, %v2070_v44  ;;  %v2059_v45 = vmax.f32 %v2057_v2, %v2058_v56 }
 0x20a   :  { %10611 = vst [vmem:[#allocation79_spill] sm:$0xff] %v7063_v30  ;;  %v2076_v48 = vsel %vm359_vm1, %v10612_v57, -inf  ;;  %v2053_v43 = vrot.slane %v2052_v47, 1  ;;  %v2084_v39 = vrot.slane %v2083_v51, 4  ;;  %v10614_v1 = vcombine.high %v6588_v27, %v6588_v27 }
 0x20b   :  { %10613 = vst [vmem:[#allocation80_spill] sm:$0xff] %v7071_v12  ;;  %v2065_v11 = vrot.slane %v2064_v24, 2  ;;  %v2077_v9 = vrot.slane %v2076_v48, 4  ;;  %v2072_v21 = vrot.slane %v2071_v36, 2  ;;  %v2060_v30 = vrot.slane %v2059_v45, 1 }
 0x20c   :  { %v2090_v29 = vsel %vm359_vm1, %v10614_v1, -inf  ;;  %v7077_v57 = vmax.f32 %v2052_v47, %v2053_v43  ;;  %v2085_v4 = vmax.f32 %v2083_v51, %v2084_v39  ;;  %v2097_v61 = vsel %vm359_vm1, %v6595_v18, -inf }
 0x20d   :  { %v2066_v19 = vmax.f32 %v2064_v24, %v2065_v11  ;;  %v2078_v15 = vmax.f32 %v2076_v48, %v2077_v9  ;;  %v2091_v20 = vrot.slane %v2090_v29, 4  ;;  %v2073_v44 = vmax.f32 %v2071_v36, %v2072_v21 }
 0x20e   :  { %10615 = vst [vmem:[#allocation81_spill] sm:$0xff] %v7077_v57  ;;  %v7081_v12 = vmax.f32 %v2059_v45, %v2060_v30  ;;  %v2086_v27 = vrot.slane %v2085_v4, 2  ;;  %v2098_v52 = vrot.slane %v2097_v61, 4  ;;  %v10616_v24 = vcombine.high %v6595_v18, %v6595_v18 }
 0x20f   :  { %v2067_v16 = vrot.slane %v2066_v19, 1  ;;  %v2079_v2 = vrot.slane %v2078_v15, 2  ;;  %v2092_v56 = vmax.f32 %v2090_v29, %v2091_v20  ;;  %v2074_v11 = vrot.slane %v2073_v44, 1 }
 0x210   :  { %v2104_v48 = vsel %vm359_vm1, %v10616_v24, -inf  ;;  %v2087_v43 = vmax.f32 %v2085_v4, %v2086_v27  ;;  %v2099_v39 = vmax.f32 %v2097_v61, %v2098_v52  ;;  %v2111_v36 = vsel %vm359_vm1, %v6599_v58, -inf }
 0x211   :  { %v7087_v47 = vmax.f32 %v2066_v19, %v2067_v16  ;;  %v2080_v51 = vmax.f32 %v2078_v15, %v2079_v2  ;;  %v2093_v9 = vrot.slane %v2092_v56, 2  ;;  %v2105_v1 = vrot.slane %v2104_v48, 4 }
 0x212   :  { %v7091_v30 = vmax.f32 %v2073_v44, %v2074_v11  ;;  %v2112_v21 = vrot.slane %v2111_v36, 4  ;;  %v2088_v20 = vrot.slane %v2087_v43, 1  ;;  %v2100_v18 = vrot.slane %v2099_v39, 2 }
 0x213   :  { %v2081_v45 = vrot.slane %v2080_v51, 1  ;;  %v2094_v29 = vmax.f32 %v2092_v56, %v2093_v9  ;;  %v2106_v57 = vmax.f32 %v2104_v48, %v2105_v1  ;;  %v10617_v19 = vcombine.high %v6599_v58, %v6599_v58 }
 0x214   :  { %v2113_v4 = vmax.f32 %v2111_v36, %v2112_v21  ;;  %v7099_v2 = vmax.f32 %v2087_v43, %v2088_v20  ;;  %v2101_v44 = vmax.f32 %v2099_v39, %v2100_v18  ;;  %v2125_v56 = vsel %vm359_vm1, %v6608_v60, -inf }
 0x215   :  { %v2118_v15 = vsel %vm359_vm1, %v10617_v19, -inf  ;;  %v7097_v16 = vmax.f32 %v2080_v51, %v2081_v45  ;;  %v2095_v52 = vrot.slane %v2094_v29, 1  ;;  %v2107_v27 = vrot.slane %v2106_v57, 2 }
 0x216   :  { %v2119_v61 = vrot.slane %v2118_v15, 4  ;;  %10618 = vst [vmem:[#allocation82_spill] sm:$0xff] %v7099_v2  ;;  %v2114_v48 = vrot.slane %v2113_v4, 2  ;;  %v2126_v9 = vrot.slane %v2125_v56, 4  ;;  %v2102_v58 = vrot.slane %v2101_v44, 1 }
 0x217   :  { %v7103_v24 = vmax.f32 %v2094_v29, %v2095_v52  ;;  %v2108_v1 = vmax.f32 %v2106_v57, %v2107_v27  ;;  %v10620_v51 = vcombine.high %v6608_v60, %v6608_v60  ;;  %v2139_v43 = vsel %vm359_vm1, %v6612_v49, -inf }
 0x218   :  { %v2120_v11 = vmax.f32 %v2118_v15, %v2119_v61  ;;  %v2115_v39 = vmax.f32 %v2113_v4, %v2114_v48  ;;  %v2127_v21 = vmax.f32 %v2125_v56, %v2126_v9  ;;  %v7111_v18 = vmax.f32 %v2101_v44, %v2102_v58 }
 0x219   :  { %10619 = vst [vmem:[#allocation83_spill] sm:$0xff] %v7103_v24  ;;  %v2132_v36 = vsel %vm359_vm1, %v10620_v51, -inf  ;;  %v2109_v29 = vrot.slane %v2108_v1, 1  ;;  %v2140_v19 = vrot.slane %v2139_v43, 4  ;;  %v10622_v15 = vcombine.high %v6612_v49, %v6612_v49 }
 0x21a   :  { %v2121_v45 = vrot.slane %v2120_v11, 2  ;;  %v2133_v20 = vrot.slane %v2132_v36, 4  ;;  %10621 = vst [vmem:[#allocation84_spill] sm:$0xff] %v7111_v18  ;;  %v2116_v52 = vrot.slane %v2115_v39, 1  ;;  %v2128_v61 = vrot.slane %v2127_v21, 2 }
 0x21b   :  { %v2146_v57 = vsel %vm359_vm1, %v10622_v15, -inf  ;;  %v7117_v51 = vmax.f32 %v2108_v1, %v2109_v29  ;;  %v2141_v24 = vmax.f32 %v2139_v43, %v2140_v19  ;;  %v2153_v56 = vsel %vm359_vm1, %v6619_v33, -inf }
 0x21c   :  { %v2122_v60 = vmax.f32 %v2120_v11, %v2121_v45  ;;  %v2134_v27 = vmax.f32 %v2132_v36, %v2133_v20  ;;  %v2147_v4 = vrot.slane %v2146_v57, 4  ;;  %v7121_v44 = vmax.f32 %v2115_v39, %v2116_v52 }
 0x21d   :  { %v2129_v9 = vmax.f32 %v2127_v21, %v2128_v61  ;;  %v2142_v18 = vrot.slane %v2141_v24, 2  ;;  %v2154_v2 = vrot.slane %v2153_v56, 4  ;;  %v10624_v11 = vcombine.high %v6619_v33, %v6619_v33 }
 0x21e   :  { %10623 = vst [vmem:[#allocation85_spill] sm:$0xff] %v7121_v44  ;;  %v2123_v48 = vrot.slane %v2122_v60, 1  ;;  %v2135_v58 = vrot.slane %v2134_v27, 2  ;;  %v2148_v49 = vmax.f32 %v2146_v57, %v2147_v4  ;;  %v2167_v21 = vsel %vm359_vm1, %v6629_v0, -inf }
 0x21f   :  { %v2160_v36 = vsel %vm359_vm1, %v10624_v11, -inf  ;;  %v2130_v43 = vrot.slane %v2129_v9, 1  ;;  %v2143_v29 = vmax.f32 %v2141_v24, %v2142_v18  ;;  %v2155_v39 = vmax.f32 %v2153_v56, %v2154_v2 }
 0x220   :  { %v7127_v1 = vmax.f32 %v2122_v60, %v2123_v48  ;;  %v2136_v45 = vmax.f32 %v2134_v27, %v2135_v58  ;;  %v2161_v20 = vrot.slane %v2160_v36, 4  ;;  %v2149_v19 = vrot.slane %v2148_v49, 2 }
 0x221   :  { %v7131_v15 = vmax.f32 %v2129_v9, %v2130_v43  ;;  %v2168_v61 = vrot.slane %v2167_v21, 4  ;;  %v2144_v4 = vrot.slane %v2143_v29, 1  ;;  %v2156_v44 = vrot.slane %v2155_v39, 2 }
 0x222   :  { %v2137_v57 = vrot.slane %v2136_v45, 1  ;;  %v2162_v52 = vmax.f32 %v2160_v36, %v2161_v20  ;;  %v2150_v33 = vmax.f32 %v2148_v49, %v2149_v19  ;;  %v10625_v60 = vcombine.high %v6629_v0, %v6629_v0 }
 0x223   :  { %v2169_v2 = vmax.f32 %v2167_v21, %v2168_v61  ;;  %v7139_v56 = vmax.f32 %v2143_v29, %v2144_v4  ;;  %v2157_v58 = vmax.f32 %v2155_v39, %v2156_v44  ;;  %v2181_v11 = vsel %vm359_vm1, %v6636_v59, -inf }
 0x224   :  { %v2174_v27 = vsel %vm359_vm1, %v10625_v60, -inf  ;;  %v7137_v48 = vmax.f32 %v2136_v45, %v2137_v57  ;;  %v2163_v24 = vrot.slane %v2162_v52, 2  ;;  %v2151_v9 = vrot.slane %v2150_v33, 1 }
 0x225   :  { %v2175_v18 = vrot.slane %v2174_v27, 4  ;;  %10626 = vst [vmem:[#allocation86_spill] sm:$0xff] %v7139_v56  ;;  %v2170_v49 = vrot.slane %v2169_v2, 2  ;;  %v2182_v20 = vrot.slane %v2181_v11, 4  ;;  %v2158_v0 = vrot.slane %v2157_v58, 1 }
 0x226   :  { %v2164_v36 = vmax.f32 %v2162_v52, %v2163_v24  ;;  %v7143_v19 = vmax.f32 %v2150_v33, %v2151_v9  ;;  %v10628_v45 = vcombine.high %v6636_v59, %v6636_v59  ;;  %v2195_v29 = vsel %vm359_vm1, %v6640_v26, -inf }
 0x227   :  { %v2176_v43 = vmax.f32 %v2174_v27, %v2175_v18  ;;  %v2171_v44 = vmax.f32 %v2169_v2, %v2170_v49  ;;  %v2183_v61 = vmax.f32 %v2181_v11, %v2182_v20  ;;  %v7151_v4 = vmax.f32 %v2157_v58, %v2158_v0 }
 0x228   :  { %10627 = vst [vmem:[#allocation87_spill] sm:$0xff] %v7143_v19  ;;  %v2188_v21 = vsel %vm359_vm1, %v10628_v45, -inf  ;;  %v2165_v57 = vrot.slane %v2164_v36, 1  ;;  %v2196_v60 = vrot.slane %v2195_v29, 4  ;;  %v10630_v33 = vcombine.high %v6640_v26, %v6640_v26 }
 0x229   :  { %v2177_v39 = vrot.slane %v2176_v43, 2  ;;  %10629 = vst [vmem:[#allocation88_spill] sm:$0xff] %v7151_v4  ;;  %v2189_v52 = vrot.slane %v2188_v21, 4  ;;  %v2172_v59 = vrot.slane %v2171_v44, 1  ;;  %v2184_v9 = vrot.slane %v2183_v61, 2 }
 0x22a   :  { %v2202_v27 = vsel %vm359_vm1, %v10630_v33, -inf  ;;  %v7157_v24 = vmax.f32 %v2164_v36, %v2165_v57  ;;  %v2197_v19 = vmax.f32 %v2195_v29, %v2196_v60  ;;  %v2209_v2 = vsel %vm359_vm1, %v6647_v25, -inf }
 0x22b   :  { %v2178_v18 = vmax.f32 %v2176_v43, %v2177_v39  ;;  %v2190_v45 = vmax.f32 %v2188_v21, %v2189_v52  ;;  %v2203_v56 = vrot.slane %v2202_v27, 4  ;;  %v7161_v58 = vmax.f32 %v2171_v44, %v2172_v59 }
 0x22c   :  { %10631 = vst [vmem:[#allocation89_spill] sm:$0xff] %v7157_v24  ;;  %v2185_v49 = vmax.f32 %v2183_v61, %v2184_v9  ;;  %v2210_v20 = vrot.slane %v2209_v2, 4  ;;  %v2198_v26 = vrot.slane %v2197_v19, 2  ;;  %v10632_v36 = vcombine.high %v6647_v25, %v6647_v25 }
 0x22d   :  { %v2179_v11 = vrot.slane %v2178_v18, 1  ;;  %v2191_v0 = vrot.slane %v2190_v45, 2  ;;  %v2204_v4 = vmax.f32 %v2202_v27, %v2203_v56  ;;  %v2223_v61 = vsel %vm359_vm1, %v6651_v35, -inf }
 0x22e   :  { %v2216_v43 = vsel %vm359_vm1, %v10632_v36, -inf  ;;  %v2186_v21 = vrot.slane %v2185_v49, 1  ;;  %v2211_v29 = vmax.f32 %v2209_v2, %v2210_v20  ;;  %v2199_v60 = vmax.f32 %v2197_v19, %v2198_v26 }
 0x22f   :  { %v7167_v57 = vmax.f32 %v2178_v18, %v2179_v11  ;;  %v2217_v39 = vrot.slane %v2216_v43, 4  ;;  %v2192_v52 = vmax.f32 %v2190_v45, %v2191_v0  ;;  %v2205_v44 = vrot.slane %v2204_v4, 2 }
 0x230   :  { %v7171_v33 = vmax.f32 %v2185_v49, %v2186_v21  ;;  %v2212_v59 = vrot.slane %v2211_v29, 2  ;;  %v2224_v27 = vrot.slane %v2223_v61, 4  ;;  %v2200_v25 = vrot.slane %v2199_v60, 1 }
 0x231   :  { %v2218_v56 = vmax.f32 %v2216_v43, %v2217_v39  ;;  %v2193_v9 = vrot.slane %v2192_v52, 1  ;;  %v2206_v24 = vmax.f32 %v2204_v4, %v2205_v44  ;;  %v10633_v18 = vcombine.high %v6651_v35, %v6651_v35 }
 0x232   :  { %v2213_v11 = vmax.f32 %v2211_v29, %v2212_v59  ;;  %v2225_v19 = vmax.f32 %v2223_v61, %v2224_v27  ;;  %v7179_v26 = vmax.f32 %v2199_v60, %v2200_v25  ;;  %v2237_v36 = vsel %vm359_vm1, %v6660_v28, -inf }
 0x233   :  { %v2230_v2 = vsel %vm359_vm1, %v10633_v18, -inf  ;;  %v2219_v45 = vrot.slane %v2218_v56, 2  ;;  %v7177_v0 = vmax.f32 %v2192_v52, %v2193_v9  ;;  %v2207_v49 = vrot.slane %v2206_v24, 1 }
 0x234   :  { %v2231_v20 = vrot.slane %v2230_v2, 4  ;;  %10634 = vst [vmem:[#allocation90_spill] sm:$0xff] %v7179_v26  ;;  %v2214_v43 = vrot.slane %v2213_v11, 1  ;;  %v2226_v4 = vrot.slane %v2225_v19, 2  ;;  %v2238_v35 = vrot.slane %v2237_v36, 4 }
 0x235   :  { %v2220_v21 = vmax.f32 %v2218_v56, %v2219_v45  ;;  %v7183_v44 = vmax.f32 %v2206_v24, %v2207_v49  ;;  %v10636_v29 = vcombine.high %v6660_v28, %v6660_v28  ;;  %v2251_v52 = vsel %vm359_vm1, %v6664_v55, -inf }
 0x236   :  { %v2232_v39 = vmax.f32 %v2230_v2, %v2231_v20  ;;  %v7191_v60 = vmax.f32 %v2213_v11, %v2214_v43  ;;  %v2227_v27 = vmax.f32 %v2225_v19, %v2226_v4  ;;  %v2239_v25 = vmax.f32 %v2237_v36, %v2238_v35 }
 0x237   :  { %10635 = vst [vmem:[#allocation91_spill] sm:$0xff] %v7183_v44  ;;  %v2244_v61 = vsel %vm359_vm1, %v10636_v29, -inf  ;;  %v2221_v59 = vrot.slane %v2220_v21, 1  ;;  %v2252_v18 = vrot.slane %v2251_v52, 4  ;;  %v10638_v24 = vcombine.high %v6664_v55, %v6664_v55 }
 0x238   :  { %10637 = vst [vmem:[#allocation92_spill] sm:$0xff] %v7191_v60  ;;  %v2233_v9 = vrot.slane %v2232_v39, 2  ;;  %v2245_v56 = vrot.slane %v2244_v61, 4  ;;  %v2228_v28 = vrot.slane %v2227_v27, 1  ;;  %v2240_v29 = vrot.slane %v2239_v25, 2 }
 0x239   :  { %v2258_v2 = vsel %vm359_vm1, %v10638_v24, -inf  ;;  %v7197_v45 = vmax.f32 %v2220_v21, %v2221_v59  ;;  %v2253_v11 = vmax.f32 %v2251_v52, %v2252_v18  ;;  %v2265_v19 = vsel %vm359_vm1, %v6671_v13, -inf }
 0x23a   :  { %v2234_v20 = vmax.f32 %v2232_v39, %v2233_v9  ;;  %v2259_v49 = vrot.slane %v2258_v2, 4  ;;  %v2246_v44 = vmax.f32 %v2244_v61, %v2245_v56  ;;  %v7201_v43 = vmax.f32 %v2227_v27, %v2228_v28 }
 0x23b   :  { %v2266_v35 = vrot.slane %v2265_v19, 4  ;;  %v2241_v60 = vmax.f32 %v2239_v25, %v2240_v29  ;;  %v2254_v26 = vrot.slane %v2253_v11, 2  ;;  %v10640_v21 = vcombine.high %v6671_v13, %v6671_v13 }
 0x23c   :  { %10639 = vst [vmem:[#allocation93_spill] sm:$0xff] %v7201_v43  ;;  %v2235_v36 = vrot.slane %v2234_v20, 1  ;;  %v2260_v4 = vmax.f32 %v2258_v2, %v2259_v49  ;;  %v2247_v55 = vrot.slane %v2246_v44, 2  ;;  %v2279_v24 = vsel %vm359_vm1, %v6681_v5, -inf }
 0x23d   :  { %v2272_v39 = vsel %vm359_vm1, %v10640_v21, -inf  ;;  %v2267_v52 = vmax.f32 %v2265_v19, %v2266_v35  ;;  %v2242_v56 = vrot.slane %v2241_v60, 1  ;;  %v2255_v27 = vmax.f32 %v2253_v11, %v2254_v26  ;;  %v10646_v21 = vld [vmem:[#allocation26_spill] sm:$0xff] }
 0x23e   :  { %v7207_v59 = vmax.f32 %v2234_v20, %v2235_v36  ;;  %v2261_v61 = vrot.slane %v2260_v4, 2  ;;  %v2273_v9 = vrot.slane %v2272_v39, 4  ;;  %v2248_v18 = vmax.f32 %v2246_v44, %v2247_v55 }
 0x23f   :  { %v2268_v25 = vrot.slane %v2267_v52, 2  ;;  %v2280_v49 = vrot.slane %v2279_v24, 4  ;;  %v7211_v29 = vmax.f32 %v2241_v60, %v2242_v56  ;;  %v2256_v43 = vrot.slane %v2255_v27, 1 }
 0x240   :  { %10641 = vst [vmem:[#allocation94_spill] sm:$0xff] %v7207_v59  ;;  %v2262_v2 = vmax.f32 %v2260_v4, %v2261_v61  ;;  %v2274_v28 = vmax.f32 %v2272_v39, %v2273_v9  ;;  %v2249_v13 = vrot.slane %v2248_v18, 1  ;;  %v10643_v20 = vcombine.high %v6681_v5, %v6681_v5 }
 0x241   :  { %10642 = vst [vmem:[#allocation95_spill] sm:$0xff] %v7211_v29  ;;  %v2269_v35 = vmax.f32 %v2267_v52, %v2268_v25  ;;  %v2281_v26 = vmax.f32 %v2279_v24, %v2280_v49  ;;  %v7219_v55 = vmax.f32 %v2255_v27, %v2256_v43  ;;  %v2293_v60 = vsel %vm359_vm1, %v10646_v21, -inf }
 0x242   :  { %v2286_v19 = vsel %vm359_vm1, %v10643_v20, -inf  ;;  %v2263_v36 = vrot.slane %v2262_v2, 1  ;;  %v2275_v44 = vrot.slane %v2274_v28, 2  ;;  %v7217_v11 = vmax.f32 %v2248_v18, %v2249_v13  ;;  %v10649_v18 = vld [vmem:[#allocation20_spill] sm:$0xff] }
 0x243   :  { %10645 = vst [vmem:[#allocation97_spill] sm:$0xff] %v7219_v55  ;;  %v2287_v4 = vrot.slane %v2286_v19, 4  ;;  %v2270_v61 = vrot.slane %v2269_v35, 1  ;;  %v2282_v56 = vrot.slane %v2281_v26, 2  ;;  %v2294_v29 = vrot.slane %v2293_v60, 4 }
 0x244   :  { %10644 = vst [vmem:[#allocation96_spill] sm:$0xff] %v7217_v11  ;;  %v7223_v39 = vmax.f32 %v2262_v2, %v2263_v36  ;;  %v2276_v9 = vmax.f32 %v2274_v28, %v2275_v44  ;;  %v10648_v52 = vcombine.high %v10646_v21, %v10646_v21  ;;  %v2307_v43 = vsel %vm359_vm1, %v10649_v18, -inf }
 0x245   :  { %v2288_v5 = vmax.f32 %v2286_v19, %v2287_v4  ;;  %v7231_v27 = vmax.f32 %v2269_v35, %v2270_v61  ;;  %v2283_v49 = vmax.f32 %v2281_v26, %v2282_v56  ;;  %v2295_v20 = vmax.f32 %v2293_v60, %v2294_v29  ;;  %v10653_v61 = vld [vmem:[#allocation24_spill] sm:$0xff] }
 0x246   :  { %10647 = vst [vmem:[#allocation26_spill] sm:$0xff] %v7223_v39  ;;  %v2300_v24 = vsel %vm359_vm1, %v10648_v52, -inf  ;;  %v2277_v25 = vrot.slane %v2276_v9, 1  ;;  %v2308_v36 = vrot.slane %v2307_v43, 4  ;;  %v10651_v28 = vcombine.high %v10649_v18, %v10649_v18 }
 0x247   :  { %10650 = vst [vmem:[#allocation20_spill] sm:$0xff] %v7231_v27  ;;  %v2301_v13 = vrot.slane %v2300_v24, 4  ;;  %v2289_v2 = vrot.slane %v2288_v5, 2  ;;  %v2284_v4 = vrot.slane %v2283_v49, 1  ;;  %v2296_v55 = vrot.slane %v2295_v20, 2 }
 0x248   :  { %v2314_v19 = vsel %vm359_vm1, %v10651_v28, -inf  ;;  %v7237_v44 = vmax.f32 %v2276_v9, %v2277_v25  ;;  %v2309_v35 = vmax.f32 %v2307_v43, %v2308_v36  ;;  %v2321_v26 = vsel %vm359_vm1, %v10653_v61, -inf  ;;  %v10657_v28 = vld [vmem:[#allocation30_spill] sm:$0xff] }
 0x249   :  { %v2302_v21 = vmax.f32 %v2300_v24, %v2301_v13  ;;  %v2315_v52 = vrot.slane %v2314_v19, 4  ;;  %v2290_v39 = vmax.f32 %v2288_v5, %v2289_v2  ;;  %v7241_v56 = vmax.f32 %v2283_v49, %v2284_v4 }
 0x24a   :  { %10652 = vst [vmem:[#allocation98_spill] sm:$0xff] %v7237_v44  ;;  %v2322_v27 = vrot.slane %v2321_v26, 4  ;;  %v2297_v18 = vmax.f32 %v2295_v20, %v2296_v55  ;;  %v2310_v59 = vrot.slane %v2309_v35, 2  ;;  %v10655_v9 = vcombine.high %v10653_v61, %v10653_v61 }
 0x24b   :  { %10654 = vst [vmem:[#allocation24_spill] sm:$0xff] %v7241_v56  ;;  %v2303_v29 = vrot.slane %v2302_v21, 2  ;;  %v2316_v60 = vmax.f32 %v2314_v19, %v2315_v52  ;;  %v2291_v11 = vrot.slane %v2290_v39, 1  ;;  %v2335_v19 = vsel %vm359_vm1, %v10657_v28, -inf }
 0x24c   :  { %v2328_v24 = vsel %vm359_vm1, %v10655_v9, -inf  ;;  %v2323_v13 = vmax.f32 %v2321_v26, %v2322_v27  ;;  %v2298_v36 = vrot.slane %v2297_v18, 1  ;;  %v2311_v49 = vmax.f32 %v2309_v35, %v2310_v59  ;;  %v10662_v9 = vld [vmem:[#allocation34_spill] sm:$0xff] }
 0x24d   :  { %v2304_v25 = vmax.f32 %v2302_v21, %v2303_v29  ;;  %v2317_v5 = vrot.slane %v2316_v60, 2  ;;  %v2329_v43 = vrot.slane %v2328_v24, 4  ;;  %v7247_v2 = vmax.f32 %v2290_v39, %v2291_v11 }
 0x24e   :  { %v2324_v55 = vrot.slane %v2323_v13, 2  ;;  %v7251_v44 = vmax.f32 %v2297_v18, %v2298_v36  ;;  %v2312_v61 = vrot.slane %v2311_v49, 1  ;;  %v2336_v56 = vrot.slane %v2335_v19, 4 }
 0x24f   :  { %10656 = vst [vmem:[#allocation99_spill] sm:$0xff] %v7247_v2  ;;  %v2305_v4 = vrot.slane %v2304_v25, 1  ;;  %v2318_v52 = vmax.f32 %v2316_v60, %v2317_v5  ;;  %v2330_v20 = vmax.f32 %v2328_v24, %v2329_v43  ;;  %v10659_v21 = vcombine.high %v10657_v28, %v10657_v28 }
 0x250   :  { %10658 = vst [vmem:[#allocation30_spill] sm:$0xff] %v7251_v44  ;;  %v2325_v59 = vmax.f32 %v2323_v13, %v2324_v55  ;;  %v7259_v26 = vmax.f32 %v2311_v49, %v2312_v61  ;;  %v2337_v29 = vmax.f32 %v2335_v19, %v2336_v56  ;;  %v2349_v18 = vsel %vm359_vm1, %v10662_v9, -inf }
 0x251   :  { %v2342_v27 = vsel %vm359_vm1, %v10659_v21, -inf  ;;  %v7257_v11 = vmax.f32 %v2304_v25, %v2305_v4  ;;  %v2319_v39 = vrot.slane %v2318_v52, 1  ;;  %v2331_v35 = vrot.slane %v2330_v20, 2  ;;  %v10665_v4 = vld [vmem:[#allocation28_spill] sm:$0xff] }
 0x252   :  { %10661 = vst [vmem:[#allocation101_spill] sm:$0xff] %v7259_v26  ;;  %v2343_v60 = vrot.slane %v2342_v27, 4  ;;  %v2326_v5 = vrot.slane %v2325_v59, 1  ;;  %v2350_v36 = vrot.slane %v2349_v18, 4  ;;  %v2338_v28 = vrot.slane %v2337_v29, 2 }
 0x253   :  { %10660 = vst [vmem:[#allocation100_spill] sm:$0xff] %v7257_v11  ;;  %v7263_v24 = vmax.f32 %v2318_v52, %v2319_v39  ;;  %v2332_v43 = vmax.f32 %v2330_v20, %v2331_v35  ;;  %v10664_v25 = vcombine.high %v10662_v9, %v10662_v9  ;;  %v2363_v49 = vsel %vm359_vm1, %v10665_v4, -inf }
 0x254   :  { %v2344_v44 = vmax.f32 %v2342_v27, %v2343_v60  ;;  %v7271_v56 = vmax.f32 %v2325_v59, %v2326_v5  ;;  %v2351_v55 = vmax.f32 %v2349_v18, %v2350_v36  ;;  %v2339_v52 = vmax.f32 %v2337_v29, %v2338_v28  ;;  %v10669_v5 = vld [vmem:[#allocation32_spill] sm:$0xff] }
 0x255   :  { %10663 = vst [vmem:[#allocation34_spill] sm:$0xff] %v7263_v24  ;;  %v2356_v13 = vsel %vm359_vm1, %v10664_v25, -inf  ;;  %v2333_v19 = vrot.slane %v2332_v43, 1  ;;  %v2364_v39 = vrot.slane %v2363_v49, 4  ;;  %v10667_v20 = vcombine.high %v10665_v4, %v10665_v4 }
 0x256   :  { %10666 = vst [vmem:[#allocation28_spill] sm:$0xff] %v7271_v56  ;;  %v2357_v61 = vrot.slane %v2356_v13, 4  ;;  %v2345_v21 = vrot.slane %v2344_v44, 2  ;;  %v2352_v60 = vrot.slane %v2351_v55, 2  ;;  %v2340_v24 = vrot.slane %v2339_v52, 1 }
 0x257   :  { %v2370_v27 = vsel %vm359_vm1, %v10667_v20, -inf  ;;  %v7277_v35 = vmax.f32 %v2332_v43, %v2333_v19  ;;  %v2365_v59 = vmax.f32 %v2363_v49, %v2364_v39  ;;  %v2377_v18 = vsel %vm359_vm1, %v10669_v5, -inf  ;;  %v10673_v20 = vld [vmem:[#allocation38_spill] sm:$0xff] }
 0x258   :  { %v2358_v9 = vmax.f32 %v2356_v13, %v2357_v61  ;;  %v2371_v25 = vrot.slane %v2370_v27, 4  ;;  %v2346_v26 = vmax.f32 %v2344_v44, %v2345_v21  ;;  %v2353_v36 = vmax.f32 %v2351_v55, %v2352_v60 }
 0x259   :  { %10668 = vst [vmem:[#allocation102_spill] sm:$0xff] %v7277_v35  ;;  %v2378_v56 = vrot.slane %v2377_v18, 4  ;;  %v7281_v11 = vmax.f32 %v2339_v52, %v2340_v24  ;;  %v2366_v2 = vrot.slane %v2365_v59, 2  ;;  %v10671_v43 = vcombine.high %v10669_v5, %v10669_v5 }
 0x25a   :  { %v2359_v29 = vrot.slane %v2358_v9, 2  ;;  %v2372_v28 = vmax.f32 %v2370_v27, %v2371_v25  ;;  %v2347_v4 = vrot.slane %v2346_v26, 1  ;;  %v2354_v19 = vrot.slane %v2353_v36, 1 }
 0x25b   :  { %10670 = vst [vmem:[#allocation32_spill] sm:$0xff] %v7281_v11  ;;  %v2384_v13 = vsel %vm359_vm1, %v10671_v43, -inf  ;;  %v2379_v49 = vmax.f32 %v2377_v18, %v2378_v56  ;;  %v2367_v39 = vmax.f32 %v2365_v59, %v2366_v2  ;;  %v2391_v27 = vsel %vm359_vm1, %v10673_v20, -inf  ;;  %v10678_v43 = vld [vmem:[#allocation42_spill] sm:$0xff] }
 0x25c   :  { %v2360_v61 = vmax.f32 %v2358_v9, %v2359_v29  ;;  %v2373_v44 = vrot.slane %v2372_v28, 2  ;;  %v7287_v21 = vmax.f32 %v2346_v26, %v2347_v4  ;;  %v2385_v55 = vrot.slane %v2384_v13, 4 }
 0x25d   :  { %v7291_v24 = vmax.f32 %v2353_v36, %v2354_v19  ;;  %v2380_v25 = vrot.slane %v2379_v49, 2  ;;  %v2368_v11 = vrot.slane %v2367_v39, 1  ;;  %v2392_v35 = vrot.slane %v2391_v27, 4 }
 0x25e   :  { %10672 = vst [vmem:[#allocation103_spill] sm:$0xff] %v7287_v21  ;;  %v2361_v52 = vrot.slane %v2360_v61, 1  ;;  %v2374_v60 = vmax.f32 %v2372_v28, %v2373_v44  ;;  %v2386_v5 = vmax.f32 %v2384_v13, %v2385_v55  ;;  %v10675_v9 = vcombine.high %v10673_v20, %v10673_v20 }
 0x25f   :  { %10674 = vst [vmem:[#allocation38_spill] sm:$0xff] %v7291_v24  ;;  %v2381_v59 = vmax.f32 %v2379_v49, %v2380_v25  ;;  %v7299_v29 = vmax.f32 %v2367_v39, %v2368_v11  ;;  %v2393_v4 = vmax.f32 %v2391_v27, %v2392_v35  ;;  %v2405_v28 = vsel %vm359_vm1, %v10678_v43, -inf }
 0x260   :  { %v2398_v56 = vsel %vm359_vm1, %v10675_v9, -inf  ;;  %v7297_v26 = vmax.f32 %v2360_v61, %v2361_v52  ;;  %v2375_v2 = vrot.slane %v2374_v60, 1  ;;  %v2387_v36 = vrot.slane %v2386_v5, 2  ;;  %v10681_v52 = vld [vmem:[#allocation36_spill] sm:$0xff] }
 0x261   :  { %v2399_v18 = vrot.slane %v2398_v56, 4  ;;  %10677 = vst [vmem:[#allocation105_spill] sm:$0xff] %v7299_v29  ;;  %v2382_v13 = vrot.slane %v2381_v59, 1  ;;  %v2406_v55 = vrot.slane %v2405_v28, 4  ;;  %v2394_v24 = vrot.slane %v2393_v4, 2 }
 0x262   :  { %10676 = vst [vmem:[#allocation104_spill] sm:$0xff] %v7297_v26  ;;  %v7303_v19 = vmax.f32 %v2374_v60, %v2375_v2  ;;  %v2388_v20 = vmax.f32 %v2386_v5, %v2387_v36  ;;  %v10680_v61 = vcombine.high %v10678_v43, %v10678_v43  ;;  %v2419_v11 = vsel %vm359_vm1, %v10681_v52, -inf }
 0x263   :  { %v2400_v44 = vmax.f32 %v2398_v56, %v2399_v18  ;;  %v7311_v39 = vmax.f32 %v2381_v59, %v2382_v13  ;;  %v2407_v27 = vmax.f32 %v2405_v28, %v2406_v55  ;;  %v2395_v9 = vmax.f32 %v2393_v4, %v2394_v24  ;;  %v10685_v13 = vld [vmem:[#allocation40_spill] sm:$0xff] }
 0x264   :  { %10679 = vst [vmem:[#allocation42_spill] sm:$0xff] %v7303_v19  ;;  %v2412_v49 = vsel %vm359_vm1, %v10680_v61, -inf  ;;  %v2389_v60 = vrot.slane %v2388_v20, 1  ;;  %v2420_v2 = vrot.slane %v2419_v11, 4  ;;  %v10683_v5 = vcombine.high %v10681_v52, %v10681_v52 }
 0x265   :  { %10682 = vst [vmem:[#allocation36_spill] sm:$0xff] %v7311_v39  ;;  %v2401_v35 = vrot.slane %v2400_v44, 2  ;;  %v2413_v25 = vrot.slane %v2412_v49, 4  ;;  %v2408_v36 = vrot.slane %v2407_v27, 2  ;;  %v2396_v29 = vrot.slane %v2395_v9, 1 }
 0x266   :  { %v2426_v56 = vsel %vm359_vm1, %v10683_v5, -inf  ;;  %v7317_v19 = vmax.f32 %v2388_v20, %v2389_v60  ;;  %v2421_v59 = vmax.f32 %v2419_v11, %v2420_v2  ;;  %v2433_v28 = vsel %vm359_vm1, %v10685_v13, -inf }
 0x267   :  { %v2402_v18 = vmax.f32 %v2400_v44, %v2401_v35  ;;  %v2414_v43 = vmax.f32 %v2412_v49, %v2413_v25  ;;  %v2427_v61 = vrot.slane %v2426_v56, 4  ;;  %v2409_v39 = vmax.f32 %v2407_v27, %v2408_v36  ;;  %v10689_v27 = vld [vmem:[#allocation49_spill] sm:$0xff] }
 0x268   :  { %10684 = vst [vmem:[#allocation106_spill] sm:$0xff] %v7317_v19  ;;  %v7321_v26 = vmax.f32 %v2395_v9, %v2396_v29  ;;  %v2422_v52 = vrot.slane %v2421_v59, 2  ;;  %v2434_v21 = vrot.slane %v2433_v28, 4  ;;  %v10687_v44 = vcombine.high %v10685_v13, %v10685_v13 }
 0x269   :  { %v2403_v55 = vrot.slane %v2402_v18, 1  ;;  %v2415_v24 = vrot.slane %v2414_v43, 2  ;;  %v2428_v4 = vmax.f32 %v2426_v56, %v2427_v61  ;;  %v2410_v35 = vrot.slane %v2409_v39, 1 }
 0x26a   :  { %10686 = vst [vmem:[#allocation40_spill] sm:$0xff] %v7321_v26  ;;  %v2440_v49 = vsel %vm359_vm1, %v10687_v44, -inf  ;;  %v2423_v60 = vmax.f32 %v2421_v59, %v2422_v52  ;;  %v2435_v2 = vmax.f32 %v2433_v28, %v2434_v21  ;;  %v2447_v56 = vsel %vm359_vm1, %v10689_v27, -inf  ;;  %v10694_v44 = vld [vmem:[#allocation50_spill] sm:$0xff] }
 0x26b   :  { %v7327_v20 = vmax.f32 %v2402_v18, %v2403_v55  ;;  %v2416_v11 = vmax.f32 %v2414_v43, %v2415_v24  ;;  %v2429_v25 = vrot.slane %v2428_v4, 2  ;;  %v2441_v5 = vrot.slane %v2440_v49, 4 }
 0x26c   :  { %v7331_v29 = vmax.f32 %v2409_v39, %v2410_v35  ;;  %v2448_v61 = vrot.slane %v2447_v56, 4  ;;  %v2424_v19 = vrot.slane %v2423_v60, 1  ;;  %v2436_v13 = vrot.slane %v2435_v2, 2 }
 0x26d   :  { %10688 = vst [vmem:[#allocation107_spill] sm:$0xff] %v7327_v20  ;;  %v2417_v9 = vrot.slane %v2416_v11, 1  ;;  %v2430_v36 = vmax.f32 %v2428_v4, %v2429_v25  ;;  %v2442_v26 = vmax.f32 %v2440_v49, %v2441_v5  ;;  %v10691_v18 = vcombine.high %v10689_v27, %v10689_v27 }
 0x26e   :  { %10690 = vst [vmem:[#allocation49_spill] sm:$0xff] %v7331_v29  ;;  %v2449_v59 = vmax.f32 %v2447_v56, %v2448_v61  ;;  %v7339_v24 = vmax.f32 %v2423_v60, %v2424_v19  ;;  %v2437_v39 = vmax.f32 %v2435_v2, %v2436_v13  ;;  %v2461_v4 = vsel %vm359_vm1, %v10694_v44, -inf }
 0x26f   :  { %v2454_v43 = vsel %vm359_vm1, %v10691_v18, -inf  ;;  %v7337_v55 = vmax.f32 %v2416_v11, %v2417_v9  ;;  %v2431_v21 = vrot.slane %v2430_v36, 1  ;;  %v2443_v52 = vrot.slane %v2442_v26, 2  ;;  %v10697_v9 = vld [vmem:[#allocation51_spill] sm:$0xff] }
 0x270   :  { %v2455_v28 = vrot.slane %v2454_v43, 4  ;;  %10693 = vst [vmem:[#allocation109_spill] sm:$0xff] %v7339_v24  ;;  %v2450_v49 = vrot.slane %v2449_v59, 2  ;;  %v2462_v5 = vrot.slane %v2461_v4, 4  ;;  %v2438_v27 = vrot.slane %v2437_v39, 1 }
 0x271   :  { %10692 = vst [vmem:[#allocation108_spill] sm:$0xff] %v7337_v55  ;;  %v7343_v35 = vmax.f32 %v2430_v36, %v2431_v21  ;;  %v2444_v29 = vmax.f32 %v2442_v26, %v2443_v52  ;;  %v10696_v11 = vcombine.high %v10694_v44, %v10694_v44  ;;  %v2475_v19 = vsel %vm359_vm1, %v10697_v9, -inf }
 0x272   :  { %v2456_v25 = vmax.f32 %v2454_v43, %v2455_v28  ;;  %v2451_v60 = vmax.f32 %v2449_v59, %v2450_v49  ;;  %v2463_v61 = vmax.f32 %v2461_v4, %v2462_v5  ;;  %v7351_v18 = vmax.f32 %v2437_v39, %v2438_v27  ;;  %v10701_v49 = vld [vmem:[#allocation52_spill] sm:$0xff] }
 0x273   :  { %10695 = vst [vmem:[#allocation50_spill] sm:$0xff] %v7343_v35  ;;  %v2468_v56 = vsel %vm359_vm1, %v10696_v11, -inf  ;;  %v2445_v36 = vrot.slane %v2444_v29, 1  ;;  %v2476_v21 = vrot.slane %v2475_v19, 4  ;;  %v10699_v43 = vcombine.high %v10697_v9, %v10697_v9 }
 0x274   :  { %v2457_v2 = vrot.slane %v2456_v25, 2  ;;  %v2469_v13 = vrot.slane %v2468_v56, 4  ;;  %10698 = vst [vmem:[#allocation51_spill] sm:$0xff] %v7351_v18  ;;  %v2452_v28 = vrot.slane %v2451_v60, 1  ;;  %v2464_v44 = vrot.slane %v2463_v61, 2 }
 0x275   :  { %v2482_v26 = vsel %vm359_vm1, %v10699_v43, -inf  ;;  %v7357_v35 = vmax.f32 %v2444_v29, %v2445_v36  ;;  %v2477_v24 = vmax.f32 %v2475_v19, %v2476_v21  ;;  %v2489_v4 = vsel %vm359_vm1, %v10701_v49, -inf  ;;  %v10705_v43 = vld [vmem:[#allocation53_spill] sm:$0xff] }
 0x276   :  { %v2458_v52 = vmax.f32 %v2456_v25, %v2457_v2  ;;  %v2470_v11 = vmax.f32 %v2468_v56, %v2469_v13  ;;  %v2483_v59 = vrot.slane %v2482_v26, 4  ;;  %v7361_v39 = vmax.f32 %v2451_v60, %v2452_v28 }
 0x277   :  { %10700 = vst [vmem:[#allocation110_spill] sm:$0xff] %v7357_v35  ;;  %v2465_v27 = vmax.f32 %v2463_v61, %v2464_v44  ;;  %v2478_v55 = vrot.slane %v2477_v24, 2  ;;  %v2490_v20 = vrot.slane %v2489_v4, 4  ;;  %v10703_v25 = vcombine.high %v10701_v49, %v10701_v49 }
 0x278   :  { %10702 = vst [vmem:[#allocation52_spill] sm:$0xff] %v7361_v39  ;;  %v2459_v5 = vrot.slane %v2458_v52, 1  ;;  %v2471_v18 = vrot.slane %v2470_v11, 2  ;;  %v2484_v9 = vmax.f32 %v2482_v26, %v2483_v59  ;;  %v2503_v61 = vsel %vm359_vm1, %v10705_v43, -inf }
 0x279   :  { %v2496_v56 = vsel %vm359_vm1, %v10703_v25, -inf  ;;  %v2466_v19 = vrot.slane %v2465_v27, 1  ;;  %v2479_v36 = vmax.f32 %v2477_v24, %v2478_v55  ;;  %v2491_v60 = vmax.f32 %v2489_v4, %v2490_v20  ;;  %v10710_v25 = vld [vmem:[#allocation54_spill] sm:$0xff] }
 0x27a   :  { %v7367_v29 = vmax.f32 %v2458_v52, %v2459_v5  ;;  %v2472_v2 = vmax.f32 %v2470_v11, %v2471_v18  ;;  %v2497_v13 = vrot.slane %v2496_v56, 4  ;;  %v2485_v21 = vrot.slane %v2484_v9, 2 }
 0x27b   :  { %v7371_v28 = vmax.f32 %v2465_v27, %v2466_v19  ;;  %v2504_v59 = vrot.slane %v2503_v61, 4  ;;  %v2480_v39 = vrot.slane %v2479_v36, 1  ;;  %v2492_v35 = vrot.slane %v2491_v60, 2 }
 0x27c   :  { %10704 = vst [vmem:[#allocation111_spill] sm:$0xff] %v7367_v29  ;;  %v2473_v26 = vrot.slane %v2472_v2, 1  ;;  %v2498_v44 = vmax.f32 %v2496_v56, %v2497_v13  ;;  %v2486_v49 = vmax.f32 %v2484_v9, %v2485_v21  ;;  %v10707_v52 = vcombine.high %v10705_v43, %v10705_v43 }
 0x27d   :  { %10706 = vst [vmem:[#allocation53_spill] sm:$0xff] %v7371_v28  ;;  %v2505_v20 = vmax.f32 %v2503_v61, %v2504_v59  ;;  %v7379_v4 = vmax.f32 %v2479_v36, %v2480_v39  ;;  %v2493_v27 = vmax.f32 %v2491_v60, %v2492_v35  ;;  %v2517_v56 = vsel %vm359_vm1, %v10710_v25, -inf }
 0x27e   :  { %v2510_v18 = vsel %vm359_vm1, %v10707_v52, -inf  ;;  %v7377_v11 = vmax.f32 %v2472_v2, %v2473_v26  ;;  %v2499_v55 = vrot.slane %v2498_v44, 2  ;;  %v2487_v5 = vrot.slane %v2486_v49, 1  ;;  %v10713_v26 = vld [vmem:[#allocation55_spill] sm:$0xff] }
 0x27f   :  { %v2511_v24 = vrot.slane %v2510_v18, 4  ;;  %10709 = vst [vmem:[#allocation113_spill] sm:$0xff] %v7379_v4  ;;  %v2506_v9 = vrot.slane %v2505_v20, 2  ;;  %v2518_v21 = vrot.slane %v2517_v56, 4  ;;  %v2494_v43 = vrot.slane %v2493_v27, 1 }
 0x280   :  { %10708 = vst [vmem:[#allocation112_spill] sm:$0xff] %v7377_v11  ;;  %v2500_v19 = vmax.f32 %v2498_v44, %v2499_v55  ;;  %v7383_v28 = vmax.f32 %v2486_v49, %v2487_v5  ;;  %v10712_v2 = vcombine.high %v10710_v25, %v10710_v25  ;;  %v2531_v39 = vsel %vm359_vm1, %v10713_v26, -inf }
 0x281   :  { %v2512_v13 = vmax.f32 %v2510_v18, %v2511_v24  ;;  %v2507_v35 = vmax.f32 %v2505_v20, %v2506_v9  ;;  %v2519_v59 = vmax.f32 %v2517_v56, %v2518_v21  ;;  %v7391_v52 = vmax.f32 %v2493_v27, %v2494_v43  ;;  %v10717_v20 = vld [vmem:[#allocation56_spill] sm:$0xff] }
 0x282   :  { %10711 = vst [vmem:[#allocation54_spill] sm:$0xff] %v7383_v28  ;;  %v2524_v61 = vsel %vm359_vm1, %v10712_v2, -inf  ;;  %v2501_v36 = vrot.slane %v2500_v19, 1  ;;  %v2532_v18 = vrot.slane %v2531_v39, 4  ;;  %v10715_v49 = vcombine.high %v10713_v26, %v10713_v26 }
 0x283   :  { %v2513_v60 = vrot.slane %v2512_v13, 2  ;;  %10714 = vst [vmem:[#allocation55_spill] sm:$0xff] %v7391_v52  ;;  %v2525_v44 = vrot.slane %v2524_v61, 4  ;;  %v2508_v5 = vrot.slane %v2507_v35, 1  ;;  %v2520_v2 = vrot.slane %v2519_v59, 2 }
 0x284   :  { %v2538_v55 = vsel %vm359_vm1, %v10715_v49, -inf  ;;  %v7397_v24 = vmax.f32 %v2500_v19, %v2501_v36  ;;  %v2533_v4 = vmax.f32 %v2531_v39, %v2532_v18  ;;  %v2545_v56 = vsel %vm359_vm1, %v10717_v20, -inf  ;;  %v10721_v49 = vld [vmem:[#allocation57_spill] sm:$0xff] }
 0x285   :  { %v2514_v25 = vmax.f32 %v2512_v13, %v2513_v60  ;;  %v2526_v28 = vmax.f32 %v2524_v61, %v2525_v44  ;;  %v2539_v11 = vrot.slane %v2538_v55, 4  ;;  %v7401_v27 = vmax.f32 %v2507_v35, %v2508_v5 }
 0x286   :  { %10716 = vst [vmem:[#allocation114_spill] sm:$0xff] %v7397_v24  ;;  %v2521_v21 = vmax.f32 %v2519_v59, %v2520_v2  ;;  %v2546_v43 = vrot.slane %v2545_v56, 4  ;;  %v2534_v26 = vrot.slane %v2533_v4, 2  ;;  %v10719_v19 = vcombine.high %v10717_v20, %v10717_v20 }
 0x287   :  { %10718 = vst [vmem:[#allocation56_spill] sm:$0xff] %v7401_v27  ;;  %v2515_v9 = vrot.slane %v2514_v25, 1  ;;  %v2527_v52 = vrot.slane %v2526_v28, 2  ;;  %v2540_v29 = vmax.f32 %v2538_v55, %v2539_v11  ;;  %v2559_v59 = vsel %vm359_vm1, %v10721_v49, -inf }
 0x288   :  { %v2552_v13 = vsel %vm359_vm1, %v10719_v19, -inf  ;;  %v2522_v61 = vrot.slane %v2521_v21, 1  ;;  %v2547_v39 = vmax.f32 %v2545_v56, %v2546_v43  ;;  %v2535_v18 = vmax.f32 %v2533_v4, %v2534_v26  ;;  %v10726_v19 = vld [vmem:[#allocation58_spill] sm:$0xff] }
 0x289   :  { %v7407_v36 = vmax.f32 %v2514_v25, %v2515_v9  ;;  %v2553_v60 = vrot.slane %v2552_v13, 4  ;;  %v2528_v44 = vmax.f32 %v2526_v28, %v2527_v52  ;;  %v2541_v35 = vrot.slane %v2540_v29, 2 }
 0x28a   :  { %v7411_v5 = vmax.f32 %v2521_v21, %v2522_v61  ;;  %v2548_v2 = vrot.slane %v2547_v39, 2  ;;  %v2560_v55 = vrot.slane %v2559_v59, 4  ;;  %v2536_v20 = vrot.slane %v2535_v18, 1 }
 0x28b   :  { %10720 = vst [vmem:[#allocation115_spill] sm:$0xff] %v7407_v36  ;;  %v2554_v11 = vmax.f32 %v2552_v13, %v2553_v60  ;;  %v2529_v24 = vrot.slane %v2528_v44, 1  ;;  %v2542_v27 = vmax.f32 %v2540_v29, %v2541_v35  ;;  %v10723_v25 = vcombine.high %v10721_v49, %v10721_v49 }
 0x28c   :  { %10722 = vst [vmem:[#allocation57_spill] sm:$0xff] %v7411_v5  ;;  %v2549_v9 = vmax.f32 %v2547_v39, %v2548_v2  ;;  %v2561_v4 = vmax.f32 %v2559_v59, %v2560_v55  ;;  %v7419_v26 = vmax.f32 %v2535_v18, %v2536_v20  ;;  %v2573_v13 = vsel %vm359_vm1, %v10726_v19, -inf }
 0x28d   :  { %v2566_v56 = vsel %vm359_vm1, %v10723_v25, -inf  ;;  %v2555_v28 = vrot.slane %v2554_v11, 2  ;;  %v7417_v43 = vmax.f32 %v2528_v44, %v2529_v24  ;;  %v2543_v21 = vrot.slane %v2542_v27, 1  ;;  %v10729_v24 = vld [vmem:[#allocation59_spill] sm:$0xff] }
 0x28e   :  { %v2567_v52 = vrot.slane %v2566_v56, 4  ;;  %10725 = vst [vmem:[#allocation117_spill] sm:$0xff] %v7419_v26  ;;  %v2550_v61 = vrot.slane %v2549_v9, 1  ;;  %v2562_v29 = vrot.slane %v2561_v4, 2  ;;  %v2574_v49 = vrot.slane %v2573_v13, 4 }
 0x28f   :  { %10724 = vst [vmem:[#allocation116_spill] sm:$0xff] %v7417_v43  ;;  %v2556_v60 = vmax.f32 %v2554_v11, %v2555_v28  ;;  %v7423_v5 = vmax.f32 %v2542_v27, %v2543_v21  ;;  %v10728_v39 = vcombine.high %v10726_v19, %v10726_v19  ;;  %v2587_v44 = vsel %vm359_vm1, %v10729_v24, -inf }
 0x290   :  { %v2568_v35 = vmax.f32 %v2566_v56, %v2567_v52  ;;  %v7431_v18 = vmax.f32 %v2549_v9, %v2550_v61  ;;  %v2563_v55 = vmax.f32 %v2561_v4, %v2562_v29  ;;  %v2575_v25 = vmax.f32 %v2573_v13, %v2574_v49  ;;  %v10733_v61 = vld [vmem:[#allocation60_spill] sm:$0xff] }
 0x291   :  { %10727 = vst [vmem:[#allocation58_spill] sm:$0xff] %v7423_v5  ;;  %v2580_v59 = vsel %vm359_vm1, %v10728_v39, -inf  ;;  %v2557_v2 = vrot.slane %v2556_v60, 1  ;;  %v2588_v28 = vrot.slane %v2587_v44, 4  ;;  %v10731_v27 = vcombine.high %v10729_v24, %v10729_v24 }
 0x292   :  { %10730 = vst [vmem:[#allocation59_spill] sm:$0xff] %v7431_v18  ;;  %v2569_v20 = vrot.slane %v2568_v35, 2  ;;  %v2581_v11 = vrot.slane %v2580_v59, 4  ;;  %v2564_v21 = vrot.slane %v2563_v55, 1  ;;  %v2576_v5 = vrot.slane %v2575_v25, 2 }
 0x293   :  { %v2594_v56 = vsel %vm359_vm1, %v10731_v27, -inf  ;;  %v7437_v52 = vmax.f32 %v2556_v60, %v2557_v2  ;;  %v2589_v9 = vmax.f32 %v2587_v44, %v2588_v28  ;;  %v2601_v4 = vsel %vm359_vm1, %v10733_v61, -inf  ;;  %v10737_v27 = vld [vmem:[#allocation61_spill] sm:$0xff] }
 0x294   :  { %v2570_v19 = vmax.f32 %v2568_v35, %v2569_v20  ;;  %v2595_v39 = vrot.slane %v2594_v56, 4  ;;  %v2582_v26 = vmax.f32 %v2580_v59, %v2581_v11  ;;  %v7441_v29 = vmax.f32 %v2563_v55, %v2564_v21 }
 0x295   :  { %10732 = vst [vmem:[#allocation118_spill] sm:$0xff] %v7437_v52  ;;  %v2602_v18 = vrot.slane %v2601_v4, 4  ;;  %v2577_v43 = vmax.f32 %v2575_v25, %v2576_v5  ;;  %v2590_v36 = vrot.slane %v2589_v9, 2  ;;  %v10735_v60 = vcombine.high %v10733_v61, %v10733_v61 }
 0x296   :  { %10734 = vst [vmem:[#allocation60_spill] sm:$0xff] %v7441_v29  ;;  %v2571_v13 = vrot.slane %v2570_v19, 1  ;;  %v2596_v49 = vmax.f32 %v2594_v56, %v2595_v39  ;;  %v2583_v24 = vrot.slane %v2582_v26, 2  ;;  %v2615_v56 = vsel %vm359_vm1, %v10737_v27, -inf }
 0x297   :  { %v2608_v35 = vsel %vm359_vm1, %v10735_v60, -inf  ;;  %v2603_v44 = vmax.f32 %v2601_v4, %v2602_v18  ;;  %v2578_v11 = vrot.slane %v2577_v43, 1  ;;  %v2591_v55 = vmax.f32 %v2589_v9, %v2590_v36  ;;  %v10742_v60 = vld [vmem:[#allocation62_spill] sm:$0xff] }
 0x298   :  { %v7447_v2 = vmax.f32 %v2570_v19, %v2571_v13  ;;  %v2597_v59 = vrot.slane %v2596_v49, 2  ;;  %v2609_v20 = vrot.slane %v2608_v35, 4  ;;  %v2584_v28 = vmax.f32 %v2582_v26, %v2583_v24 }
 0x299   :  { %v2604_v5 = vrot.slane %v2603_v44, 2  ;;  %v2616_v39 = vrot.slane %v2615_v56, 4  ;;  %v7451_v29 = vmax.f32 %v2577_v43, %v2578_v11  ;;  %v2592_v52 = vrot.slane %v2591_v55, 1 }
 0x29a   :  { %10736 = vst [vmem:[#allocation119_spill] sm:$0xff] %v7447_v2  ;;  %v2598_v21 = vmax.f32 %v2596_v49, %v2597_v59  ;;  %v2610_v25 = vmax.f32 %v2608_v35, %v2609_v20  ;;  %v2585_v61 = vrot.slane %v2584_v28, 1  ;;  %v10739_v19 = vcombine.high %v10737_v27, %v10737_v27 }
 0x29b   :  { %10738 = vst [vmem:[#allocation61_spill] sm:$0xff] %v7451_v29  ;;  %v2605_v13 = vmax.f32 %v2603_v44, %v2604_v5  ;;  %v2617_v36 = vmax.f32 %v2615_v56, %v2616_v39  ;;  %v7459_v24 = vmax.f32 %v2591_v55, %v2592_v52  ;;  %v2629_v43 = vsel %vm359_vm1, %v10742_v60, -inf }
 0x29c   :  { %v2622_v18 = vsel %vm359_vm1, %v10739_v19, -inf  ;;  %v2599_v4 = vrot.slane %v2598_v21, 1  ;;  %v2611_v26 = vrot.slane %v2610_v25, 2  ;;  %v7457_v9 = vmax.f32 %v2584_v28, %v2585_v61  ;;  %v10745_v28 = vld [vmem:[#allocation63_spill] sm:$0xff] }
 0x29d   :  { %10741 = vst [vmem:[#allocation121_spill] sm:$0xff] %v7459_v24  ;;  %v2623_v49 = vrot.slane %v2622_v18, 4  ;;  %v2606_v59 = vrot.slane %v2605_v13, 1  ;;  %v2618_v11 = vrot.slane %v2617_v36, 2  ;;  %v2630_v29 = vrot.slane %v2629_v43, 4 }
 0x29e   :  { %10740 = vst [vmem:[#allocation120_spill] sm:$0xff] %v7457_v9  ;;  %v7463_v35 = vmax.f32 %v2598_v21, %v2599_v4  ;;  %v2612_v20 = vmax.f32 %v2610_v25, %v2611_v26  ;;  %v10744_v44 = vcombine.high %v10742_v60, %v10742_v60  ;;  %v2643_v52 = vsel %vm359_vm1, %v10745_v28, -inf }
 0x29f   :  { %v2624_v27 = vmax.f32 %v2622_v18, %v2623_v49  ;;  %v7471_v55 = vmax.f32 %v2605_v13, %v2606_v59  ;;  %v2619_v39 = vmax.f32 %v2617_v36, %v2618_v11  ;;  %v2631_v19 = vmax.f32 %v2629_v43, %v2630_v29  ;;  %v10748_v59 = vld [vmem:[#allocation64_spill] sm:$0xff] }
 0x2a0   :  { %10743 = vst [vmem:[#allocation62_spill] sm:$0xff] %v7463_v35  ;;  %v2636_v56 = vsel %vm359_vm1, %v10744_v44, -inf  ;;  %v2613_v5 = vrot.slane %v2612_v20, 1  ;;  %v2644_v4 = vrot.slane %v2643_v52, 4  ;;  %v10747_v25 = vcombine.high %v10745_v28, %v10745_v28 }
 0x2a1   :  { %10746 = vst [vmem:[#allocation63_spill] sm:$0xff] %v7471_v55  ;;  %v2637_v61 = vrot.slane %v2636_v56, 4  ;;  %v2625_v21 = vrot.slane %v2624_v27, 2  ;;  %v2620_v49 = vrot.slane %v2619_v39, 1  ;;  %v2632_v24 = vrot.slane %v2631_v19, 2 }
 0x2a2   :  { %v2650_v18 = vsel %vm359_vm1, %v10747_v25, -inf  ;;  %v7477_v26 = vmax.f32 %v2612_v20, %v2613_v5  ;;  %v2645_v13 = vmax.f32 %v2643_v52, %v2644_v4  ;;  %v2657_v36 = vsel %vm359_vm1, %v10748_v59, -inf }
 0x2a3   :  { %v2638_v60 = vmax.f32 %v2636_v56, %v2637_v61  ;;  %v2651_v44 = vrot.slane %v2650_v18, 4  ;;  %v2626_v35 = vmax.f32 %v2624_v27, %v2625_v21  ;;  %v7481_v11 = vmax.f32 %v2619_v39, %v2620_v49 }
 0x2a4   :  { %v2658_v55 = vrot.slane %v2657_v36, 4  ;;  %v2633_v28 = vmax.f32 %v2631_v19, %v2632_v24  ;;  %v2646_v2 = vrot.slane %v2645_v13, 2  ;;  %v10749_v20 = vcombine.high %v10748_v59, %v10748_v59 }
 0x2a5   :  { %v2639_v29 = vrot.slane %v2638_v60, 2  ;;  %v2652_v43 = vmax.f32 %v2650_v18, %v2651_v44  ;;  %v2627_v9 = vrot.slane %v2626_v35, 1  ;;  %v7491_v25 = vmax.f32 %v6885_v62, %v6925_v40 }
 0x2a6   :  { %v2664_v56 = vsel %vm359_vm1, %v10749_v20, -inf  ;;  %v2659_v61 = vmax.f32 %v2657_v36, %v2658_v55  ;;  %v2634_v4 = vrot.slane %v2633_v28, 1  ;;  %v2647_v39 = vmax.f32 %v2645_v13, %v2646_v2  ;;  %v10753_v13 = vld [vmem:[#allocation65_spill] sm:$0xff]  ;;  %v10759_v20 = vld [vmem:[#allocation68_spill] sm:$0xff] }
 0x2a7   :  { %v2640_v5 = vmax.f32 %v2638_v60, %v2639_v29  ;;  %v2653_v27 = vrot.slane %v2652_v43, 2  ;;  %v2665_v52 = vrot.slane %v2664_v56, 4  ;;  %v7487_v21 = vmax.f32 %v2626_v35, %v2627_v9  ;;  %10750 = vst [vmem:[#allocation64_spill] sm:$0xff] %v7491_v25  ;;  %v10755_v29 = vld [vmem:[#allocation66_spill] sm:$0xff] }
 0x2a8   :  { %v2660_v19 = vrot.slane %v2659_v61, 2  ;;  %v7493_v44 = vmax.f32 %v2633_v28, %v2634_v4  ;;  %v2648_v59 = vrot.slane %v2647_v39, 1  ;;  %v7497_v60 = vmax.f32 %v6887_v42, %v6927_v3  ;;  %v10757_v42 = vld [vmem:[#allocation67_spill] sm:$0xff] }
 0x2a9   :  { %v2641_v18 = vrot.slane %v2640_v5, 1  ;;  %v2654_v24 = vmax.f32 %v2652_v43, %v2653_v27  ;;  %v2666_v49 = vmax.f32 %v2664_v56, %v2665_v52  ;;  %v7501_v9 = vmax.f32 %v6889_v17, %v6931_v32  ;;  %v10762_v27 = vld [vmem:[#allocation69_spill] sm:$0xff] }
 0x2aa   :  { %10751 = vst [vmem:[#allocation122_spill] sm:$0xff] %v7497_v60  ;;  %v2661_v62 = vmax.f32 %v2659_v61, %v2660_v19  ;;  %v7505_v55 = vmax.f32 %v2647_v39, %v2648_v59  ;;  %v7509_v36 = vmax.f32 %v10753_v13, %v6937_v14  ;;  %v7513_v43 = vmax.f32 %v10755_v29, %v6939_v50  ;;  %v10768_v39 = vld [vmem:[#allocation71_spill] sm:$0xff] }
 0x2ab   :  { %10752 = vst [vmem:[#allocation123_spill] sm:$0xff] %v7501_v9  ;;  %v7503_v2 = vmax.f32 %v2640_v5, %v2641_v18  ;;  %v2655_v35 = vrot.slane %v2654_v24, 1  ;;  %v2667_v40 = vrot.slane %v2666_v49, 2  ;;  %v7517_v3 = vmax.f32 %v10757_v42, %v6941_v10  ;;  %v10761_v5 = vld [vmem:[#allocation70_spill] sm:$0xff]  ;;  %v10786_v13 = vld [vmem:[#allocation83_spill] sm:$0xff]  ;;  %v10789_v42 = vld [vmem:[#allocation84_spill] sm:$0xff] }
 0x2ac   :  { %10754 = vst [vmem:[#allocation65_spill] sm:$0xff] %v7509_v36  ;;  %10756 = vst [vmem:[#allocation66_spill] sm:$0xff] %v7513_v43  ;;  %v2662_v32 = vrot.slane %v2661_v62, 1  ;;  %v7521_v56 = vmax.f32 %v10759_v20, %v6951_v6  ;;  %v7525_v61 = vmax.f32 %v10762_v27, %v10761_v5  ;;  %v7529_v14 = vmax.f32 %v6965_v46, %v7005_v22  ;;  %v10770_v46 = vld [vmem:[#allocation75_spill] sm:$0xff]  ;;  %v10771_v22 = vld [vmem:[#allocation72_spill] sm:$0xff] }
 0x2ad   :  { %10758 = vst [vmem:[#allocation67_spill] sm:$0xff] %v7517_v3  ;;  %v2656_v17 = vmax.f32 %v2654_v24, %v2655_v35  ;;  %v2668_v28 = vmax.f32 %v2666_v49, %v2667_v40  ;;  %v7533_v50 = vmax.f32 %v6967_v34, %v7007_v8  ;;  %v7537_v10 = vmax.f32 %v6971_v41, %v7011_v7  ;;  %v10773_v34 = vld [vmem:[#allocation76_spill] sm:$0xff]  ;;  %v10774_v8 = vld [vmem:[#allocation73_spill] sm:$0xff]  ;;  %v10776_v41 = vld [vmem:[#allocation74_spill] sm:$0xff] }
 0x2ae   :  { %10760 = vst [vmem:[#allocation68_spill] sm:$0xff] %v7521_v56  ;;  %10763 = vst [vmem:[#allocation70_spill] sm:$0xff] %v7525_v61  ;;  %v2663_v52 = vmax.f32 %v2661_v62, %v2662_v32  ;;  %v7541_v6 = vmax.f32 %v6973_v53, %v7017_v23  ;;  %v7545_v18 = vmax.f32 %v10768_v39, %v7019_v63  ;;  %v10778_v49 = vld [vmem:[#allocation77_spill] sm:$0xff]  ;;  %v10783_v62 = vld [vmem:[#allocation82_spill] sm:$0xff] }
 0x2af   :  { %10764 = vst [vmem:[#allocation69_spill] sm:$0xff] %v7529_v14  ;;  %10765 = vst [vmem:[#allocation124_spill] sm:$0xff] %v7533_v50  ;;  %v2669_v4 = vrot.slane %v2668_v28, 1  ;;  %v7549_v24 = vmax.f32 %v10771_v22, %v10770_v46  ;;  %v7553_v19 = vmax.f32 %v10774_v8, %v10773_v34  ;;  %v7557_v7 = vmax.f32 %v10776_v41, %v7037_v37  ;;  %v10784_v37 = vld [vmem:[#allocation78_spill] sm:$0xff]  ;;  %v10790_v32 = vld [vmem:[#allocation80_spill] sm:$0xff] }
 0x2b0   :  { %10766 = vst [vmem:[#allocation125_spill] sm:$0xff] %v7537_v10  ;;  %10767 = vst [vmem:[#allocation126_spill] sm:$0xff] %v7541_v6  ;;  %v7561_v53 = vmax.f32 %v10778_v49, %v7081_v12  ;;  %v7565_v63 = vmax.f32 %v7047_v38, %v7087_v47  ;;  %v7569_v59 = vmax.f32 %v7051_v31, %v7091_v30  ;;  %v10787_v12 = vld [vmem:[#allocation79_spill] sm:$0xff]  ;;  %v10792_v47 = vld [vmem:[#allocation81_spill] sm:$0xff] }
 0x2b1   :  { %10769 = vst [vmem:[#allocation71_spill] sm:$0xff] %v7545_v18  ;;  %10772 = vst [vmem:[#allocation75_spill] sm:$0xff] %v7549_v24  ;;  %v2670_v23 = vmax.f32 %v2668_v28, %v2669_v4  ;;  %v7573_v35 = vmax.f32 %v7057_v54, %v7097_v16  ;;  %v7577_v40 = vmax.f32 %v10784_v37, %v10783_v62  ;;  %v10794_v30 = vld [vmem:[#allocation85_spill] sm:$0xff]  ;;  %v10799_v5 = vld [vmem:[#allocation90_spill] sm:$0xff] }
 0x2b2   :  { %10775 = vst [vmem:[#allocation72_spill] sm:$0xff] %v7553_v19  ;;  %10777 = vst [vmem:[#allocation76_spill] sm:$0xff] %v7557_v7  ;;  %v7581_v29 = vmax.f32 %v10787_v12, %v10786_v13  ;;  %v7585_v38 = vmax.f32 %v10790_v32, %v10789_v42  ;;  %v7589_v31 = vmax.f32 %v10792_v47, %v7117_v51  ;;  %v10800_v27 = vld [vmem:[#allocation86_spill] sm:$0xff]  ;;  %v10802_v4 = vld [vmem:[#allocation91_spill] sm:$0xff] }
 0x2b3   :  { %10779 = vst [vmem:[#allocation73_spill] sm:$0xff] %v7561_v53  ;;  %10780 = vst [vmem:[#allocation74_spill] sm:$0xff] %v7565_v63  ;;  %v7593_v54 = vmax.f32 %v10794_v30, %v7161_v58  ;;  %v7597_v16 = vmax.f32 %v7127_v1, %v7167_v57  ;;  %v7601_v28 = vmax.f32 %v7131_v15, %v7171_v33  ;;  %v10803_v39 = vld [vmem:[#allocation87_spill] sm:$0xff]  ;;  %v10805_v46 = vld [vmem:[#allocation92_spill] sm:$0xff] }
 0x2b4   :  { %10781 = vst [vmem:[#allocation77_spill] sm:$0xff] %v7569_v59  ;;  %10782 = vst [vmem:[#allocation127_spill] sm:$0xff] %v7573_v35  ;;  %v7605_v20 = vmax.f32 %v7137_v48, %v7177_v0  ;;  %v7609_v51 = vmax.f32 %v10800_v27, %v10799_v5  ;;  %v7613_v58 = vmax.f32 %v10803_v39, %v10802_v4  ;;  %v10806_v22 = vld [vmem:[#allocation88_spill] sm:$0xff]  ;;  %v10808_v57 = vld [vmem:[#allocation89_spill] sm:$0xff] }
 0x2b5   :  { %10785 = vst [vmem:[#allocation82_spill] sm:$0xff] %v7577_v40  ;;  %10788 = vst [vmem:[#allocation78_spill] sm:$0xff] %v7581_v29  ;;  %v7617_v1 = vmax.f32 %v10806_v22, %v10805_v46  ;;  %v7621_v15 = vmax.f32 %v10808_v57, %v7197_v45  ;;  %v10810_v33 = vld [vmem:[#allocation24_spill] sm:$0xff]  ;;  %v10811_v34 = vld [vmem:[#allocation93_spill] sm:$0xff] }
 0x2b6   :  { %10791 = vst [vmem:[#allocation83_spill] sm:$0xff] %v7585_v38  ;;  %10793 = vst [vmem:[#allocation79_spill] sm:$0xff] %v7589_v31  ;;  %v7625_v48 = vmax.f32 %v10811_v34, %v10810_v33  ;;  %v10813_v0 = vld [vmem:[#allocation99_spill] sm:$0xff]  ;;  %v10814_v8 = vld [vmem:[#allocation94_spill] sm:$0xff] }
 0x2b7   :  { %10795 = vst [vmem:[#allocation84_spill] sm:$0xff] %v7593_v54  ;;  %10796 = vst [vmem:[#allocation80_spill] sm:$0xff] %v7597_v16  ;;  %v7629_v41 = vmax.f32 %v10814_v8, %v10813_v0  ;;  %v10816_v49 = vld [vmem:[#allocation30_spill] sm:$0xff]  ;;  %v10817_v62 = vld [vmem:[#allocation95_spill] sm:$0xff] }
 0x2b8   :  { %10797 = vst [vmem:[#allocation81_spill] sm:$0xff] %v7601_v28  ;;  %10798 = vst [vmem:[#allocation85_spill] sm:$0xff] %v7605_v20  ;;  %v7633_v37 = vmax.f32 %v10817_v62, %v10816_v49  ;;  %v10819_v13 = vld [vmem:[#allocation100_spill] sm:$0xff]  ;;  %v10822_v32 = vld [vmem:[#allocation101_spill] sm:$0xff] }
 0x2b9   :  { %10801 = vst [vmem:[#allocation90_spill] sm:$0xff] %v7609_v51  ;;  %10804 = vst [vmem:[#allocation86_spill] sm:$0xff] %v7613_v58  ;;  %v10820_v12 = vld [vmem:[#allocation96_spill] sm:$0xff]  ;;  %v10823_v47 = vld [vmem:[#allocation97_spill] sm:$0xff] }
 0x2ba   :  { %10807 = vst [vmem:[#allocation91_spill] sm:$0xff] %v7617_v1  ;;  %10809 = vst [vmem:[#allocation87_spill] sm:$0xff] %v7621_v15  ;;  %v7637_v42 = vmax.f32 %v10820_v12, %v10819_v13  ;;  %v7641_v45 = vmax.f32 %v10823_v47, %v10822_v32  ;;  %v10825_v30 = vld [vmem:[#allocation34_spill] sm:$0xff]  ;;  %v10828_v4 = vld [vmem:[#allocation28_spill] sm:$0xff] }
 0x2bb   :  { %10812 = vst [vmem:[#allocation92_spill] sm:$0xff] %v7625_v48  ;;  %10815 = vst [vmem:[#allocation88_spill] sm:$0xff] %v7629_v41  ;;  %v10826_v5 = vld [vmem:[#allocation26_spill] sm:$0xff]  ;;  %v10829_v39 = vld [vmem:[#allocation20_spill] sm:$0xff] }
 0x2bc   :  { %10818 = vst [vmem:[#allocation89_spill] sm:$0xff] %v7633_v37  ;;  %10821 = vst [vmem:[#allocation24_spill] sm:$0xff] %v7637_v42  ;;  %v7645_v27 = vmax.f32 %v10826_v5, %v10825_v30  ;;  %v7649_v46 = vmax.f32 %v10829_v39, %v10828_v4  ;;  %v10831_v22 = vld [vmem:[#allocation102_spill] sm:$0xff]  ;;  %v10834_v34 = vld [vmem:[#allocation40_spill] sm:$0xff] }
 0x2bd   :  { %10824 = vst [vmem:[#allocation93_spill] sm:$0xff] %v7641_v45  ;;  %v10832_v57 = vld [vmem:[#allocation98_spill] sm:$0xff]  ;;  %v10835_v0 = vld [vmem:[#allocation32_spill] sm:$0xff]  ;;  %v10837_v49 = vld [vmem:[#allocation107_spill] sm:$0xff] }
 0x2be   :  { %10827 = vst [vmem:[#allocation99_spill] sm:$0xff] %v7645_v27  ;;  %10830 = vst [vmem:[#allocation94_spill] sm:$0xff] %v7649_v46  ;;  %v7653_v33 = vmax.f32 %v10832_v57, %v10831_v22  ;;  %v7657_v8 = vmax.f32 %v10835_v0, %v10834_v34  ;;  %v10838_v62 = vld [vmem:[#allocation103_spill] sm:$0xff]  ;;  %v10840_v12 = vld [vmem:[#allocation49_spill] sm:$0xff] }
 0x2bf   :  { %v7661_v13 = vmax.f32 %v10838_v62, %v10837_v49  ;;  %v10841_v32 = vld [vmem:[#allocation38_spill] sm:$0xff]  ;;  %v10843_v30 = vld [vmem:[#allocation108_spill] sm:$0xff]  ;;  %v10846_v39 = vld [vmem:[#allocation109_spill] sm:$0xff] }
 0x2c0   :  { %10833 = vst [vmem:[#allocation30_spill] sm:$0xff] %v7653_v33  ;;  %10836 = vst [vmem:[#allocation95_spill] sm:$0xff] %v7657_v8  ;;  %v7665_v47 = vmax.f32 %v10841_v32, %v10840_v12  ;;  %v10844_v5 = vld [vmem:[#allocation104_spill] sm:$0xff]  ;;  %v10847_v46 = vld [vmem:[#allocation105_spill] sm:$0xff] }
 0x2c1   :  { %10839 = vst [vmem:[#allocation100_spill] sm:$0xff] %v7661_v13  ;;  %v7669_v4 = vmax.f32 %v10844_v5, %v10843_v30  ;;  %v7673_v22 = vmax.f32 %v10847_v46, %v10846_v39  ;;  %v10849_v57 = vld [vmem:[#allocation50_spill] sm:$0xff]  ;;  %v10852_v0 = vld [vmem:[#allocation51_spill] sm:$0xff]  ;;  %v10853_v8 = vld [vmem:[#allocation36_spill] sm:$0xff] }
 0x2c2   :  { %10842 = vst [vmem:[#allocation96_spill] sm:$0xff] %v7665_v47  ;;  %v10850_v33 = vld [vmem:[#allocation42_spill] sm:$0xff]  ;;  %v7681_v49 = vmax.f32 %v10853_v8, %v10852_v0  ;;  %v10858_v32 = vld [vmem:[#allocation56_spill] sm:$0xff]  ;;  %v10861_v5 = vld [vmem:[#allocation115_spill] sm:$0xff] }
 0x2c3   :  { %10845 = vst [vmem:[#allocation101_spill] sm:$0xff] %v7669_v4  ;;  %10848 = vst [vmem:[#allocation97_spill] sm:$0xff] %v7673_v22  ;;  %v7677_v34 = vmax.f32 %v10850_v33, %v10849_v57  ;;  %v10855_v62 = vld [vmem:[#allocation110_spill] sm:$0xff]  ;;  %v10859_v47 = vld [vmem:[#allocation52_spill] sm:$0xff] }
 0x2c4   :  { %10854 = vst [vmem:[#allocation26_spill] sm:$0xff] %v7681_v49  ;;  %v10856_v13 = vld [vmem:[#allocation106_spill] sm:$0xff]  ;;  %v7689_v30 = vmax.f32 %v10859_v47, %v10858_v32  ;;  %v10862_v4 = vld [vmem:[#allocation111_spill] sm:$0xff]  ;;  %v10864_v39 = vld [vmem:[#allocation57_spill] sm:$0xff] }
 0x2c5   :  { %10851 = vst [vmem:[#allocation34_spill] sm:$0xff] %v7677_v34  ;;  %v7685_v12 = vmax.f32 %v10856_v13, %v10855_v62  ;;  %v7693_v46 = vmax.f32 %v10862_v4, %v10861_v5  ;;  %v10865_v22 = vld [vmem:[#allocation53_spill] sm:$0xff]  ;;  %v10867_v57 = vld [vmem:[#allocation116_spill] sm:$0xff]  ;;  %v10873_v62 = vld [vmem:[#allocation58_spill] sm:$0xff] }
 0x2c6   :  { %10860 = vst [vmem:[#allocation20_spill] sm:$0xff] %v7689_v30  ;;  %v7697_v33 = vmax.f32 %v10865_v22, %v10864_v39  ;;  %v10868_v34 = vld [vmem:[#allocation112_spill] sm:$0xff]  ;;  %v10870_v0 = vld [vmem:[#allocation117_spill] sm:$0xff]  ;;  %v10876_v32 = vld [vmem:[#allocation59_spill] sm:$0xff] }
 0x2c7   :  { %10857 = vst [vmem:[#allocation28_spill] sm:$0xff] %v7685_v12  ;;  %10863 = vst [vmem:[#allocation102_spill] sm:$0xff] %v7693_v46  ;;  %v7701_v8 = vmax.f32 %v10868_v34, %v10867_v57  ;;  %v10871_v49 = vld [vmem:[#allocation113_spill] sm:$0xff]  ;;  %v10874_v12 = vld [vmem:[#allocation54_spill] sm:$0xff] }
 0x2c8   :  { %10866 = vst [vmem:[#allocation98_spill] sm:$0xff] %v7697_v33  ;;  %v7705_v13 = vmax.f32 %v10871_v49, %v10870_v0  ;;  %v7709_v47 = vmax.f32 %v10874_v12, %v10873_v62  ;;  %v10877_v30 = vld [vmem:[#allocation55_spill] sm:$0xff]  ;;  %v10879_v5 = vld [vmem:[#allocation118_spill] sm:$0xff]  ;;  %v10882_v39 = vld [vmem:[#allocation60_spill] sm:$0xff] }
 0x2c9   :  { %10869 = vst [vmem:[#allocation40_spill] sm:$0xff] %v7701_v8  ;;  %v7713_v4 = vmax.f32 %v10877_v30, %v10876_v32  ;;  %v10880_v46 = vld [vmem:[#allocation114_spill] sm:$0xff]  ;;  %v7721_v34 = vmax.f32 %v10882_v39, %v7481_v11  ;;  %v10884_v57 = vld [vmem:[#allocation119_spill] sm:$0xff]  ;;  %v10886_v0 = vld [vmem:[#allocation61_spill] sm:$0xff] }
 0x2ca   :  { %10872 = vst [vmem:[#allocation32_spill] sm:$0xff] %v7705_v13  ;;  %10875 = vst [vmem:[#allocation107_spill] sm:$0xff] %v7709_v47  ;;  %v7717_v22 = vmax.f32 %v10880_v46, %v10879_v5  ;;  %v7725_v49 = vmax.f32 %v10884_v57, %v7487_v21  ;;  %v7729_v12 = vmax.f32 %v10886_v0, %v7493_v44  ;;  %v10888_v62 = vld [vmem:[#allocation120_spill] sm:$0xff]  ;;  %v10890_v32 = vld [vmem:[#allocation121_spill] sm:$0xff] }
 0x2cb   :  { %10878 = vst [vmem:[#allocation103_spill] sm:$0xff] %v7713_v4  ;;  %10883 = vst [vmem:[#allocation38_spill] sm:$0xff] %v7721_v34  ;;  %v7733_v30 = vmax.f32 %v10888_v62, %v7503_v2  ;;  %v7737_v46 = vmax.f32 %v10890_v32, %v7505_v55  ;;  %v10892_v5 = vld [vmem:[#allocation62_spill] sm:$0xff]  ;;  %v10894_v11 = vld [vmem:[#allocation63_spill] sm:$0xff]  ;;  %v7746_v21 = vmax.f32 %v7477_v26, %v2670_v23 }
 0x2cc   :  { %10881 = vst [vmem:[#allocation49_spill] sm:$0xff] %v7717_v22  ;;  %10885 = vst [vmem:[#allocation108_spill] sm:$0xff] %v7725_v49  ;;  %v7740_v22 = vmax.f32 %v10892_v5, %v2656_v17  ;;  %v7743_v39 = vmax.f32 %v10894_v11, %v2663_v52  ;;  %v10897_v57 = vld [vmem:[#allocation4_spill] sm:$0xff]  ;;  %v10900_v62 = vld [vmem:[#allocation3_spill] sm:$0xff] }
 0x2cd   :  { %10887 = vst [vmem:[#allocation104_spill] sm:$0xff] %v7729_v12  ;;  %10889 = vst [vmem:[#allocation109_spill] sm:$0xff] %v7733_v30  ;;  %v10898_v44 = vld [vmem:[#allocation48_spill] sm:$0xff]  ;;  %v10899_v12 = vld [vmem:[#allocation6_spill] sm:$0xff] }
 0x2ce   :  { %10891 = vst [vmem:[#allocation105_spill] sm:$0xff] %v7737_v46  ;;  %10893 = vst [vmem:[#allocation50_spill] sm:$0xff] %v7740_v22  ;;  %v2767_v0 = vmul.f32 %v10898_v44, %v10897_v57  ;;  %v2768_v2 = vmul.f32 %v10898_v44, %v10899_v12  ;;  %v2769_v30 = vmul.f32 %v10900_v62, %v10898_v44  ;;  %v10901_v55 = vld [vmem:[#allocation5_spill] sm:$0xff]  ;;  %v10902_v17 = vld [vmem:[#allocation8_spill] sm:$0xff] }
 0x2cf   :  { %10895 = vst [vmem:[#allocation42_spill] sm:$0xff] %v7743_v39  ;;  %10896 = vst [vmem:[#allocation51_spill] sm:$0xff] %v7746_v21  ;;  %v2770_v32 = vmul.f32 %v10901_v55, %v10898_v44  ;;  %v2771_v5 = vmul.f32 %v10898_v44, %v10902_v17  ;;  %v10903_v52 = vld [vmem:[#allocation10_spill] sm:$0xff]  ;;  %v10904_v26 = vld [vmem:[#allocation7_spill] sm:$0xff] }
 0x2d0   :  { %v2772_v11 = vmul.f32 %v10898_v44, %v10903_v52  ;;  %v2773_v23 = vmul.f32 %v10904_v26, %v10898_v44  ;;  %v10905_v57 = vld [vmem:[#allocation9_spill] sm:$0xff]  ;;  %v10906_v39 = vld [vmem:[#allocation12_spill] sm:$0xff]  ;;  %v10907_v22 = vld [vmem:[#allocation14_spill] sm:$0xff] }
 0x2d1   :  { %v2774_v21 = vmul.f32 %v10905_v57, %v10898_v44  ;;  %v2775_v12 = vmul.f32 %v10898_v44, %v10906_v39  ;;  %v2776_v62 = vmul.f32 %v10898_v44, %v10907_v22  ;;  %v10908_v55 = vld [vmem:[#allocation11_spill] sm:$0xff]  ;;  %v10909_v17 = vld [vmem:[#allocation13_spill] sm:$0xff]  ;;  %v10910_v34 = vld [vmem:[#allocation16_spill] sm:$0xff] }
 0x2d2   :  { %v2777_v46 = vmul.f32 %v10908_v55, %v10898_v44  ;;  %v2778_v49 = vmul.f32 %v10909_v17, %v10898_v44  ;;  %v2779_v52 = vmul.f32 %v10898_v44, %v10910_v34  ;;  %v10911_v4 = vld [vmem:[#allocation19_spill] sm:$0xff]  ;;  %v10913_v39 = vld [vmem:[#allocation18_spill] sm:$0xff]  ;;  %v10916_v17 = vld [vmem:[#allocation21_spill] sm:$0xff] }
 0x2d3   :  { %v2780_v26 = vmul.f32 %v10898_v44, %v10911_v4  ;;  %v10912_v57 = vld [vmem:[#allocation15_spill] sm:$0xff]  ;;  %v2782_v13 = vmul.f32 %v10913_v39, %v10898_v44  ;;  %v2785_v27 = vmul.f32 %v10916_v17, %v10898_v44  ;;  %v10917_v34 = vld [vmem:[#allocation25_spill] sm:$0xff] }
 0x2d4   :  { %v2781_v47 = vmul.f32 %v10912_v57, %v10898_v44  ;;  %v10914_v8 = vld [vmem:[#allocation23_spill] sm:$0xff]  ;;  %v2786_v45 = vmul.f32 %v10917_v34, %v10898_v44  ;;  %v10920_v39 = vld [vmem:[#allocation29_spill] sm:$0xff] }
 0x2d5   :  { %v2783_v22 = vmul.f32 %v10898_v44, %v10914_v8  ;;  %v10915_v33 = vld [vmem:[#allocation27_spill] sm:$0xff]  ;;  %v2789_v41 = vmul.f32 %v10920_v39, %v10898_v44  ;;  %v10921_v8 = vld [vmem:[#allocation33_spill] sm:$0xff] }
 0x2d6   :  { %v2784_v55 = vmul.f32 %v10898_v44, %v10915_v33  ;;  %v10918_v42 = vld [vmem:[#allocation31_spill] sm:$0xff]  ;;  %v2790_v48 = vmul.f32 %v10921_v8, %v10898_v44  ;;  %v10924_v34 = vld [vmem:[#allocation37_spill] sm:$0xff]  ;;  %v10928_v8 = vld [vmem:[#allocation44_spill] sm:$0xff] }
 0x2d7   :  { %v2787_v4 = vmul.f32 %v10898_v44, %v10918_v42  ;;  %v10919_v37 = vld [vmem:[#allocation35_spill] sm:$0xff]  ;;  %v2793_v58 = vmul.f32 %v10924_v34, %v10898_v44  ;;  %v10925_v42 = vld [vmem:[#allocation41_spill] sm:$0xff]  ;;  %v2797_v16 = vmul.f32 %v10928_v8, %v10898_v44 }
 0x2d8   :  { %v2788_v57 = vmul.f32 %v10898_v44, %v10919_v37  ;;  %v10922_v15 = vld [vmem:[#allocation39_spill] sm:$0xff]  ;;  %v2794_v51 = vmul.f32 %v10925_v42, %v10898_v44  ;;  %v10926_v20 = vld [vmem:[#allocation45_spill] sm:$0xff] }
 0x2d9   :  { %v2791_v33 = vmul.f32 %v10898_v44, %v10922_v15  ;;  %v10923_v1 = vld [vmem:[#allocation43_spill] sm:$0xff]  ;;  %v2795_v37 = vmul.f32 %v10898_v44, %v10926_v20  ;;  %v10929_v15 = vld [vmem:[#allocation46_spill] sm:$0xff]  ;;  %v10930_v31 = vld [vmem:[#allocation17_spill] sm:$0xff] }
 0x2da   :  { %v2792_v17 = vmul.f32 %v10898_v44, %v10923_v1  ;;  %v10927_v28 = vld [vmem:[#allocation47_spill] sm:$0xff]  ;;  %v2798_v54 = vmul.f32 %v10929_v15, %v10898_v44  ;;  %v2799_v1 = vadd.f32 %v2767_v0, %v10930_v31  ;;  %v2800_v38 = vadd.f32 %v2768_v2, %v10930_v31 }
 0x2db   :  { %v2796_v39 = vmul.f32 %v10898_v44, %v10927_v28  ;;  %v2801_v34 = vadd.f32 %v2769_v30, %v10930_v31  ;;  %v2802_v42 = vadd.f32 %v2770_v32, %v10930_v31  ;;  %v2803_v29 = vadd.f32 %v2771_v5, %v10930_v31 }
 0x2dc   :  { %v2804_v20 = vadd.f32 %v2772_v11, %v10930_v31  ;;  %v2805_v28 = vadd.f32 %v2773_v23, %v10930_v31  ;;  %v2806_v40 = vadd.f32 %v2774_v21, %v10930_v31  ;;  %v2807_v8 = vadd.f32 %v2775_v12, %v10930_v31 }
 0x2dd   :  { %v2808_v44 = vadd.f32 %v2776_v62, %v10930_v31  ;;  %v2809_v0 = vadd.f32 %v2777_v46, %v10930_v31  ;;  %v2810_v2 = vadd.f32 %v2778_v49, %v10930_v31  ;;  %v2811_v30 = vadd.f32 %v2779_v52, %v10930_v31 }
 0x2de   :  { %v2812_v32 = vadd.f32 %v2780_v26, %v10930_v31  ;;  %v2813_v5 = vadd.f32 %v2781_v47, %v10930_v31  ;;  %v2814_v11 = vadd.f32 %v2782_v13, %v10930_v31  ;;  %v2815_v23 = vadd.f32 %v2783_v22, %v10930_v31 }
 0x2df   :  { %v2816_v21 = vadd.f32 %v2784_v55, %v10930_v31  ;;  %v2817_v12 = vadd.f32 %v2785_v27, %v10930_v31  ;;  %v2818_v62 = vadd.f32 %v2786_v45, %v10930_v31  ;;  %v2819_v46 = vadd.f32 %v2787_v4, %v10930_v31 }
 0x2e0   :  { %v2820_v49 = vadd.f32 %v2788_v57, %v10930_v31  ;;  %v2821_v52 = vadd.f32 %v2789_v41, %v10930_v31  ;;  %v2822_v26 = vadd.f32 %v2790_v48, %v10930_v31  ;;  %v2823_v47 = vadd.f32 %v2791_v33, %v10930_v31 }
 0x2e1   :  { %v2824_v13 = vadd.f32 %v2792_v17, %v10930_v31  ;;  %v2825_v22 = vadd.f32 %v2793_v58, %v10930_v31  ;;  %v2826_v55 = vadd.f32 %v2794_v51, %v10930_v31  ;;  %v2827_v27 = vadd.f32 %v2795_v37, %v10930_v31 }
 0x2e2   :  { %v2828_v45 = vadd.f32 %v2796_v39, %v10930_v31  ;;  %v2829_v4 = vadd.f32 %v2797_v16, %v10930_v31  ;;  %v2830_v57 = vadd.f32 %v2798_v54, %v10930_v31  ;;  %v2831_v15 = vmax.f32 %v2799_v1, 0.0 }
 0x2e3   :  { %v2832_v41 = vmax.f32 %v2800_v38, 0.0  ;;  %v2833_v35 = vmax.f32 %v2801_v34, 0.0  ;;  %v2834_v48 = vmax.f32 %v2802_v42, 0.0  ;;  %v2835_v59 = vmax.f32 %v2803_v29, 0.0 }
 0x2e4   :  { %v2836_v33 = vmax.f32 %v2804_v20, 0.0  ;;  %v2837_v63 = vmax.f32 %v2805_v28, 0.0  ;;  %v7844_v17 = vmax.f32 %v2806_v40, 0.0  ;;  %v7846_v58 = vmax.f32 %v2807_v8, 0.0 }
 0x2e5   :  { %v7848_v51 = vmax.f32 %v2808_v44, 0.0  ;;  %v7850_v37 = vmax.f32 %v2809_v0, 0.0  ;;  %v7852_v39 = vmax.f32 %v2810_v2, 0.0  ;;  %v7854_v16 = vmax.f32 %v2811_v30, 0.0 }
 0x2e6   :  { %v7856_v31 = vmax.f32 %v2812_v32, 0.0  ;;  %v7858_v38 = vmax.f32 %v2813_v5, 0.0  ;;  %v7860_v54 = vmax.f32 %v2814_v11, 0.0  ;;  %v7862_v29 = vmax.f32 %v2815_v23, 0.0 }
 0x2e7   :  { %v7864_v40 = vmax.f32 %v2816_v21, 0.0  ;;  %v7866_v1 = vmax.f32 %v2817_v12, 0.0  ;;  %v7868_v34 = vmax.f32 %v2818_v62, 0.0  ;;  %v7870_v42 = vmax.f32 %v2819_v46, 0.0  ;;  %v10931_v12 = vld [vmem:[#allocation22_spill] sm:$0xff] }
 0x2e8   :  { %v7872_v20 = vmax.f32 %v2820_v49, 0.0  ;;  %v7874_v28 = vmax.f32 %v2821_v52, 0.0  ;;  %v7876_v8 = vmax.f32 %v2822_v26, 0.0  ;;  %v7878_v44 = vmax.f32 %v2823_v47, 0.0 }
 0x2e9   :  { %v7880_v0 = vmax.f32 %v2824_v13, 0.0  ;;  %v7882_v2 = vmax.f32 %v2825_v22, 0.0  ;;  %v7884_v30 = vmax.f32 %v2826_v55, 0.0  ;;  %v7886_v32 = vmax.f32 %v2827_v27, 0.0 }
 0x2ea   :  { %v7888_v5 = vmax.f32 %v2828_v45, 0.0  ;;  %v7890_v11 = vmax.f32 %v2829_v4, 0.0  ;;  %v7892_v23 = vmax.f32 %v2830_v57, 0.0  ;;  %v2895_v21 = vcombine.high %v2831_v15, %v2831_v15 }
 0x2eb   :  { %v7895_v62 = vrot.slane %v2831_v15, %v10931_v12  ;;  %v2912_v46 = vcombine.high %v2832_v41, %v2832_v41  ;;  %v7898_v49 = vrot.slane %v2832_v41, %v10931_v12  ;;  %v2929_v52 = vcombine.high %v2833_v35, %v2833_v35 }
 0x2ec   :  { %v7901_v26 = vrot.slane %v2833_v35, %v10931_v12  ;;  %v2946_v47 = vcombine.high %v2834_v48, %v2834_v48  ;;  %v7904_v13 = vrot.slane %v2834_v48, %v10931_v12  ;;  %v7907_v22 = vrot.slane %v2895_v21, %v10931_v12 }
 0x2ed   :  { %v7912_v27 = vrot.slane %v2912_v46, %v10931_v12  ;;  %v7917_v4 = vrot.slane %v2929_v52, %v10931_v12  ;;  %v2963_v21 = vcombine.high %v2835_v59, %v2835_v59  ;;  %v7931_v46 = vrot.slane %v2835_v59, %v10931_v12 }
 0x2ee   :  { %v7922_v57 = vrot.slane %v2946_v47, %v10931_v12  ;;  %v2980_v35 = vcombine.high %v2836_v33, %v2836_v33  ;;  %v7938_v45 = vrot.slane %v2836_v33, %v10931_v12  ;;  %v2997_v41 = vcombine.high %v2837_v63, %v2837_v63 }
 0x2ef   :  { %v7941_v15 = vrot.slane %v2963_v21, %v10931_v12  ;;  %v7946_v59 = vrot.slane %v2837_v63, %v10931_v12  ;;  %v3014_v33 = vcombine.high %v7844_v17, %v7844_v17  ;;  %v7957_v21 = vrot.slane %v7844_v17, %v10931_v12 }
 0x2f0   :  { %v7949_v55 = vrot.slane %v2980_v35, %v10931_v12  ;;  %v7962_v52 = vrot.slane %v2997_v41, %v10931_v12  ;;  %v3031_v35 = vcombine.high %v7846_v58, %v7846_v58  ;;  %v7977_v48 = vrot.slane %v7846_v58, %v10931_v12 }
 0x2f1   :  { %v7971_v53 = vrot.slane %v3014_v33, %v10931_v12  ;;  %v3048_v7 = vcombine.high %v7848_v51, %v7848_v51  ;;  %v7988_v33 = vrot.slane %v7848_v51, %v10931_v12  ;;  %v3065_v47 = vcombine.high %v7850_v37, %v7850_v37 }
 0x2f2   :  { %v7982_v63 = vrot.slane %v3031_v35, %v10931_v12  ;;  %v7998_v35 = vrot.slane %v7850_v37, %v10931_v12  ;;  %v3082_v17 = vcombine.high %v7852_v39, %v7852_v39  ;;  %v8016_v37 = vrot.slane %v7852_v39, %v10931_v12 }
 0x2f3   :  { %v8003_v19 = vrot.slane %v3048_v7, %v10931_v12  ;;  %v8010_v58 = vrot.slane %v3065_v47, %v10931_v12  ;;  %v3099_v7 = vcombine.high %v7854_v16, %v7854_v16  ;;  %v8027_v47 = vrot.slane %v7854_v16, %v10931_v12 }
 0x2f4   :  { %v8023_v51 = vrot.slane %v3082_v17, %v10931_v12  ;;  %v3116_v24 = vcombine.high %v7856_v31, %v7856_v31  ;;  %v8040_v17 = vrot.slane %v7856_v31, %v10931_v12  ;;  %v3133_v39 = vcombine.high %v7858_v38, %v7858_v38 }
 0x2f5   :  { %v8036_v6 = vrot.slane %v3099_v7, %v10931_v12  ;;  %v8057_v31 = vrot.slane %v7858_v38, %v10931_v12  ;;  %v3150_v16 = vcombine.high %v7860_v54, %v7860_v54  ;;  %v8068_v50 = vrot.slane %v7860_v54, %v10931_v12 }
 0x2f6   :  { %v8047_v10 = vrot.slane %v3116_v24, %v10931_v12  ;;  %v8064_v41 = vrot.slane %v3133_v39, %v10931_v12  ;;  %v3167_v18 = vcombine.high %v7862_v29, %v7862_v29  ;;  %v8079_v14 = vrot.slane %v7862_v29, %v10931_v12 }
 0x2f7   :  { %v8075_v7 = vrot.slane %v3150_v16, %v10931_v12  ;;  %v3184_v39 = vcombine.high %v7864_v40, %v7864_v40  ;;  %v8092_v16 = vrot.slane %v7864_v40, %v10931_v12  ;;  %v3201_v54 = vcombine.high %v7866_v1, %v7866_v1 }
 0x2f8   :  { %v8088_v61 = vrot.slane %v3167_v18, %v10931_v12  ;;  %v8109_v40 = vrot.slane %v7866_v1, %v10931_v12  ;;  %v3218_v29 = vcombine.high %v7868_v34, %v7868_v34  ;;  %v8120_v3 = vrot.slane %v7868_v34, %v10931_v12 }
 0x2f9   :  { %v8099_v56 = vrot.slane %v3184_v39, %v10931_v12  ;;  %v8116_v38 = vrot.slane %v3201_v54, %v10931_v12  ;;  %v3235_v24 = vcombine.high %v7870_v42, %v7870_v42  ;;  %v8131_v43 = vrot.slane %v7870_v42, %v10931_v12 }
 0x2fa   :  { %10933 = vst [vmem:[#allocation110_spill] sm:$0xff] %v8120_v3  ;;  %v8127_v18 = vrot.slane %v3218_v29, %v10931_v12  ;;  %v3252_v54 = vcombine.high %v7872_v20, %v7872_v20  ;;  %v8144_v29 = vrot.slane %v7872_v20, %v10931_v12  ;;  %v3269_v34 = vcombine.high %v7874_v28, %v7874_v28 }
 0x2fb   :  { %10932 = vst [vmem:[#allocation36_spill] sm:$0xff] %v8116_v38  ;;  %10935 = vst [vmem:[#allocation56_spill] sm:$0xff] %v8131_v43  ;;  %v8140_v36 = vrot.slane %v3235_v24, %v10931_v12  ;;  %v8161_v20 = vrot.slane %v7874_v28, %v10931_v12  ;;  %v3286_v42 = vcombine.high %v7876_v8, %v7876_v8 }
 0x2fc   :  { %10934 = vst [vmem:[#allocation106_spill] sm:$0xff] %v8127_v18  ;;  %10937 = vst [vmem:[#allocation115_spill] sm:$0xff] %v8144_v29  ;;  %v8151_v9 = vrot.slane %v3252_v54, %v10931_v12  ;;  %v8168_v1 = vrot.slane %v3269_v34, %v10931_v12  ;;  %v8172_v60 = vrot.slane %v7876_v8, %v10931_v12 }
 0x2fd   :  { %10936 = vst [vmem:[#allocation52_spill] sm:$0xff] %v8140_v36  ;;  %10939 = vst [vmem:[#allocation57_spill] sm:$0xff] %v8161_v20  ;;  %v3303_v39 = vcombine.high %v7878_v44, %v7878_v44  ;;  %v8179_v24 = vrot.slane %v3286_v42, %v10931_v12  ;;  %v8183_v25 = vrot.slane %v7878_v44, %v10931_v12 }
 0x2fe   :  { %10938 = vst [vmem:[#allocation111_spill] sm:$0xff] %v8151_v9  ;;  %10940 = vst [vmem:[#allocation53_spill] sm:$0xff] %v8168_v1  ;;  %v3320_v34 = vcombine.high %v7880_v0, %v7880_v0  ;;  %v8196_v42 = vrot.slane %v7880_v0, %v10931_v12  ;;  %v3337_v8 = vcombine.high %v7882_v2, %v7882_v2 }
 0x2ff   :  { %10941 = vst [vmem:[#allocation116_spill] sm:$0xff] %v8172_v60  ;;  %10942 = vst [vmem:[#allocation112_spill] sm:$0xff] %v8179_v24  ;;  %v8192_v9 = vrot.slane %v3303_v39, %v10931_v12  ;;  %v8213_v0 = vrot.slane %v7882_v2, %v10931_v12  ;;  %v3354_v44 = vcombine.high %v7884_v30, %v7884_v30 }
 0x300   :  { %10943 = vst [vmem:[#allocation117_spill] sm:$0xff] %v8183_v25  ;;  %10945 = vst [vmem:[#allocation58_spill] sm:$0xff] %v8196_v42  ;;  %v8203_v20 = vrot.slane %v3320_v34, %v10931_v12  ;;  %v8220_v28 = vrot.slane %v3337_v8, %v10931_v12  ;;  %v8224_v25 = vrot.slane %v7884_v30, %v10931_v12  ;;  %v3567_v34 = vsel %vm359_vm1, %v7895_v62, -inf }
 0x301   :  { %10944 = vst [vmem:[#allocation113_spill] sm:$0xff] %v8192_v9  ;;  %10947 = vst [vmem:[#allocation59_spill] sm:$0xff] %v8213_v0  ;;  %v3371_v54 = vcombine.high %v7886_v32, %v7886_v32  ;;  %v8231_v39 = vrot.slane %v3354_v44, %v10931_v12  ;;  %v8235_v42 = vrot.slane %v7886_v32, %v10931_v12 }
 0x302   :  { %10946 = vst [vmem:[#allocation54_spill] sm:$0xff] %v8203_v20  ;;  %10948 = vst [vmem:[#allocation55_spill] sm:$0xff] %v8220_v28  ;;  %v3388_v8 = vcombine.high %v7888_v5, %v7888_v5  ;;  %v8248_v44 = vrot.slane %v7888_v5, %v10931_v12  ;;  %v3405_v30 = vcombine.high %v7890_v11, %v7890_v11 }
 0x303   :  { %10949 = vst [vmem:[#allocation118_spill] sm:$0xff] %v8224_v25  ;;  %10950 = vst [vmem:[#allocation114_spill] sm:$0xff] %v8231_v39  ;;  %v8244_v20 = vrot.slane %v3371_v54, %v10931_v12  ;;  %v8265_v5 = vrot.slane %v7890_v11, %v10931_v12  ;;  %v3422_v32 = vcombine.high %v7892_v23, %v7892_v23  ;;  %v3581_v39 = vsel %vm359_vm1, %v7907_v22, -inf }
 0x304   :  { %10951 = vst [vmem:[#allocation60_spill] sm:$0xff] %v8235_v42  ;;  %10953 = vst [vmem:[#allocation61_spill] sm:$0xff] %v8248_v44  ;;  %v8255_v0 = vrot.slane %v3388_v8, %v10931_v12  ;;  %v8272_v2 = vrot.slane %v3405_v30, %v10931_v12  ;;  %v8276_v42 = vrot.slane %v7892_v23, %v10931_v12  ;;  %v3568_v44 = vrot.slane %v3567_v34, 4 }
 0x305   :  { %10952 = vst [vmem:[#allocation119_spill] sm:$0xff] %v8244_v20  ;;  %10955 = vst [vmem:[#allocation121_spill] sm:$0xff] %v8265_v5  ;;  %v8283_v54 = vrot.slane %v3422_v32, %v10931_v12  ;;  %v10959_v8 = vcombine.high %v7895_v62, %v7895_v62  ;;  %v3582_v11 = vrot.slane %v3581_v39, 4  ;;  %v10960_v62 = vcombine.high %v7907_v22, %v7907_v22 }
 0x306   :  { %10954 = vst [vmem:[#allocation120_spill] sm:$0xff] %v8255_v0  ;;  %10956 = vst [vmem:[#allocation62_spill] sm:$0xff] %v8272_v2  ;;  %v3569_v32 = vmax.f32 %v3567_v34, %v3568_v44  ;;  %v3595_v0 = vsel %vm359_vm1, %v7898_v49, -inf  ;;  %v10961_v23 = vcombine.high %v7898_v49, %v7898_v49  ;;  %v3609_v22 = vsel %vm359_vm1, %v7912_v27, -inf }
 0x307   :  { %10957 = vst [vmem:[#allocation63_spill] sm:$0xff] %v8276_v42  ;;  %10958 = vst [vmem:[#allocation4_spill] sm:$0xff] %v8283_v54  ;;  %v3574_v30 = vsel %vm359_vm1, %v10959_v8, -inf  ;;  %v3588_v8 = vsel %vm359_vm1, %v10960_v62, -inf  ;;  %v3583_v28 = vmax.f32 %v3581_v39, %v3582_v11  ;;  %v3596_v12 = vrot.slane %v3595_v0, 4 }
 0x308   :  { %v3575_v20 = vrot.slane %v3574_v30, 4  ;;  %v3589_v25 = vrot.slane %v3588_v8, 4  ;;  %v3602_v42 = vsel %vm359_vm1, %v10961_v23, -inf  ;;  %v3570_v2 = vrot.slane %v3569_v32, 2 }
 0x309   :  { %v3603_v34 = vrot.slane %v3602_v42, 4  ;;  %v3584_v9 = vrot.slane %v3583_v28, 2  ;;  %v3597_v24 = vmax.f32 %v3595_v0, %v3596_v12  ;;  %v3610_v1 = vrot.slane %v3609_v22, 4 }
 0x30a   :  { %v3576_v5 = vmax.f32 %v3574_v30, %v3575_v20  ;;  %v3590_v54 = vmax.f32 %v3588_v8, %v3589_v25  ;;  %v10962_v20 = vcombine.high %v7912_v27, %v7912_v27  ;;  %v3571_v62 = vmax.f32 %v3569_v32, %v3570_v2 }
 0x30b   :  { %v3604_v49 = vmax.f32 %v3602_v42, %v3603_v34  ;;  %v3585_v29 = vmax.f32 %v3583_v28, %v3584_v9  ;;  %v3598_v36 = vrot.slane %v3597_v24, 2  ;;  %v3611_v18 = vmax.f32 %v3609_v22, %v3610_v1 }
 0x30c   :  { %v3577_v44 = vrot.slane %v3576_v5, 2  ;;  %v3616_v30 = vsel %vm359_vm1, %v10962_v20, -inf  ;;  %v3591_v23 = vrot.slane %v3590_v54, 2  ;;  %v3572_v11 = vrot.slane %v3571_v62, 1 }
 0x30d   :  { %v3617_v39 = vrot.slane %v3616_v30, 4  ;;  %v3605_v25 = vrot.slane %v3604_v49, 2  ;;  %v3586_v27 = vrot.slane %v3585_v29, 1  ;;  %v3599_v20 = vmax.f32 %v3597_v24, %v3598_v36 }
 0x30e   :  { %v3578_v60 = vmax.f32 %v3576_v5, %v3577_v44  ;;  %v3592_v43 = vmax.f32 %v3590_v54, %v3591_v23  ;;  %v8313_v38 = vmax.f32 %v3571_v62, %v3572_v11  ;;  %v3612_v0 = vrot.slane %v3611_v18, 2 }
 0x30f   :  { %v3618_v3 = vmax.f32 %v3616_v30, %v3617_v39  ;;  %v3606_v2 = vmax.f32 %v3604_v49, %v3605_v25  ;;  %v8317_v12 = vmax.f32 %v3585_v29, %v3586_v27  ;;  %v3600_v34 = vrot.slane %v3599_v20, 1 }
 0x310   :  { %v3579_v8 = vrot.slane %v3578_v60, 1  ;;  %v3593_v42 = vrot.slane %v3592_v43, 1  ;;  %v3623_v28 = vsel %vm359_vm1, %v7901_v26, -inf  ;;  %v3613_v1 = vmax.f32 %v3611_v18, %v3612_v0 }
 0x311   :  { %v3619_v5 = vrot.slane %v3618_v3, 2  ;;  %v3607_v9 = vrot.slane %v3606_v2, 1  ;;  %v3624_v22 = vrot.slane %v3623_v28, 4  ;;  %v8323_v30 = vmax.f32 %v3599_v20, %v3600_v34 }
 0x312   :  { %v8315_v32 = vmax.f32 %v3578_v60, %v3579_v8  ;;  %v8321_v54 = vmax.f32 %v3592_v43, %v3593_v42  ;;  %v10966_v60 = vcombine.high %v7901_v26, %v7901_v26  ;;  %v3637_v24 = vsel %vm359_vm1, %v7917_v4, -inf }
 0x313   :  { %v3620_v44 = vmax.f32 %v3618_v3, %v3619_v5  ;;  %10964 = vst [vmem:[#allocation6_spill] sm:$0xff] %v8323_v30  ;;  %v8325_v36 = vmax.f32 %v3606_v2, %v3607_v9  ;;  %v3614_v62 = vrot.slane %v3613_v1, 1  ;;  %v3625_v23 = vmax.f32 %v3623_v28, %v3624_v22 }
 0x314   :  { %10963 = vst [vmem:[#allocation48_spill] sm:$0xff] %v8321_v54  ;;  %v3630_v29 = vsel %vm359_vm1, %v10966_v60, -inf  ;;  %v3638_v39 = vrot.slane %v3637_v24, 4  ;;  %v10967_v3 = vcombine.high %v7917_v4, %v7917_v4  ;;  %v3651_v11 = vsel %vm359_vm1, %v7904_v13, -inf }
 0x315   :  { %10965 = vst [vmem:[#allocation3_spill] sm:$0xff] %v8325_v36  ;;  %v3621_v49 = vrot.slane %v3620_v44, 1  ;;  %v3631_v43 = vrot.slane %v3630_v29, 4  ;;  %v10968_v26 = vcombine.high %v7904_v13, %v7904_v13  ;;  %v8343_v8 = vmax.f32 %v3613_v1, %v3614_v62 }
 0x316   :  { %v3644_v18 = vsel %vm359_vm1, %v10967_v3, -inf  ;;  %v3626_v20 = vrot.slane %v3625_v23, 2  ;;  %v3639_v42 = vmax.f32 %v3637_v24, %v3638_v39  ;;  %v3652_v5 = vrot.slane %v3651_v11, 4 }
 0x317   :  { %v3658_v25 = vsel %vm359_vm1, %v10968_v26, -inf  ;;  %10969 = vst [vmem:[#allocation5_spill] sm:$0xff] %v8343_v8  ;;  %v8345_v27 = vmax.f32 %v3620_v44, %v3621_v49  ;;  %v3632_v2 = vmax.f32 %v3630_v29, %v3631_v43  ;;  %v3645_v0 = vrot.slane %v3644_v18, 4 }
 0x318   :  { %v3659_v4 = vrot.slane %v3658_v25, 4  ;;  %v3627_v34 = vmax.f32 %v3625_v23, %v3626_v20  ;;  %v3665_v28 = vsel %vm359_vm1, %v7922_v57, -inf  ;;  %v10971_v13 = vcombine.high %v7922_v57, %v7922_v57 }
 0x319   :  { %10970 = vst [vmem:[#allocation8_spill] sm:$0xff] %v8345_v27  ;;  %v3633_v9 = vrot.slane %v3632_v2, 2  ;;  %v3640_v1 = vrot.slane %v3639_v42, 2  ;;  %v3646_v60 = vmax.f32 %v3644_v18, %v3645_v0  ;;  %v3653_v44 = vmax.f32 %v3651_v11, %v3652_v5 }
 0x31a   :  { %v3672_v22 = vsel %vm359_vm1, %v10971_v13, -inf  ;;  %v3660_v62 = vmax.f32 %v3658_v25, %v3659_v4  ;;  %v3628_v49 = vrot.slane %v3627_v34, 1  ;;  %v3666_v24 = vrot.slane %v3665_v28, 4 }
 0x31b   :  { %v3634_v29 = vmax.f32 %v3632_v2, %v3633_v9  ;;  %v3673_v43 = vrot.slane %v3672_v22, 4  ;;  %v3641_v39 = vmax.f32 %v3639_v42, %v3640_v1  ;;  %v3647_v3 = vrot.slane %v3646_v60, 2 }
 0x31c   :  { %v3654_v23 = vrot.slane %v3653_v44, 2  ;;  %v3661_v26 = vrot.slane %v3660_v62, 2  ;;  %v8353_v20 = vmax.f32 %v3627_v34, %v3628_v49  ;;  %v3667_v8 = vmax.f32 %v3665_v28, %v3666_v24 }
 0x31d   :  { %v3635_v27 = vrot.slane %v3634_v29, 1  ;;  %v3674_v36 = vmax.f32 %v3672_v22, %v3673_v43  ;;  %v3642_v57 = vrot.slane %v3641_v39, 1  ;;  %v3648_v30 = vmax.f32 %v3646_v60, %v3647_v3 }
 0x31e   :  { %v3655_v13 = vmax.f32 %v3653_v44, %v3654_v23  ;;  %v3662_v54 = vmax.f32 %v3660_v62, %v3661_v26  ;;  %v3668_v11 = vrot.slane %v3667_v8, 2  ;;  %v3679_v2 = vsel %vm359_vm1, %v7931_v46, -inf }
 0x31f   :  { %v8355_v18 = vmax.f32 %v3634_v29, %v3635_v27  ;;  %v3675_v25 = vrot.slane %v3674_v36, 2  ;;  %v8359_v42 = vmax.f32 %v3641_v39, %v3642_v57  ;;  %v3649_v0 = vrot.slane %v3648_v30, 1 }
 0x320   :  { %v3656_v5 = vrot.slane %v3655_v13, 1  ;;  %v3663_v4 = vrot.slane %v3662_v54, 1  ;;  %v3669_v34 = vmax.f32 %v3667_v8, %v3668_v11  ;;  %v3680_v28 = vrot.slane %v3679_v2, 4 }
 0x321   :  { %v3676_v9 = vmax.f32 %v3674_v36, %v3675_v25  ;;  %v10972_v22 = vcombine.high %v7931_v46, %v7931_v46  ;;  %v8365_v27 = vmax.f32 %v3648_v30, %v3649_v0  ;;  %v3693_v8 = vsel %vm359_vm1, %v7941_v15, -inf }
 0x322   :  { %v8367_v60 = vmax.f32 %v3655_v13, %v3656_v5  ;;  %v8369_v44 = vmax.f32 %v3662_v54, %v3663_v4  ;;  %v3670_v49 = vrot.slane %v3669_v34, 1  ;;  %v3681_v24 = vmax.f32 %v3679_v2, %v3680_v28 }
 0x323   :  { %v3686_v1 = vsel %vm359_vm1, %v10972_v22, -inf  ;;  %v3677_v29 = vrot.slane %v3676_v9, 1  ;;  %v3694_v43 = vrot.slane %v3693_v8, 4  ;;  %v10973_v46 = vcombine.high %v7941_v15, %v7941_v15 }
 0x324   :  { %v3687_v62 = vrot.slane %v3686_v1, 4  ;;  %v3707_v30 = vsel %vm359_vm1, %v7938_v45, -inf  ;;  %v8379_v3 = vmax.f32 %v3669_v34, %v3670_v49  ;;  %v3682_v23 = vrot.slane %v3681_v24, 2 }
 0x325   :  { %v3700_v39 = vsel %vm359_vm1, %v10973_v46, -inf  ;;  %v8381_v54 = vmax.f32 %v3676_v9, %v3677_v29  ;;  %v3695_v13 = vmax.f32 %v3693_v8, %v3694_v43  ;;  %v3708_v11 = vrot.slane %v3707_v30, 4 }
 0x326   :  { %v3688_v36 = vmax.f32 %v3686_v1, %v3687_v62  ;;  %v3701_v26 = vrot.slane %v3700_v39, 4  ;;  %v10975_v25 = vcombine.high %v7938_v45, %v7938_v45  ;;  %v3683_v15 = vmax.f32 %v3681_v24, %v3682_v23 }
 0x327   :  { %10974 = vst [vmem:[#allocation10_spill] sm:$0xff] %v8381_v54  ;;  %v3721_v4 = vsel %vm359_vm1, %v7949_v55, -inf  ;;  %v3696_v28 = vrot.slane %v3695_v13, 2  ;;  %v3709_v9 = vmax.f32 %v3707_v30, %v3708_v11  ;;  %v10976_v29 = vcombine.high %v7949_v55, %v7949_v55 }
 0x328   :  { %v3689_v57 = vrot.slane %v3688_v36, 2  ;;  %v3714_v2 = vsel %vm359_vm1, %v10975_v25, -inf  ;;  %v3702_v0 = vmax.f32 %v3700_v39, %v3701_v26  ;;  %v3722_v22 = vrot.slane %v3721_v4, 4 }
 0x329   :  { %v3715_v5 = vrot.slane %v3714_v2, 4  ;;  %v3684_v1 = vrot.slane %v3683_v15, 1  ;;  %v3728_v45 = vsel %vm359_vm1, %v10976_v29, -inf  ;;  %v3697_v43 = vmax.f32 %v3695_v13, %v3696_v28 }
 0x32a   :  { %v3690_v34 = vmax.f32 %v3688_v36, %v3689_v57  ;;  %v3703_v62 = vrot.slane %v3702_v0, 2  ;;  %v3710_v24 = vrot.slane %v3709_v9, 2  ;;  %v3723_v46 = vmax.f32 %v3721_v4, %v3722_v22 }
 0x32b   :  { %v3716_v49 = vmax.f32 %v3714_v2, %v3715_v5  ;;  %v8393_v39 = vmax.f32 %v3683_v15, %v3684_v1  ;;  %v3729_v36 = vrot.slane %v3728_v45, 4  ;;  %v3698_v30 = vrot.slane %v3697_v43, 1 }
 0x32c   :  { %v3691_v8 = vrot.slane %v3690_v34, 1  ;;  %v3704_v23 = vmax.f32 %v3702_v0, %v3703_v62  ;;  %v3711_v11 = vmax.f32 %v3709_v9, %v3710_v24  ;;  %v3724_v25 = vrot.slane %v3723_v46, 2 }
 0x32d   :  { %v3717_v26 = vrot.slane %v3716_v49, 2  ;;  %v3730_v54 = vmax.f32 %v3728_v45, %v3729_v36  ;;  %v3735_v55 = vsel %vm359_vm1, %v7946_v59, -inf  ;;  %v8399_v29 = vmax.f32 %v3697_v43, %v3698_v30 }
 0x32e   :  { %v8395_v57 = vmax.f32 %v3690_v34, %v3691_v8  ;;  %v3705_v2 = vrot.slane %v3704_v23, 1  ;;  %v3712_v13 = vrot.slane %v3711_v11, 1  ;;  %v3725_v4 = vmax.f32 %v3723_v46, %v3724_v25 }
 0x32f   :  { %v3718_v5 = vmax.f32 %v3716_v49, %v3717_v26  ;;  %v3736_v15 = vrot.slane %v3735_v55, 4  ;;  %v3731_v22 = vrot.slane %v3730_v54, 2  ;;  %v10977_v34 = vcombine.high %v7946_v59, %v7946_v59 }
 0x330   :  { %v8401_v28 = vmax.f32 %v3704_v23, %v3705_v2  ;;  %v8407_v1 = vmax.f32 %v3711_v11, %v3712_v13  ;;  %v3726_v62 = vrot.slane %v3725_v4, 1  ;;  %v3749_v24 = vsel %vm359_vm1, %v7962_v52, -inf }
 0x331   :  { %v3719_v0 = vrot.slane %v3718_v5, 1  ;;  %v3742_v9 = vsel %vm359_vm1, %v10977_v34, -inf  ;;  %v3737_v49 = vmax.f32 %v3735_v55, %v3736_v15  ;;  %v3732_v43 = vmax.f32 %v3730_v54, %v3731_v22 }
 0x332   :  { %10978 = vst [vmem:[#allocation7_spill] sm:$0xff] %v8407_v1  ;;  %v3743_v45 = vrot.slane %v3742_v9, 4  ;;  %v10980_v46 = vcombine.high %v7962_v52, %v7962_v52  ;;  %v8417_v26 = vmax.f32 %v3725_v4, %v3726_v62  ;;  %v3750_v30 = vrot.slane %v3749_v24, 4 }
 0x333   :  { %v8409_v8 = vmax.f32 %v3718_v5, %v3719_v0  ;;  %v3738_v59 = vrot.slane %v3737_v49, 2  ;;  %v3733_v11 = vrot.slane %v3732_v43, 1  ;;  %v3763_v2 = vsel %vm359_vm1, %v7957_v21, -inf }
 0x334   :  { %v3756_v23 = vsel %vm359_vm1, %v10980_v46, -inf  ;;  %10981 = vst [vmem:[#allocation12_spill] sm:$0xff] %v8417_v26  ;;  %v3744_v36 = vmax.f32 %v3742_v9, %v3743_v45  ;;  %v10982_v54 = vcombine.high %v7957_v21, %v7957_v21  ;;  %v3751_v52 = vmax.f32 %v3749_v24, %v3750_v30 }
 0x335   :  { %10979 = vst [vmem:[#allocation9_spill] sm:$0xff] %v8409_v8  ;;  %v3757_v25 = vrot.slane %v3756_v23, 4  ;;  %v3739_v55 = vmax.f32 %v3737_v49, %v3738_v59  ;;  %v3764_v15 = vrot.slane %v3763_v2, 4  ;;  %v8425_v0 = vmax.f32 %v3732_v43, %v3733_v11 }
 0x336   :  { %v3770_v5 = vsel %vm359_vm1, %v10982_v54, -inf  ;;  %v3745_v13 = vrot.slane %v3744_v36, 2  ;;  %v3777_v34 = vsel %vm359_vm1, %v7971_v53, -inf  ;;  %v3752_v45 = vrot.slane %v3751_v52, 2 }
 0x337   :  { %10983 = vst [vmem:[#allocation14_spill] sm:$0xff] %v8425_v0  ;;  %v3758_v4 = vmax.f32 %v3756_v23, %v3757_v25  ;;  %v3771_v22 = vrot.slane %v3770_v5, 4  ;;  %v3740_v9 = vrot.slane %v3739_v55, 1  ;;  %v3765_v46 = vmax.f32 %v3763_v2, %v3764_v15 }
 0x338   :  { %v3746_v62 = vmax.f32 %v3744_v36, %v3745_v13  ;;  %v3778_v21 = vrot.slane %v3777_v34, 4  ;;  %v10984_v49 = vcombine.high %v7971_v53, %v7971_v53  ;;  %v3753_v23 = vmax.f32 %v3751_v52, %v3752_v45 }
 0x339   :  { %v3759_v26 = vrot.slane %v3758_v4, 2  ;;  %v3772_v8 = vmax.f32 %v3770_v5, %v3771_v22  ;;  %v8433_v59 = vmax.f32 %v3739_v55, %v3740_v9  ;;  %v3766_v30 = vrot.slane %v3765_v46, 2 }
 0x33a   :  { %v3784_v24 = vsel %vm359_vm1, %v10984_v49, -inf  ;;  %v3747_v43 = vrot.slane %v3746_v62, 1  ;;  %v3779_v54 = vmax.f32 %v3777_v34, %v3778_v21  ;;  %v3754_v2 = vrot.slane %v3753_v23, 1 }
 0x33b   :  { %v3760_v11 = vmax.f32 %v3758_v4, %v3759_v26  ;;  %v3773_v25 = vrot.slane %v3772_v8, 2  ;;  %v3785_v0 = vrot.slane %v3784_v24, 4  ;;  %v3767_v13 = vmax.f32 %v3765_v46, %v3766_v30 }
 0x33c   :  { %v8435_v36 = vmax.f32 %v3746_v62, %v3747_v43  ;;  %v3791_v5 = vsel %vm359_vm1, %v7977_v48, -inf  ;;  %v3780_v22 = vrot.slane %v3779_v54, 2  ;;  %v8439_v55 = vmax.f32 %v3753_v23, %v3754_v2 }
 0x33d   :  { %v3761_v15 = vrot.slane %v3760_v11, 1  ;;  %v3774_v53 = vmax.f32 %v3772_v8, %v3773_v25  ;;  %v3786_v49 = vmax.f32 %v3784_v24, %v3785_v0  ;;  %v3768_v9 = vrot.slane %v3767_v13, 1 }
 0x33e   :  { %v3792_v52 = vrot.slane %v3791_v5, 4  ;;  %v10985_v26 = vcombine.high %v7977_v48, %v7977_v48  ;;  %v3781_v45 = vmax.f32 %v3779_v54, %v3780_v22  ;;  %v3805_v0 = vsel %vm359_vm1, %v7982_v63, -inf }
 0x33f   :  { %v8445_v34 = vmax.f32 %v3760_v11, %v3761_v15  ;;  %v3775_v62 = vrot.slane %v3774_v53, 1  ;;  %v3787_v46 = vrot.slane %v3786_v49, 2  ;;  %v8447_v21 = vmax.f32 %v3767_v13, %v3768_v9 }
 0x340   :  { %v3798_v4 = vsel %vm359_vm1, %v10985_v26, -inf  ;;  %v3793_v43 = vmax.f32 %v3791_v5, %v3792_v52  ;;  %v3782_v23 = vrot.slane %v3781_v45, 1  ;;  %v3806_v25 = vrot.slane %v3805_v0, 4 }
 0x341   :  { %v3799_v8 = vrot.slane %v3798_v4, 4  ;;  %v8451_v24 = vmax.f32 %v3774_v53, %v3775_v62  ;;  %v3788_v30 = vmax.f32 %v3786_v49, %v3787_v46  ;;  %v10987_v11 = vcombine.high %v7982_v63, %v7982_v63 }
 0x342   :  { %v3794_v48 = vrot.slane %v3793_v43, 2  ;;  %v3819_v13 = vsel %vm359_vm1, %v7988_v33, -inf  ;;  %v8459_v5 = vmax.f32 %v3781_v45, %v3782_v23  ;;  %v3807_v22 = vmax.f32 %v3805_v0, %v3806_v25 }
 0x343   :  { %10986 = vst [vmem:[#allocation11_spill] sm:$0xff] %v8451_v24  ;;  %v3800_v2 = vmax.f32 %v3798_v4, %v3799_v8  ;;  %v3812_v54 = vsel %vm359_vm1, %v10987_v11, -inf  ;;  %v3789_v15 = vrot.slane %v3788_v30, 1  ;;  %v3820_v26 = vrot.slane %v3819_v13, 4 }
 0x344   :  { %10988 = vst [vmem:[#allocation13_spill] sm:$0xff] %v8459_v5  ;;  %v3813_v9 = vrot.slane %v3812_v54, 4  ;;  %v3795_v53 = vmax.f32 %v3793_v43, %v3794_v48  ;;  %v10989_v49 = vcombine.high %v7988_v33, %v7988_v33  ;;  %v3808_v63 = vrot.slane %v3807_v22, 2 }
 0x345   :  { %v3801_v52 = vrot.slane %v3800_v2, 2  ;;  %v8465_v62 = vmax.f32 %v3788_v30, %v3789_v15  ;;  %v3821_v45 = vmax.f32 %v3819_v13, %v3820_v26  ;;  %v3833_v0 = vsel %vm359_vm1, %v8003_v19, -inf }
 0x346   :  { %v3826_v4 = vsel %vm359_vm1, %v10989_v49, -inf  ;;  %v3814_v46 = vmax.f32 %v3812_v54, %v3813_v9  ;;  %v3796_v11 = vrot.slane %v3795_v53, 1  ;;  %v3809_v23 = vmax.f32 %v3807_v22, %v3808_v63 }
 0x347   :  { %v3827_v8 = vrot.slane %v3826_v4, 4  ;;  %v3802_v24 = vmax.f32 %v3800_v2, %v3801_v52  ;;  %v3834_v48 = vrot.slane %v3833_v0, 4  ;;  %v3822_v1 = vrot.slane %v3821_v45, 2 }
 0x348   :  { %v3815_v43 = vrot.slane %v3814_v46, 2  ;;  %v8469_v5 = vmax.f32 %v3795_v53, %v3796_v11  ;;  %v10991_v30 = vcombine.high %v8003_v19, %v8003_v19  ;;  %v3810_v15 = vrot.slane %v3809_v23, 1 }
 0x349   :  { %v3828_v25 = vmax.f32 %v3826_v4, %v3827_v8  ;;  %v3803_v33 = vrot.slane %v3802_v24, 1  ;;  %v3835_v13 = vmax.f32 %v3833_v0, %v3834_v48  ;;  %v3823_v26 = vmax.f32 %v3821_v45, %v3822_v1 }
 0x34a   :  { %10990 = vst [vmem:[#allocation16_spill] sm:$0xff] %v8469_v5  ;;  %v3840_v54 = vsel %vm359_vm1, %v10991_v30, -inf  ;;  %v3816_v9 = vmax.f32 %v3814_v46, %v3815_v43  ;;  %v3847_v49 = vsel %vm359_vm1, %v7998_v35, -inf  ;;  %v8479_v53 = vmax.f32 %v3809_v23, %v3810_v15 }
 0x34b   :  { %v3829_v2 = vrot.slane %v3828_v25, 2  ;;  %v8475_v52 = vmax.f32 %v3802_v24, %v3803_v33  ;;  %v3841_v22 = vrot.slane %v3840_v54, 4  ;;  %v3836_v8 = vrot.slane %v3835_v13, 2 }
 0x34c   :  { %v3817_v4 = vrot.slane %v3816_v9, 1  ;;  %v3824_v11 = vrot.slane %v3823_v26, 1  ;;  %v3848_v5 = vrot.slane %v3847_v49, 4  ;;  %v10992_v46 = vcombine.high %v7998_v35, %v7998_v35 }
 0x34d   :  { %v3830_v63 = vmax.f32 %v3828_v25, %v3829_v2  ;;  %v3842_v19 = vmax.f32 %v3840_v54, %v3841_v22  ;;  %v3837_v45 = vmax.f32 %v3835_v13, %v3836_v8  ;;  %v3861_v25 = vsel %vm359_vm1, %v8010_v58, -inf }
 0x34e   :  { %v3854_v0 = vsel %vm359_vm1, %v10992_v46, -inf  ;;  %v8485_v24 = vmax.f32 %v3816_v9, %v3817_v4  ;;  %v8487_v48 = vmax.f32 %v3823_v26, %v3824_v11  ;;  %v3849_v33 = vmax.f32 %v3847_v49, %v3848_v5 }
 0x34f   :  { %v3831_v1 = vrot.slane %v3830_v63, 1  ;;  %v3855_v43 = vrot.slane %v3854_v0, 4  ;;  %v3843_v23 = vrot.slane %v3842_v19, 2  ;;  %v3838_v54 = vrot.slane %v3837_v45, 1 }
 0x350   :  { %10993 = vst [vmem:[#allocation19_spill] sm:$0xff] %v8487_v48  ;;  %v3862_v2 = vrot.slane %v3861_v25, 4  ;;  %v3850_v22 = vrot.slane %v3849_v33, 2  ;;  %v10995_v9 = vcombine.high %v8010_v58, %v8010_v58  ;;  %v3875_v26 = vsel %vm359_vm1, %v8016_v37, -inf }
 0x351   :  { %v8491_v30 = vmax.f32 %v3830_v63, %v3831_v1  ;;  %v3856_v15 = vmax.f32 %v3854_v0, %v3855_v43  ;;  %v3844_v35 = vmax.f32 %v3842_v19, %v3843_v23  ;;  %v8499_v4 = vmax.f32 %v3837_v45, %v3838_v54 }
 0x352   :  { %v3868_v13 = vsel %vm359_vm1, %v10995_v9, -inf  ;;  %v3863_v49 = vmax.f32 %v3861_v25, %v3862_v2  ;;  %v3851_v11 = vmax.f32 %v3849_v33, %v3850_v22  ;;  %v3876_v46 = vrot.slane %v3875_v26, 4 }
 0x353   :  { %10994 = vst [vmem:[#allocation15_spill] sm:$0xff] %v8491_v30  ;;  %10996 = vst [vmem:[#allocation18_spill] sm:$0xff] %v8499_v4  ;;  %v3857_v5 = vrot.slane %v3856_v15, 2  ;;  %v3869_v8 = vrot.slane %v3868_v13, 4  ;;  %v3845_v63 = vrot.slane %v3844_v35, 1  ;;  %v10997_v19 = vcombine.high %v8016_v37, %v8016_v37 }
 0x354   :  { %v3864_v58 = vrot.slane %v3863_v49, 2  ;;  %v3852_v30 = vrot.slane %v3851_v11, 1  ;;  %v3877_v45 = vmax.f32 %v3875_v26, %v3876_v46  ;;  %v3889_v25 = vsel %vm359_vm1, %v8023_v51, -inf }
 0x355   :  { %v3882_v0 = vsel %vm359_vm1, %v10997_v19, -inf  ;;  %v3858_v1 = vmax.f32 %v3856_v15, %v3857_v5  ;;  %v3870_v43 = vmax.f32 %v3868_v13, %v3869_v8  ;;  %v8505_v9 = vmax.f32 %v3844_v35, %v3845_v63 }
 0x356   :  { %v3883_v23 = vrot.slane %v3882_v0, 4  ;;  %v3865_v2 = vmax.f32 %v3863_v49, %v3864_v58  ;;  %v8509_v4 = vmax.f32 %v3851_v11, %v3852_v30  ;;  %v3878_v37 = vrot.slane %v3877_v45, 2 }
 0x357   :  { %10998 = vst [vmem:[#allocation23_spill] sm:$0xff] %v8505_v9  ;;  %v3859_v54 = vrot.slane %v3858_v1, 1  ;;  %v3871_v33 = vrot.slane %v3870_v43, 2  ;;  %v3890_v48 = vrot.slane %v3889_v25, 4  ;;  %v10999_v15 = vcombine.high %v8023_v51, %v8023_v51 }
 0x358   :  { %v3884_v22 = vmax.f32 %v3882_v0, %v3883_v23  ;;  %v3866_v5 = vrot.slane %v3865_v2, 1  ;;  %v3879_v63 = vmax.f32 %v3877_v45, %v3878_v37  ;;  %v3903_v49 = vsel %vm359_vm1, %v8027_v47, -inf }
 0x359   :  { %v3896_v13 = vsel %vm359_vm1, %v10999_v15, -inf  ;;  %v8515_v35 = vmax.f32 %v3858_v1, %v3859_v54  ;;  %v3872_v26 = vmax.f32 %v3870_v43, %v3871_v33  ;;  %v3891_v46 = vmax.f32 %v3889_v25, %v3890_v48 }
 0x35a   :  { %v3885_v8 = vrot.slane %v3884_v22, 2  ;;  %v3897_v19 = vrot.slane %v3896_v13, 4  ;;  %v8519_v30 = vmax.f32 %v3865_v2, %v3866_v5  ;;  %v3904_v58 = vrot.slane %v3903_v49, 4 }
 0x35b   :  { %v3873_v11 = vrot.slane %v3872_v26, 1  ;;  %v3880_v23 = vrot.slane %v3879_v63, 1  ;;  %v3892_v51 = vrot.slane %v3891_v46, 2  ;;  %v11000_v1 = vcombine.high %v8027_v47, %v8027_v47 }
 0x35c   :  { %v3886_v0 = vmax.f32 %v3884_v22, %v3885_v8  ;;  %v3898_v9 = vmax.f32 %v3896_v13, %v3897_v19  ;;  %v3905_v45 = vmax.f32 %v3903_v49, %v3904_v58  ;;  %v3917_v22 = vsel %vm359_vm1, %v8036_v6, -inf }
 0x35d   :  { %v3910_v43 = vsel %vm359_vm1, %v11000_v1, -inf  ;;  %v8525_v54 = vmax.f32 %v3872_v26, %v3873_v11  ;;  %v8527_v33 = vmax.f32 %v3879_v63, %v3880_v23  ;;  %v3893_v2 = vmax.f32 %v3891_v46, %v3892_v51 }
 0x35e   :  { %v3887_v48 = vrot.slane %v3886_v0, 1  ;;  %v3911_v25 = vrot.slane %v3910_v43, 4  ;;  %v3899_v37 = vrot.slane %v3898_v9, 2  ;;  %v3906_v13 = vrot.slane %v3905_v45, 2 }
 0x35f   :  { %11001 = vst [vmem:[#allocation27_spill] sm:$0xff] %v8527_v33  ;;  %v3918_v8 = vrot.slane %v3917_v22, 4  ;;  %v3894_v47 = vrot.slane %v3893_v2, 1  ;;  %v11003_v26 = vcombine.high %v8036_v6, %v8036_v6  ;;  %v3931_v63 = vsel %vm359_vm1, %v8040_v17, -inf }
 0x360   :  { %v8531_v15 = vmax.f32 %v3886_v0, %v3887_v48  ;;  %v3912_v5 = vmax.f32 %v3910_v43, %v3911_v25  ;;  %v3900_v19 = vmax.f32 %v3898_v9, %v3899_v37  ;;  %v3907_v46 = vmax.f32 %v3905_v45, %v3906_v13 }
 0x361   :  { %v3924_v49 = vsel %vm359_vm1, %v11003_v26, -inf  ;;  %v3919_v58 = vmax.f32 %v3917_v22, %v3918_v8  ;;  %v8539_v51 = vmax.f32 %v3893_v2, %v3894_v47  ;;  %v3932_v1 = vrot.slane %v3931_v63, 4 }
 0x362   :  { %11002 = vst [vmem:[#allocation21_spill] sm:$0xff] %v8531_v15  ;;  %v3913_v11 = vrot.slane %v3912_v5, 2  ;;  %v3925_v23 = vrot.slane %v3924_v49, 4  ;;  %v3901_v0 = vrot.slane %v3900_v19, 1  ;;  %v11005_v43 = vcombine.high %v8040_v17, %v8040_v17 }
 0x363   :  { %11004 = vst [vmem:[#allocation25_spill] sm:$0xff] %v8539_v51  ;;  %v3908_v48 = vrot.slane %v3907_v46, 1  ;;  %v3920_v25 = vrot.slane %v3919_v58, 2  ;;  %v3933_v15 = vmax.f32 %v3931_v63, %v3932_v1  ;;  %v3945_v22 = vsel %vm359_vm1, %v8047_v10, -inf }
 0x364   :  { %v3938_v9 = vsel %vm359_vm1, %v11005_v43, -inf  ;;  %v3914_v6 = vmax.f32 %v3912_v5, %v3913_v11  ;;  %v3926_v37 = vmax.f32 %v3924_v49, %v3925_v23  ;;  %v8545_v26 = vmax.f32 %v3900_v19, %v3901_v0 }
 0x365   :  { %v3939_v45 = vrot.slane %v3938_v9, 4  ;;  %v8549_v2 = vmax.f32 %v3907_v46, %v3908_v48  ;;  %v3921_v8 = vmax.f32 %v3919_v58, %v3920_v25  ;;  %v3934_v51 = vrot.slane %v3933_v15, 2 }
 0x366   :  { %v3915_v13 = vrot.slane %v3914_v6, 1  ;;  %v3927_v47 = vrot.slane %v3926_v37, 2  ;;  %v3946_v33 = vrot.slane %v3945_v22, 4  ;;  %v11007_v5 = vcombine.high %v8047_v10, %v8047_v10 }
 0x367   :  { %11006 = vst [vmem:[#allocation31_spill] sm:$0xff] %v8549_v2  ;;  %v3940_v17 = vmax.f32 %v3938_v9, %v3939_v45  ;;  %v3922_v63 = vrot.slane %v3921_v8, 1  ;;  %v3935_v0 = vmax.f32 %v3933_v15, %v3934_v51  ;;  %v3959_v58 = vsel %vm359_vm1, %v8057_v31, -inf }
 0x368   :  { %v3952_v49 = vsel %vm359_vm1, %v11007_v5, -inf  ;;  %v8555_v19 = vmax.f32 %v3914_v6, %v3915_v13  ;;  %v3928_v11 = vmax.f32 %v3926_v37, %v3927_v47  ;;  %v3947_v46 = vmax.f32 %v3945_v22, %v3946_v33 }
 0x369   :  { %v3953_v23 = vrot.slane %v3952_v49, 4  ;;  %v3941_v1 = vrot.slane %v3940_v17, 2  ;;  %v8559_v43 = vmax.f32 %v3921_v8, %v3922_v63  ;;  %v3960_v25 = vrot.slane %v3959_v58, 4 }
 0x36a   :  { %v3929_v9 = vrot.slane %v3928_v11, 1  ;;  %v3936_v45 = vrot.slane %v3935_v0, 1  ;;  %v3948_v2 = vrot.slane %v3947_v46, 2  ;;  %v11008_v6 = vcombine.high %v8057_v31, %v8057_v31 }
 0x36b   :  { %v3954_v48 = vmax.f32 %v3952_v49, %v3953_v23  ;;  %v3942_v10 = vmax.f32 %v3940_v17, %v3941_v1  ;;  %v3961_v33 = vmax.f32 %v3959_v58, %v3960_v25  ;;  %v3973_v5 = vsel %vm359_vm1, %v8064_v41, -inf }
 0x36c   :  { %v3966_v37 = vsel %vm359_vm1, %v11008_v6, -inf  ;;  %v8565_v13 = vmax.f32 %v3928_v11, %v3929_v9  ;;  %v8567_v22 = vmax.f32 %v3935_v0, %v3936_v45  ;;  %v3949_v47 = vmax.f32 %v3947_v46, %v3948_v2 }
 0x36d   :  { %v3955_v15 = vrot.slane %v3954_v48, 2  ;;  %v3967_v51 = vrot.slane %v3966_v37, 4  ;;  %v3943_v8 = vrot.slane %v3942_v10, 1  ;;  %v3962_v17 = vrot.slane %v3961_v33, 2 }
 0x36e   :  { %11009 = vst [vmem:[#allocation35_spill] sm:$0xff] %v8567_v22  ;;  %v3974_v23 = vrot.slane %v3973_v5, 4  ;;  %v3950_v31 = vrot.slane %v3949_v47, 1  ;;  %v11011_v11 = vcombine.high %v8064_v41, %v8064_v41  ;;  %v3987_v0 = vsel %vm359_vm1, %v8068_v50, -inf }
 0x36f   :  { %v3956_v49 = vmax.f32 %v3954_v48, %v3955_v15  ;;  %v3968_v63 = vmax.f32 %v3966_v37, %v3967_v51  ;;  %v8571_v1 = vmax.f32 %v3942_v10, %v3943_v8  ;;  %v3963_v2 = vmax.f32 %v3961_v33, %v3962_v17 }
 0x370   :  { %v3980_v58 = vsel %vm359_vm1, %v11011_v11, -inf  ;;  %v3975_v25 = vmax.f32 %v3973_v5, %v3974_v23  ;;  %v8579_v45 = vmax.f32 %v3949_v47, %v3950_v31  ;;  %v3988_v6 = vrot.slane %v3987_v0, 4 }
 0x371   :  { %11010 = vst [vmem:[#allocation29_spill] sm:$0xff] %v8571_v1  ;;  %v3957_v9 = vrot.slane %v3956_v49, 1  ;;  %v3969_v46 = vrot.slane %v3968_v63, 2  ;;  %v3981_v48 = vrot.slane %v3980_v58, 4  ;;  %v11013_v10 = vcombine.high %v8068_v50, %v8068_v50 }
 0x372   :  { %11012 = vst [vmem:[#allocation33_spill] sm:$0xff] %v8579_v45  ;;  %v3964_v41 = vrot.slane %v3963_v2, 1  ;;  %v3976_v8 = vrot.slane %v3975_v25, 2  ;;  %v3989_v1 = vmax.f32 %v3987_v0, %v3988_v6  ;;  %v4001_v33 = vsel %vm359_vm1, %v8075_v7, -inf }
 0x373   :  { %v3994_v37 = vsel %vm359_vm1, %v11013_v10, -inf  ;;  %v8585_v15 = vmax.f32 %v3956_v49, %v3957_v9  ;;  %v3970_v51 = vmax.f32 %v3968_v63, %v3969_v46  ;;  %v3982_v11 = vmax.f32 %v3980_v58, %v3981_v48 }
 0x374   :  { %v3995_v22 = vrot.slane %v3994_v37, 4  ;;  %v8589_v47 = vmax.f32 %v3963_v2, %v3964_v41  ;;  %v3977_v17 = vmax.f32 %v3975_v25, %v3976_v8  ;;  %v4002_v23 = vrot.slane %v4001_v33, 4 }
 0x375   :  { %11014 = vst [vmem:[#allocation39_spill] sm:$0xff] %v8585_v15  ;;  %v3971_v5 = vrot.slane %v3970_v51, 1  ;;  %v3983_v31 = vrot.slane %v3982_v11, 2  ;;  %v3990_v50 = vrot.slane %v3989_v1, 2  ;;  %v11015_v49 = vcombine.high %v8075_v7, %v8075_v7 }
 0x376   :  { %v3996_v45 = vmax.f32 %v3994_v37, %v3995_v22  ;;  %v3978_v58 = vrot.slane %v3977_v17, 1  ;;  %v4003_v0 = vmax.f32 %v4001_v33, %v4002_v23  ;;  %v4015_v25 = vsel %vm359_vm1, %v8079_v14, -inf }
 0x377   :  { %v4008_v63 = vsel %vm359_vm1, %v11015_v49, -inf  ;;  %v8595_v9 = vmax.f32 %v3970_v51, %v3971_v5  ;;  %v3984_v48 = vmax.f32 %v3982_v11, %v3983_v31  ;;  %v3991_v6 = vmax.f32 %v3989_v1, %v3990_v50 }
 0x378   :  { %v4009_v46 = vrot.slane %v4008_v63, 4  ;;  %v3997_v2 = vrot.slane %v3996_v45, 2  ;;  %v8599_v10 = vmax.f32 %v3977_v17, %v3978_v58  ;;  %v4004_v41 = vrot.slane %v4003_v0, 2 }
 0x379   :  { %v4016_v37 = vrot.slane %v4015_v25, 4  ;;  %v3985_v8 = vrot.slane %v3984_v48, 1  ;;  %v3992_v7 = vrot.slane %v3991_v6, 1  ;;  %v11016_v51 = vcombine.high %v8079_v14, %v8079_v14 }
 0x37a   :  { %v4010_v22 = vmax.f32 %v4008_v63, %v4009_v46  ;;  %v3998_v15 = vmax.f32 %v3996_v45, %v3997_v2  ;;  %v4005_v5 = vmax.f32 %v4003_v0, %v4004_v41  ;;  %v4029_v49 = vsel %vm359_vm1, %v8088_v61, -inf }
 0x37b   :  { %v4022_v33 = vsel %vm359_vm1, %v11016_v51, -inf  ;;  %v4017_v1 = vmax.f32 %v4015_v25, %v4016_v37  ;;  %v8605_v31 = vmax.f32 %v3984_v48, %v3985_v8  ;;  %v8607_v50 = vmax.f32 %v3991_v6, %v3992_v7 }
 0x37c   :  { %v4011_v11 = vrot.slane %v4010_v22, 2  ;;  %v4023_v23 = vrot.slane %v4022_v33, 4  ;;  %v3999_v17 = vrot.slane %v3998_v15, 1  ;;  %v4006_v63 = vrot.slane %v4005_v5, 1 }
 0x37d   :  { %11017 = vst [vmem:[#allocation43_spill] sm:$0xff] %v8607_v50  ;;  %v4018_v45 = vrot.slane %v4017_v1, 2  ;;  %v4030_v14 = vrot.slane %v4029_v49, 4  ;;  %v11019_v0 = vcombine.high %v8088_v61, %v8088_v61  ;;  %v4043_v48 = vsel %vm359_vm1, %v8092_v16, -inf }
 0x37e   :  { %v4012_v58 = vmax.f32 %v4010_v22, %v4011_v11  ;;  %v4024_v46 = vmax.f32 %v4022_v33, %v4023_v23  ;;  %v8611_v2 = vmax.f32 %v3998_v15, %v3999_v17  ;;  %v8619_v6 = vmax.f32 %v4005_v5, %v4006_v63 }
 0x37f   :  { %v4036_v25 = vsel %vm359_vm1, %v11019_v0, -inf  ;;  %v4019_v37 = vmax.f32 %v4017_v1, %v4018_v45  ;;  %v4031_v7 = vmax.f32 %v4029_v49, %v4030_v14  ;;  %v4044_v51 = vrot.slane %v4043_v48, 4 }
 0x380   :  { %11018 = vst [vmem:[#allocation37_spill] sm:$0xff] %v8611_v2  ;;  %11020 = vst [vmem:[#allocation41_spill] sm:$0xff] %v8619_v6  ;;  %v4013_v41 = vrot.slane %v4012_v58, 1  ;;  %v4025_v8 = vrot.slane %v4024_v46, 2  ;;  %v4037_v22 = vrot.slane %v4036_v25, 4  ;;  %v11021_v15 = vcombine.high %v8092_v16, %v8092_v16 }
 0x381   :  { %v4020_v61 = vrot.slane %v4019_v37, 1  ;;  %v4032_v0 = vrot.slane %v4031_v7, 2  ;;  %v4045_v5 = vmax.f32 %v4043_v48, %v4044_v51  ;;  %v4057_v1 = vsel %vm359_vm1, %v8099_v56, -inf }
 0x382   :  { %v4050_v33 = vsel %vm359_vm1, %v11021_v15, -inf  ;;  %v8625_v11 = vmax.f32 %v4012_v58, %v4013_v41  ;;  %v4026_v23 = vmax.f32 %v4024_v46, %v4025_v8  ;;  %v4038_v2 = vmax.f32 %v4036_v25, %v4037_v22 }
 0x383   :  { %v4051_v17 = vrot.slane %v4050_v33, 4  ;;  %v8629_v63 = vmax.f32 %v4019_v37, %v4020_v61  ;;  %v4058_v14 = vrot.slane %v4057_v1, 4  ;;  %v4033_v6 = vmax.f32 %v4031_v7, %v4032_v0 }
 0x384   :  { %v4027_v49 = vrot.slane %v4026_v23, 1  ;;  %v4039_v16 = vrot.slane %v4038_v2, 2  ;;  %v4046_v50 = vrot.slane %v4045_v5, 2  ;;  %v11023_v58 = vcombine.high %v8099_v56, %v8099_v56 }
 0x385   :  { %11022 = vst [vmem:[#allocation45_spill] sm:$0xff] %v8629_v63  ;;  %v4052_v45 = vmax.f32 %v4050_v33, %v4051_v17  ;;  %v4059_v48 = vmax.f32 %v4057_v1, %v4058_v14  ;;  %v4034_v22 = vrot.slane %v4033_v6, 1  ;;  %v4071_v15 = vsel %vm359_vm1, %v8109_v40, -inf }
 0x386   :  { %v4064_v46 = vsel %vm359_vm1, %v11023_v58, -inf  ;;  %v8635_v41 = vmax.f32 %v4026_v23, %v4027_v49  ;;  %v4040_v51 = vmax.f32 %v4038_v2, %v4039_v16  ;;  %v4047_v37 = vmax.f32 %v4045_v5, %v4046_v50  ;;  %v11029_v58 = vld [vmem:[#allocation36_spill] sm:$0xff] }
 0x387   :  { %v4053_v25 = vrot.slane %v4052_v45, 2  ;;  %v4065_v8 = vrot.slane %v4064_v46, 4  ;;  %v4060_v7 = vrot.slane %v4059_v48, 2  ;;  %v4072_v17 = vrot.slane %v4071_v15, 4 }
 0x388   :  { %11024 = vst [vmem:[#allocation47_spill] sm:$0xff] %v8635_v41  ;;  %v8639_v0 = vmax.f32 %v4033_v6, %v4034_v22  ;;  %v4041_v56 = vrot.slane %v4040_v51, 1  ;;  %v4048_v63 = vrot.slane %v4047_v37, 1  ;;  %v11026_v23 = vcombine.high %v8109_v40, %v8109_v40 }
 0x389   :  { %v4054_v33 = vmax.f32 %v4052_v45, %v4053_v25  ;;  %v4066_v61 = vmax.f32 %v4064_v46, %v4065_v8  ;;  %v4061_v14 = vmax.f32 %v4059_v48, %v4060_v7  ;;  %v4073_v50 = vmax.f32 %v4071_v15, %v4072_v17 }
 0x38a   :  { %11025 = vst [vmem:[#allocation44_spill] sm:$0xff] %v8639_v0  ;;  %v4078_v1 = vsel %vm359_vm1, %v11026_v23, -inf  ;;  %v8645_v5 = vmax.f32 %v4040_v51, %v4041_v56  ;;  %v8647_v16 = vmax.f32 %v4047_v37, %v4048_v63  ;;  %v4085_v6 = vsel %vm359_vm1, %v11029_v58, -inf  ;;  %v11032_v51 = vld [vmem:[#allocation110_spill] sm:$0xff] }
 0x38b   :  { %v4055_v49 = vrot.slane %v4054_v33, 1  ;;  %v4067_v2 = vrot.slane %v4066_v61, 2  ;;  %v4079_v45 = vrot.slane %v4078_v1, 4  ;;  %v4062_v25 = vrot.slane %v4061_v14, 1 }
 0x38c   :  { %11027 = vst [vmem:[#allocation46_spill] sm:$0xff] %v8645_v5  ;;  %11028 = vst [vmem:[#allocation17_spill] sm:$0xff] %v8647_v16  ;;  %v4074_v22 = vrot.slane %v4073_v50, 2  ;;  %v4086_v0 = vrot.slane %v4085_v6, 4  ;;  %v11031_v48 = vcombine.high %v11029_v58, %v11029_v58  ;;  %v4099_v63 = vsel %vm359_vm1, %v11032_v51, -inf }
 0x38d   :  { %v8651_v46 = vmax.f32 %v4054_v33, %v4055_v49  ;;  %v4068_v8 = vmax.f32 %v4066_v61, %v4067_v2  ;;  %v4080_v40 = vmax.f32 %v4078_v1, %v4079_v45  ;;  %v8659_v37 = vmax.f32 %v4061_v14, %v4062_v25  ;;  %v11036_v25 = vld [vmem:[#allocation106_spill] sm:$0xff] }
 0x38e   :  { %v4092_v15 = vsel %vm359_vm1, %v11031_v48, -inf  ;;  %v4075_v17 = vmax.f32 %v4073_v50, %v4074_v22  ;;  %v4087_v23 = vmax.f32 %v4085_v6, %v4086_v0  ;;  %v4100_v49 = vrot.slane %v4099_v63, 4 }
 0x38f   :  { %11030 = vst [vmem:[#allocation22_spill] sm:$0xff] %v8651_v46  ;;  %11033 = vst [vmem:[#allocation36_spill] sm:$0xff] %v8659_v37  ;;  %v4069_v7 = vrot.slane %v4068_v8, 1  ;;  %v4093_v56 = vrot.slane %v4092_v15, 4  ;;  %v4081_v33 = vrot.slane %v4080_v40, 2  ;;  %v11034_v61 = vcombine.high %v11032_v51, %v11032_v51 }
 0x390   :  { %v4076_v45 = vrot.slane %v4075_v17, 1  ;;  %v4088_v16 = vrot.slane %v4087_v23, 2  ;;  %v4101_v14 = vmax.f32 %v4099_v63, %v4100_v49  ;;  %v4113_v50 = vsel %vm359_vm1, %v11036_v25, -inf }
 0x391   :  { %v4106_v1 = vsel %vm359_vm1, %v11034_v61, -inf  ;;  %v8665_v2 = vmax.f32 %v4068_v8, %v4069_v7  ;;  %v4094_v58 = vmax.f32 %v4092_v15, %v4093_v56  ;;  %v4082_v46 = vmax.f32 %v4080_v40, %v4081_v33  ;;  %v11040_v61 = vld [vmem:[#allocation56_spill] sm:$0xff] }
 0x392   :  { %v4107_v48 = vrot.slane %v4106_v1, 4  ;;  %v8669_v22 = vmax.f32 %v4075_v17, %v4076_v45  ;;  %v4114_v37 = vrot.slane %v4113_v50, 4  ;;  %v4089_v51 = vmax.f32 %v4087_v23, %v4088_v16 }
 0x393   :  { %11035 = vst [vmem:[#allocation110_spill] sm:$0xff] %v8665_v2  ;;  %v4095_v0 = vrot.slane %v4094_v58, 2  ;;  %v4083_v5 = vrot.slane %v4082_v46, 1  ;;  %v4102_v41 = vrot.slane %v4101_v14, 2  ;;  %v11038_v8 = vcombine.high %v11036_v25, %v11036_v25 }
 0x394   :  { %11037 = vst [vmem:[#allocation106_spill] sm:$0xff] %v8669_v22  ;;  %v4108_v6 = vmax.f32 %v4106_v1, %v4107_v48  ;;  %v4115_v56 = vmax.f32 %v4113_v50, %v4114_v37  ;;  %v4090_v49 = vrot.slane %v4089_v51, 1  ;;  %v4127_v1 = vsel %vm359_vm1, %v11040_v61, -inf }
 0x395   :  { %v4120_v15 = vsel %vm359_vm1, %v11038_v8, -inf  ;;  %v4096_v7 = vmax.f32 %v4094_v58, %v4095_v0  ;;  %v8675_v33 = vmax.f32 %v4082_v46, %v4083_v5  ;;  %v4103_v17 = vmax.f32 %v4101_v14, %v4102_v41  ;;  %v11045_v8 = vld [vmem:[#allocation52_spill] sm:$0xff] }
 0x396   :  { %v4109_v40 = vrot.slane %v4108_v6, 2  ;;  %v4121_v63 = vrot.slane %v4120_v15, 4  ;;  %v4116_v16 = vrot.slane %v4115_v56, 2  ;;  %v8679_v2 = vmax.f32 %v4089_v51, %v4090_v49 }
 0x397   :  { %11039 = vst [vmem:[#allocation128_spill] sm:$0xff] %v8675_v33  ;;  %v4097_v45 = vrot.slane %v4096_v7, 1  ;;  %v4104_v25 = vrot.slane %v4103_v17, 1  ;;  %v4128_v22 = vrot.slane %v4127_v1, 4  ;;  %v11042_v58 = vcombine.high %v11040_v61, %v11040_v61 }
 0x398   :  { %v4110_v48 = vmax.f32 %v4108_v6, %v4109_v40  ;;  %v4122_v23 = vmax.f32 %v4120_v15, %v4121_v63  ;;  %11041 = vst [vmem:[#allocation56_spill] sm:$0xff] %v8679_v2  ;;  %v4117_v41 = vmax.f32 %v4115_v56, %v4116_v16  ;;  %v4141_v51 = vsel %vm359_vm1, %v11045_v8, -inf }
 0x399   :  { %v4134_v37 = vsel %vm359_vm1, %v11042_v58, -inf  ;;  %v8685_v5 = vmax.f32 %v4096_v7, %v4097_v45  ;;  %v8687_v50 = vmax.f32 %v4103_v17, %v4104_v25  ;;  %v4129_v0 = vmax.f32 %v4127_v1, %v4128_v22  ;;  %v11048_v45 = vld [vmem:[#allocation115_spill] sm:$0xff] }
 0x39a   :  { %v4111_v46 = vrot.slane %v4110_v48, 1  ;;  %v4123_v14 = vrot.slane %v4122_v23, 2  ;;  %v4135_v6 = vrot.slane %v4134_v37, 4  ;;  %v4118_v40 = vrot.slane %v4117_v41, 1 }
 0x39b   :  { %11043 = vst [vmem:[#allocation129_spill] sm:$0xff] %v8685_v5  ;;  %11044 = vst [vmem:[#allocation130_spill] sm:$0xff] %v8687_v50  ;;  %v4142_v49 = vrot.slane %v4141_v51, 4  ;;  %v4130_v61 = vrot.slane %v4129_v0, 2  ;;  %v11047_v7 = vcombine.high %v11045_v8, %v11045_v8  ;;  %v4155_v17 = vsel %vm359_vm1, %v11048_v45, -inf }
 0x39c   :  { %v8691_v15 = vmax.f32 %v4110_v48, %v4111_v46  ;;  %v4124_v63 = vmax.f32 %v4122_v23, %v4123_v14  ;;  %v4136_v2 = vmax.f32 %v4134_v37, %v4135_v6  ;;  %v8699_v22 = vmax.f32 %v4117_v41, %v4118_v40  ;;  %v11052_v40 = vld [vmem:[#allocation111_spill] sm:$0xff] }
 0x39d   :  { %v4148_v56 = vsel %vm359_vm1, %v11047_v7, -inf  ;;  %v4143_v16 = vmax.f32 %v4141_v51, %v4142_v49  ;;  %v4131_v48 = vmax.f32 %v4129_v0, %v4130_v61  ;;  %v4156_v46 = vrot.slane %v4155_v17, 4 }
 0x39e   :  { %11046 = vst [vmem:[#allocation52_spill] sm:$0xff] %v8691_v15  ;;  %11049 = vst [vmem:[#allocation115_spill] sm:$0xff] %v8699_v22  ;;  %v4125_v1 = vrot.slane %v4124_v63, 1  ;;  %v4149_v25 = vrot.slane %v4148_v56, 4  ;;  %v4137_v58 = vrot.slane %v4136_v2, 2  ;;  %v11050_v23 = vcombine.high %v11048_v45, %v11048_v45 }
 0x39f   :  { %v4144_v6 = vrot.slane %v4143_v16, 2  ;;  %v4132_v15 = vrot.slane %v4131_v48, 1  ;;  %v4157_v41 = vmax.f32 %v4155_v17, %v4156_v46  ;;  %v4169_v51 = vsel %vm359_vm1, %v11052_v40, -inf }
 0x3a0   :  { %v4162_v37 = vsel %vm359_vm1, %v11050_v23, -inf  ;;  %v8705_v14 = vmax.f32 %v4124_v63, %v4125_v1  ;;  %v4150_v8 = vmax.f32 %v4148_v56, %v4149_v25  ;;  %v4138_v50 = vmax.f32 %v4136_v2, %v4137_v58  ;;  %v11056_v23 = vld [vmem:[#allocation57_spill] sm:$0xff] }
 0x3a1   :  { %v4163_v7 = vrot.slane %v4162_v37, 4  ;;  %v4145_v49 = vmax.f32 %v4143_v16, %v4144_v6  ;;  %v4170_v22 = vrot.slane %v4169_v51, 4  ;;  %v8709_v5 = vmax.f32 %v4131_v48, %v4132_v15 }
 0x3a2   :  { %11051 = vst [vmem:[#allocation131_spill] sm:$0xff] %v8705_v14  ;;  %v4151_v0 = vrot.slane %v4150_v8, 2  ;;  %v4139_v45 = vrot.slane %v4138_v50, 1  ;;  %v4158_v33 = vrot.slane %v4157_v41, 2  ;;  %v11054_v63 = vcombine.high %v11052_v40, %v11052_v40 }
 0x3a3   :  { %v4164_v61 = vmax.f32 %v4162_v37, %v4163_v7  ;;  %11053 = vst [vmem:[#allocation111_spill] sm:$0xff] %v8709_v5  ;;  %v4146_v1 = vrot.slane %v4145_v49, 1  ;;  %v4171_v17 = vmax.f32 %v4169_v51, %v4170_v22  ;;  %v4183_v37 = vsel %vm359_vm1, %v11056_v23, -inf }
 0x3a4   :  { %v4176_v56 = vsel %vm359_vm1, %v11054_v63, -inf  ;;  %v4152_v25 = vmax.f32 %v4150_v8, %v4151_v0  ;;  %v8715_v58 = vmax.f32 %v4138_v50, %v4139_v45  ;;  %v4159_v46 = vmax.f32 %v4157_v41, %v4158_v33  ;;  %v11061_v63 = vld [vmem:[#allocation53_spill] sm:$0xff] }
 0x3a5   :  { %v4165_v2 = vrot.slane %v4164_v61, 2  ;;  %v4177_v16 = vrot.slane %v4176_v56, 4  ;;  %v8719_v15 = vmax.f32 %v4145_v49, %v4146_v1  ;;  %v4172_v7 = vrot.slane %v4171_v17, 2 }
 0x3a6   :  { %11055 = vst [vmem:[#allocation132_spill] sm:$0xff] %v8715_v58  ;;  %v4153_v48 = vrot.slane %v4152_v25, 1  ;;  %v4160_v5 = vrot.slane %v4159_v46, 1  ;;  %v4184_v14 = vrot.slane %v4183_v37, 4  ;;  %v11058_v8 = vcombine.high %v11056_v23, %v11056_v23 }
 0x3a7   :  { %11057 = vst [vmem:[#allocation57_spill] sm:$0xff] %v8719_v15  ;;  %v4166_v6 = vmax.f32 %v4164_v61, %v4165_v2  ;;  %v4178_v40 = vmax.f32 %v4176_v56, %v4177_v16  ;;  %v4173_v41 = vmax.f32 %v4171_v17, %v4172_v7  ;;  %v4197_v61 = vsel %vm359_vm1, %v11061_v63, -inf }
 0x3a8   :  { %v4190_v22 = vsel %vm359_vm1, %v11058_v8, -inf  ;;  %v8725_v50 = vmax.f32 %v4152_v25, %v4153_v48  ;;  %v8727_v0 = vmax.f32 %v4159_v46, %v4160_v5  ;;  %v4185_v45 = vmax.f32 %v4183_v37, %v4184_v14  ;;  %v11064_v48 = vld [vmem:[#allocation116_spill] sm:$0xff] }
 0x3a9   :  { %v4167_v33 = vrot.slane %v4166_v6, 1  ;;  %v4191_v51 = vrot.slane %v4190_v22, 4  ;;  %v4179_v49 = vrot.slane %v4178_v40, 2  ;;  %v4174_v56 = vrot.slane %v4173_v41, 1 }
 0x3aa   :  { %11059 = vst [vmem:[#allocation133_spill] sm:$0xff] %v8725_v50  ;;  %11060 = vst [vmem:[#allocation134_spill] sm:$0xff] %v8727_v0  ;;  %v4198_v16 = vrot.slane %v4197_v61, 4  ;;  %v4186_v15 = vrot.slane %v4185_v45, 2  ;;  %v11063_v25 = vcombine.high %v11061_v63, %v11061_v63  ;;  %v4211_v5 = vsel %vm359_vm1, %v11064_v48, -inf }
 0x3ab   :  { %v8731_v1 = vmax.f32 %v4166_v6, %v4167_v33  ;;  %v4192_v2 = vmax.f32 %v4190_v22, %v4191_v51  ;;  %v4180_v23 = vmax.f32 %v4178_v40, %v4179_v49  ;;  %v8739_v46 = vmax.f32 %v4173_v41, %v4174_v56  ;;  %v11068_v56 = vld [vmem:[#allocation112_spill] sm:$0xff] }
 0x3ac   :  { %v4204_v17 = vsel %vm359_vm1, %v11063_v25, -inf  ;;  %v4199_v37 = vmax.f32 %v4197_v61, %v4198_v16  ;;  %v4187_v8 = vmax.f32 %v4185_v45, %v4186_v15  ;;  %v4212_v33 = vrot.slane %v4211_v5, 4 }
 0x3ad   :  { %11062 = vst [vmem:[#allocation53_spill] sm:$0xff] %v8731_v1  ;;  %11065 = vst [vmem:[#allocation116_spill] sm:$0xff] %v8739_v46  ;;  %v4193_v14 = vrot.slane %v4192_v2, 2  ;;  %v4205_v7 = vrot.slane %v4204_v17, 4  ;;  %v4181_v6 = vrot.slane %v4180_v23, 1  ;;  %v11066_v40 = vcombine.high %v11064_v48, %v11064_v48 }
 0x3ae   :  { %v4200_v49 = vrot.slane %v4199_v37, 2  ;;  %v4188_v0 = vrot.slane %v4187_v8, 1  ;;  %v4213_v41 = vmax.f32 %v4211_v5, %v4212_v33  ;;  %v4225_v61 = vsel %vm359_vm1, %v11068_v56, -inf }
 0x3af   :  { %v4218_v22 = vsel %vm359_vm1, %v11066_v40, -inf  ;;  %v4194_v51 = vmax.f32 %v4192_v2, %v4193_v14  ;;  %v4206_v63 = vmax.f32 %v4204_v17, %v4205_v7  ;;  %v8745_v1 = vmax.f32 %v4180_v23, %v4181_v6 }
 0x3b0   :  { %v4219_v25 = vrot.slane %v4218_v22, 4  ;;  %v4201_v46 = vmax.f32 %v4199_v37, %v4200_v49  ;;  %v8749_v50 = vmax.f32 %v4187_v8, %v4188_v0  ;;  %v4214_v48 = vrot.slane %v4213_v41, 2  ;;  %v11072_v37 = vld [vmem:[#allocation117_spill] sm:$0xff] }
 0x3b1   :  { %11067 = vst [vmem:[#allocation135_spill] sm:$0xff] %v8745_v1  ;;  %v4195_v16 = vrot.slane %v4194_v51, 1  ;;  %v4207_v15 = vrot.slane %v4206_v63, 2  ;;  %v4226_v58 = vrot.slane %v4225_v61, 4  ;;  %v11070_v2 = vcombine.high %v11068_v56, %v11068_v56 }
 0x3b2   :  { %v4220_v45 = vmax.f32 %v4218_v22, %v4219_v25  ;;  %11069 = vst [vmem:[#allocation112_spill] sm:$0xff] %v8749_v50  ;;  %v4202_v14 = vrot.slane %v4201_v46, 1  ;;  %v4215_v6 = vmax.f32 %v4213_v41, %v4214_v48  ;;  %v4239_v22 = vsel %vm359_vm1, %v11072_v37, -inf }
 0x3b3   :  { %v4232_v17 = vsel %vm359_vm1, %v11070_v2, -inf  ;;  %v8755_v23 = vmax.f32 %v4194_v51, %v4195_v16  ;;  %v4208_v5 = vmax.f32 %v4206_v63, %v4207_v15  ;;  %v4227_v33 = vmax.f32 %v4225_v61, %v4226_v58  ;;  %v11077_v2 = vld [vmem:[#allocation113_spill] sm:$0xff] }
 0x3b4   :  { %v4221_v7 = vrot.slane %v4220_v45, 2  ;;  %v4233_v40 = vrot.slane %v4232_v17, 4  ;;  %v8759_v0 = vmax.f32 %v4201_v46, %v4202_v14  ;;  %v4240_v25 = vrot.slane %v4239_v22, 4 }
 0x3b5   :  { %11071 = vst [vmem:[#allocation136_spill] sm:$0xff] %v8755_v23  ;;  %v4209_v8 = vrot.slane %v4208_v5, 1  ;;  %v4216_v1 = vrot.slane %v4215_v6, 1  ;;  %v4228_v56 = vrot.slane %v4227_v33, 2  ;;  %v11074_v51 = vcombine.high %v11072_v37, %v11072_v37 }
 0x3b6   :  { %11073 = vst [vmem:[#allocation117_spill] sm:$0xff] %v8759_v0  ;;  %v4222_v49 = vmax.f32 %v4220_v45, %v4221_v7  ;;  %v4234_v50 = vmax.f32 %v4232_v17, %v4233_v40  ;;  %v4241_v41 = vmax.f32 %v4239_v22, %v4240_v25  ;;  %v4253_v45 = vsel %vm359_vm1, %v11077_v2, -inf }
 0x3b7   :  { %v4246_v63 = vsel %vm359_vm1, %v11074_v51, -inf  ;;  %v8765_v16 = vmax.f32 %v4208_v5, %v4209_v8  ;;  %v8767_v15 = vmax.f32 %v4215_v6, %v4216_v1  ;;  %v4229_v46 = vmax.f32 %v4227_v33, %v4228_v56  ;;  %v11080_v8 = vld [vmem:[#allocation58_spill] sm:$0xff] }
 0x3b8   :  { %v4223_v58 = vrot.slane %v4222_v49, 1  ;;  %v4247_v61 = vrot.slane %v4246_v63, 4  ;;  %v4235_v48 = vrot.slane %v4234_v50, 2  ;;  %v4242_v17 = vrot.slane %v4241_v41, 2 }
 0x3b9   :  { %11075 = vst [vmem:[#allocation137_spill] sm:$0xff] %v8765_v16  ;;  %11076 = vst [vmem:[#allocation138_spill] sm:$0xff] %v8767_v15  ;;  %v4254_v40 = vrot.slane %v4253_v45, 4  ;;  %v4230_v37 = vrot.slane %v4229_v46, 1  ;;  %v11079_v5 = vcombine.high %v11077_v2, %v11077_v2  ;;  %v4267_v1 = vsel %vm359_vm1, %v11080_v8, -inf }
 0x3ba   :  { %v8771_v14 = vmax.f32 %v4222_v49, %v4223_v58  ;;  %v4248_v7 = vmax.f32 %v4246_v63, %v4247_v61  ;;  %v4236_v0 = vmax.f32 %v4234_v50, %v4235_v48  ;;  %v4243_v6 = vmax.f32 %v4241_v41, %v4242_v17  ;;  %v11084_v17 = vld [vmem:[#allocation54_spill] sm:$0xff] }
 0x3bb   :  { %v4260_v22 = vsel %vm359_vm1, %v11079_v5, -inf  ;;  %v4255_v25 = vmax.f32 %v4253_v45, %v4254_v40  ;;  %v8779_v51 = vmax.f32 %v4229_v46, %v4230_v37  ;;  %v4268_v58 = vrot.slane %v4267_v1, 4 }
 0x3bc   :  { %11078 = vst [vmem:[#allocation113_spill] sm:$0xff] %v8771_v14  ;;  %v4249_v33 = vrot.slane %v4248_v7, 2  ;;  %v4261_v56 = vrot.slane %v4260_v22, 4  ;;  %v4237_v49 = vrot.slane %v4236_v0, 1  ;;  %v11082_v63 = vcombine.high %v11080_v8, %v11080_v8 }
 0x3bd   :  { %11081 = vst [vmem:[#allocation58_spill] sm:$0xff] %v8779_v51  ;;  %v4244_v61 = vrot.slane %v4243_v6, 1  ;;  %v4256_v2 = vrot.slane %v4255_v25, 2  ;;  %v4269_v15 = vmax.f32 %v4267_v1, %v4268_v58  ;;  %v4281_v45 = vsel %vm359_vm1, %v11084_v17, -inf }
 0x3be   :  { %v4274_v50 = vsel %vm359_vm1, %v11082_v63, -inf  ;;  %v4250_v48 = vmax.f32 %v4248_v7, %v4249_v33  ;;  %v4262_v5 = vmax.f32 %v4260_v22, %v4261_v56  ;;  %v8785_v14 = vmax.f32 %v4236_v0, %v4237_v49  ;;  %v11088_v63 = vld [vmem:[#allocation59_spill] sm:$0xff] }
 0x3bf   :  { %v4275_v41 = vrot.slane %v4274_v50, 4  ;;  %v8789_v46 = vmax.f32 %v4243_v6, %v4244_v61  ;;  %v4257_v37 = vmax.f32 %v4255_v25, %v4256_v2  ;;  %v4270_v16 = vrot.slane %v4269_v15, 2 }
 0x3c0   :  { %11083 = vst [vmem:[#allocation139_spill] sm:$0xff] %v8785_v14  ;;  %v4251_v40 = vrot.slane %v4250_v48, 1  ;;  %v4263_v51 = vrot.slane %v4262_v5, 2  ;;  %v4282_v23 = vrot.slane %v4281_v45, 4  ;;  %v11086_v7 = vcombine.high %v11084_v17, %v11084_v17 }
 0x3c1   :  { %11085 = vst [vmem:[#allocation54_spill] sm:$0xff] %v8789_v46  ;;  %v4276_v8 = vmax.f32 %v4274_v50, %v4275_v41  ;;  %v4258_v1 = vrot.slane %v4257_v37, 1  ;;  %v4271_v49 = vmax.f32 %v4269_v15, %v4270_v16  ;;  %v4295_v25 = vsel %vm359_vm1, %v11088_v63, -inf }
 0x3c2   :  { %v4288_v22 = vsel %vm359_vm1, %v11086_v7, -inf  ;;  %v8795_v0 = vmax.f32 %v4250_v48, %v4251_v40  ;;  %v4264_v33 = vmax.f32 %v4262_v5, %v4263_v51  ;;  %v4283_v6 = vmax.f32 %v4281_v45, %v4282_v23  ;;  %v11093_v7 = vld [vmem:[#allocation55_spill] sm:$0xff] }
 0x3c3   :  { %v4289_v56 = vrot.slane %v4288_v22, 4  ;;  %v4277_v58 = vrot.slane %v4276_v8, 2  ;;  %v8799_v61 = vmax.f32 %v4257_v37, %v4258_v1  ;;  %v4296_v41 = vrot.slane %v4295_v25, 4 }
 0x3c4   :  { %11087 = vst [vmem:[#allocation140_spill] sm:$0xff] %v8795_v0  ;;  %v4265_v50 = vrot.slane %v4264_v33, 1  ;;  %v4272_v46 = vrot.slane %v4271_v49, 1  ;;  %v4284_v14 = vrot.slane %v4283_v6, 2  ;;  %v11090_v48 = vcombine.high %v11088_v63, %v11088_v63 }
 0x3c5   :  { %11089 = vst [vmem:[#allocation59_spill] sm:$0xff] %v8799_v61  ;;  %v4290_v2 = vmax.f32 %v4288_v22, %v4289_v56  ;;  %v4278_v17 = vmax.f32 %v4276_v8, %v4277_v58  ;;  %v4297_v23 = vmax.f32 %v4295_v25, %v4296_v41  ;;  %v4309_v22 = vsel %vm359_vm1, %v11093_v7, -inf }
 0x3c6   :  { %v4302_v51 = vsel %vm359_vm1, %v11090_v48, -inf  ;;  %v8805_v5 = vmax.f32 %v4264_v33, %v4265_v50  ;;  %v8807_v45 = vmax.f32 %v4271_v49, %v4272_v46  ;;  %v4285_v37 = vmax.f32 %v4283_v6, %v4284_v14  ;;  %v11096_v50 = vld [vmem:[#allocation118_spill] sm:$0xff] }
 0x3c7   :  { %v4291_v16 = vrot.slane %v4290_v2, 2  ;;  %v4303_v15 = vrot.slane %v4302_v51, 4  ;;  %v4279_v40 = vrot.slane %v4278_v17, 1  ;;  %v4298_v8 = vrot.slane %v4297_v23, 2 }
 0x3c8   :  { %11091 = vst [vmem:[#allocation141_spill] sm:$0xff] %v8805_v5  ;;  %11092 = vst [vmem:[#allocation142_spill] sm:$0xff] %v8807_v45  ;;  %v4310_v58 = vrot.slane %v4309_v22, 4  ;;  %v4286_v63 = vrot.slane %v4285_v37, 1  ;;  %v11095_v33 = vcombine.high %v11093_v7, %v11093_v7  ;;  %v4323_v46 = vsel %vm359_vm1, %v11096_v50, -inf }
 0x3c9   :  { %v4292_v1 = vmax.f32 %v4290_v2, %v4291_v16  ;;  %v4304_v56 = vmax.f32 %v4302_v51, %v4303_v15  ;;  %v8811_v61 = vmax.f32 %v4278_v17, %v4279_v40  ;;  %v4299_v14 = vmax.f32 %v4297_v23, %v4298_v8  ;;  %v11100_v23 = vld [vmem:[#allocation114_spill] sm:$0xff] }
 0x3ca   :  { %v4316_v25 = vsel %vm359_vm1, %v11095_v33, -inf  ;;  %v4311_v41 = vmax.f32 %v4309_v22, %v4310_v58  ;;  %v8819_v48 = vmax.f32 %v4285_v37, %v4286_v63  ;;  %v4324_v51 = vrot.slane %v4323_v46, 4 }
 0x3cb   :  { %11094 = vst [vmem:[#allocation55_spill] sm:$0xff] %v8811_v61  ;;  %v4293_v49 = vrot.slane %v4292_v1, 1  ;;  %v4305_v6 = vrot.slane %v4304_v56, 2  ;;  %v4317_v2 = vrot.slane %v4316_v25, 4  ;;  %v11098_v17 = vcombine.high %v11096_v50, %v11096_v50 }
 0x3cc   :  { %11097 = vst [vmem:[#allocation118_spill] sm:$0xff] %v8819_v48  ;;  %v4300_v40 = vrot.slane %v4299_v14, 1  ;;  %v4312_v33 = vrot.slane %v4311_v41, 2  ;;  %v4325_v45 = vmax.f32 %v4323_v46, %v4324_v51  ;;  %v4337_v22 = vsel %vm359_vm1, %v11100_v23, -inf }
 0x3cd   :  { %v4330_v16 = vsel %vm359_vm1, %v11098_v17, -inf  ;;  %v8825_v15 = vmax.f32 %v4292_v1, %v4293_v49  ;;  %v4306_v7 = vmax.f32 %v4304_v56, %v4305_v6  ;;  %v4318_v61 = vmax.f32 %v4316_v25, %v4317_v2  ;;  %v11104_v17 = vld [vmem:[#allocation60_spill] sm:$0xff] }
 0x3ce   :  { %v4331_v5 = vrot.slane %v4330_v16, 4  ;;  %v8829_v37 = vmax.f32 %v4299_v14, %v4300_v40  ;;  %v4313_v58 = vmax.f32 %v4311_v41, %v4312_v33  ;;  %v4338_v63 = vrot.slane %v4337_v22, 4 }
 0x3cf   :  { %11099 = vst [vmem:[#allocation143_spill] sm:$0xff] %v8825_v15  ;;  %v4307_v8 = vrot.slane %v4306_v7, 1  ;;  %v4319_v48 = vrot.slane %v4318_v61, 2  ;;  %v4326_v50 = vrot.slane %v4325_v45, 2  ;;  %v11102_v1 = vcombine.high %v11100_v23, %v11100_v23 }
 0x3d0   :  { %11101 = vst [vmem:[#allocation114_spill] sm:$0xff] %v8829_v37  ;;  %v4332_v0 = vmax.f32 %v4330_v16, %v4331_v5  ;;  %v4314_v25 = vrot.slane %v4313_v58, 1  ;;  %v4339_v46 = vmax.f32 %v4337_v22, %v4338_v63  ;;  %v4351_v41 = vsel %vm359_vm1, %v11104_v17, -inf }
 0x3d1   :  { %v4344_v56 = vsel %vm359_vm1, %v11102_v1, -inf  ;;  %v8835_v49 = vmax.f32 %v4306_v7, %v4307_v8  ;;  %v4320_v2 = vmax.f32 %v4318_v61, %v4319_v48  ;;  %v4327_v51 = vmax.f32 %v4325_v45, %v4326_v50  ;;  %v11109_v1 = vld [vmem:[#allocation119_spill] sm:$0xff] }
 0x3d2   :  { %v4345_v6 = vrot.slane %v4344_v56, 4  ;;  %v4333_v14 = vrot.slane %v4332_v0, 2  ;;  %v8839_v40 = vmax.f32 %v4313_v58, %v4314_v25  ;;  %v4340_v33 = vrot.slane %v4339_v46, 2 }
 0x3d3   :  { %11103 = vst [vmem:[#allocation144_spill] sm:$0xff] %v8835_v49  ;;  %v4352_v16 = vrot.slane %v4351_v41, 4  ;;  %v4321_v15 = vrot.slane %v4320_v2, 1  ;;  %v4328_v23 = vrot.slane %v4327_v51, 1  ;;  %v11106_v7 = vcombine.high %v11104_v17, %v11104_v17 }
 0x3d4   :  { %11105 = vst [vmem:[#allocation60_spill] sm:$0xff] %v8839_v40  ;;  %v4346_v5 = vmax.f32 %v4344_v56, %v4345_v6  ;;  %v4334_v37 = vmax.f32 %v4332_v0, %v4333_v14  ;;  %v4341_v8 = vmax.f32 %v4339_v46, %v4340_v33  ;;  %v4365_v56 = vsel %vm359_vm1, %v11109_v1, -inf }
 0x3d5   :  { %v4358_v22 = vsel %vm359_vm1, %v11106_v7, -inf  ;;  %v4353_v45 = vmax.f32 %v4351_v41, %v4352_v16  ;;  %v8845_v63 = vmax.f32 %v4320_v2, %v4321_v15  ;;  %v8847_v50 = vmax.f32 %v4327_v51, %v4328_v23  ;;  %v11112_v15 = vld [vmem:[#allocation61_spill] sm:$0xff] }
 0x3d6   :  { %v4347_v61 = vrot.slane %v4346_v5, 2  ;;  %v4359_v48 = vrot.slane %v4358_v22, 4  ;;  %v4335_v58 = vrot.slane %v4334_v37, 1  ;;  %v4342_v25 = vrot.slane %v4341_v8, 1 }
 0x3d7   :  { %11107 = vst [vmem:[#allocation145_spill] sm:$0xff] %v8845_v63  ;;  %11108 = vst [vmem:[#allocation146_spill] sm:$0xff] %v8847_v50  ;;  %v4354_v0 = vrot.slane %v4353_v45, 2  ;;  %v4366_v17 = vrot.slane %v4365_v56, 4  ;;  %v11111_v46 = vcombine.high %v11109_v1, %v11109_v1  ;;  %v4379_v2 = vsel %vm359_vm1, %v11112_v15, -inf }
 0x3d8   :  { %v4348_v6 = vmax.f32 %v4346_v5, %v4347_v61  ;;  %v4360_v14 = vmax.f32 %v4358_v22, %v4359_v48  ;;  %v8851_v40 = vmax.f32 %v4334_v37, %v4335_v58  ;;  %v8859_v51 = vmax.f32 %v4341_v8, %v4342_v25  ;;  %v11116_v25 = vld [vmem:[#allocation120_spill] sm:$0xff] }
 0x3d9   :  { %v4372_v41 = vsel %vm359_vm1, %v11111_v46, -inf  ;;  %v4355_v16 = vmax.f32 %v4353_v45, %v4354_v0  ;;  %v4367_v7 = vmax.f32 %v4365_v56, %v4366_v17  ;;  %v4380_v61 = vrot.slane %v4379_v2, 4 }
 0x3da   :  { %11110 = vst [vmem:[#allocation119_spill] sm:$0xff] %v8851_v40  ;;  %11113 = vst [vmem:[#allocation61_spill] sm:$0xff] %v8859_v51  ;;  %v4349_v33 = vrot.slane %v4348_v6, 1  ;;  %v4361_v23 = vrot.slane %v4360_v14, 2  ;;  %v4373_v5 = vrot.slane %v4372_v41, 4  ;;  %v11114_v37 = vcombine.high %v11112_v15, %v11112_v15 }
 0x3db   :  { %v4356_v58 = vrot.slane %v4355_v16, 1  ;;  %v4368_v40 = vrot.slane %v4367_v7, 2  ;;  %v4381_v8 = vmax.f32 %v4379_v2, %v4380_v61  ;;  %v4393_v45 = vsel %vm359_vm1, %v11116_v25, -inf }
 0x3dc   :  { %v4386_v22 = vsel %vm359_vm1, %v11114_v37, -inf  ;;  %v8865_v48 = vmax.f32 %v4348_v6, %v4349_v33  ;;  %v4362_v1 = vmax.f32 %v4360_v14, %v4361_v23  ;;  %v4374_v50 = vmax.f32 %v4372_v41, %v4373_v5  ;;  %v11120_v37 = vld [vmem:[#allocation121_spill] sm:$0xff] }
 0x3dd   :  { %v4387_v46 = vrot.slane %v4386_v22, 4  ;;  %v8869_v0 = vmax.f32 %v4355_v16, %v4356_v58  ;;  %v4394_v51 = vrot.slane %v4393_v45, 4  ;;  %v4369_v63 = vmax.f32 %v4367_v7, %v4368_v40 }
 0x3de   :  { %11115 = vst [vmem:[#allocation147_spill] sm:$0xff] %v8865_v48  ;;  %v4363_v56 = vrot.slane %v4362_v1, 1  ;;  %v4375_v15 = vrot.slane %v4374_v50, 2  ;;  %v4382_v49 = vrot.slane %v4381_v8, 2  ;;  %v11118_v6 = vcombine.high %v11116_v25, %v11116_v25 }
 0x3df   :  { %11117 = vst [vmem:[#allocation120_spill] sm:$0xff] %v8869_v0  ;;  %v4388_v17 = vmax.f32 %v4386_v22, %v4387_v46  ;;  %v4395_v2 = vmax.f32 %v4393_v45, %v4394_v51  ;;  %v4370_v5 = vrot.slane %v4369_v63, 1  ;;  %v4407_v22 = vsel %vm359_vm1, %v11120_v37, -inf }
 0x3e0   :  { %v4400_v14 = vsel %vm359_vm1, %v11118_v6, -inf  ;;  %v8875_v33 = vmax.f32 %v4362_v1, %v4363_v56  ;;  %v4376_v61 = vmax.f32 %v4374_v50, %v4375_v15  ;;  %v4383_v16 = vmax.f32 %v4381_v8, %v4382_v49  ;;  %v11125_v6 = vld [vmem:[#allocation62_spill] sm:$0xff] }
 0x3e1   :  { %v4389_v41 = vrot.slane %v4388_v17, 2  ;;  %v4401_v23 = vrot.slane %v4400_v14, 4  ;;  %v4396_v40 = vrot.slane %v4395_v2, 2  ;;  %v4408_v46 = vrot.slane %v4407_v22, 4 }
 0x3e2   :  { %11119 = vst [vmem:[#allocation148_spill] sm:$0xff] %v8875_v33  ;;  %v8879_v0 = vmax.f32 %v4369_v63, %v4370_v5  ;;  %v4377_v25 = vrot.slane %v4376_v61, 1  ;;  %v4384_v48 = vrot.slane %v4383_v16, 1  ;;  %v11122_v1 = vcombine.high %v11120_v37, %v11120_v37 }
 0x3e3   :  { %v4390_v58 = vmax.f32 %v4388_v17, %v4389_v41  ;;  %v4402_v7 = vmax.f32 %v4400_v14, %v4401_v23  ;;  %v4397_v56 = vmax.f32 %v4395_v2, %v4396_v40  ;;  %v4409_v49 = vmax.f32 %v4407_v22, %v4408_v46 }
 0x3e4   :  { %11121 = vst [vmem:[#allocation121_spill] sm:$0xff] %v8879_v0  ;;  %v4414_v51 = vsel %vm359_vm1, %v11122_v1, -inf  ;;  %v8885_v8 = vmax.f32 %v4376_v61, %v4377_v25  ;;  %v8887_v15 = vmax.f32 %v4383_v16, %v4384_v48  ;;  %v4421_v63 = vsel %vm359_vm1, %v11125_v6, -inf  ;;  %v11128_v61 = vld [vmem:[#allocation63_spill] sm:$0xff] }
 0x3e5   :  { %v4391_v45 = vrot.slane %v4390_v58, 1  ;;  %v4403_v50 = vrot.slane %v4402_v7, 2  ;;  %v4415_v17 = vrot.slane %v4414_v51, 4  ;;  %v4398_v41 = vrot.slane %v4397_v56, 1 }
 0x3e6   :  { %11123 = vst [vmem:[#allocation149_spill] sm:$0xff] %v8885_v8  ;;  %11124 = vst [vmem:[#allocation150_spill] sm:$0xff] %v8887_v15  ;;  %v4410_v5 = vrot.slane %v4409_v49, 2  ;;  %v4422_v0 = vrot.slane %v4421_v63, 4  ;;  %v11127_v2 = vcombine.high %v11125_v6, %v11125_v6  ;;  %v4435_v48 = vsel %vm359_vm1, %v11128_v61, -inf }
 0x3e7   :  { %v8891_v14 = vmax.f32 %v4390_v58, %v4391_v45  ;;  %v4404_v23 = vmax.f32 %v4402_v7, %v4403_v50  ;;  %v4416_v37 = vmax.f32 %v4414_v51, %v4415_v17  ;;  %v8899_v16 = vmax.f32 %v4397_v56, %v4398_v41  ;;  %v11131_v41 = vld [vmem:[#allocation4_spill] sm:$0xff] }
 0x3e8   :  { %v4428_v22 = vsel %vm359_vm1, %v11127_v2, -inf  ;;  %v4411_v46 = vmax.f32 %v4409_v49, %v4410_v5  ;;  %v4423_v1 = vmax.f32 %v4421_v63, %v4422_v0  ;;  %v4436_v45 = vrot.slane %v4435_v48, 4 }
 0x3e9   :  { %11126 = vst [vmem:[#allocation62_spill] sm:$0xff] %v8891_v14  ;;  %11129 = vst [vmem:[#allocation63_spill] sm:$0xff] %v8899_v16  ;;  %v4405_v40 = vrot.slane %v4404_v23, 1  ;;  %v4429_v25 = vrot.slane %v4428_v22, 4  ;;  %v4417_v58 = vrot.slane %v4416_v37, 2  ;;  %v11130_v7 = vcombine.high %v11128_v61, %v11128_v61 }
 0x3ea   :  { %v4412_v17 = vrot.slane %v4411_v46, 1  ;;  %v4424_v15 = vrot.slane %v4423_v1, 2  ;;  %v4437_v56 = vmax.f32 %v4435_v48, %v4436_v45  ;;  %v4449_v49 = vsel %vm359_vm1, %v11131_v41, -inf }
 0x3eb   :  { %v4442_v51 = vsel %vm359_vm1, %v11130_v7, -inf  ;;  %v8905_v50 = vmax.f32 %v4404_v23, %v4405_v40  ;;  %v4430_v6 = vmax.f32 %v4428_v22, %v4429_v25  ;;  %v4418_v14 = vmax.f32 %v4416_v37, %v4417_v58 }
 0x3ec   :  { %v4443_v2 = vrot.slane %v4442_v51, 4  ;;  %v8909_v5 = vmax.f32 %v4411_v46, %v4412_v17  ;;  %v4450_v16 = vrot.slane %v4449_v49, 4  ;;  %v4425_v61 = vmax.f32 %v4423_v1, %v4424_v15 }
 0x3ed   :  { %v4431_v0 = vrot.slane %v4430_v6, 2  ;;  %v4419_v8 = vrot.slane %v4418_v14, 1  ;;  %v4438_v33 = vrot.slane %v4437_v56, 2  ;;  %v11132_v23 = vcombine.high %v11131_v41, %v11131_v41 }
 0x3ee   :  { %v4444_v63 = vmax.f32 %v4442_v51, %v4443_v2  ;;  %v4451_v25 = vmax.f32 %v4449_v49, %v4450_v16  ;;  %v4426_v45 = vrot.slane %v4425_v61, 1  ;;  %v8919_v7 = vmax.f32 %v8313_v38, %v8353_v20 }
 0x3ef   :  { %v4456_v22 = vsel %vm359_vm1, %v11132_v23, -inf  ;;  %v4432_v40 = vmax.f32 %v4430_v6, %v4431_v0  ;;  %v8915_v58 = vmax.f32 %v4418_v14, %v4419_v8  ;;  %v4439_v46 = vmax.f32 %v4437_v56, %v4438_v33  ;;  %v11136_v56 = vld [vmem:[#allocation48_spill] sm:$0xff]  ;;  %v11138_v0 = vld [vmem:[#allocation6_spill] sm:$0xff]  ;;  %v11142_v23 = vld [vmem:[#allocation5_spill] sm:$0xff] }
 0x3f0   :  { %v4445_v37 = vrot.slane %v4444_v63, 2  ;;  %v4457_v48 = vrot.slane %v4456_v22, 4  ;;  %11133 = vst [vmem:[#allocation4_spill] sm:$0xff] %v8919_v7  ;;  %v4452_v1 = vrot.slane %v4451_v25, 2  ;;  %v8921_v2 = vmax.f32 %v4425_v61, %v4426_v45  ;;  %v11336_v7 = vld [vmem:[#allocation38_spill] sm:$0xff] }
 0x3f1   :  { %v4433_v51 = vrot.slane %v4432_v40, 1  ;;  %v4440_v41 = vrot.slane %v4439_v46, 1  ;;  %v8925_v6 = vmax.f32 %v8315_v32, %v8355_v18  ;;  %v8929_v8 = vmax.f32 %v8317_v12, %v8359_v42  ;;  %v11140_v32 = vld [vmem:[#allocation3_spill] sm:$0xff] }
 0x3f2   :  { %v4446_v15 = vmax.f32 %v4444_v63, %v4445_v37  ;;  %v4458_v17 = vmax.f32 %v4456_v22, %v4457_v48  ;;  %v4453_v38 = vmax.f32 %v4451_v25, %v4452_v1  ;;  %v8937_v49 = vmax.f32 %v11136_v56, %v8365_v27  ;;  %v11145_v37 = vld [vmem:[#allocation8_spill] sm:$0xff]  ;;  %v11169_v56 = vld [vmem:[#allocation21_spill] sm:$0xff] }
 0x3f3   :  { %11134 = vst [vmem:[#allocation151_spill] sm:$0xff] %v8925_v6  ;;  %11135 = vst [vmem:[#allocation152_spill] sm:$0xff] %v8929_v8  ;;  %v8931_v33 = vmax.f32 %v4432_v40, %v4433_v51  ;;  %v8933_v16 = vmax.f32 %v4439_v46, %v4440_v41  ;;  %v8941_v63 = vmax.f32 %v11138_v0, %v8367_v60  ;;  %v11144_v40 = vld [vmem:[#allocation10_spill] sm:$0xff]  ;;  %v11151_v46 = vld [vmem:[#allocation7_spill] sm:$0xff] }
 0x3f4   :  { %v4447_v14 = vrot.slane %v4446_v15, 1  ;;  %v4459_v20 = vrot.slane %v4458_v17, 2  ;;  %11137 = vst [vmem:[#allocation48_spill] sm:$0xff] %v8937_v49  ;;  %v8945_v18 = vmax.f32 %v11140_v32, %v8369_v44  ;;  %v4454_v42 = vrot.slane %v4453_v38, 1  ;;  %v11172_v32 = vld [vmem:[#allocation25_spill] sm:$0xff]  ;;  %v11341_v49 = vld [vmem:[#allocation50_spill] sm:$0xff] }
 0x3f5   :  { %11139 = vst [vmem:[#allocation6_spill] sm:$0xff] %v8941_v63  ;;  %v8949_v22 = vmax.f32 %v11142_v23, %v8379_v3  ;;  %v8953_v25 = vmax.f32 %v11145_v37, %v11144_v40  ;;  %v8957_v27 = vmax.f32 %v8393_v39, %v8433_v59  ;;  %v8961_v60 = vmax.f32 %v8395_v57, %v8435_v36  ;;  %v11153_v39 = vld [vmem:[#allocation11_spill] sm:$0xff]  ;;  %v11154_v59 = vld [vmem:[#allocation9_spill] sm:$0xff]  ;;  %v11157_v36 = vld [vmem:[#allocation12_spill] sm:$0xff] }
 0x3f6   :  { %11141 = vst [vmem:[#allocation3_spill] sm:$0xff] %v8945_v18  ;;  %v4448_v12 = vmax.f32 %v4446_v15, %v4447_v14  ;;  %v4460_v61 = vmax.f32 %v4458_v17, %v4459_v20  ;;  %v8965_v44 = vmax.f32 %v8399_v29, %v8439_v55  ;;  %v4455_v48 = vmax.f32 %v4453_v38, %v4454_v42  ;;  %v11156_v57 = vld [vmem:[#allocation13_spill] sm:$0xff]  ;;  %v11159_v29 = vld [vmem:[#allocation14_spill] sm:$0xff]  ;;  %v11161_v17 = vld [vmem:[#allocation16_spill] sm:$0xff] }
 0x3f7   :  { %11143 = vst [vmem:[#allocation5_spill] sm:$0xff] %v8949_v22  ;;  %11146 = vst [vmem:[#allocation10_spill] sm:$0xff] %v8953_v25  ;;  %v8969_v3 = vmax.f32 %v8401_v28, %v8445_v34  ;;  %v8973_v51 = vmax.f32 %v11151_v46, %v8447_v21  ;;  %v8977_v15 = vmax.f32 %v11154_v59, %v11153_v39  ;;  %v11166_v38 = vld [vmem:[#allocation27_spill] sm:$0xff]  ;;  %v11173_v42 = vld [vmem:[#allocation18_spill] sm:$0xff] }
 0x3f8   :  { %11147 = vst [vmem:[#allocation8_spill] sm:$0xff] %v8957_v27  ;;  %11148 = vst [vmem:[#allocation153_spill] sm:$0xff] %v8961_v60  ;;  %v4461_v45 = vrot.slane %v4460_v61, 1  ;;  %v8981_v1 = vmax.f32 %v11157_v36, %v11156_v57  ;;  %v8985_v55 = vmax.f32 %v11159_v29, %v8465_v62  ;;  %v8989_v28 = vmax.f32 %v11161_v17, %v8509_v4  ;;  %v11167_v62 = vld [vmem:[#allocation19_spill] sm:$0xff]  ;;  %v11186_v46 = vld [vmem:[#allocation29_spill] sm:$0xff] }
 0x3f9   :  { %11149 = vst [vmem:[#allocation154_spill] sm:$0xff] %v8965_v44  ;;  %11150 = vst [vmem:[#allocation155_spill] sm:$0xff] %v8969_v3  ;;  %v8993_v21 = vmax.f32 %v8475_v52, %v8515_v35  ;;  %v8997_v41 = vmax.f32 %v8479_v53, %v8519_v30  ;;  %v9001_v14 = vmax.f32 %v8485_v24, %v8525_v54  ;;  %v11170_v4 = vld [vmem:[#allocation15_spill] sm:$0xff]  ;;  %v11188_v39 = vld [vmem:[#allocation41_spill] sm:$0xff] }
 0x3fa   :  { %11152 = vst [vmem:[#allocation7_spill] sm:$0xff] %v8973_v51  ;;  %11155 = vst [vmem:[#allocation11_spill] sm:$0xff] %v8977_v15  ;;  %v4462_v34 = vmax.f32 %v4460_v61, %v4461_v45  ;;  %v9005_v20 = vmax.f32 %v11167_v62, %v11166_v38  ;;  %v9009_v0 = vmax.f32 %v11170_v4, %v11169_v56  ;;  %v11175_v35 = vld [vmem:[#allocation23_spill] sm:$0xff]  ;;  %v11185_v45 = vld [vmem:[#allocation37_spill] sm:$0xff] }
 0x3fb   :  { %11158 = vst [vmem:[#allocation9_spill] sm:$0xff] %v8981_v1  ;;  %11160 = vst [vmem:[#allocation13_spill] sm:$0xff] %v8985_v55  ;;  %v9013_v52 = vmax.f32 %v11173_v42, %v11172_v32  ;;  %v9017_v53 = vmax.f32 %v11175_v35, %v8545_v26  ;;  %v11177_v30 = vld [vmem:[#allocation31_spill] sm:$0xff]  ;;  %v9025_v54 = vmax.f32 %v8555_v19, %v8595_v9  ;;  %v11189_v59 = vld [vmem:[#allocation33_spill] sm:$0xff] }
 0x3fc   :  { %11162 = vst [vmem:[#allocation12_spill] sm:$0xff] %v8989_v28  ;;  %11163 = vst [vmem:[#allocation14_spill] sm:$0xff] %v8993_v21  ;;  %v9021_v24 = vmax.f32 %v11177_v30, %v8589_v47  ;;  %v9029_v61 = vmax.f32 %v8559_v43, %v8599_v10  ;;  %v9033_v23 = vmax.f32 %v8565_v13, %v8605_v31  ;;  %v11182_v40 = vld [vmem:[#allocation43_spill] sm:$0xff]  ;;  %v11193_v10 = vld [vmem:[#allocation106_spill] sm:$0xff] }
 0x3fd   :  { %11164 = vst [vmem:[#allocation16_spill] sm:$0xff] %v8997_v41  ;;  %11165 = vst [vmem:[#allocation156_spill] sm:$0xff] %v9001_v14  ;;  %v11183_v37 = vld [vmem:[#allocation35_spill] sm:$0xff]  ;;  %v9041_v47 = vmax.f32 %v11186_v46, %v11185_v45  ;;  %v9045_v19 = vmax.f32 %v11189_v59, %v11188_v39  ;;  %v11194_v57 = vld [vmem:[#allocation45_spill] sm:$0xff] }
 0x3fe   :  { %11168 = vst [vmem:[#allocation27_spill] sm:$0xff] %v9005_v20  ;;  %11171 = vst [vmem:[#allocation19_spill] sm:$0xff] %v9009_v0  ;;  %v9037_v26 = vmax.f32 %v11183_v37, %v11182_v40  ;;  %v11191_v9 = vld [vmem:[#allocation39_spill] sm:$0xff]  ;;  %v9053_v13 = vmax.f32 %v11194_v57, %v11193_v10  ;;  %v11196_v31 = vld [vmem:[#allocation128_spill] sm:$0xff] }
 0x3ff   :  { %11174 = vst [vmem:[#allocation21_spill] sm:$0xff] %v9013_v52  ;;  %11176 = vst [vmem:[#allocation15_spill] sm:$0xff] %v9017_v53  ;;  %v9049_v43 = vmax.f32 %v11191_v9, %v8625_v11  ;;  %v11197_v36 = vld [vmem:[#allocation47_spill] sm:$0xff]  ;;  %v11199_v17 = vld [vmem:[#allocation56_spill] sm:$0xff] }
 0x400   :  { %11178 = vst [vmem:[#allocation25_spill] sm:$0xff] %v9021_v24  ;;  %11179 = vst [vmem:[#allocation18_spill] sm:$0xff] %v9025_v54  ;;  %v9057_v29 = vmax.f32 %v11197_v36, %v11196_v31  ;;  %v11200_v38 = vld [vmem:[#allocation44_spill] sm:$0xff]  ;;  %v11202_v56 = vld [vmem:[#allocation129_spill] sm:$0xff] }
 0x401   :  { %11180 = vst [vmem:[#allocation23_spill] sm:$0xff] %v9029_v61  ;;  %11181 = vst [vmem:[#allocation31_spill] sm:$0xff] %v9033_v23  ;;  %v9061_v62 = vmax.f32 %v11200_v38, %v11199_v17  ;;  %v11203_v4 = vld [vmem:[#allocation46_spill] sm:$0xff]  ;;  %v11206_v35 = vld [vmem:[#allocation17_spill] sm:$0xff] }
 0x402   :  { %11184 = vst [vmem:[#allocation43_spill] sm:$0xff] %v9037_v26  ;;  %11187 = vst [vmem:[#allocation35_spill] sm:$0xff] %v9041_v47  ;;  %v9065_v32 = vmax.f32 %v11203_v4, %v11202_v56  ;;  %v11205_v42 = vld [vmem:[#allocation130_spill] sm:$0xff]  ;;  %v11208_v30 = vld [vmem:[#allocation52_spill] sm:$0xff] }
 0x403   :  { %11190 = vst [vmem:[#allocation37_spill] sm:$0xff] %v9045_v19  ;;  %11192 = vst [vmem:[#allocation29_spill] sm:$0xff] %v9049_v43  ;;  %v9069_v11 = vmax.f32 %v11206_v35, %v11205_v42  ;;  %v11209_v40 = vld [vmem:[#allocation22_spill] sm:$0xff]  ;;  %v11211_v45 = vld [vmem:[#allocation115_spill] sm:$0xff] }
 0x404   :  { %11195 = vst [vmem:[#allocation41_spill] sm:$0xff] %v9053_v13  ;;  %11198 = vst [vmem:[#allocation33_spill] sm:$0xff] %v9057_v29  ;;  %v9073_v37 = vmax.f32 %v11209_v40, %v11208_v30  ;;  %v11212_v46 = vld [vmem:[#allocation36_spill] sm:$0xff]  ;;  %v11214_v59 = vld [vmem:[#allocation131_spill] sm:$0xff] }
 0x405   :  { %11201 = vst [vmem:[#allocation39_spill] sm:$0xff] %v9061_v62  ;;  %11204 = vst [vmem:[#allocation106_spill] sm:$0xff] %v9065_v32  ;;  %v9077_v39 = vmax.f32 %v11212_v46, %v11211_v45  ;;  %v11215_v9 = vld [vmem:[#allocation110_spill] sm:$0xff]  ;;  %v11217_v57 = vld [vmem:[#allocation112_spill] sm:$0xff] }
 0x406   :  { %11207 = vst [vmem:[#allocation45_spill] sm:$0xff] %v9069_v11  ;;  %11210 = vst [vmem:[#allocation128_spill] sm:$0xff] %v9073_v37  ;;  %v9081_v10 = vmax.f32 %v11215_v9, %v11214_v59  ;;  %v11218_v31 = vld [vmem:[#allocation111_spill] sm:$0xff]  ;;  %v11220_v17 = vld [vmem:[#allocation136_spill] sm:$0xff] }
 0x407   :  { %11213 = vst [vmem:[#allocation47_spill] sm:$0xff] %v9077_v39  ;;  %v9085_v36 = vmax.f32 %v11218_v31, %v11217_v57  ;;  %v11221_v38 = vld [vmem:[#allocation132_spill] sm:$0xff]  ;;  %v11223_v4 = vld [vmem:[#allocation117_spill] sm:$0xff]  ;;  %v11229_v46 = vld [vmem:[#allocation138_spill] sm:$0xff] }
 0x408   :  { %11216 = vst [vmem:[#allocation56_spill] sm:$0xff] %v9081_v10  ;;  %v9089_v56 = vmax.f32 %v11221_v38, %v11220_v17  ;;  %v11224_v42 = vld [vmem:[#allocation57_spill] sm:$0xff]  ;;  %v11230_v39 = vld [vmem:[#allocation134_spill] sm:$0xff]  ;;  %v11238_v38 = vld [vmem:[#allocation139_spill] sm:$0xff] }
 0x409   :  { %11219 = vst [vmem:[#allocation44_spill] sm:$0xff] %v9085_v36  ;;  %v9093_v35 = vmax.f32 %v11224_v42, %v11223_v4  ;;  %v11226_v30 = vld [vmem:[#allocation137_spill] sm:$0xff]  ;;  %v9101_v59 = vmax.f32 %v11230_v39, %v11229_v46  ;;  %v11235_v31 = vld [vmem:[#allocation58_spill] sm:$0xff]  ;;  %v11236_v36 = vld [vmem:[#allocation116_spill] sm:$0xff] }
 0x40a   :  { %11222 = vst [vmem:[#allocation129_spill] sm:$0xff] %v9089_v56  ;;  %v11227_v40 = vld [vmem:[#allocation133_spill] sm:$0xff]  ;;  %v9109_v17 = vmax.f32 %v11236_v36, %v11235_v31  ;;  %v11239_v56 = vld [vmem:[#allocation135_spill] sm:$0xff]  ;;  %v11241_v42 = vld [vmem:[#allocation114_spill] sm:$0xff] }
 0x40b   :  { %11225 = vst [vmem:[#allocation46_spill] sm:$0xff] %v9093_v35  ;;  %v9097_v45 = vmax.f32 %v11227_v40, %v11226_v30  ;;  %11231 = vst [vmem:[#allocation17_spill] sm:$0xff] %v9101_v59  ;;  %v11232_v9 = vld [vmem:[#allocation113_spill] sm:$0xff]  ;;  %v9113_v4 = vmax.f32 %v11239_v56, %v11238_v38  ;;  %v11242_v35 = vld [vmem:[#allocation54_spill] sm:$0xff] }
 0x40c   :  { %v11233_v10 = vld [vmem:[#allocation53_spill] sm:$0xff]  ;;  %11237 = vst [vmem:[#allocation22_spill] sm:$0xff] %v9109_v17  ;;  %v9117_v30 = vmax.f32 %v11242_v35, %v11241_v42  ;;  %v11244_v40 = vld [vmem:[#allocation144_spill] sm:$0xff]  ;;  %v11248_v59 = vld [vmem:[#allocation59_spill] sm:$0xff] }
 0x40d   :  { %11228 = vst [vmem:[#allocation130_spill] sm:$0xff] %v9097_v45  ;;  %v9105_v57 = vmax.f32 %v11233_v10, %v11232_v9  ;;  %11240 = vst [vmem:[#allocation115_spill] sm:$0xff] %v9113_v4  ;;  %v11245_v45 = vld [vmem:[#allocation140_spill] sm:$0xff]  ;;  %v11250_v9 = vld [vmem:[#allocation145_spill] sm:$0xff] }
 0x40e   :  { %11243 = vst [vmem:[#allocation36_spill] sm:$0xff] %v9117_v30  ;;  %v9121_v39 = vmax.f32 %v11245_v45, %v11244_v40  ;;  %v11247_v46 = vld [vmem:[#allocation60_spill] sm:$0xff]  ;;  %v11253_v31 = vld [vmem:[#allocation146_spill] sm:$0xff]  ;;  %v11256_v38 = vld [vmem:[#allocation119_spill] sm:$0xff] }
 0x40f   :  { %11234 = vst [vmem:[#allocation52_spill] sm:$0xff] %v9105_v57  ;;  %v9125_v10 = vmax.f32 %v11248_v59, %v11247_v46  ;;  %v11251_v57 = vld [vmem:[#allocation141_spill] sm:$0xff]  ;;  %v11254_v17 = vld [vmem:[#allocation142_spill] sm:$0xff]  ;;  %v11257_v4 = vld [vmem:[#allocation55_spill] sm:$0xff] }
 0x410   :  { %11246 = vst [vmem:[#allocation131_spill] sm:$0xff] %v9121_v39  ;;  %v9129_v36 = vmax.f32 %v11251_v57, %v11250_v9  ;;  %v9133_v56 = vmax.f32 %v11254_v17, %v11253_v31  ;;  %v9137_v35 = vmax.f32 %v11257_v4, %v11256_v38  ;;  %v11259_v42 = vld [vmem:[#allocation61_spill] sm:$0xff]  ;;  %v11260_v30 = vld [vmem:[#allocation118_spill] sm:$0xff]  ;;  %v11262_v40 = vld [vmem:[#allocation147_spill] sm:$0xff] }
 0x411   :  { %11249 = vst [vmem:[#allocation110_spill] sm:$0xff] %v9125_v10  ;;  %v9141_v45 = vmax.f32 %v11260_v30, %v11259_v42  ;;  %v11263_v39 = vld [vmem:[#allocation143_spill] sm:$0xff]  ;;  %v11265_v46 = vld [vmem:[#allocation120_spill] sm:$0xff]  ;;  %v11269_v31 = vld [vmem:[#allocation121_spill] sm:$0xff] }
 0x412   :  { %11252 = vst [vmem:[#allocation112_spill] sm:$0xff] %v9129_v36  ;;  %11255 = vst [vmem:[#allocation111_spill] sm:$0xff] %v9133_v56  ;;  %v9145_v59 = vmax.f32 %v11263_v39, %v11262_v40  ;;  %v9149_v57 = vmax.f32 %v11265_v46, %v8909_v5  ;;  %v11267_v9 = vld [vmem:[#allocation148_spill] sm:$0xff]  ;;  %v9157_v4 = vmax.f32 %v11269_v31, %v8921_v2  ;;  %v11271_v38 = vld [vmem:[#allocation149_spill] sm:$0xff] }
 0x413   :  { %11258 = vst [vmem:[#allocation136_spill] sm:$0xff] %v9137_v35  ;;  %11261 = vst [vmem:[#allocation132_spill] sm:$0xff] %v9141_v45  ;;  %v9153_v17 = vmax.f32 %v11267_v9, %v8915_v58  ;;  %v9161_v30 = vmax.f32 %v11271_v38, %v8931_v33  ;;  %v11273_v42 = vld [vmem:[#allocation150_spill] sm:$0xff]  ;;  %v11277_v5 = vld [vmem:[#allocation63_spill] sm:$0xff]  ;;  %v9174_v58 = vmax.f32 %v8905_v50, %v4462_v34 }
 0x414   :  { %11264 = vst [vmem:[#allocation117_spill] sm:$0xff] %v9145_v59  ;;  %11266 = vst [vmem:[#allocation57_spill] sm:$0xff] %v9149_v57  ;;  %v9165_v39 = vmax.f32 %v11273_v42, %v8933_v16  ;;  %v11275_v40 = vld [vmem:[#allocation62_spill] sm:$0xff]  ;;  %v9171_v46 = vmax.f32 %v11277_v5, %v4455_v48  ;;  %v11280_v9 = vld [vmem:[#allocation64_spill] sm:$0xff] }
 0x415   :  { %11268 = vst [vmem:[#allocation137_spill] sm:$0xff] %v9153_v17  ;;  %11270 = vst [vmem:[#allocation133_spill] sm:$0xff] %v9157_v4  ;;  %v9168_v59 = vmax.f32 %v11275_v40, %v4448_v12  ;;  %v11281_v31 = vld [vmem:[#allocation122_spill] sm:$0xff]  ;;  %v11282_v38 = vld [vmem:[#allocation123_spill] sm:$0xff]  ;;  %v11344_v33 = vpack.c.bf16 %v11280_v9, %v11280_v9 }
 0x416   :  { %11272 = vst [vmem:[#allocation138_spill] sm:$0xff] %v9161_v30  ;;  %11274 = vst [vmem:[#allocation134_spill] sm:$0xff] %v9165_v39  ;;  %v11283_v16 = vld [vmem:[#allocation65_spill] sm:$0xff]  ;;  %v11284_v12 = vld [vmem:[#allocation66_spill] sm:$0xff]  ;;  %v11345_v42 = vpack.c.bf16 %v11281_v31, %v11281_v31  ;;  %v11346_v40 = vpack.c.bf16 %v11282_v38, %v11282_v38 }
 0x417   :  { %11276 = vst [vmem:[#allocation113_spill] sm:$0xff] %v9168_v59  ;;  %11278 = vst [vmem:[#allocation53_spill] sm:$0xff] %v9171_v46  ;;  %v11285_v48 = vld [vmem:[#allocation67_spill] sm:$0xff]  ;;  %v11286_v50 = vld [vmem:[#allocation68_spill] sm:$0xff]  ;;  %v9307_v25 = vunpack.c.l.b16 %v11344_v33  ;;  %v11347_v34 = vpack.c.bf16 %v11283_v16, %v11283_v16  ;;  %v11348_v9 = vpack.c.bf16 %v11284_v12, %v11284_v12 }
 0x418   :  { %11279 = vst [vmem:[#allocation58_spill] sm:$0xff] %v9174_v58  ;;  %v11287_v58 = vld [vmem:[#allocation70_spill] sm:$0xff]  ;;  %v11288_v46 = vld [vmem:[#allocation69_spill] sm:$0xff]  ;;  %v11289_v59 = vld [vmem:[#allocation124_spill] sm:$0xff]  ;;  %v9312_v30 = vunpack.c.l.b16 %v11345_v42  ;;  %v9317_v5 = vunpack.c.l.b16 %v11346_v40  ;;  %v11349_v31 = vpack.c.bf16 %v11285_v48, %v11285_v48  ;;  %v11350_v38 = vpack.c.bf16 %v11286_v50, %v11286_v50 }
 0x419   :  { %v11290_v39 = vld [vmem:[#allocation125_spill] sm:$0xff]  ;;  %v11291_v4 = vld [vmem:[#allocation126_spill] sm:$0xff]  ;;  %v11292_v17 = vld [vmem:[#allocation71_spill] sm:$0xff]  ;;  %v9322_v8 = vunpack.c.l.b16 %v11347_v34  ;;  %v9327_v33 = vunpack.c.l.b16 %v11348_v9  ;;  %v11351_v16 = vpack.c.bf16 %v11287_v58, %v11287_v58  ;;  %v11353_v12 = vpack.c.bf16 %v11288_v46, %v11288_v46 }
 0x41a   :  { %v11293_v57 = vld [vmem:[#allocation75_spill] sm:$0xff]  ;;  %v11294_v45 = vld [vmem:[#allocation72_spill] sm:$0xff]  ;;  %v11296_v56 = vld [vmem:[#allocation73_spill] sm:$0xff]  ;;  %v9332_v42 = vunpack.c.l.b16 %v11349_v31  ;;  %v9337_v40 = vunpack.c.l.b16 %v11350_v38  ;;  %v11354_v48 = vpack.c.bf16 %v11289_v59, %v11289_v59  ;;  %v11355_v50 = vpack.c.bf16 %v11290_v39, %v11290_v39 }
 0x41b   :  { %v11295_v35 = vld [vmem:[#allocation76_spill] sm:$0xff]  ;;  %v11297_v36 = vld [vmem:[#allocation74_spill] sm:$0xff]  ;;  %v11298_v10 = vld [vmem:[#allocation77_spill] sm:$0xff]  ;;  %v9342_v34 = vunpack.c.l.b16 %v11351_v16  ;;  %v9347_v9 = vunpack.c.l.b16 %v11353_v12  ;;  %v11356_v58 = vpack.c.bf16 %v11291_v4, %v11291_v4  ;;  %v11357_v46 = vpack.c.bf16 %v11292_v17, %v11292_v17 }
 0x41c   :  { %v11299_v37 = vld [vmem:[#allocation127_spill] sm:$0xff]  ;;  %v11300_v11 = vld [vmem:[#allocation82_spill] sm:$0xff]  ;;  %v11304_v13 = vld [vmem:[#allocation84_spill] sm:$0xff]  ;;  %v9352_v31 = vunpack.c.l.b16 %v11354_v48  ;;  %v9357_v38 = vunpack.c.l.b16 %v11355_v50  ;;  %v11358_v59 = vpack.c.bf16 %v11293_v57, %v11293_v57  ;;  %v11359_v39 = vpack.c.bf16 %v11294_v45, %v11294_v45 }
 0x41d   :  { %v11301_v32 = vld [vmem:[#allocation78_spill] sm:$0xff]  ;;  %v11302_v62 = vld [vmem:[#allocation83_spill] sm:$0xff]  ;;  %v11305_v43 = vld [vmem:[#allocation80_spill] sm:$0xff]  ;;  %11352 = vst [vmem:[#allocation116_spill] sm:$0xff] %v9342_v34  ;;  %v9362_v16 = vunpack.c.l.b16 %v11356_v58  ;;  %v9367_v12 = vunpack.c.l.b16 %v11357_v46  ;;  %v11360_v4 = vpack.c.bf16 %v11295_v35, %v11295_v35  ;;  %v11361_v17 = vpack.c.bf16 %v11296_v56, %v11296_v56 }
 0x41e   :  { %v11303_v29 = vld [vmem:[#allocation79_spill] sm:$0xff]  ;;  %v11306_v19 = vld [vmem:[#allocation81_spill] sm:$0xff]  ;;  %v11308_v26 = vld [vmem:[#allocation90_spill] sm:$0xff]  ;;  %v9372_v48 = vunpack.c.l.b16 %v11358_v59  ;;  %v9377_v50 = vunpack.c.l.b16 %v11359_v39  ;;  %v11362_v2 = vpack.c.bf16 %v11297_v36, %v11297_v36  ;;  %v11363_v59 = vpack.c.bf16 %v11298_v10, %v11298_v10 }
 0x41f   :  { %v11307_v47 = vld [vmem:[#allocation85_spill] sm:$0xff]  ;;  %v11309_v23 = vld [vmem:[#allocation86_spill] sm:$0xff]  ;;  %v11310_v61 = vld [vmem:[#allocation91_spill] sm:$0xff]  ;;  %v9382_v58 = vunpack.c.l.b16 %v11360_v4  ;;  %v4799_v46 = vunpack.c.l.b16 %v11361_v17  ;;  %v11364_v45 = vpack.c.bf16 %v11299_v37, %v11299_v37  ;;  %v11365_v35 = vpack.c.bf16 %v11300_v11, %v11300_v11 }
 0x420   :  { %v11311_v54 = vld [vmem:[#allocation87_spill] sm:$0xff]  ;;  %v11312_v24 = vld [vmem:[#allocation92_spill] sm:$0xff]  ;;  %v11314_v52 = vld [vmem:[#allocation89_spill] sm:$0xff]  ;;  %v4800_v57 = vunpack.c.l.b16 %v11362_v2  ;;  %v4801_v34 = vunpack.c.l.b16 %v11363_v59  ;;  %v11366_v56 = vpack.c.bf16 %v11301_v32, %v11301_v32  ;;  %v11367_v36 = vpack.c.bf16 %v11302_v62, %v11302_v62 }
 0x421   :  { %v11313_v53 = vld [vmem:[#allocation88_spill] sm:$0xff]  ;;  %v11316_v20 = vld [vmem:[#allocation93_spill] sm:$0xff]  ;;  %v11317_v14 = vld [vmem:[#allocation99_spill] sm:$0xff]  ;;  %v9396_v39 = vunpack.c.l.b16 %v11364_v45  ;;  %v9401_v4 = vunpack.c.l.b16 %v11365_v35  ;;  %v11368_v37 = vpack.c.bf16 %v11303_v29, %v11303_v29  ;;  %v11369_v11 = vpack.c.bf16 %v11304_v13, %v11304_v13 }
 0x422   :  { %v11315_v0 = vld [vmem:[#allocation24_spill] sm:$0xff]  ;;  %v11318_v41 = vld [vmem:[#allocation94_spill] sm:$0xff]  ;;  %v11320_v28 = vld [vmem:[#allocation95_spill] sm:$0xff]  ;;  %v9406_v17 = vunpack.c.l.b16 %v11366_v56  ;;  %v9411_v10 = vunpack.c.l.b16 %v11367_v36  ;;  %v11370_v45 = vpack.c.bf16 %v11305_v43, %v11305_v43  ;;  %v11371_v35 = vpack.c.bf16 %v11306_v19, %v11306_v19 }
 0x423   :  { %v11319_v21 = vld [vmem:[#allocation30_spill] sm:$0xff]  ;;  %v11321_v55 = vld [vmem:[#allocation100_spill] sm:$0xff]  ;;  %v11323_v15 = vld [vmem:[#allocation101_spill] sm:$0xff]  ;;  %v9416_v2 = vunpack.c.l.b16 %v11368_v37  ;;  %v4807_v59 = vunpack.c.l.b16 %v11369_v11  ;;  %v11372_v62 = vpack.c.bf16 %v11307_v47, %v11307_v47  ;;  %v11373_v29 = vpack.c.bf16 %v11308_v26, %v11308_v26 }
 0x424   :  { %v11322_v1 = vld [vmem:[#allocation96_spill] sm:$0xff]  ;;  %v11324_v51 = vld [vmem:[#allocation97_spill] sm:$0xff]  ;;  %v11325_v3 = vld [vmem:[#allocation34_spill] sm:$0xff]  ;;  %v4808_v32 = vunpack.c.l.b16 %v11370_v45  ;;  %v4809_v56 = vunpack.c.l.b16 %v11371_v35  ;;  %v11374_v13 = vpack.c.bf16 %v11309_v23, %v11309_v23  ;;  %v11375_v43 = vpack.c.bf16 %v11310_v61, %v11310_v61 }
 0x425   :  { %v11326_v44 = vld [vmem:[#allocation26_spill] sm:$0xff]  ;;  %v11327_v60 = vld [vmem:[#allocation28_spill] sm:$0xff]  ;;  %v11339_v18 = vld [vmem:[#allocation109_spill] sm:$0xff]  ;;  %v4810_v36 = vunpack.c.l.b16 %v11372_v62  ;;  %v4811_v37 = vunpack.c.l.b16 %v11373_v29  ;;  %v11376_v19 = vpack.c.bf16 %v11311_v54, %v11311_v54  ;;  %v11377_v47 = vpack.c.bf16 %v11312_v24, %v11312_v24 }
 0x426   :  { %v11328_v27 = vld [vmem:[#allocation20_spill] sm:$0xff]  ;;  %v11340_v63 = vld [vmem:[#allocation105_spill] sm:$0xff]  ;;  %v11343_v6 = vld [vmem:[#allocation51_spill] sm:$0xff]  ;;  %v9436_v11 = vunpack.c.l.b16 %v11374_v13  ;;  %v9441_v45 = vunpack.c.l.b16 %v11375_v43  ;;  %v11378_v23 = vpack.c.bf16 %v11313_v53, %v11313_v53  ;;  %v11379_v61 = vpack.c.bf16 %v11314_v52, %v11314_v52 }
 0x427   :  { %v11338_v22 = vld [vmem:[#allocation104_spill] sm:$0xff]  ;;  %v9446_v35 = vunpack.c.l.b16 %v11376_v19  ;;  %v9451_v26 = vunpack.c.l.b16 %v11377_v47  ;;  %v11380_v54 = vpack.c.bf16 %v11315_v0, %v11315_v0  ;;  %v11381_v24 = vpack.c.bf16 %v11316_v20, %v11316_v20 }
 0x428   :  { %v9456_v62 = vunpack.c.l.b16 %v11378_v23  ;;  %v9461_v29 = vunpack.c.l.b16 %v11379_v61  ;;  %v11382_v53 = vpack.c.bf16 %v11317_v14, %v11317_v14  ;;  %v11383_v52 = vpack.c.bf16 %v11318_v41, %v11318_v41 }
 0x429   :  { %v9466_v13 = vunpack.c.l.b16 %v11380_v54  ;;  %v9471_v43 = vunpack.c.l.b16 %v11381_v24  ;;  %v11385_v0 = vpack.c.bf16 %v11319_v21, %v11319_v21  ;;  %v11387_v20 = vpack.c.bf16 %v11320_v28, %v11320_v28 }
 0x42a   :  { %v9476_v19 = vunpack.c.l.b16 %v11382_v53  ;;  %v9481_v47 = vunpack.c.l.b16 %v11383_v52  ;;  %v11388_v54 = vpack.c.bf16 %v11321_v55, %v11321_v55  ;;  %v11389_v24 = vpack.c.bf16 %v11322_v1, %v11322_v1 }
 0x42b   :  { %v9486_v23 = vunpack.c.l.b16 %v11385_v0  ;;  %v4823_v61 = vunpack.c.l.b16 %v11387_v20  ;;  %v11390_v41 = vpack.c.bf16 %v11323_v15, %v11323_v15  ;;  %v11391_v21 = vpack.c.bf16 %v11324_v51, %v11324_v51 }
 0x42c   :  { %11384 = vst [vmem:[#allocation139_spill] sm:$0xff] %v9481_v47  ;;  %v4824_v14 = vunpack.c.l.b16 %v11388_v54  ;;  %v9497_v53 = vunpack.c.l.b16 %v11389_v24  ;;  %v11393_v28 = vpack.c.bf16 %v11325_v3, %v11325_v3  ;;  %v11395_v1 = vpack.c.bf16 %v11326_v44, %v11326_v44  ;;  %v11404_v44 = vld [vmem:[#allocation40_spill] sm:$0xff] }
 0x42d   :  { %11386 = vst [vmem:[#allocation135_spill] sm:$0xff] %v9486_v23  ;;  %v9502_v52 = vunpack.c.l.b16 %v11390_v41  ;;  %v9507_v0 = vunpack.c.l.b16 %v11391_v21  ;;  %v11397_v15 = vpack.c.bf16 %v11327_v60, %v11327_v60  ;;  %v11399_v51 = vpack.c.bf16 %v11328_v27, %v11328_v27  ;;  %v11400_v41 = vld [vmem:[#allocation102_spill] sm:$0xff]  ;;  %v11406_v47 = vld [vmem:[#allocation32_spill] sm:$0xff] }
 0x42e   :  { %v9512_v55 = vunpack.c.l.b16 %v11393_v28  ;;  %v9517_v20 = vunpack.c.l.b16 %v11395_v1  ;;  %v11401_v21 = vpack.c.bf16 %v11400_v41, %v11400_v41  ;;  %v11402_v28 = vld [vmem:[#allocation98_spill] sm:$0xff]  ;;  %v11405_v1 = vpack.c.bf16 %v11404_v44, %v11404_v44  ;;  %v11412_v41 = vld [vmem:[#allocation103_spill] sm:$0xff] }
 0x42f   :  { %11392 = vst [vmem:[#allocation114_spill] sm:$0xff] %v9507_v0  ;;  %v9522_v54 = vunpack.c.l.b16 %v11397_v15  ;;  %v4831_v24 = vunpack.c.l.b16 %v11399_v51  ;;  %v11403_v23 = vpack.c.bf16 %v11402_v28, %v11402_v28  ;;  %v11407_v60 = vpack.c.bf16 %v11406_v47, %v11406_v47 }
 0x430   :  { %11394 = vst [vmem:[#allocation54_spill] sm:$0xff] %v9512_v55  ;;  %11396 = vst [vmem:[#allocation144_spill] sm:$0xff] %v9517_v20  ;;  %v4832_v3 = vunpack.c.l.b16 %v11401_v21  ;;  %v4834_v20 = vunpack.c.l.b16 %v11405_v1  ;;  %v11413_v21 = vpack.c.bf16 %v11412_v41, %v11412_v41  ;;  %v11417_v47 = vpack.c.bf16 %v11336_v7, %v11336_v7 }
 0x431   :  { %11398 = vst [vmem:[#allocation140_spill] sm:$0xff] %v9522_v54  ;;  %v4833_v55 = vunpack.c.l.b16 %v11403_v23  ;;  %v9539_v15 = vunpack.c.l.b16 %v11407_v60  ;;  %v11409_v54 = vld [vmem:[#allocation107_spill] sm:$0xff]  ;;  %v11414_v23 = vld [vmem:[#allocation49_spill] sm:$0xff]  ;;  %v11418_v60 = vld [vmem:[#allocation108_spill] sm:$0xff]  ;;  %v11421_v41 = vpack.c.bf16 %v11339_v18, %v11339_v18  ;;  %v11423_v7 = vpack.c.bf16 %v11341_v49, %v11341_v49 }
 0x432   :  { %v11410_v27 = vpack.c.bf16 %v11409_v54, %v11409_v54  ;;  %v9549_v0 = vunpack.c.l.b16 %v11413_v21  ;;  %v11415_v28 = vpack.c.bf16 %v11414_v23, %v11414_v23  ;;  %v4839_v1 = vunpack.c.l.b16 %v11417_v47 }
 0x433   :  { %11408 = vst [vmem:[#allocation60_spill] sm:$0xff] %v9539_v15  ;;  %v11419_v15 = vpack.c.bf16 %v11418_v60, %v11418_v60  ;;  %v4842_v21 = vunpack.c.l.b16 %v11421_v41  ;;  %v11422_v23 = vpack.c.bf16 %v11340_v63, %v11340_v63  ;;  %v4844_v47 = vunpack.c.l.b16 %v11423_v7 }
 0x434   :  { %v9544_v51 = vunpack.c.l.b16 %v11410_v27  ;;  %v9554_v44 = vunpack.c.l.b16 %v11415_v28  ;;  %v11420_v27 = vpack.c.bf16 %v11338_v22, %v11338_v22  ;;  %v11426_v22 = vpack.c.bf16 %v11343_v6, %v11343_v6 }
 0x435   :  { %v4840_v54 = vunpack.c.l.b16 %v11419_v15  ;;  %v4843_v28 = vunpack.c.l.b16 %v11422_v23  ;;  %v4848_v63 = vsel %vm4847_vm2, %v9312_v30, %v9307_v25  ;;  %v4861_v6 = vsel %vm4847_vm2, %v9352_v31, %v9347_v9 }
 0x436   :  { %11411 = vst [vmem:[#allocation59_spill] sm:$0xff] %v9544_v51  ;;  %11416 = vst [vmem:[#allocation145_spill] sm:$0xff] %v9554_v44  ;;  %v4841_v51 = vunpack.c.l.b16 %v11420_v27  ;;  %v11424_v44 = vld [vmem:[#allocation42_spill] sm:$0xff]  ;;  %v9580_v27 = vunpack.c.l.b16 %v11426_v22  ;;  %v4850_v49 = vsel %vm4849_vm3, %v9317_v5, %v4848_v63  ;;  %v4868_v18 = vsel %vm4847_vm2, %v4800_v57, %v4799_v46 }
 0x437   :  { %v11425_v60 = vpack.c.bf16 %v11424_v44, %v11424_v44  ;;  %v4875_v44 = vsel %vm4847_vm2, %v4808_v32, %v4807_v59  ;;  %v4852_v41 = vsel %vm4851_vm4, %v9322_v8, %v4850_v49  ;;  %v4862_v25 = vsel %vm4849_vm3, %v9357_v38, %v4861_v6  ;;  %v11427_v59 = vld [vmem:[#allocation116_spill] sm:$0xff] }
 0x438   :  { %v4869_v30 = vsel %vm4849_vm3, %v4801_v34, %v4868_v18  ;;  %v4876_v23 = vsel %vm4849_vm3, %v4809_v56, %v4875_v44  ;;  %v4854_v5 = vsel %vm4853_vm5, %v9327_v33, %v4852_v41  ;;  %v4863_v9 = vsel %vm4851_vm4, %v9362_v16, %v4862_v25  ;;  %v11435_v49 = vld [vmem:[#allocation140_spill] sm:$0xff] }
 0x439   :  { %v4845_v15 = vunpack.c.l.b16 %v11425_v60  ;;  %v4870_v31 = vsel %vm4851_vm4, %v9396_v39, %v4869_v30  ;;  %v4877_v46 = vsel %vm4851_vm4, %v4810_v36, %v4876_v23  ;;  %v4856_v8 = vsel %vm4855_vm6, %v9332_v42, %v4854_v5  ;;  %v11434_v60 = vld [vmem:[#allocation144_spill] sm:$0xff] }
 0x43a   :  { %v4864_v38 = vsel %vm4853_vm5, %v9367_v12, %v4863_v9  ;;  %v4871_v34 = vsel %vm4853_vm5, %v9401_v4, %v4870_v31  ;;  %v4878_v57 = vsel %vm4853_vm5, %v4811_v37, %v4877_v46  ;;  %v4858_v33 = vsel %vm4857_vm7, %v9337_v40, %v4856_v8  ;;  %v11500_v8 = vld [vmem:[#allocation58_spill] sm:$0xff] }
 0x43b   :  { %v4865_v16 = vsel %vm4855_vm6, %v9372_v48, %v4864_v38  ;;  %v4872_v39 = vsel %vm4855_vm6, %v9406_v17, %v4871_v34  ;;  %v4879_v42 = vsel %vm4855_vm6, %v9436_v11, %v4878_v57  ;;  %v4860_v12 = vsel %vm4859_vm8, %v11427_v59, %v4858_v33  ;;  %v11439_v38 = vld [vmem:[#allocation152_spill] sm:$0xff]  ;;  %v11496_v59 = vld [vmem:[#allocation138_spill] sm:$0xff]  ;;  %v11498_v33 = vld [vmem:[#allocation113_spill] sm:$0xff] }
 0x43c   :  { %v4866_v4 = vsel %vm4857_vm7, %v9377_v50, %v4865_v16  ;;  %v4873_v32 = vsel %vm4857_vm7, %v9411_v10, %v4872_v39  ;;  %v4880_v40 = vsel %vm4857_vm7, %v9441_v45, %v4879_v42  ;;  %v4882_v36 = vsel %vm4847_vm2, %v9456_v62, %v9451_v26  ;;  %v11440_v57 = vld [vmem:[#allocation48_spill] sm:$0xff]  ;;  %v11441_v16 = vld [vmem:[#allocation6_spill] sm:$0xff]  ;;  %v11442_v42 = vld [vmem:[#allocation3_spill] sm:$0xff] }
 0x43d   :  { %v4867_v48 = vsel %vm4859_vm8, %v9382_v58, %v4866_v4  ;;  %v4874_v17 = vsel %vm4859_vm8, %v9416_v2, %v4873_v32  ;;  %v4881_v56 = vsel %vm4859_vm8, %v9446_v35, %v4880_v40  ;;  %v4883_v50 = vsel %vm4849_vm3, %v9461_v29, %v4882_v36  ;;  %v11436_v18 = vld [vmem:[#allocation145_spill] sm:$0xff]  ;;  %v11444_v32 = vld [vmem:[#allocation10_spill] sm:$0xff]  ;;  %v11484_v36 = vld [vmem:[#allocation115_spill] sm:$0xff] }
 0x43e   :  { %v4889_v10 = vsel %vm4847_vm2, %v4824_v14, %v4823_v61  ;;  %v4896_v37 = vsel %vm4847_vm2, %v4832_v3, %v4831_v24  ;;  %v4903_v11 = vsel %vm4847_vm2, %v4840_v54, %v4839_v1  ;;  %v4884_v58 = vsel %vm4851_vm4, %v9466_v13, %v4883_v50  ;;  %v11428_v14 = vld [vmem:[#allocation114_spill] sm:$0xff]  ;;  %v11429_v24 = vld [vmem:[#allocation60_spill] sm:$0xff]  ;;  %v11495_v4 = vld [vmem:[#allocation133_spill] sm:$0xff] }
 0x43f   :  { %v4890_v2 = vsel %vm4849_vm3, %v9497_v53, %v4889_v10  ;;  %v4897_v45 = vsel %vm4849_vm3, %v4833_v55, %v4896_v37  ;;  %v4904_v35 = vsel %vm4849_vm3, %v4841_v51, %v4903_v11  ;;  %v4885_v26 = vsel %vm4853_vm5, %v9471_v43, %v4884_v58  ;;  %v11430_v51 = vld [vmem:[#allocation139_spill] sm:$0xff]  ;;  %v11431_v1 = vld [vmem:[#allocation54_spill] sm:$0xff]  ;;  %v11482_v11 = vld [vmem:[#allocation52_spill] sm:$0xff] }
 0x440   :  { %v4891_v62 = vsel %vm4851_vm4, %v9502_v52, %v4890_v2  ;;  %v4898_v29 = vsel %vm4851_vm4, %v4834_v20, %v4897_v45  ;;  %v4905_v61 = vsel %vm4851_vm4, %v4842_v21, %v4904_v35  ;;  %v4886_v13 = vsel %vm4855_vm6, %v9476_v19, %v4885_v26  ;;  %v11432_v20 = vld [vmem:[#allocation59_spill] sm:$0xff]  ;;  %v11447_v50 = vld [vmem:[#allocation154_spill] sm:$0xff]  ;;  %v11451_v26 = vld [vmem:[#allocation9_spill] sm:$0xff] }
 0x441   :  { %v4892_v53 = vsel %vm4853_vm5, %v11428_v14, %v4891_v62  ;;  %v4899_v55 = vsel %vm4853_vm5, %v11429_v24, %v4898_v29  ;;  %v4906_v3 = vsel %vm4853_vm5, %v4843_v28, %v4905_v61  ;;  %v4887_v43 = vsel %vm4857_vm7, %v11430_v51, %v4886_v13  ;;  %v11433_v19 = vld [vmem:[#allocation135_spill] sm:$0xff]  ;;  %v11452_v29 = vld [vmem:[#allocation13_spill] sm:$0xff]  ;;  %v11453_v13 = vld [vmem:[#allocation12_spill] sm:$0xff] }
 0x442   :  { %v4893_v52 = vsel %vm4855_vm6, %v11431_v1, %v4892_v53  ;;  %v4900_v54 = vsel %vm4855_vm6, %v11432_v20, %v4899_v55  ;;  %v4907_v21 = vsel %vm4855_vm6, %v4844_v47, %v4906_v3  ;;  %v4888_v7 = vsel %vm4859_vm8, %v11433_v19, %v4887_v43  ;;  %v11448_v37 = vld [vmem:[#allocation155_spill] sm:$0xff]  ;;  %v11454_v53 = vld [vmem:[#allocation14_spill] sm:$0xff]  ;;  %v11455_v55 = vld [vmem:[#allocation16_spill] sm:$0xff] }
 0x443   :  { %v4894_v22 = vsel %vm4857_vm7, %v11434_v60, %v4893_v52  ;;  %v4901_v28 = vsel %vm4857_vm7, %v9549_v0, %v4900_v54  ;;  %v4908_v63 = vsel %vm4857_vm7, %v4845_v15, %v4907_v21  ;;  %v4910_v41 = vpack.c.b16 %v4860_v12, %v4860_v12  ;;  %v11437_v0 = vld [vmem:[#allocation4_spill] sm:$0xff]  ;;  %v11443_v12 = vld [vmem:[#allocation5_spill] sm:$0xff]  ;;  %v11449_v58 = vld [vmem:[#allocation7_spill] sm:$0xff] }
 0x444   :  { %v4895_v6 = vsel %vm4859_vm8, %v11435_v49, %v4894_v22  ;;  %v4902_v44 = vsel %vm4859_vm8, %v11436_v18, %v4901_v28  ;;  %v4909_v47 = vsel %vm4859_vm8, %v9580_v27, %v4908_v63  ;;  %v4911_v25 = vpack.c.b16 %v4867_v48, %v4867_v48  ;;  %v11438_v27 = vld [vmem:[#allocation151_spill] sm:$0xff]  ;;  %v11445_v48 = vld [vmem:[#allocation8_spill] sm:$0xff]  ;;  %v11459_v21 = vld [vmem:[#allocation21_spill] sm:$0xff] }
 0x445   :  { %v4912_v30 = vpack.c.b16 %v4874_v17, %v4874_v17  ;;  %v4913_v23 = vpack.c.b16 %v4881_v56, %v4881_v56  ;;  %v4914_v5 = vpack.c.b16 %v4888_v7, %v4888_v7  ;;  %v4915_v9 = vpack.c.b16 %v4895_v6, %v4895_v6  ;;  %4927 = vst.msk [vmem:[%s10200_s4] sm:$0xf] %vm4926_vm9, %v4910_v41  ;;  %v11446_v56 = vld [vmem:[#allocation153_spill] sm:$0xff]  ;;  %v11450_v45 = vld [vmem:[#allocation11_spill] sm:$0xff]  ;;  %v11456_v51 = vld [vmem:[#allocation156_spill] sm:$0xff] }
 0x446   :  { %v4916_v31 = vpack.c.b16 %v4902_v44, %v4902_v44  ;;  %v4917_v46 = vpack.c.b16 %v4909_v47, %v4909_v47  ;;  %4928 = vst.msk [vmem:[%s10200_s4 + $0x4] sm:$0xf] %vm4926_vm9, %v4911_v25  ;;  %v11457_v1 = vld [vmem:[#allocation27_spill] sm:$0xff]  ;;  %v11461_v22 = vld [vmem:[#allocation25_spill] sm:$0xff]  ;;  %v11462_v63 = vld [vmem:[#allocation18_spill] sm:$0xff]  ;;  %v11503_v49 = vpack.c.bf16 %v11439_v38, %v11439_v38  ;;  %v11504_v47 = vpack.c.bf16 %v11440_v57, %v11440_v57 }
 0x447   :  { %4929 = vst.msk [vmem:[%s10200_s4 + $0x8] sm:$0xf] %vm4926_vm9, %v4912_v30  ;;  %4930 = vst.msk [vmem:[%s10200_s4 + $0xc] sm:$0xf] %vm4926_vm9, %v4913_v23  ;;  %v11458_v20 = vld [vmem:[#allocation19_spill] sm:$0xff]  ;;  %v11469_v28 = vld [vmem:[#allocation41_spill] sm:$0xff]  ;;  %v11501_v23 = vpack.c.bf16 %v11437_v0, %v11437_v0  ;;  %v11505_v0 = vpack.c.bf16 %v11441_v16, %v11441_v16  ;;  %v11508_v38 = vpack.c.bf16 %v11443_v12, %v11443_v12 }
 0x448   :  { %4931 = vst.msk [vmem:[%s10200_s4 + $0x10] sm:$0xf] %vm4926_vm9, %v4914_v5  ;;  %4932 = vst.msk [vmem:[%s10200_s4 + $0x14] sm:$0xf] %vm4926_vm9, %v4915_v9  ;;  %v11460_v7 = vld [vmem:[#allocation15_spill] sm:$0xff]  ;;  %v11467_v5 = vld [vmem:[#allocation37_spill] sm:$0xff]  ;;  %v9854_v18 = vunpack.c.l.b16 %v11503_v49  ;;  %v9859_v34 = vunpack.c.l.b16 %v11504_v47  ;;  %v11509_v57 = vpack.c.bf16 %v11444_v32, %v11444_v32  ;;  %v11510_v16 = vpack.c.bf16 %v11445_v48, %v11445_v48 }
 0x449   :  { %4933 = vst.msk [vmem:[%s10200_s4 + $0x18] sm:$0xf] %vm4926_vm9, %v4916_v31  ;;  %4934 = vst.msk [vmem:[%s10200_s4 + $0x1c] sm:$0xf] %vm4926_vm9, %v4917_v46  ;;  %v11463_v6 = vld [vmem:[#allocation23_spill] sm:$0xff]  ;;  %v11468_v31 = vld [vmem:[#allocation29_spill] sm:$0xff]  ;;  %v9844_v40 = vunpack.c.l.b16 %v11501_v23  ;;  %v11502_v46 = vpack.c.bf16 %v11438_v27, %v11438_v27  ;;  %v9864_v23 = vunpack.c.l.b16 %v11505_v0  ;;  %v11506_v27 = vpack.c.bf16 %v11442_v42, %v11442_v42 }
 0x44a   :  { %v11464_v44 = vld [vmem:[#allocation31_spill] sm:$0xff]  ;;  %v11470_v60 = vld [vmem:[#allocation33_spill] sm:$0xff]  ;;  %v11472_v54 = vld [vmem:[#allocation106_spill] sm:$0xff]  ;;  %v9874_v49 = vunpack.c.l.b16 %v11508_v38  ;;  %v9879_v47 = vunpack.c.l.b16 %v11509_v57  ;;  %v5199_v0 = vunpack.c.l.b16 %v11510_v16  ;;  %v11511_v25 = vpack.c.bf16 %v11446_v56, %v11446_v56 }
 0x44b   :  { %v11465_v41 = vld [vmem:[#allocation43_spill] sm:$0xff]  ;;  %v11473_v52 = vld [vmem:[#allocation45_spill] sm:$0xff]  ;;  %v11474_v43 = vld [vmem:[#allocation128_spill] sm:$0xff]  ;;  %v9849_v9 = vunpack.c.l.b16 %v11502_v46  ;;  %v9869_v46 = vunpack.c.l.b16 %v11506_v27  ;;  %v11512_v27 = vpack.c.bf16 %v11447_v50, %v11447_v50  ;;  %v11513_v12 = vpack.c.bf16 %v11448_v37, %v11448_v37 }
 0x44c   :  { %v11466_v30 = vld [vmem:[#allocation35_spill] sm:$0xff]  ;;  %v11476_v24 = vld [vmem:[#allocation56_spill] sm:$0xff]  ;;  %v11478_v61 = vld [vmem:[#allocation129_spill] sm:$0xff]  ;;  %v5200_v42 = vunpack.c.l.b16 %v11511_v25  ;;  %v11514_v32 = vpack.c.bf16 %v11449_v58, %v11449_v58  ;;  %v11515_v48 = vpack.c.bf16 %v11450_v45, %v11450_v45  ;;  %v11516_v56 = vpack.c.bf16 %v11451_v26, %v11451_v26 }
 0x44d   :  { %v11471_v19 = vld [vmem:[#allocation39_spill] sm:$0xff]  ;;  %v11477_v14 = vld [vmem:[#allocation44_spill] sm:$0xff]  ;;  %v11479_v62 = vld [vmem:[#allocation46_spill] sm:$0xff]  ;;  %11507 = vst [vmem:[#allocation141_spill] sm:$0xff] %v9869_v46  ;;  %v5201_v46 = vunpack.c.l.b16 %v11512_v27  ;;  %v9893_v38 = vunpack.c.l.b16 %v11513_v12  ;;  %v11517_v37 = vpack.c.bf16 %v11452_v29, %v11452_v29  ;;  %v11518_v58 = vpack.c.bf16 %v11453_v13, %v11453_v13 }
 0x44e   :  { %v11475_v3 = vld [vmem:[#allocation47_spill] sm:$0xff]  ;;  %v11480_v35 = vld [vmem:[#allocation130_spill] sm:$0xff]  ;;  %v11481_v2 = vld [vmem:[#allocation17_spill] sm:$0xff]  ;;  %v9898_v57 = vunpack.c.l.b16 %v11514_v32  ;;  %v9903_v16 = vunpack.c.l.b16 %v11515_v48  ;;  %v9908_v50 = vunpack.c.l.b16 %v11516_v56  ;;  %v11519_v12 = vpack.c.bf16 %v11454_v53, %v11454_v53 }
 0x44f   :  { %v11483_v10 = vld [vmem:[#allocation22_spill] sm:$0xff]  ;;  %v11485_v17 = vld [vmem:[#allocation36_spill] sm:$0xff]  ;;  %v11493_v15 = vld [vmem:[#allocation57_spill] sm:$0xff]  ;;  %v9913_v25 = vunpack.c.l.b16 %v11517_v37  ;;  %v5207_v27 = vunpack.c.l.b16 %v11518_v58  ;;  %v11520_v32 = vpack.c.bf16 %v11455_v55, %v11455_v55  ;;  %v11521_v26 = vpack.c.bf16 %v11456_v51, %v11456_v51 }
 0x450   :  { %v11497_v39 = vld [vmem:[#allocation134_spill] sm:$0xff]  ;;  %v5208_v45 = vunpack.c.l.b16 %v11519_v12  ;;  %v11522_v29 = vpack.c.bf16 %v11457_v1, %v11457_v1  ;;  %v11523_v13 = vpack.c.bf16 %v11458_v20, %v11458_v20  ;;  %v11524_v53 = vpack.c.bf16 %v11459_v21, %v11459_v21 }
 0x451   :  { %v5209_v48 = vunpack.c.l.b16 %v11520_v32  ;;  %v5210_v56 = vunpack.c.l.b16 %v11521_v26  ;;  %v11525_v55 = vpack.c.bf16 %v11460_v7, %v11460_v7  ;;  %v11526_v51 = vpack.c.bf16 %v11461_v22, %v11461_v22 }
 0x452   :  { %v5211_v37 = vunpack.c.l.b16 %v11522_v29  ;;  %v5212_v58 = vunpack.c.l.b16 %v11523_v13  ;;  %v9936_v12 = vunpack.c.l.b16 %v11524_v53  ;;  %v11527_v1 = vpack.c.bf16 %v11462_v63, %v11462_v63 }
 0x453   :  { %v9941_v32 = vunpack.c.l.b16 %v11525_v55  ;;  %v5215_v26 = vunpack.c.l.b16 %v11526_v51  ;;  %v11528_v20 = vpack.c.bf16 %v11463_v6, %v11463_v6  ;;  %v11529_v21 = vpack.c.bf16 %v11464_v44, %v11464_v44 }
 0x454   :  { %v5216_v29 = vunpack.c.l.b16 %v11527_v1  ;;  %v11530_v7 = vpack.c.bf16 %v11465_v41, %v11465_v41  ;;  %v11531_v22 = vpack.c.bf16 %v11466_v30, %v11466_v30  ;;  %v11532_v63 = vpack.c.bf16 %v11467_v5, %v11467_v5 }
 0x455   :  { %v5217_v13 = vunpack.c.l.b16 %v11528_v20  ;;  %v5218_v53 = vunpack.c.l.b16 %v11529_v21  ;;  %v11533_v6 = vpack.c.bf16 %v11468_v31, %v11468_v31  ;;  %v11534_v44 = vpack.c.bf16 %v11469_v28, %v11469_v28 }
 0x456   :  { %v5219_v55 = vunpack.c.l.b16 %v11530_v7  ;;  %v5220_v51 = vunpack.c.l.b16 %v11531_v22  ;;  %v5221_v1 = vunpack.c.l.b16 %v11532_v63  ;;  %v11535_v41 = vpack.c.bf16 %v11470_v60, %v11470_v60 }
 0x457   :  { %v5222_v20 = vunpack.c.l.b16 %v11533_v6  ;;  %v5223_v21 = vunpack.c.l.b16 %v11534_v44  ;;  %v11536_v30 = vpack.c.bf16 %v11471_v19, %v11471_v19  ;;  %v11537_v5 = vpack.c.bf16 %v11472_v54, %v11472_v54 }
 0x458   :  { %v5224_v7 = vunpack.c.l.b16 %v11535_v41  ;;  %v11539_v31 = vpack.c.bf16 %v11473_v52, %v11473_v52  ;;  %v11541_v28 = vpack.c.bf16 %v11474_v43, %v11474_v43  ;;  %v11543_v19 = vpack.c.bf16 %v11475_v3, %v11475_v3 }
 0x459   :  { %v9976_v22 = vunpack.c.l.b16 %v11536_v30  ;;  %v9981_v63 = vunpack.c.l.b16 %v11537_v5  ;;  %v11545_v54 = vpack.c.bf16 %v11476_v24, %v11476_v24  ;;  %v11547_v52 = vpack.c.bf16 %v11477_v14, %v11477_v14 }
 0x45a   :  { %v9986_v6 = vunpack.c.l.b16 %v11539_v31  ;;  %v9991_v60 = vunpack.c.l.b16 %v11541_v28  ;;  %v9996_v44 = vunpack.c.l.b16 %v11543_v19  ;;  %v11548_v5 = vpack.c.bf16 %v11478_v61, %v11478_v61 }
 0x45b   :  { %11538 = vst [vmem:[#allocation146_spill] sm:$0xff] %v9981_v63  ;;  %v10001_v41 = vunpack.c.l.b16 %v11545_v54  ;;  %v5231_v30 = vunpack.c.l.b16 %v11547_v52  ;;  %v11549_v31 = vpack.c.bf16 %v11479_v62, %v11479_v62  ;;  %v11550_v3 = vpack.c.bf16 %v11480_v35, %v11480_v35  ;;  %v11575_v63 = vld [vmem:[#allocation137_spill] sm:$0xff] }
 0x45c   :  { %11540 = vst [vmem:[#allocation142_spill] sm:$0xff] %v9986_v6  ;;  %11542 = vst [vmem:[#allocation119_spill] sm:$0xff] %v9991_v60  ;;  %v5232_v43 = vunpack.c.l.b16 %v11548_v5  ;;  %v11551_v24 = vpack.c.bf16 %v11481_v2, %v11481_v2  ;;  %v11552_v14 = vpack.c.bf16 %v11482_v11, %v11482_v11  ;;  %v11554_v61 = vpack.c.bf16 %v11483_v10, %v11483_v10  ;;  %v11563_v10 = vld [vmem:[#allocation112_spill] sm:$0xff]  ;;  %v11571_v6 = vld [vmem:[#allocation117_spill] sm:$0xff] }
 0x45d   :  { %11544 = vst [vmem:[#allocation55_spill] sm:$0xff] %v9996_v44  ;;  %11546 = vst [vmem:[#allocation61_spill] sm:$0xff] %v10001_v41  ;;  %v5233_v28 = vunpack.c.l.b16 %v11549_v31  ;;  %v5234_v19 = vunpack.c.l.b16 %v11550_v3  ;;  %v11556_v62 = vpack.c.bf16 %v11484_v36, %v11484_v36  ;;  %v11558_v35 = vpack.c.bf16 %v11485_v17, %v11485_v17  ;;  %v11559_v3 = vld [vmem:[#allocation131_spill] sm:$0xff]  ;;  %v11569_v60 = vld [vmem:[#allocation132_spill] sm:$0xff] }
 0x45e   :  { %v5235_v54 = vunpack.c.l.b16 %v11551_v24  ;;  %v10021_v52 = vunpack.c.l.b16 %v11552_v14  ;;  %v10026_v5 = vunpack.c.l.b16 %v11554_v61  ;;  %v11560_v24 = vpack.c.bf16 %v11559_v3, %v11559_v3  ;;  %v11561_v14 = vld [vmem:[#allocation110_spill] sm:$0xff] }
 0x45f   :  { %v10031_v31 = vunpack.c.l.b16 %v11556_v62  ;;  %v5239_v2 = vunpack.c.l.b16 %v11558_v35  ;;  %v11562_v41 = vpack.c.bf16 %v11561_v14, %v11561_v14  ;;  %v11564_v61 = vpack.c.bf16 %v11563_v10, %v11563_v10 }
 0x460   :  { %11553 = vst [vmem:[#allocation118_spill] sm:$0xff] %v10021_v52  ;;  %11555 = vst [vmem:[#allocation147_spill] sm:$0xff] %v10026_v5  ;;  %v5240_v11 = vunpack.c.l.b16 %v11560_v24  ;;  %v11565_v52 = vld [vmem:[#allocation111_spill] sm:$0xff]  ;;  %v11570_v3 = vpack.c.bf16 %v11569_v60, %v11569_v60  ;;  %v11572_v14 = vpack.c.bf16 %v11571_v6, %v11571_v6  ;;  %v11574_v10 = vpack.c.bf16 %v11493_v15, %v11493_v15 }
 0x461   :  { %11557 = vst [vmem:[#allocation143_spill] sm:$0xff] %v10031_v31  ;;  %v5241_v44 = vunpack.c.l.b16 %v11562_v41  ;;  %v5242_v5 = vunpack.c.l.b16 %v11564_v61  ;;  %v11566_v36 = vpack.c.bf16 %v11565_v52, %v11565_v52  ;;  %v11567_v31 = vld [vmem:[#allocation136_spill] sm:$0xff]  ;;  %v11576_v52 = vpack.c.bf16 %v11575_v63, %v11575_v63 }
 0x462   :  { %v11568_v17 = vpack.c.bf16 %v11567_v31, %v11567_v31  ;;  %v5245_v24 = vunpack.c.l.b16 %v11570_v3  ;;  %v10057_v41 = vunpack.c.l.b16 %v11572_v14  ;;  %v5247_v61 = vunpack.c.l.b16 %v11574_v10 }
 0x463   :  { %v5243_v62 = vunpack.c.l.b16 %v11566_v36  ;;  %v5248_v36 = vunpack.c.l.b16 %v11576_v52  ;;  %v11577_v31 = vpack.c.bf16 %v11495_v4, %v11495_v4  ;;  %v11578_v60 = vpack.c.bf16 %v11496_v59, %v11496_v59 }
 0x464   :  { %v5244_v35 = vunpack.c.l.b16 %v11568_v17  ;;  %11573 = vst [vmem:[#allocation120_spill] sm:$0xff] %v10057_v41  ;;  %v11579_v6 = vpack.c.bf16 %v11497_v39, %v11497_v39  ;;  %v11580_v15 = vpack.c.bf16 %v11498_v33, %v11498_v33  ;;  %v11581_v41 = vld [vmem:[#allocation53_spill] sm:$0xff]  ;;  %v11583_v4 = vpack.c.bf16 %v11500_v8, %v11500_v8 }
 0x465   :  { %v5249_v17 = vunpack.c.l.b16 %v11577_v31  ;;  %v5250_v3 = vunpack.c.l.b16 %v11578_v60  ;;  %v11582_v63 = vpack.c.bf16 %v11581_v41, %v11581_v41  ;;  %v5255_v59 = vsel %vm4847_vm2, %v9849_v9, %v9844_v40 }
 0x466   :  { %v5251_v14 = vunpack.c.l.b16 %v11579_v6  ;;  %v5252_v10 = vunpack.c.l.b16 %v11580_v15  ;;  %v5254_v31 = vunpack.c.l.b16 %v11583_v4  ;;  %v5262_v60 = vsel %vm4847_vm2, %v5200_v42, %v5199_v0 }
 0x467   :  { %v5253_v52 = vunpack.c.l.b16 %v11582_v63  ;;  %v5269_v39 = vsel %vm4847_vm2, %v5208_v45, %v5207_v27  ;;  %v5276_v6 = vsel %vm4847_vm2, %v5216_v29, %v5215_v26  ;;  %v5256_v33 = vsel %vm4849_vm3, %v9854_v18, %v5255_v59  ;;  %v11584_v45 = vld [vmem:[#allocation141_spill] sm:$0xff]  ;;  %v11590_v4 = vld [vmem:[#allocation147_spill] sm:$0xff] }
 0x468   :  { %v5263_v41 = vsel %vm4849_vm3, %v5201_v46, %v5262_v60  ;;  %v5270_v15 = vsel %vm4849_vm3, %v5209_v48, %v5269_v39  ;;  %v5277_v8 = vsel %vm4849_vm3, %v5217_v13, %v5276_v6  ;;  %v5257_v63 = vsel %vm4851_vm4, %v9859_v34, %v5256_v33  ;;  %v11591_v59 = vld [vmem:[#allocation61_spill] sm:$0xff]  ;;  %v11592_v39 = vld [vmem:[#allocation143_spill] sm:$0xff] }
 0x469   :  { %v5264_v40 = vsel %vm4851_vm4, %v9893_v38, %v5263_v41  ;;  %v5271_v9 = vsel %vm4851_vm4, %v5210_v56, %v5270_v15  ;;  %v5278_v0 = vsel %vm4851_vm4, %v5218_v53, %v5277_v8  ;;  %v5258_v42 = vsel %vm4853_vm5, %v9864_v23, %v5257_v63 }
 0x46a   :  { %v5265_v18 = vsel %vm4853_vm5, %v9898_v57, %v5264_v40  ;;  %v5272_v46 = vsel %vm4853_vm5, %v5211_v37, %v5271_v9  ;;  %v5279_v27 = vsel %vm4853_vm5, %v5219_v55, %v5278_v0  ;;  %v5259_v34 = vsel %vm4855_vm6, %v11584_v45, %v5258_v42 }
 0x46b   :  { %v5266_v38 = vsel %vm4855_vm6, %v9903_v16, %v5265_v18  ;;  %v5273_v48 = vsel %vm4855_vm6, %v5212_v58, %v5272_v46  ;;  %v5280_v56 = vsel %vm4855_vm6, %v5220_v51, %v5279_v27  ;;  %v5260_v23 = vsel %vm4857_vm7, %v9874_v49, %v5259_v34  ;;  %v11593_v33 = vld [vmem:[#allocation120_spill] sm:$0xff] }
 0x46c   :  { %v5267_v57 = vsel %vm4857_vm7, %v9908_v50, %v5266_v38  ;;  %v5274_v37 = vsel %vm4857_vm7, %v9936_v12, %v5273_v48  ;;  %v5281_v26 = vsel %vm4857_vm7, %v5221_v1, %v5280_v56  ;;  %v5261_v29 = vsel %vm4859_vm8, %v9879_v47, %v5260_v23 }
 0x46d   :  { %v5268_v16 = vsel %vm4859_vm8, %v9913_v25, %v5267_v57  ;;  %v5275_v58 = vsel %vm4859_vm8, %v9941_v32, %v5274_v37  ;;  %v5282_v13 = vsel %vm4859_vm8, %v5222_v20, %v5281_v26  ;;  %v5283_v49 = vsel %vm4847_vm2, %v5224_v7, %v5223_v21  ;;  %v11585_v32 = vld [vmem:[#allocation146_spill] sm:$0xff] }
 0x46e   :  { %v5290_v50 = vsel %vm4847_vm2, %v5232_v43, %v5231_v30  ;;  %v5297_v53 = vsel %vm4847_vm2, %v5240_v11, %v5239_v2  ;;  %v5304_v12 = vsel %vm4847_vm2, %v5248_v36, %v5247_v61  ;;  %v5284_v55 = vsel %vm4849_vm3, %v9976_v22, %v5283_v49  ;;  %v11586_v30 = vld [vmem:[#allocation142_spill] sm:$0xff]  ;;  %v11587_v2 = vld [vmem:[#allocation119_spill] sm:$0xff] }
 0x46f   :  { %v5291_v47 = vsel %vm4849_vm3, %v5233_v28, %v5290_v50  ;;  %v5298_v25 = vsel %vm4849_vm3, %v5241_v44, %v5297_v53  ;;  %v5305_v51 = vsel %vm4849_vm3, %v5249_v17, %v5304_v12  ;;  %v5285_v1 = vsel %vm4851_vm4, %v11585_v32, %v5284_v55  ;;  %v11588_v61 = vld [vmem:[#allocation118_spill] sm:$0xff]  ;;  %v11589_v17 = vld [vmem:[#allocation55_spill] sm:$0xff] }
 0x470   :  { %v5292_v20 = vsel %vm4851_vm4, %v5234_v19, %v5291_v47  ;;  %v5299_v21 = vsel %vm4851_vm4, %v5242_v5, %v5298_v25  ;;  %v5306_v7 = vsel %vm4851_vm4, %v5250_v3, %v5305_v51  ;;  %v5286_v43 = vsel %vm4853_vm5, %v11586_v30, %v5285_v1 }
 0x471   :  { %v5293_v22 = vsel %vm4853_vm5, %v5235_v54, %v5292_v20  ;;  %v5300_v28 = vsel %vm4853_vm5, %v5243_v62, %v5299_v21  ;;  %v5307_v44 = vsel %vm4853_vm5, %v5251_v14, %v5306_v7  ;;  %v5287_v11 = vsel %vm4855_vm6, %v11587_v2, %v5286_v43 }
 0x472   :  { %v5294_v36 = vsel %vm4855_vm6, %v11588_v61, %v5293_v22  ;;  %v5301_v19 = vsel %vm4855_vm6, %v5244_v35, %v5300_v28  ;;  %v5308_v5 = vsel %vm4855_vm6, %v5252_v10, %v5307_v44  ;;  %v5288_v3 = vsel %vm4857_vm7, %v11589_v17, %v5287_v11 }
 0x473   :  { %v5295_v54 = vsel %vm4857_vm7, %v11590_v4, %v5294_v36  ;;  %v5302_v62 = vsel %vm4857_vm7, %v5245_v24, %v5301_v19  ;;  %v5309_v14 = vsel %vm4857_vm7, %v5253_v52, %v5308_v5  ;;  %v5289_v60 = vsel %vm4859_vm8, %v11591_v59, %v5288_v3 }
 0x474   :  { %v5296_v6 = vsel %vm4859_vm8, %v11592_v39, %v5295_v54  ;;  %v5303_v35 = vsel %vm4859_vm8, %v11593_v33, %v5302_v62  ;;  %v5310_v10 = vsel %vm4859_vm8, %v5254_v31, %v5309_v14  ;;  %v5311_v41 = vpack.c.b16 %v5261_v29, %v5261_v29 }
 0x475   :  { %v5312_v15 = vpack.c.b16 %v5268_v16, %v5268_v16  ;;  %v5313_v8 = vpack.c.b16 %v5275_v58, %v5275_v58  ;;  %v5314_v63 = vpack.c.b16 %v5282_v13, %v5282_v13  ;;  %v5315_v40 = vpack.c.b16 %v5289_v60, %v5289_v60 }
 0x476   :  { %v5316_v9 = vpack.c.b16 %v5296_v6, %v5296_v6  ;;  %v5317_v24 = vpack.c.b16 %v5303_v35, %v5303_v35  ;;  %v5318_v0 = vpack.c.b16 %v5310_v10, %v5310_v10  ;;  %5535 = vst.msk [vmem:[%s10200_s4 + $0x20] sm:$0xf] %vm4926_vm9, %v5311_v41 }
 0x477   :  { %5536 = vst.msk [vmem:[%s10200_s4 + $0x24] sm:$0xf] %vm4926_vm9, %v5312_v15  ;;  %5537 = vst.msk [vmem:[%s10200_s4 + $0x28] sm:$0xf] %vm4926_vm9, %v5313_v8 }
 0x478   :  { %5538 = vst.msk [vmem:[%s10200_s4 + $0x2c] sm:$0xf] %vm4926_vm9, %v5314_v63  ;;  %5539 = vst.msk [vmem:[%s10200_s4 + $0x30] sm:$0xf] %vm4926_vm9, %v5315_v40 }
 0x479   :  { %5540 = vst.msk [vmem:[%s10200_s4 + $0x34] sm:$0xf] %vm4926_vm9, %v5316_v9  ;;  %5541 = vst.msk [vmem:[%s10200_s4 + $0x38] sm:$0xf] %vm4926_vm9, %v5317_v24 }
 0x47a   :  { %5542 = vst.msk [vmem:[%s10200_s4 + $0x3c] sm:$0xf] %vm4926_vm9, %v5318_v0 }

</bundles_post_ra>
